<compile_context>
chip_gen: v5e
topology: v5e:2x2
jax: 0.10.0
libtpu: 0.0.40
codegen_flags: <defaults>
</compile_context>

<pallas_src>
import jax
import jax.numpy as jnp
from jax.experimental import pallas as pl
from jax.experimental.pallas import tpu as pltpu

BN_EPS = 1e-5
CP = 128                                   # padded channel width (lane-dense)
VMEM_LIMIT = 32 * 1024 * 1024
VMEM_SPEC = pl.BlockSpec(memory_space=pltpu.MemorySpace.VMEM)


# -----------------------------------------------------------------------------
# Pallas kernels
# -----------------------------------------------------------------------------
def _stem_kernel(cols_ref, ws_ref, bs_ref, wad_ref, bad_ref, o_ref):
    # cols: (tm, 128) bf16 stem im2col columns (27 real + zero pad)
    # ws:   (128, 128) bf16 BN-folded stem conv ; bs: (1, 128) f32
    # wad:  (128, 256) bf16 packed [wa_block1 | wd_block1] ; bad: (1, 256) f32
    y = jnp.dot(cols_ref[...], ws_ref[...], preferred_element_type=jnp.float32)
    y = jnp.maximum(y + bs_ref[...], 0.0)                       # stem conv+BN+ReLU
    z = jnp.dot(y.astype(jnp.bfloat16), wad_ref[...],
                preferred_element_type=jnp.float32) + bad_ref[...]
    # first 128 lanes: next block's a-conv output (ReLU); last 128: downsample pre-act.
    o_ref[:, :CP] = jnp.maximum(z[:, :CP], 0.0).astype(o_ref.dtype)
    o_ref[:, CP:] = z[:, CP:].astype(o_ref.dtype)


def _block_kernel(cols_ref, dctr_ref, wb_ref, bb_ref, wc_ref, bc_ref,
                  wad_ref, bad_ref, o_ref):
    # cols: (tm, 1152) bf16  tap-major im2col of the (already ReLU'd) a-output
    # dctr: (tm, 128)  bf16  downsample output at the stride-2 centres
    # wb:   (1152, 128) bf16 BN-folded block-diagonal grouped 3x3 (flat over taps)
    # wc:   (128, 128)  bf16 BN-folded 1x1 c-conv
    # wad:  (128, 256)  bf16 packed [wa_next | wd_next]
    b = jnp.dot(cols_ref[...], wb_ref[...], preferred_element_type=jnp.float32)
    b = jnp.maximum(b + bb_ref[...], 0.0)                       # b-conv+BN+ReLU
    c = jnp.dot(b.astype(jnp.bfloat16), wc_ref[...],
                preferred_element_type=jnp.float32) + bc_ref[...]
    y = jnp.maximum(c + dctr_ref[...].astype(jnp.float32), 0.0)  # + identity, ReLU
    z = jnp.dot(y.astype(jnp.bfloat16), wad_ref[...],
                preferred_element_type=jnp.float32) + bad_ref[...]
    o_ref[:, :CP] = jnp.maximum(z[:, :CP], 0.0).astype(o_ref.dtype)
    o_ref[:, CP:] = z[:, CP:].astype(o_ref.dtype)


def _last_kernel(cols_ref, dctr_ref, wb_ref, bb_ref, wc_ref, bc_ref,
                 pool_ref, fcw_ref, fcb_ref, o_ref):
    # Block 4 (b/c convs + residual + ReLU) fused with avgpool + FC head.
    b = jnp.dot(cols_ref[...], wb_ref[...], preferred_element_type=jnp.float32)
    b = jnp.maximum(b + bb_ref[...], 0.0)
    c = jnp.dot(b.astype(jnp.bfloat16), wc_ref[...],
                preferred_element_type=jnp.float32) + bc_ref[...]
    y = jnp.maximum(c + dctr_ref[...].astype(jnp.float32), 0.0)  # (M4, 128) f32
    pooled = jnp.dot(pool_ref[...], y, preferred_element_type=jnp.float32)
    o_ref[...] = jnp.dot(pooled, fcw_ref[...],
                         preferred_element_type=jnp.float32) + fcb_ref[...]


# -----------------------------------------------------------------------------
# pallas_call wrappers
# -----------------------------------------------------------------------------
def _choose_tm(m, pref):
    tm = min(pref, m)
    while m % tm != 0:
        tm //= 2
    if tm < 8:
        tm = m                 # full-extent block is always legal
    return tm


def stem_call(cols, p, *, tm_pref=512):
    M, K = cols.shape
    tm = _choose_tm(M, tm_pref)
    return pl.pallas_call(
        _stem_kernel,
        out_shape=jax.ShapeDtypeStruct((M, 2 * CP), jnp.bfloat16),
        grid=(M // tm,),
        in_specs=[pl.BlockSpec((tm, K), lambda i: (i, 0)),
                  pl.BlockSpec((K, CP), lambda i: (0, 0)),
                  pl.BlockSpec((1, CP), lambda i: (0, 0)),
                  pl.BlockSpec((CP, 2 * CP), lambda i: (0, 0)),
                  pl.BlockSpec((1, 2 * CP), lambda i: (0, 0))],
        out_specs=pl.BlockSpec((tm, 2 * CP), lambda i: (i, 0)),
        compiler_params=pltpu.CompilerParams(
            dimension_semantics=("parallel",),
            vmem_limit_bytes=VMEM_LIMIT),
    )(cols, p['w'], p['b'], p['wad'], p['bad'])


def block_call(cols, dctr, p, *, tm_pref=256):
    M, K = cols.shape
    tm = _choose_tm(M, tm_pref)
    return pl.pallas_call(
        _block_kernel,
        out_shape=jax.ShapeDtypeStruct((M, 2 * CP), jnp.bfloat16),
        grid=(M // tm,),
        in_specs=[pl.BlockSpec((tm, K), lambda i: (i, 0)),
                  pl.BlockSpec((tm, CP), lambda i: (i, 0)),
                  pl.BlockSpec((K, CP), lambda i: (0, 0)),
                  pl.BlockSpec((1, CP), lambda i: (0, 0)),
                  pl.BlockSpec((CP, CP), lambda i: (0, 0)),
                  pl.BlockSpec((1, CP), lambda i: (0, 0)),
                  pl.BlockSpec((CP, 2 * CP), lambda i: (0, 0)),
                  pl.BlockSpec((1, 2 * CP), lambda i: (0, 0))],
        out_specs=pl.BlockSpec((tm, 2 * CP), lambda i: (i, 0)),
        compiler_params=pltpu.CompilerParams(
            dimension_semantics=("parallel",),
            vmem_limit_bytes=VMEM_LIMIT),
    )(cols, dctr, p['wb'], p['bb'], p['wc'], p['bc'], p['wad'], p['bad'])


def last_call(cols, dctr, p, head, pool):
    N = pool.shape[0]
    nc = head['w'].shape[1]
    return pl.pallas_call(
        _last_kernel,
        out_shape=jax.ShapeDtypeStruct((N, nc), jnp.float32),
        in_specs=[VMEM_SPEC] * 9,
        out_specs=VMEM_SPEC,
        compiler_params=pltpu.CompilerParams(vmem_limit_bytes=VMEM_LIMIT),
    )(cols, dctr, p['wb'], p['bb'], p['wc'], p['bc'], pool, head['w'], head['b'])


# -----------------------------------------------------------------------------
# XLA glue: stem im2col (runs once on the raw input) and the per-block im2col
# of the a-conv output (true zero padding -> no mask needed anywhere).
# -----------------------------------------------------------------------------
def _stem_cols(x_nhwc):
    N, H, W, C = x_nhwc.shape
    Ho, Wo = H // 2, W // 2
    xp = jnp.pad(x_nhwc, ((0, 0), (1, 1), (1, 1), (0, 0)))
    taps = []
    for di in range(3):
        for dj in range(3):
            taps.append(xp[:, di:di + 2 * Ho:2, dj:dj + 2 * Wo:2, :]
                        .reshape(N * Ho * Wo, C))
    cols = jnp.concatenate(taps, axis=-1)                       # (M, 27), tap-major
    cols = jnp.pad(cols, ((0, 0), (0, CP - cols.shape[1])))
    return cols.astype(jnp.bfloat16), Ho, Wo


def _block_glue(z, N, Hi, Wi):
    """z: (N*Hi*Wi, 256) = [a | d].  Returns tap-major cols and centre-sampled d."""
    a = z[:, :CP].reshape(N, Hi, Wi, CP)
    d = z[:, CP:].reshape(N, Hi, Wi, CP)
    Ho, Wo = Hi // 2, Wi // 2
    d_center = d[:, ::2, ::2, :].reshape(N * Ho * Wo, CP)       # stride-2 1x1 sampling
    ap = jnp.pad(a, ((0, 0), (1, 1), (1, 1), (0, 0)))            # true zero padding
    taps = []
    for di in range(3):
        for dj in range(3):
            taps.append(ap[:, di:di + 2 * Ho:2, dj:dj + 2 * Wo:2, :]
                        .reshape(N * Ho * Wo, CP))
    cols = jnp.concatenate(taps, axis=-1)                        # (M_out, 1152)
    return cols, d_center, Ho, Wo


# -----------------------------------------------------------------------------
# Parameter construction: synthetic weights, BN folded, channels padded to 128.
# -----------------------------------------------------------------------------
def _conv_init(key, cout, cin_g, kh, kw):
    return 0.1 * jax.random.normal(key, (cout, cin_g, kh, kw), jnp.float32)


def _bn_init(key, c):
    k1, k2, k3, k4 = jax.random.split(key, 4)
    gamma = 1.0 + 0.1 * jax.random.normal(k1, (c,), jnp.float32)
    beta = 0.1 * jax.random.normal(k2, (c,), jnp.float32)
    mean = 0.1 * jax.random.normal(k3, (c,), jnp.float32)
    var = 0.5 + 0.1 * jnp.abs(jax.random.normal(k4, (c,), jnp.float32))
    scale = gamma / jnp.sqrt(var + BN_EPS)
    bias = beta - mean * scale
    return scale, bias


def _pad2(w, rows, cols):
    return jnp.pad(w, ((0, rows - w.shape[0]), (0, cols - w.shape[1])))


def _pad_bias(b, cp):
    return jnp.pad(b, (0, cp - b.shape[0]))[None, :]


def _fold_1x1(w_pt, scale):
    # (Cout, Cin, 1, 1) -> (CP, CP), rows = cin, cols = cout, BN scale folded.
    mat = jnp.transpose(w_pt[:, :, 0, 0], (1, 0)) * scale[None, :]
    return _pad2(mat, CP, CP)


def _fold_grouped3x3_flat(w_pt, scale, groups):
    # (Cout, Cin/g, 3, 3) -> (9*CP, CP) block-diagonal per tap (tap-major rows).
    cout, cin_g, kh, kw = w_pt.shape
    cout_g = cout // groups
    cin = cin_g * groups
    taps = []
    for i in range(kh):
        for j in range(kw):
            B = jnp.zeros((cin, cout), jnp.float32)
            for g in range(groups):
                blk = jnp.transpose(w_pt[g * cout_g:(g + 1) * cout_g, :, i, j], (1, 0))
                B = B.at[g * cin_g:(g + 1) * cin_g,
                         g * cout_g:(g + 1) * cout_g].set(blk)
            taps.append(_pad2(B * scale[None, :], CP, CP))
    return jnp.concatenate(taps, axis=0)


def build_regnet_params(key,
                        layers=(1, 1, 1, 1),
                        channels=(8, 8, 16, 32, 64),
                        group_width=8,
                        num_classes=10,
                        input_channels=3,
                        strides=(2, 2, 2, 2, 2)):
    keys = iter(jax.random.split(key, 256))
    inplanes = channels[0]

    # simple_stem: conv3x3 stride s0 pad 1 + BN + ReLU (BN scale folded).
    w = _conv_init(next(keys), inplanes, input_channels, 3, 3)
    s, b = _bn_init(next(keys), inplanes)
    wmat = jnp.transpose(w, (2, 3, 1, 0)).reshape(9 * input_channels, inplanes)
    stem_w = _pad2(wmat * s[None, :], CP, CP).astype(jnp.bfloat16)
    stem_b = _pad_bias(b, CP)

    sf = 2  # simple_stem => stage-1 stride is 2
    stage_strides = (sf, strides[2], strides[3], strides[4])

    blocks_logical = []
    for si in range(4):
        planes = channels[si + 1]
        stride0 = stage_strides[si]
        groups = planes // group_width if group_width is not None else 1
        width = (planes // groups) * groups
        for bi in range(layers[si]):
            blk_stride = stride0 if bi == 0 else 1
            has_down = (blk_stride != 1) or (inplanes != planes)
            # TODO(synk): the fused pipeline below assumes stride-2 + downsample
            #             blocks (true for layers=(1,1,1,1)); stride-1 blocks would
            #             need a second (identity-passthrough) kernel variant.
            assert blk_stride == 2 and has_down, "fused path expects stride-2 blocks"
            aw = _conv_init(next(keys), width, inplanes, 1, 1)
            asc, ab = _bn_init(next(keys), width)
            bw = _conv_init(next(keys), width, width // groups, 3, 3)
            bsc, bb_ = _bn_init(next(keys), width)
            cw = _conv_init(next(keys), planes, width, 1, 1)
            csc, cb = _bn_init(next(keys), planes)
            dw = _conv_init(next(keys), planes, inplanes, 1, 1)
            dsc, db = _bn_init(next(keys), planes)
            blocks_logical.append(dict(
                wa=_fold_1x1(aw, asc), ba=_pad_bias(ab, CP),
                wb=_fold_grouped3x3_flat(bw, bsc, groups).astype(jnp.bfloat16),
                bb=_pad_bias(bb_, CP),
                wc=_fold_1x1(cw, csc).astype(jnp.bfloat16), bc=_pad_bias(cb, CP),
                wd=_fold_1x1(dw, dsc), bd=_pad_bias(db, CP)))
            inplanes = planes

    def pack_ad(blk):
        wad = jnp.concatenate([blk['wa'], blk['wd']], axis=1).astype(jnp.bfloat16)
        bad = jnp.concatenate([blk['ba'], blk['bd']], axis=1)
        return wad, bad

    wad1, bad1 = pack_ad(blocks_logical[0])
    params = {'stem': {'w': stem_w, 'b': stem_b, 'wad': wad1, 'bad': bad1},
              'blocks': []}
    for k in range(4):
        blk = blocks_logical[k]
        entry = {'wb': blk['wb'], 'bb': blk['bb'], 'wc': blk['wc'], 'bc': blk['bc']}
        if k < 3:
            entry['wad'], entry['bad'] = pack_ad(blocks_logical[k + 1])
        params['blocks'].append(entry)

    fc_w = 0.1 * jax.random.normal(next(keys), (num_classes, channels[4]), jnp.float32)
    fc_b = 0.1 * jax.random.normal(next(keys), (num_classes,), jnp.float32)
    params['head'] = {'w': jnp.pad(jnp.transpose(fc_w),
                                   ((0, CP - channels[4]), (0, 0))),
                      'b': fc_b[None, :]}
    return params


# -----------------------------------------------------------------------------
# Forward pass
# -----------------------------------------------------------------------------
def regnet_forward(x_nchw, params):
    x = jnp.transpose(x_nchw, (0, 2, 3, 1))            # NCHW -> NHWC
    N = x.shape[0]

    # Stem kernel: stem conv+BN+ReLU, then block1's [a | downsample] epilogue.
    cols, H, W = _stem_cols(x)
    z = stem_call(cols, params['stem'])

    # Blocks 1..3: one kernel each (b/c conv + residual + ReLU + next a/d).
    for k in range(3):
        cols_b, dctr, H, W = _block_glue(z, N, H, W)
        z = block_call(cols_b, dctr, params['blocks'][k])

    # Block 4 + avgpool + FC head fused in one final kernel.
    cols_b, dctr, H, W = _block_glue(z, N, H, W)
    hw = H * W
    pool = jnp.repeat(jnp.eye(N, dtype=jnp.float32), hw, axis=1) / float(hw)
    return last_call(cols_b, dctr, params['blocks'][3], params['head'], pool)


# -----------------------------------------------------------------------------
if __name__ == "__main__":
    key = jax.random.PRNGKey(0)
    k_x, k_p = jax.random.split(key)

    x = jax.random.normal(k_x, (2, 3, 64, 64), jnp.float32)   # NCHW like PyTorch
    params = build_regnet_params(k_p)

    fwd = jax.jit(lambda inp: regnet_forward(inp, params))
    logits = jax.block_until_ready(fwd(x))

    assert logits.shape == (2, 10), logits.shape
    assert bool(jnp.all(jnp.isfinite(logits)))
    print("KERNEL_OK")
</pallas_src>

<mosaic_0001>
module attributes {stable_mosaic.version = 11 : i64} {
  func.func @_stem_kernel(%arg0: i32, %arg1: memref<512x128xbf16, #tpu.memory_space<vmem>>, %arg2: memref<128x128xbf16, #tpu.memory_space<vmem>>, %arg3: memref<1x128xf32, #tpu.memory_space<vmem>>, %arg4: memref<128x256xbf16, #tpu.memory_space<vmem>>, %arg5: memref<1x256xf32, #tpu.memory_space<vmem>>, %arg6: memref<512x256xbf16, #tpu.memory_space<vmem>>) attributes {dimension_semantics = [#tpu.dimension_semantics<parallel>], iteration_bounds = array<i64: 4>, scalar_prefetch = 0 : i64, scratch_operands = 0 : i64, tpu.core_type = #tpu.core_type<tc>, window_params = [{transform_indices = @transform_0, window_bounds = array<i64: 512, 128>}, {pipeline_mode = #tpu.pipeline_mode<synchronous>, transform_indices = @transform_1, window_bounds = array<i64: 128, 128>}, {pipeline_mode = #tpu.pipeline_mode<synchronous>, transform_indices = @transform_2, window_bounds = array<i64: 1, 128>}, {pipeline_mode = #tpu.pipeline_mode<synchronous>, transform_indices = @transform_3, window_bounds = array<i64: 128, 256>}, {pipeline_mode = #tpu.pipeline_mode<synchronous>, transform_indices = @transform_4, window_bounds = array<i64: 1, 256>}, {transform_indices = @transform_5, window_bounds = array<i64: 512, 256>}]} {
    %c0 = arith.constant 0 : index
    %c0_0 = arith.constant 0 : index
    %0 = vector.load %arg1[%c0, %c0_0] : memref<512x128xbf16, #tpu.memory_space<vmem>>, vector<512x128xbf16>
    %c0_1 = arith.constant 0 : index
    %c0_2 = arith.constant 0 : index
    %1 = vector.load %arg2[%c0_1, %c0_2] : memref<128x128xbf16, #tpu.memory_space<vmem>>, vector<128x128xbf16>
    %cst = arith.constant dense<0.000000e+00> : vector<512x128xf32>
    %2 = tpu.matmul %0, %1, %cst {dimension_numbers = #tpu.dot_dimension_numbers<[1], [0], [0], [1], [0, 0, 1, 1], [], []>} : vector<512x128xbf16>, vector<128x128xbf16>, vector<512x128xf32> -> vector<512x128xf32>
    %c0_3 = arith.constant 0 : index
    %c0_4 = arith.constant 0 : index
    %3 = vector.load %arg3[%c0_3, %c0_4] : memref<1x128xf32, #tpu.memory_space<vmem>>, vector<1x128xf32>
    %4 = vector.broadcast %3 : vector<1x128xf32> to vector<512x128xf32>
    %5 = arith.addf %2, %4 : vector<512x128xf32>
    %cst_5 = arith.constant 0.000000e+00 : f32
    %6 = vector.broadcast %cst_5 : f32 to vector<512x128xf32>
    %7 = arith.maximumf %5, %6 : vector<512x128xf32>
    %8 = arith.truncf %7 : vector<512x128xf32> to vector<512x128xbf16>
    %c0_6 = arith.constant 0 : index
    %c0_7 = arith.constant 0 : index
    %9 = vector.load %arg4[%c0_6, %c0_7] : memref<128x256xbf16, #tpu.memory_space<vmem>>, vector<128x256xbf16>
    %cst_8 = arith.constant dense<0.000000e+00> : vector<512x256xf32>
    %10 = tpu.matmul %8, %9, %cst_8 {dimension_numbers = #tpu.dot_dimension_numbers<[1], [0], [0], [1], [0, 0, 1, 1], [], []>} : vector<512x128xbf16>, vector<128x256xbf16>, vector<512x256xf32> -> vector<512x256xf32>
    %c0_9 = arith.constant 0 : index
    %c0_10 = arith.constant 0 : index
    %11 = vector.load %arg5[%c0_9, %c0_10] : memref<1x256xf32, #tpu.memory_space<vmem>>, vector<1x256xf32>
    %12 = vector.broadcast %11 : vector<1x256xf32> to vector<512x256xf32>
    %13 = arith.addf %10, %12 : vector<512x256xf32>
    %14 = vector.extract_strided_slice %13 {offsets = [0, 0], sizes = [512, 128], strides = [1, 1]} : vector<512x256xf32> to vector<512x128xf32>
    %cst_11 = arith.constant 0.000000e+00 : f32
    %15 = vector.broadcast %cst_11 : f32 to vector<512x128xf32>
    %16 = arith.maximumf %14, %15 : vector<512x128xf32>
    %17 = arith.truncf %16 : vector<512x128xf32> to vector<512x128xbf16>
    %c0_12 = arith.constant 0 : index
    %c0_13 = arith.constant 0 : index
    %18 = vector.load %arg6[%c0_12, %c0_13] : memref<512x256xbf16, #tpu.memory_space<vmem>>, vector<512x128xbf16>
    tpu.vector_store %arg6[%c0_12, %c0_13], %17 {strides = array<i32>} : memref<512x256xbf16, #tpu.memory_space<vmem>>, vector<512x128xbf16>,
    %19 = vector.extract_strided_slice %13 {offsets = [0, 128], sizes = [512, 128], strides = [1, 1]} : vector<512x256xf32> to vector<512x128xf32>
    %20 = arith.truncf %19 : vector<512x128xf32> to vector<512x128xbf16>
    %c0_14 = arith.constant 0 : index
    %c128 = arith.constant 128 : index
    %21 = vector.load %arg6[%c0_14, %c128] : memref<512x256xbf16, #tpu.memory_space<vmem>>, vector<512x128xbf16>
    tpu.vector_store %arg6[%c0_14, %c128], %20 {strides = array<i32>} : memref<512x256xbf16, #tpu.memory_space<vmem>>, vector<512x128xbf16>,
    return
  }
  func.func @transform_0(%arg0: i32) -> (i32, i32) {
    %c0_i32 = arith.constant 0 : i32
    %c0_i32_0 = arith.constant 0 : i32
    return %arg0, %c0_i32 : i32, i32
  }
  func.func @transform_1(%arg0: i32) -> (i32, i32) {
    %c0_i32 = arith.constant 0 : i32
    %c0_i32_0 = arith.constant 0 : i32
    %c0_i32_1 = arith.constant 0 : i32
    return %c0_i32, %c0_i32_0 : i32, i32
  }
  func.func @transform_2(%arg0: i32) -> (i32, i32) {
    %c0_i32 = arith.constant 0 : i32
    %c0_i32_0 = arith.constant 0 : i32
    %c0_i32_1 = arith.constant 0 : i32
    return %c0_i32, %c0_i32_0 : i32, i32
  }
  func.func @transform_3(%arg0: i32) -> (i32, i32) {
    %c0_i32 = arith.constant 0 : i32
    %c0_i32_0 = arith.constant 0 : i32
    %c0_i32_1 = arith.constant 0 : i32
    return %c0_i32, %c0_i32_0 : i32, i32
  }
  func.func @transform_4(%arg0: i32) -> (i32, i32) {
    %c0_i32 = arith.constant 0 : i32
    %c0_i32_0 = arith.constant 0 : i32
    %c0_i32_1 = arith.constant 0 : i32
    return %c0_i32, %c0_i32_0 : i32, i32
  }
  func.func @transform_5(%arg0: i32) -> (i32, i32) {
    %c0_i32 = arith.constant 0 : i32
    %c0_i32_0 = arith.constant 0 : i32
    return %arg0, %c0_i32 : i32, i32
  }
}

module attributes {stable_mosaic.version = 11 : i64} {
  func.func @_block_kernel(%arg0: i32, %arg1: memref<256x1152xbf16, #tpu.memory_space<vmem>>, %arg2: memref<256x128xbf16, #tpu.memory_space<vmem>>, %arg3: memref<1152x128xbf16, #tpu.memory_space<vmem>>, %arg4: memref<1x128xf32, #tpu.memory_space<vmem>>, %arg5: memref<128x128xbf16, #tpu.memory_space<vmem>>, %arg6: memref<1x128xf32, #tpu.memory_space<vmem>>, %arg7: memref<128x256xbf16, #tpu.memory_space<vmem>>, %arg8: memref<1x256xf32, #tpu.memory_space<vmem>>, %arg9: memref<256x256xbf16, #tpu.memory_space<vmem>>) attributes {dimension_semantics = [#tpu.dimension_semantics<parallel>], iteration_bounds = array<i64: 2>, scalar_prefetch = 0 : i64, scratch_operands = 0 : i64, tpu.core_type = #tpu.core_type<tc>, window_params = [{transform_indices = @transform_0, window_bounds = array<i64: 256, 1152>}, {transform_indices = @transform_1, window_bounds = array<i64: 256, 128>}, {pipeline_mode = #tpu.pipeline_mode<synchronous>, transform_indices = @transform_2, window_bounds = array<i64: 1152, 128>}, {pipeline_mode = #tpu.pipeline_mode<synchronous>, transform_indices = @transform_3, window_bounds = array<i64: 1, 128>}, {pipeline_mode = #tpu.pipeline_mode<synchronous>, transform_indices = @transform_4, window_bounds = array<i64: 128, 128>}, {pipeline_mode = #tpu.pipeline_mode<synchronous>, transform_indices = @transform_5, window_bounds = array<i64: 1, 128>}, {pipeline_mode = #tpu.pipeline_mode<synchronous>, transform_indices = @transform_6, window_bounds = array<i64: 128, 256>}, {pipeline_mode = #tpu.pipeline_mode<synchronous>, transform_indices = @transform_7, window_bounds = array<i64: 1, 256>}, {transform_indices = @transform_8, window_bounds = array<i64: 256, 256>}]} {
    %c0 = arith.constant 0 : index
    %c0_0 = arith.constant 0 : index
    %0 = vector.load %arg1[%c0, %c0_0] : memref<256x1152xbf16, #tpu.memory_space<vmem>>, vector<256x1152xbf16>
    %c0_1 = arith.constant 0 : index
    %c0_2 = arith.constant 0 : index
    %1 = vector.load %arg3[%c0_1, %c0_2] : memref<1152x128xbf16, #tpu.memory_space<vmem>>, vector<1152x128xbf16>
    %cst = arith.constant dense<0.000000e+00> : vector<256x128xf32>
    %2 = tpu.matmul %0, %1, %cst {dimension_numbers = #tpu.dot_dimension_numbers<[1], [0], [0], [1], [0, 0, 1, 1], [], []>} : vector<256x1152xbf16>, vector<1152x128xbf16>, vector<256x128xf32> -> vector<256x128xf32>
    %c0_3 = arith.constant 0 : index
    %c0_4 = arith.constant 0 : index
    %3 = vector.load %arg4[%c0_3, %c0_4] : memref<1x128xf32, #tpu.memory_space<vmem>>, vector<1x128xf32>
    %4 = vector.broadcast %3 : vector<1x128xf32> to vector<256x128xf32>
    %5 = arith.addf %2, %4 : vector<256x128xf32>
    %cst_5 = arith.constant 0.000000e+00 : f32
    %6 = vector.broadcast %cst_5 : f32 to vector<256x128xf32>
    %7 = arith.maximumf %5, %6 : vector<256x128xf32>
    %8 = arith.truncf %7 : vector<256x128xf32> to vector<256x128xbf16>
    %c0_6 = arith.constant 0 : index
    %c0_7 = arith.constant 0 : index
    %9 = vector.load %arg5[%c0_6, %c0_7] : memref<128x128xbf16, #tpu.memory_space<vmem>>, vector<128x128xbf16>
    %cst_8 = arith.constant dense<0.000000e+00> : vector<256x128xf32>
    %10 = tpu.matmul %8, %9, %cst_8 {dimension_numbers = #tpu.dot_dimension_numbers<[1], [0], [0], [1], [0, 0, 1, 1], [], []>} : vector<256x128xbf16>, vector<128x128xbf16>, vector<256x128xf32> -> vector<256x128xf32>
    %c0_9 = arith.constant 0 : index
    %c0_10 = arith.constant 0 : index
    %11 = vector.load %arg6[%c0_9, %c0_10] : memref<1x128xf32, #tpu.memory_space<vmem>>, vector<1x128xf32>
    %12 = vector.broadcast %11 : vector<1x128xf32> to vector<256x128xf32>
    %13 = arith.addf %10, %12 : vector<256x128xf32>
    %c0_11 = arith.constant 0 : index
    %c0_12 = arith.constant 0 : index
    %14 = vector.load %arg2[%c0_11, %c0_12] : memref<256x128xbf16, #tpu.memory_space<vmem>>, vector<256x128xbf16>
    %15 = arith.extf %14 : vector<256x128xbf16> to vector<256x128xf32>
    %16 = arith.addf %13, %15 : vector<256x128xf32>
    %cst_13 = arith.constant 0.000000e+00 : f32
    %17 = vector.broadcast %cst_13 : f32 to vector<256x128xf32>
    %18 = arith.maximumf %16, %17 : vector<256x128xf32>
    %19 = arith.truncf %18 : vector<256x128xf32> to vector<256x128xbf16>
    %c0_14 = arith.constant 0 : index
    %c0_15 = arith.constant 0 : index
    %20 = vector.load %arg7[%c0_14, %c0_15] : memref<128x256xbf16, #tpu.memory_space<vmem>>, vector<128x256xbf16>
    %cst_16 = arith.constant dense<0.000000e+00> : vector<256x256xf32>
    %21 = tpu.matmul %19, %20, %cst_16 {dimension_numbers = #tpu.dot_dimension_numbers<[1], [0], [0], [1], [0, 0, 1, 1], [], []>} : vector<256x128xbf16>, vector<128x256xbf16>, vector<256x256xf32> -> vector<256x256xf32>
    %c0_17 = arith.constant 0 : index
    %c0_18 = arith.constant 0 : index
    %22 = vector.load %arg8[%c0_17, %c0_18] : memref<1x256xf32, #tpu.memory_space<vmem>>, vector<1x256xf32>
    %23 = vector.broadcast %22 : vector<1x256xf32> to vector<256x256xf32>
    %24 = arith.addf %21, %23 : vector<256x256xf32>
    %25 = vector.extract_strided_slice %24 {offsets = [0, 0], sizes = [256, 128], strides = [1, 1]} : vector<256x256xf32> to vector<256x128xf32>
    %cst_19 = arith.constant 0.000000e+00 : f32
    %26 = vector.broadcast %cst_19 : f32 to vector<256x128xf32>
    %27 = arith.maximumf %25, %26 : vector<256x128xf32>
    %28 = arith.truncf %27 : vector<256x128xf32> to vector<256x128xbf16>
    %c0_20 = arith.constant 0 : index
    %c0_21 = arith.constant 0 : index
    %29 = vector.load %arg9[%c0_20, %c0_21] : memref<256x256xbf16, #tpu.memory_space<vmem>>, vector<256x128xbf16>
    tpu.vector_store %arg9[%c0_20, %c0_21], %28 {strides = array<i32>} : memref<256x256xbf16, #tpu.memory_space<vmem>>, vector<256x128xbf16>,
    %30 = vector.extract_strided_slice %24 {offsets = [0, 128], sizes = [256, 128], strides = [1, 1]} : vector<256x256xf32> to vector<256x128xf32>
    %31 = arith.truncf %30 : vector<256x128xf32> to vector<256x128xbf16>
    %c0_22 = arith.constant 0 : index
    %c128 = arith.constant 128 : index
    %32 = vector.load %arg9[%c0_22, %c128] : memref<256x256xbf16, #tpu.memory_space<vmem>>, vector<256x128xbf16>
    tpu.vector_store %arg9[%c0_22, %c128], %31 {strides = array<i32>} : memref<256x256xbf16, #tpu.memory_space<vmem>>, vector<256x128xbf16>,
    return
  }
  func.func @transform_0(%arg0: i32) -> (i32, i32) {
    %c0_i32 = arith.constant 0 : i32
    %c0_i32_0 = arith.constant 0 : i32
    return %arg0, %c0_i32 : i32, i32
  }
  func.func @transform_1(%arg0: i32) -> (i32, i32) {
    %c0_i32 = arith.constant 0 : i32
    %c0_i32_0 = arith.constant 0 : i32
    return %arg0, %c0_i32 : i32, i32
  }
  func.func @transform_2(%arg0: i32) -> (i32, i32) {
    %c0_i32 = arith.constant 0 : i32
    %c0_i32_0 = arith.constant 0 : i32
    %c0_i32_1 = arith.constant 0 : i32
    return %c0_i32, %c0_i32_0 : i32, i32
  }
  func.func @transform_3(%arg0: i32) -> (i32, i32) {
    %c0_i32 = arith.constant 0 : i32
    %c0_i32_0 = arith.constant 0 : i32
    %c0_i32_1 = arith.constant 0 : i32
    return %c0_i32, %c0_i32_0 : i32, i32
  }
  func.func @transform_4(%arg0: i32) -> (i32, i32) {
    %c0_i32 = arith.constant 0 : i32
    %c0_i32_0 = arith.constant 0 : i32
    %c0_i32_1 = arith.constant 0 : i32
    return %c0_i32, %c0_i32_0 : i32, i32
  }
  func.func @transform_5(%arg0: i32) -> (i32, i32) {
    %c0_i32 = arith.constant 0 : i32
    %c0_i32_0 = arith.constant 0 : i32
    %c0_i32_1 = arith.constant 0 : i32
    return %c0_i32, %c0_i32_0 : i32, i32
  }
  func.func @transform_6(%arg0: i32) -> (i32, i32) {
    %c0_i32 = arith.constant 0 : i32
    %c0_i32_0 = arith.constant 0 : i32
    %c0_i32_1 = arith.constant 0 : i32
    return %c0_i32, %c0_i32_0 : i32, i32
  }
  func.func @transform_7(%arg0: i32) -> (i32, i32) {
    %c0_i32 = arith.constant 0 : i32
    %c0_i32_0 = arith.constant 0 : i32
    %c0_i32_1 = arith.constant 0 : i32
    return %c0_i32, %c0_i32_0 : i32, i32
  }
  func.func @transform_8(%arg0: i32) -> (i32, i32) {
    %c0_i32 = arith.constant 0 : i32
    %c0_i32_0 = arith.constant 0 : i32
    return %arg0, %c0_i32 : i32, i32
  }
}

module attributes {stable_mosaic.version = 11 : i64} {
  func.func @_block_kernel(%arg0: i32, %arg1: memref<128x1152xbf16, #tpu.memory_space<vmem>>, %arg2: memref<128x128xbf16, #tpu.memory_space<vmem>>, %arg3: memref<1152x128xbf16, #tpu.memory_space<vmem>>, %arg4: memref<1x128xf32, #tpu.memory_space<vmem>>, %arg5: memref<128x128xbf16, #tpu.memory_space<vmem>>, %arg6: memref<1x128xf32, #tpu.memory_space<vmem>>, %arg7: memref<128x256xbf16, #tpu.memory_space<vmem>>, %arg8: memref<1x256xf32, #tpu.memory_space<vmem>>, %arg9: memref<128x256xbf16, #tpu.memory_space<vmem>>) attributes {dimension_semantics = [#tpu.dimension_semantics<parallel>], iteration_bounds = array<i64: 1>, scalar_prefetch = 0 : i64, scratch_operands = 0 : i64, tpu.core_type = #tpu.core_type<tc>, window_params = [{transform_indices = @transform_0, window_bounds = array<i64: 128, 1152>}, {transform_indices = @transform_1, window_bounds = array<i64: 128, 128>}, {pipeline_mode = #tpu.pipeline_mode<synchronous>, transform_indices = @transform_2, window_bounds = array<i64: 1152, 128>}, {pipeline_mode = #tpu.pipeline_mode<synchronous>, transform_indices = @transform_3, window_bounds = array<i64: 1, 128>}, {pipeline_mode = #tpu.pipeline_mode<synchronous>, transform_indices = @transform_4, window_bounds = array<i64: 128, 128>}, {pipeline_mode = #tpu.pipeline_mode<synchronous>, transform_indices = @transform_5, window_bounds = array<i64: 1, 128>}, {pipeline_mode = #tpu.pipeline_mode<synchronous>, transform_indices = @transform_6, window_bounds = array<i64: 128, 256>}, {pipeline_mode = #tpu.pipeline_mode<synchronous>, transform_indices = @transform_7, window_bounds = array<i64: 1, 256>}, {transform_indices = @transform_8, window_bounds = array<i64: 128, 256>}]} {
    %c0 = arith.constant 0 : index
    %c0_0 = arith.constant 0 : index
    %0 = vector.load %arg1[%c0, %c0_0] : memref<128x1152xbf16, #tpu.memory_space<vmem>>, vector<128x1152xbf16>
    %c0_1 = arith.constant 0 : index
    %c0_2 = arith.constant 0 : index
    %1 = vector.load %arg3[%c0_1, %c0_2] : memref<1152x128xbf16, #tpu.memory_space<vmem>>, vector<1152x128xbf16>
    %cst = arith.constant dense<0.000000e+00> : vector<128x128xf32>
    %2 = tpu.matmul %0, %1, %cst {dimension_numbers = #tpu.dot_dimension_numbers<[1], [0], [0], [1], [0, 0, 1, 1], [], []>} : vector<128x1152xbf16>, vector<1152x128xbf16>, vector<128x128xf32> -> vector<128x128xf32>
    %c0_3 = arith.constant 0 : index
    %c0_4 = arith.constant 0 : index
    %3 = vector.load %arg4[%c0_3, %c0_4] : memref<1x128xf32, #tpu.memory_space<vmem>>, vector<1x128xf32>
    %4 = vector.broadcast %3 : vector<1x128xf32> to vector<128x128xf32>
    %5 = arith.addf %2, %4 : vector<128x128xf32>
    %cst_5 = arith.constant 0.000000e+00 : f32
    %6 = vector.broadcast %cst_5 : f32 to vector<128x128xf32>
    %7 = arith.maximumf %5, %6 : vector<128x128xf32>
    %8 = arith.truncf %7 : vector<128x128xf32> to vector<128x128xbf16>
    %c0_6 = arith.constant 0 : index
    %c0_7 = arith.constant 0 : index
    %9 = vector.load %arg5[%c0_6, %c0_7] : memref<128x128xbf16, #tpu.memory_space<vmem>>, vector<128x128xbf16>
    %cst_8 = arith.constant dense<0.000000e+00> : vector<128x128xf32>
    %10 = tpu.matmul %8, %9, %cst_8 {dimension_numbers = #tpu.dot_dimension_numbers<[1], [0], [0], [1], [0, 0, 1, 1], [], []>} : vector<128x128xbf16>, vector<128x128xbf16>, vector<128x128xf32> -> vector<128x128xf32>
    %c0_9 = arith.constant 0 : index
    %c0_10 = arith.constant 0 : index
    %11 = vector.load %arg6[%c0_9, %c0_10] : memref<1x128xf32, #tpu.memory_space<vmem>>, vector<1x128xf32>
    %12 = vector.broadcast %11 : vector<1x128xf32> to vector<128x128xf32>
    %13 = arith.addf %10, %12 : vector<128x128xf32>
    %c0_11 = arith.constant 0 : index
    %c0_12 = arith.constant 0 : index
    %14 = vector.load %arg2[%c0_11, %c0_12] : memref<128x128xbf16, #tpu.memory_space<vmem>>, vector<128x128xbf16>
    %15 = arith.extf %14 : vector<128x128xbf16> to vector<128x128xf32>
    %16 = arith.addf %13, %15 : vector<128x128xf32>
    %cst_13 = arith.constant 0.000000e+00 : f32
    %17 = vector.broadcast %cst_13 : f32 to vector<128x128xf32>
    %18 = arith.maximumf %16, %17 : vector<128x128xf32>
    %19 = arith.truncf %18 : vector<128x128xf32> to vector<128x128xbf16>
    %c0_14 = arith.constant 0 : index
    %c0_15 = arith.constant 0 : index
    %20 = vector.load %arg7[%c0_14, %c0_15] : memref<128x256xbf16, #tpu.memory_space<vmem>>, vector<128x256xbf16>
    %cst_16 = arith.constant dense<0.000000e+00> : vector<128x256xf32>
    %21 = tpu.matmul %19, %20, %cst_16 {dimension_numbers = #tpu.dot_dimension_numbers<[1], [0], [0], [1], [0, 0, 1, 1], [], []>} : vector<128x128xbf16>, vector<128x256xbf16>, vector<128x256xf32> -> vector<128x256xf32>
    %c0_17 = arith.constant 0 : index
    %c0_18 = arith.constant 0 : index
    %22 = vector.load %arg8[%c0_17, %c0_18] : memref<1x256xf32, #tpu.memory_space<vmem>>, vector<1x256xf32>
    %23 = vector.broadcast %22 : vector<1x256xf32> to vector<128x256xf32>
    %24 = arith.addf %21, %23 : vector<128x256xf32>
    %25 = vector.extract_strided_slice %24 {offsets = [0, 0], sizes = [128, 128], strides = [1, 1]} : vector<128x256xf32> to vector<128x128xf32>
    %cst_19 = arith.constant 0.000000e+00 : f32
    %26 = vector.broadcast %cst_19 : f32 to vector<128x128xf32>
    %27 = arith.maximumf %25, %26 : vector<128x128xf32>
    %28 = arith.truncf %27 : vector<128x128xf32> to vector<128x128xbf16>
    %c0_20 = arith.constant 0 : index
    %c0_21 = arith.constant 0 : index
    %29 = vector.load %arg9[%c0_20, %c0_21] : memref<128x256xbf16, #tpu.memory_space<vmem>>, vector<128x128xbf16>
    tpu.vector_store %arg9[%c0_20, %c0_21], %28 {strides = array<i32>} : memref<128x256xbf16, #tpu.memory_space<vmem>>, vector<128x128xbf16>,
    %30 = vector.extract_strided_slice %24 {offsets = [0, 128], sizes = [128, 128], strides = [1, 1]} : vector<128x256xf32> to vector<128x128xf32>
    %31 = arith.truncf %30 : vector<128x128xf32> to vector<128x128xbf16>
    %c0_22 = arith.constant 0 : index
    %c128 = arith.constant 128 : index
    %32 = vector.load %arg9[%c0_22, %c128] : memref<128x256xbf16, #tpu.memory_space<vmem>>, vector<128x128xbf16>
    tpu.vector_store %arg9[%c0_22, %c128], %31 {strides = array<i32>} : memref<128x256xbf16, #tpu.memory_space<vmem>>, vector<128x128xbf16>,
    return
  }
  func.func @transform_0(%arg0: i32) -> (i32, i32) {
    %c0_i32 = arith.constant 0 : i32
    %c0_i32_0 = arith.constant 0 : i32
    return %arg0, %c0_i32 : i32, i32
  }
  func.func @transform_1(%arg0: i32) -> (i32, i32) {
    %c0_i32 = arith.constant 0 : i32
    %c0_i32_0 = arith.constant 0 : i32
    return %arg0, %c0_i32 : i32, i32
  }
  func.func @transform_2(%arg0: i32) -> (i32, i32) {
    %c0_i32 = arith.constant 0 : i32
    %c0_i32_0 = arith.constant 0 : i32
    %c0_i32_1 = arith.constant 0 : i32
    return %c0_i32, %c0_i32_0 : i32, i32
  }
  func.func @transform_3(%arg0: i32) -> (i32, i32) {
    %c0_i32 = arith.constant 0 : i32
    %c0_i32_0 = arith.constant 0 : i32
    %c0_i32_1 = arith.constant 0 : i32
    return %c0_i32, %c0_i32_0 : i32, i32
  }
  func.func @transform_4(%arg0: i32) -> (i32, i32) {
    %c0_i32 = arith.constant 0 : i32
    %c0_i32_0 = arith.constant 0 : i32
    %c0_i32_1 = arith.constant 0 : i32
    return %c0_i32, %c0_i32_0 : i32, i32
  }
  func.func @transform_5(%arg0: i32) -> (i32, i32) {
    %c0_i32 = arith.constant 0 : i32
    %c0_i32_0 = arith.constant 0 : i32
    %c0_i32_1 = arith.constant 0 : i32
    return %c0_i32, %c0_i32_0 : i32, i32
  }
  func.func @transform_6(%arg0: i32) -> (i32, i32) {
    %c0_i32 = arith.constant 0 : i32
    %c0_i32_0 = arith.constant 0 : i32
    %c0_i32_1 = arith.constant 0 : i32
    return %c0_i32, %c0_i32_0 : i32, i32
  }
  func.func @transform_7(%arg0: i32) -> (i32, i32) {
    %c0_i32 = arith.constant 0 : i32
    %c0_i32_0 = arith.constant 0 : i32
    %c0_i32_1 = arith.constant 0 : i32
    return %c0_i32, %c0_i32_0 : i32, i32
  }
  func.func @transform_8(%arg0: i32) -> (i32, i32) {
    %c0_i32 = arith.constant 0 : i32
    %c0_i32_0 = arith.constant 0 : i32
    return %arg0, %c0_i32 : i32, i32
  }
}

module attributes {stable_mosaic.version = 11 : i64} {
  func.func @_block_kernel(%arg0: i32, %arg1: memref<32x1152xbf16, #tpu.memory_space<vmem>>, %arg2: memref<32x128xbf16, #tpu.memory_space<vmem>>, %arg3: memref<1152x128xbf16, #tpu.memory_space<vmem>>, %arg4: memref<1x128xf32, #tpu.memory_space<vmem>>, %arg5: memref<128x128xbf16, #tpu.memory_space<vmem>>, %arg6: memref<1x128xf32, #tpu.memory_space<vmem>>, %arg7: memref<128x256xbf16, #tpu.memory_space<vmem>>, %arg8: memref<1x256xf32, #tpu.memory_space<vmem>>, %arg9: memref<32x256xbf16, #tpu.memory_space<vmem>>) attributes {dimension_semantics = [#tpu.dimension_semantics<parallel>], iteration_bounds = array<i64: 1>, scalar_prefetch = 0 : i64, scratch_operands = 0 : i64, tpu.core_type = #tpu.core_type<tc>, window_params = [{transform_indices = @transform_0, window_bounds = array<i64: 32, 1152>}, {transform_indices = @transform_1, window_bounds = array<i64: 32, 128>}, {pipeline_mode = #tpu.pipeline_mode<synchronous>, transform_indices = @transform_2, window_bounds = array<i64: 1152, 128>}, {pipeline_mode = #tpu.pipeline_mode<synchronous>, transform_indices = @transform_3, window_bounds = array<i64: 1, 128>}, {pipeline_mode = #tpu.pipeline_mode<synchronous>, transform_indices = @transform_4, window_bounds = array<i64: 128, 128>}, {pipeline_mode = #tpu.pipeline_mode<synchronous>, transform_indices = @transform_5, window_bounds = array<i64: 1, 128>}, {pipeline_mode = #tpu.pipeline_mode<synchronous>, transform_indices = @transform_6, window_bounds = array<i64: 128, 256>}, {pipeline_mode = #tpu.pipeline_mode<synchronous>, transform_indices = @transform_7, window_bounds = array<i64: 1, 256>}, {transform_indices = @transform_8, window_bounds = array<i64: 32, 256>}]} {
    %c0 = arith.constant 0 : index
    %c0_0 = arith.constant 0 : index
    %0 = vector.load %arg1[%c0, %c0_0] : memref<32x1152xbf16, #tpu.memory_space<vmem>>, vector<32x1152xbf16>
    %c0_1 = arith.constant 0 : index
    %c0_2 = arith.constant 0 : index
    %1 = vector.load %arg3[%c0_1, %c0_2] : memref<1152x128xbf16, #tpu.memory_space<vmem>>, vector<1152x128xbf16>
    %cst = arith.constant dense<0.000000e+00> : vector<32x128xf32>
    %2 = tpu.matmul %0, %1, %cst {dimension_numbers = #tpu.dot_dimension_numbers<[1], [0], [0], [1], [0, 0, 1, 1], [], []>} : vector<32x1152xbf16>, vector<1152x128xbf16>, vector<32x128xf32> -> vector<32x128xf32>
    %c0_3 = arith.constant 0 : index
    %c0_4 = arith.constant 0 : index
    %3 = vector.load %arg4[%c0_3, %c0_4] : memref<1x128xf32, #tpu.memory_space<vmem>>, vector<1x128xf32>
    %4 = vector.broadcast %3 : vector<1x128xf32> to vector<32x128xf32>
    %5 = arith.addf %2, %4 : vector<32x128xf32>
    %cst_5 = arith.constant 0.000000e+00 : f32
    %6 = vector.broadcast %cst_5 : f32 to vector<32x128xf32>
    %7 = arith.maximumf %5, %6 : vector<32x128xf32>
    %8 = arith.truncf %7 : vector<32x128xf32> to vector<32x128xbf16>
    %c0_6 = arith.constant 0 : index
    %c0_7 = arith.constant 0 : index
    %9 = vector.load %arg5[%c0_6, %c0_7] : memref<128x128xbf16, #tpu.memory_space<vmem>>, vector<128x128xbf16>
    %cst_8 = arith.constant dense<0.000000e+00> : vector<32x128xf32>
    %10 = tpu.matmul %8, %9, %cst_8 {dimension_numbers = #tpu.dot_dimension_numbers<[1], [0], [0], [1], [0, 0, 1, 1], [], []>} : vector<32x128xbf16>, vector<128x128xbf16>, vector<32x128xf32> -> vector<32x128xf32>
    %c0_9 = arith.constant 0 : index
    %c0_10 = arith.constant 0 : index
    %11 = vector.load %arg6[%c0_9, %c0_10] : memref<1x128xf32, #tpu.memory_space<vmem>>, vector<1x128xf32>
    %12 = vector.broadcast %11 : vector<1x128xf32> to vector<32x128xf32>
    %13 = arith.addf %10, %12 : vector<32x128xf32>
    %c0_11 = arith.constant 0 : index
    %c0_12 = arith.constant 0 : index
    %14 = vector.load %arg2[%c0_11, %c0_12] : memref<32x128xbf16, #tpu.memory_space<vmem>>, vector<32x128xbf16>
    %15 = arith.extf %14 : vector<32x128xbf16> to vector<32x128xf32>
    %16 = arith.addf %13, %15 : vector<32x128xf32>
    %cst_13 = arith.constant 0.000000e+00 : f32
    %17 = vector.broadcast %cst_13 : f32 to vector<32x128xf32>
    %18 = arith.maximumf %16, %17 : vector<32x128xf32>
    %19 = arith.truncf %18 : vector<32x128xf32> to vector<32x128xbf16>
    %c0_14 = arith.constant 0 : index
    %c0_15 = arith.constant 0 : index
    %20 = vector.load %arg7[%c0_14, %c0_15] : memref<128x256xbf16, #tpu.memory_space<vmem>>, vector<128x256xbf16>
    %cst_16 = arith.constant dense<0.000000e+00> : vector<32x256xf32>
    %21 = tpu.matmul %19, %20, %cst_16 {dimension_numbers = #tpu.dot_dimension_numbers<[1], [0], [0], [1], [0, 0, 1, 1], [], []>} : vector<32x128xbf16>, vector<128x256xbf16>, vector<32x256xf32> -> vector<32x256xf32>
    %c0_17 = arith.constant 0 : index
    %c0_18 = arith.constant 0 : index
    %22 = vector.load %arg8[%c0_17, %c0_18] : memref<1x256xf32, #tpu.memory_space<vmem>>, vector<1x256xf32>
    %23 = vector.broadcast %22 : vector<1x256xf32> to vector<32x256xf32>
    %24 = arith.addf %21, %23 : vector<32x256xf32>
    %25 = vector.extract_strided_slice %24 {offsets = [0, 0], sizes = [32, 128], strides = [1, 1]} : vector<32x256xf32> to vector<32x128xf32>
    %cst_19 = arith.constant 0.000000e+00 : f32
    %26 = vector.broadcast %cst_19 : f32 to vector<32x128xf32>
    %27 = arith.maximumf %25, %26 : vector<32x128xf32>
    %28 = arith.truncf %27 : vector<32x128xf32> to vector<32x128xbf16>
    %c0_20 = arith.constant 0 : index
    %c0_21 = arith.constant 0 : index
    %29 = vector.load %arg9[%c0_20, %c0_21] : memref<32x256xbf16, #tpu.memory_space<vmem>>, vector<32x128xbf16>
    tpu.vector_store %arg9[%c0_20, %c0_21], %28 {strides = array<i32>} : memref<32x256xbf16, #tpu.memory_space<vmem>>, vector<32x128xbf16>,
    %30 = vector.extract_strided_slice %24 {offsets = [0, 128], sizes = [32, 128], strides = [1, 1]} : vector<32x256xf32> to vector<32x128xf32>
    %31 = arith.truncf %30 : vector<32x128xf32> to vector<32x128xbf16>
    %c0_22 = arith.constant 0 : index
    %c128 = arith.constant 128 : index
    %32 = vector.load %arg9[%c0_22, %c128] : memref<32x256xbf16, #tpu.memory_space<vmem>>, vector<32x128xbf16>
    tpu.vector_store %arg9[%c0_22, %c128], %31 {strides = array<i32>} : memref<32x256xbf16, #tpu.memory_space<vmem>>, vector<32x128xbf16>,
    return
  }
  func.func @transform_0(%arg0: i32) -> (i32, i32) {
    %c0_i32 = arith.constant 0 : i32
    %c0_i32_0 = arith.constant 0 : i32
    return %arg0, %c0_i32 : i32, i32
  }
  func.func @transform_1(%arg0: i32) -> (i32, i32) {
    %c0_i32 = arith.constant 0 : i32
    %c0_i32_0 = arith.constant 0 : i32
    return %arg0, %c0_i32 : i32, i32
  }
  func.func @transform_2(%arg0: i32) -> (i32, i32) {
    %c0_i32 = arith.constant 0 : i32
    %c0_i32_0 = arith.constant 0 : i32
    %c0_i32_1 = arith.constant 0 : i32
    return %c0_i32, %c0_i32_0 : i32, i32
  }
  func.func @transform_3(%arg0: i32) -> (i32, i32) {
    %c0_i32 = arith.constant 0 : i32
    %c0_i32_0 = arith.constant 0 : i32
    %c0_i32_1 = arith.constant 0 : i32
    return %c0_i32, %c0_i32_0 : i32, i32
  }
  func.func @transform_4(%arg0: i32) -> (i32, i32) {
    %c0_i32 = arith.constant 0 : i32
    %c0_i32_0 = arith.constant 0 : i32
    %c0_i32_1 = arith.constant 0 : i32
    return %c0_i32, %c0_i32_0 : i32, i32
  }
  func.func @transform_5(%arg0: i32) -> (i32, i32) {
    %c0_i32 = arith.constant 0 : i32
    %c0_i32_0 = arith.constant 0 : i32
    %c0_i32_1 = arith.constant 0 : i32
    return %c0_i32, %c0_i32_0 : i32, i32
  }
  func.func @transform_6(%arg0: i32) -> (i32, i32) {
    %c0_i32 = arith.constant 0 : i32
    %c0_i32_0 = arith.constant 0 : i32
    %c0_i32_1 = arith.constant 0 : i32
    return %c0_i32, %c0_i32_0 : i32, i32
  }
  func.func @transform_7(%arg0: i32) -> (i32, i32) {
    %c0_i32 = arith.constant 0 : i32
    %c0_i32_0 = arith.constant 0 : i32
    %c0_i32_1 = arith.constant 0 : i32
    return %c0_i32, %c0_i32_0 : i32, i32
  }
  func.func @transform_8(%arg0: i32) -> (i32, i32) {
    %c0_i32 = arith.constant 0 : i32
    %c0_i32_0 = arith.constant 0 : i32
    return %arg0, %c0_i32 : i32, i32
  }
}

module attributes {stable_mosaic.version = 11 : i64} {
  func.func @_last_kernel(%arg0: memref<8x1152xbf16, #tpu.memory_space<vmem>>, %arg1: memref<8x128xbf16, #tpu.memory_space<vmem>>, %arg2: memref<1152x128xbf16, #tpu.memory_space<vmem>>, %arg3: memref<1x128xf32, #tpu.memory_space<vmem>>, %arg4: memref<128x128xbf16, #tpu.memory_space<vmem>>, %arg5: memref<1x128xf32, #tpu.memory_space<vmem>>, %arg6: memref<2x8xf32, #tpu.memory_space<vmem>>, %arg7: memref<128x10xf32, #tpu.memory_space<vmem>>, %arg8: memref<1x10xf32, #tpu.memory_space<vmem>>, %arg9: memref<2x10xf32, #tpu.memory_space<vmem>>) attributes {dimension_semantics = [], scalar_prefetch = 0 : i64, scratch_operands = 0 : i64, tpu.core_type = #tpu.core_type<tc>} {
    %c0 = arith.constant 0 : index
    %c0_0 = arith.constant 0 : index
    %0 = vector.load %arg0[%c0, %c0_0] : memref<8x1152xbf16, #tpu.memory_space<vmem>>, vector<8x1152xbf16>
    %c0_1 = arith.constant 0 : index
    %c0_2 = arith.constant 0 : index
    %1 = vector.load %arg2[%c0_1, %c0_2] : memref<1152x128xbf16, #tpu.memory_space<vmem>>, vector<1152x128xbf16>
    %cst = arith.constant dense<0.000000e+00> : vector<8x128xf32>
    %2 = tpu.matmul %0, %1, %cst {dimension_numbers = #tpu.dot_dimension_numbers<[1], [0], [0], [1], [0, 0, 1, 1], [], []>} : vector<8x1152xbf16>, vector<1152x128xbf16>, vector<8x128xf32> -> vector<8x128xf32>
    %c0_3 = arith.constant 0 : index
    %c0_4 = arith.constant 0 : index
    %3 = vector.load %arg3[%c0_3, %c0_4] : memref<1x128xf32, #tpu.memory_space<vmem>>, vector<1x128xf32>
    %4 = vector.broadcast %3 : vector<1x128xf32> to vector<8x128xf32>
    %5 = arith.addf %2, %4 : vector<8x128xf32>
    %cst_5 = arith.constant 0.000000e+00 : f32
    %6 = vector.broadcast %cst_5 : f32 to vector<8x128xf32>
    %7 = arith.maximumf %5, %6 : vector<8x128xf32>
    %8 = arith.truncf %7 : vector<8x128xf32> to vector<8x128xbf16>
    %c0_6 = arith.constant 0 : index
    %c0_7 = arith.constant 0 : index
    %9 = vector.load %arg4[%c0_6, %c0_7] : memref<128x128xbf16, #tpu.memory_space<vmem>>, vector<128x128xbf16>
    %cst_8 = arith.constant dense<0.000000e+00> : vector<8x128xf32>
    %10 = tpu.matmul %8, %9, %cst_8 {dimension_numbers = #tpu.dot_dimension_numbers<[1], [0], [0], [1], [0, 0, 1, 1], [], []>} : vector<8x128xbf16>, vector<128x128xbf16>, vector<8x128xf32> -> vector<8x128xf32>
    %c0_9 = arith.constant 0 : index
    %c0_10 = arith.constant 0 : index
    %11 = vector.load %arg5[%c0_9, %c0_10] : memref<1x128xf32, #tpu.memory_space<vmem>>, vector<1x128xf32>
    %12 = vector.broadcast %11 : vector<1x128xf32> to vector<8x128xf32>
    %13 = arith.addf %10, %12 : vector<8x128xf32>
    %c0_11 = arith.constant 0 : index
    %c0_12 = arith.constant 0 : index
    %14 = vector.load %arg1[%c0_11, %c0_12] : memref<8x128xbf16, #tpu.memory_space<vmem>>, vector<8x128xbf16>
    %15 = arith.extf %14 : vector<8x128xbf16> to vector<8x128xf32>
    %16 = arith.addf %13, %15 : vector<8x128xf32>
    %cst_13 = arith.constant 0.000000e+00 : f32
    %17 = vector.broadcast %cst_13 : f32 to vector<8x128xf32>
    %18 = arith.maximumf %16, %17 : vector<8x128xf32>
    %c0_14 = arith.constant 0 : index
    %c0_15 = arith.constant 0 : index
    %19 = vector.load %arg6[%c0_14, %c0_15] : memref<2x8xf32, #tpu.memory_space<vmem>>, vector<2x8xf32>
    %cst_16 = arith.constant dense<0.000000e+00> : vector<2x128xf32>
    %20 = tpu.matmul %19, %18, %cst_16 {dimension_numbers = #tpu.dot_dimension_numbers<[1], [0], [0], [1], [0, 0, 1, 1], [], []>} : vector<2x8xf32>, vector<8x128xf32>, vector<2x128xf32> -> vector<2x128xf32>
    %c0_17 = arith.constant 0 : index
    %c0_18 = arith.constant 0 : index
    %21 = vector.load %arg7[%c0_17, %c0_18] : memref<128x10xf32, #tpu.memory_space<vmem>>, vector<128x10xf32>
    %cst_19 = arith.constant dense<0.000000e+00> : vector<2x10xf32>
    %22 = tpu.matmul %20, %21, %cst_19 {dimension_numbers = #tpu.dot_dimension_numbers<[1], [0], [0], [1], [0, 0, 1, 1], [], []>} : vector<2x128xf32>, vector<128x10xf32>, vector<2x10xf32> -> vector<2x10xf32>
    %c0_20 = arith.constant 0 : index
    %c0_21 = arith.constant 0 : index
    %23 = vector.load %arg8[%c0_20, %c0_21] : memref<1x10xf32, #tpu.memory_space<vmem>>, vector<1x10xf32>
    %24 = vector.broadcast %23 : vector<1x10xf32> to vector<2x10xf32>
    %25 = arith.addf %22, %24 : vector<2x10xf32>
    %c0_22 = arith.constant 0 : index
    %c0_23 = arith.constant 0 : index
    %26 = vector.load %arg9[%c0_22, %c0_23] : memref<2x10xf32, #tpu.memory_space<vmem>>, vector<2x10xf32>
    tpu.vector_store %arg9[%c0_22, %c0_23], %25 {strides = array<i32>} : memref<2x10xf32, #tpu.memory_space<vmem>>, vector<2x10xf32>,
    return
  }
}

</mosaic_0001>

<bundles_post_ra>
// kernel: _lambda_.5
= control target key start
LH: loop header
LB: loop body
LE: loop exit
PB: predicated region body
PF: predicated region fallthrough
CT: control target
= control target key end

     0   :  { %s2002_s18 = smov 0   ;;  %s2556_s0 = inlined_call_operand.vmem [shape: bf16[2048,128], index: 0, kind: input, shape index: {}]   ;;  %s2557_s1 = inlined_call_operand.vmem [shape: bf16[128,128], index: 1, kind: input, shape index: {}]   ;;  %s2558_s2 = inlined_call_operand.vmem [shape: f32[1,128], index: 2, kind: input, shape index: {}]   ;;  %s2559_s3 = inlined_call_operand.vmem [shape: bf16[128,256], index: 3, kind: input, shape index: {}]   ;;  %s2560_s4 = inlined_call_operand.vmem [shape: f32[1,256], index: 4, kind: input, shape index: {}]   ;;  %s2561_s5 = inlined_call_operand.vmem [shape: bf16[2048,256], index: 5, kind: output, shape index: {}]  }
   0x1 LB: > { %s1637_s19 = sadd.s32 4294967295, %s1970_s18   ;;  %p1641_p0 = scmp.ge.s32.totalorder %s1970_s18, 1  ;;  %s1970_s18 = sphi %s2002_s18, %s15_s18  }
   0x2   : > { %p188_p1 = scmp.lt.s32.totalorder %s1970_s18, 5 }
   0x4   : > { %p189_p2 = pnand %p1641_p0, %p188_p1 }
   0x5   : > { %s1642_s28 = sshll.u32 (!%p189_p2), %s1637_s19, 6 }
   0x6   : > { %192 = sbr.rel (%p189_p2) target bundleno = 696 (0x2b8), region = 40  ;;  %p218_p3 = scmp.lt.s32.totalorder (!%p189_p2), %s1642_s28, 255 }
   0xb   : > { %v1913_v0 = vld [vmem:[%s2557_s1 + $0x38] sm:$0xff]  ;;  %v1912_v1 = vld [vmem:[%s2557_s1 + $0x30] sm:$0xff]  ;;  %v1911_v2 = vld [vmem:[%s2557_s1 + $0x28] sm:$0xff]  ;;  %s2563_s28 = smov (!%p218_p3, %s1642_s28), 255 }
   0xc   : > { %554 = vmatpush.bf16.msra.mxu0 %v1913_v0  ;;  %1930 = vmatpush.bf16.msra.mxu3 %v1913_v0  ;;  %v1910_v3 = vld [vmem:[%s2557_s1 + $0x20] sm:$0xff]  ;;  %v1909_v4 = vld [vmem:[%s2557_s1 + $0x18] sm:$0xff]  ;;  %v1908_v5 = vld [vmem:[%s2557_s1 + $0x10] sm:$0xff]  ;;  %s1643_s10 = sshll.u32 %s2563_s28, 2  ;;  %s1873_s19 = sshll.u32 %s2563_s28, 3 }
   0xd   : > { %v1907_v6 = vld [vmem:[%s2557_s1 + $0x8] sm:$0xff]  ;;  %v1906_v7 = vld [vmem:[%s2557_s1] sm:$0xff]  ;;  %s2040_s15 = scalar_lea.vmem %s2556_s0, %s1643_s10  ;;  %v1865_v18 = vld [vmem:[%s2559_s3 + $0x70] sm:$0xf]  ;;  %s2247_s22 = scalar_lea.vmem %s2561_s5, %s1873_s19 }
   0xe   : > { %v1874_v8 = vld [vmem:[%s2040_s15] sm:$0xff]  ;;  %v1875_v10 = vld [vmem:[%s2040_s15 + $0x8] sm:$0xff]  ;;  %v1876_v12 = vld [vmem:[%s2040_s15 + $0x10] sm:$0xff] }
   0xf   : > { %v1898_v9 = vld [vmem:[%s2040_s15 + $0xc0] sm:$0xff]  ;;  %v1899_v11 = vld [vmem:[%s2040_s15 + $0xc8] sm:$0xff]  ;;  %v1900_v13 = vld [vmem:[%s2040_s15 + $0xd0] sm:$0xff] }
  0x10   : > { %555 = vmatpush.bf16.msra.mxu0 %v1912_v1  ;;  %1931 = vmatpush.bf16.msra.mxu3 %v1912_v1  ;;  %v1877_v14 = vld [vmem:[%s2040_s15 + $0x18] sm:$0xff]  ;;  %v1878_v16 = vld [vmem:[%s2040_s15 + $0x20] sm:$0xff]  ;;  %v1928_v20 = vld [vmem:[%s2559_s3 + $0x74] sm:$0xf] }
  0x11   : > { %v1901_v15 = vld [vmem:[%s2040_s15 + $0xd8] sm:$0xff]  ;;  %v1902_v17 = vld [vmem:[%s2040_s15 + $0xe0] sm:$0xff]  ;;  %v1879_v24 = vld [vmem:[%s2040_s15 + $0x28] sm:$0xff] }
  0x12   : > { %v1929_v19 = vld [vmem:[%s2559_s3 + $0x74] sm:$0xf0]  ;;  %v1867_v22 = vld [vmem:[%s2559_s3 + $0x78] sm:$0xf0]  ;;  %v1903_v25 = vld [vmem:[%s2040_s15 + $0xe8] sm:$0xff] }
  0x13   : > { %v1866_v21 = vor.u32 %v1929_v19, %v1865_v18  ;;  %v2064_v23 = vor.u32 %v1928_v20, %v1867_v22  ;;  %v1857_v26 = vld [vmem:[%s2559_s3 + $0x60] sm:$0xf]  ;;  %v1927_v27 = vld [vmem:[%s2559_s3 + $0x64] sm:$0xf0]  ;;  %v1926_v29 = vld [vmem:[%s2559_s3 + $0x64] sm:$0xf] }
  0x14   : > { %556 = vmatpush.bf16.msra.mxu0 %v1911_v2  ;;  %1932 = vmatpush.bf16.msra.mxu3 %v1911_v2  ;;  %v1858_v28 = vor.u32 %v1927_v27, %v1857_v26  ;;  %v1859_v30 = vld [vmem:[%s2559_s3 + $0x68] sm:$0xf0]  ;;  %v1849_v32 = vld [vmem:[%s2559_s3 + $0x50] sm:$0xf]  ;;  %v1925_v33 = vld [vmem:[%s2559_s3 + $0x54] sm:$0xf0] }
  0x15   : > { %921 = vmatpush.bf16.msra.mxu1 %v1866_v21  ;;  %1090 = vmatpush.bf16.msra.mxu2 %v2064_v23  ;;  %v2081_v31 = vor.u32 %v1926_v29, %v1859_v30  ;;  %v1924_v34 = vld [vmem:[%s2559_s3 + $0x54] sm:$0xf]  ;;  %v1850_v35 = vor.u32 %v1925_v33, %v1849_v32  ;;  %v1851_v36 = vld [vmem:[%s2559_s3 + $0x58] sm:$0xf0]  ;;  %v1841_v38 = vld [vmem:[%s2559_s3 + $0x40] sm:$0xf] }
  0x16   : > { %v1854_v37 = vor.u32 %v1924_v34, %v1851_v36  ;;  %v1923_v39 = vld [vmem:[%s2559_s3 + $0x44] sm:$0xf0]  ;;  %v1922_v40 = vld [vmem:[%s2559_s3 + $0x44] sm:$0xf]  ;;  %v1843_v41 = vld [vmem:[%s2559_s3 + $0x48] sm:$0xf0] }
  0x17   : > { %v1842_v42 = vor.u32 %v1923_v39, %v1841_v38  ;;  %v1846_v43 = vor.u32 %v1922_v40, %v1843_v41  ;;  %v1833_v44 = vld [vmem:[%s2559_s3 + $0x30] sm:$0xf]  ;;  %v1921_v45 = vld [vmem:[%s2559_s3 + $0x34] sm:$0xf0]  ;;  %v1920_v46 = vld [vmem:[%s2559_s3 + $0x34] sm:$0xf] }
  0x18   : > { %557 = vmatpush.bf16.msra.mxu0 %v1910_v3  ;;  %1933 = vmatpush.bf16.msra.mxu3 %v1910_v3  ;;  %v1834_v47 = vor.u32 %v1921_v45, %v1833_v44  ;;  %v1835_v48 = vld [vmem:[%s2559_s3 + $0x38] sm:$0xf0]  ;;  %v1880_v49 = vld [vmem:[%s2040_s15 + $0x30] sm:$0xff]  ;;  %v1825_v52 = vld [vmem:[%s2559_s3 + $0x20] sm:$0xf] }
  0x19   : > { %922 = vmatpush.bf16.msra.mxu1 %v1858_v28  ;;  %1091 = vmatpush.bf16.msra.mxu2 %v2081_v31  ;;  %v1904_v50 = vld [vmem:[%s2040_s15 + $0xf0] sm:$0xff]  ;;  %v1838_v51 = vor.u32 %v1920_v46, %v1835_v48  ;;  %v1919_v53 = vld [vmem:[%s2559_s3 + $0x24] sm:$0xf0]  ;;  %v1918_v55 = vld [vmem:[%s2559_s3 + $0x24] sm:$0xf] }
  0x1a   : > { %v1826_v54 = vor.u32 %v1919_v53, %v1825_v52  ;;  %v1827_v56 = vld [vmem:[%s2559_s3 + $0x28] sm:$0xf0]  ;;  %v1817_v58 = vld [vmem:[%s2559_s3 + $0x10] sm:$0xf]  ;;  %v1917_v59 = vld [vmem:[%s2559_s3 + $0x14] sm:$0xf0] }
  0x1b   : > { %v1830_v57 = vor.u32 %v1918_v55, %v1827_v56  ;;  %v1916_v60 = vld [vmem:[%s2559_s3 + $0x14] sm:$0xf]  ;;  %v1818_v61 = vor.u32 %v1917_v59, %v1817_v58  ;;  %v1819_v62 = vld [vmem:[%s2559_s3 + $0x18] sm:$0xf0]  ;;  %v1809_v0 = vld [vmem:[%s2559_s3] sm:$0xf] }
  0x1c   : > { %558 = vmatpush.bf16.msra.mxu0 %v1909_v4  ;;  %1934 = vmatpush.bf16.msra.mxu3 %v1909_v4  ;;  %v1822_v63 = vor.u32 %v1916_v60, %v1819_v62  ;;  %v1915_v1 = vld [vmem:[%s2559_s3 + $0x4] sm:$0xf0]  ;;  %v1914_v2 = vld [vmem:[%s2559_s3 + $0x4] sm:$0xf]  ;;  %v1811_v4 = vld [vmem:[%s2559_s3 + $0x8] sm:$0xf0] }
  0x1d   : > { %923 = vmatpush.bf16.msra.mxu1 %v1850_v35  ;;  %1092 = vmatpush.bf16.msra.mxu2 %v1854_v37  ;;  %v1810_v3 = vor.u32 %v1915_v1, %v1809_v0  ;;  %v1883_v22 = vld [vmem:[%s2040_s15 + $0x48] sm:$0xff]  ;;  %v1885_v52 = vld [vmem:[%s2040_s15 + $0x58] sm:$0xff] }
  0x20   : > { %559 = vmatpush.bf16.msra.mxu0 %v1908_v5  ;;  %1935 = vmatpush.bf16.msra.mxu3 %v1908_v5  ;;  %v1814_v5 = vor.u32 %v1914_v2, %v1811_v4 }
  0x21   : > { %924 = vmatpush.bf16.msra.mxu1 %v1842_v42  ;;  %1093 = vmatpush.bf16.msra.mxu2 %v1846_v43 }
  0x24   : > { %560 = vmatpush.bf16.msra.mxu0 %v1907_v6  ;;  %1936 = vmatpush.bf16.msra.mxu3 %v1907_v6  ;;  %v1881_v6 = vld [vmem:[%s2040_s15 + $0x38] sm:$0xff] }
  0x25   : > { %925 = vmatpush.bf16.msra.mxu1 %v1834_v47  ;;  %1094 = vmatpush.bf16.msra.mxu2 %v1838_v51 }
  0x28   : > { %561 = vmatpush.bf16.msra.mxu0 %v1906_v7  ;;  %1937 = vmatpush.bf16.msra.mxu3 %v1906_v7  ;;  %v1905_v7 = vld [vmem:[%s2040_s15 + $0xf8] sm:$0xff] }
  0x29   : > { %926 = vmatpush.bf16.msra.mxu1 %v1826_v54  ;;  %1095 = vmatpush.bf16.msra.mxu2 %v1830_v57 }
  0x2b   : > { %562 = vmatmul.bf16.vlgmr.msra.gmra.mxu0 %v1874_v8  ;;  %682 = vmatmul.bf16.vlgmr.msra.gmra.mxu3 %v1898_v9  ;;  %v1882_v8 = vld [vmem:[%s2040_s15 + $0x40] sm:$0xff] }
  0x2c   : > { %1938 = vmatpush.bf16.msrb.mxu3 %v1866_v21 }
  0x2d   : > { %927 = vmatpush.bf16.msra.mxu1 %v1818_v61  ;;  %1096 = vmatpush.bf16.msra.mxu2 %v1822_v63 }
  0x30   : > { %1939 = vmatpush.bf16.msrb.mxu3 %v1858_v28 }
  0x31   : > { %928 = vmatpush.bf16.msra.mxu1 %v1810_v3  ;;  %1097 = vmatpush.bf16.msra.mxu2 %v1814_v5 }
  0x34   : > { %1940 = vmatpush.bf16.msrb.mxu3 %v1850_v35 }
  0x38   : > { %1941 = vmatpush.bf16.msrb.mxu3 %v1842_v42 }
  0x3b   : > { %567 = vmatmul.bf16.gmra.mxu0 %v1875_v10  ;;  %687 = vmatmul.bf16.gmra.mxu3 %v1899_v11  ;;  %v2166_v10 = vld [vmem:[%s2558_s2] ss:$0 sm:$0xff] }
  0x3c   : > { %1942 = vmatpush.bf16.msrb.mxu3 %v1834_v47 }
  0x40   : > { %1943 = vmatpush.bf16.msrb.mxu3 %v1826_v54 }
  0x44   : > { %1944 = vmatpush.bf16.msrb.mxu3 %v1818_v61 }
  0x48   : > { %1945 = vmatpush.bf16.msrb.mxu3 %v1810_v3  ;;  %v1886_v3 = vld [vmem:[%s2040_s15 + $0x60] sm:$0xff] }
  0x4b   : > { %572 = vmatmul.bf16.gmra.mxu0 %v1876_v12  ;;  %692 = vmatmul.bf16.gmra.mxu3 %v1900_v13 }
  0x4c   : > { %1946 = vmatpush.bf16.msra.mxu3 %v2064_v23 }
  0x50   : > { %1947 = vmatpush.bf16.msra.mxu3 %v2081_v31 }
  0x54   : > { %1948 = vmatpush.bf16.msra.mxu3 %v1854_v37  ;;  %v1884_v37 = vld [vmem:[%s2040_s15 + $0x50] sm:$0xff] }
  0x58   : > { %1949 = vmatpush.bf16.msra.mxu3 %v1846_v43 }
  0x5b   : > { %577 = vmatmul.bf16.gmra.mxu0 %v1877_v14  ;;  %697 = vmatmul.bf16.gmra.mxu3 %v1901_v15 }
  0x5c   : > { %1950 = vmatpush.bf16.msra.mxu3 %v1838_v51 }
  0x60   : > { %1951 = vmatpush.bf16.msra.mxu3 %v1830_v57 }
  0x64   : > { %1952 = vmatpush.bf16.msra.mxu3 %v1822_v63 }
  0x68   : > { %1953 = vmatpush.bf16.msra.mxu3 %v1814_v5 }
  0x6b   : > { %582 = vmatmul.bf16.gmra.mxu0 %v1878_v16  ;;  %702 = vmatmul.bf16.gmra.mxu3 %v1902_v17 }
  0x7b   : > { %587 = vmatmul.bf16.gmra.mxu0 %v1879_v24  ;;  %707 = vmatmul.bf16.gmra.mxu3 %v1903_v25 }
  0x8b   : > { %592 = vmatmul.bf16.gmra.mxu0 %v1880_v49  ;;  %712 = vmatmul.bf16.gmra.mxu3 %v1904_v50 }
  0x9b   : > { %597 = vmatmul.bf16.gmra.mxu0 %v1881_v6  ;;  %717 = vmatmul.bf16.gmra.mxu3 %v1905_v7 }
  0xa8   : > { %v563_v9 = vpop.f32.mrf.mxu0 }
  0xa9   : > { %v564_v12 = vadd.f32 %v2166_v10, %v563_v9 }
  0xab   : > { %602 = vmatmul.bf16.gmra.mxu0 %v1882_v8  ;;  %v723_v15 = vmax.f32 %v564_v12, 0.0 }
  0xae   : > { %v683_v11 = vpop.f32.mrf.mxu3 }
  0xaf   : > { %v684_v16 = vadd.f32 %v2166_v10, %v683_v11 }
  0xb0   : > { %v565_v13 = vpop.f32.mrf.mxu0 }
  0xb1   : > { %v566_v14 = vadd.f32 %v2166_v10, %v565_v13  ;;  %v771_v20 = vmax.f32 %v684_v16, 0.0 }
  0xb3   : > { %v724_v17 = vmax.f32 %v566_v14, 0.0 }
  0xb5   : > { %v787_v18 = vpack.c.bf16 %v724_v17, %v723_v15 }
  0xb6   : > { %v685_v19 = vpop.f32.mrf.mxu3 }
  0xb7   : > { %v686_v21 = vadd.f32 %v2166_v10, %v685_v19  ;;  %929 = vmatmul.bf16.vlgmr.msra.gmra.mxu1 %v787_v18  ;;  %1098 = vmatmul.bf16.vlgmr.msra.gmra.mxu2 %v787_v18  ;;  %v1887_v19 = vld [vmem:[%s2040_s15 + $0x68] sm:$0xff] }
  0xb8   : > { %v568_v23 = vpop.f32.mrf.mxu0 }
  0xb9   : > { %v772_v24 = vmax.f32 %v686_v21, 0.0  ;;  %v569_v27 = vadd.f32 %v2166_v10, %v568_v23 }
  0xbb   : > { %607 = vmatmul.bf16.gmra.mxu0 %v1883_v22  ;;  %v2173_v25 = vpack.c.bf16 %v772_v24, %v771_v20  ;;  %v725_v30 = vmax.f32 %v569_v27, 0.0 }
  0xbd   : > { %1049 = vmatmul.bf16.vlgmr.msrb.gmra.mxu3 %v2173_v25 }
  0xbe   : > { %v688_v26 = vpop.f32.mrf.mxu3 }
  0xbf   : > { %v689_v31 = vadd.f32 %v2166_v10, %v688_v26 }
  0xc0   : > { %v570_v28 = vpop.f32.mrf.mxu0 }
  0xc1   : > { %v571_v29 = vadd.f32 %v2166_v10, %v570_v28  ;;  %v773_v35 = vmax.f32 %v689_v31, 0.0 }
  0xc3   : > { %v726_v32 = vmax.f32 %v571_v29, 0.0 }
  0xc5   : > { %v788_v33 = vpack.c.bf16 %v726_v32, %v725_v30 }
  0xc6   : > { %v690_v34 = vpop.f32.mrf.mxu3 }
  0xc7   : > { %v691_v36 = vadd.f32 %v2166_v10, %v690_v34  ;;  %934 = vmatmul.bf16.gmra.mxu1 %v788_v33  ;;  %1103 = vmatmul.bf16.gmra.mxu2 %v788_v33 }
  0xc8   : > { %v573_v38 = vpop.f32.mrf.mxu0 }
  0xc9   : > { %v774_v39 = vmax.f32 %v691_v36, 0.0  ;;  %v574_v42 = vadd.f32 %v2166_v10, %v573_v38 }
  0xcb   : > { %612 = vmatmul.bf16.gmra.mxu0 %v1884_v37  ;;  %v2181_v40 = vpack.c.bf16 %v774_v39, %v773_v35  ;;  %v727_v45 = vmax.f32 %v574_v42, 0.0  ;;  %v1888_v35 = vld [vmem:[%s2040_s15 + $0x70] sm:$0xff] }
  0xcd   : > { %1054 = vmatmul.bf16.gmra.mxu3 %v2181_v40 }
  0xce   : > { %v693_v41 = vpop.f32.mrf.mxu3 }
  0xcf   : > { %v694_v46 = vadd.f32 %v2166_v10, %v693_v41 }
  0xd0   : > { %v575_v43 = vpop.f32.mrf.mxu0 }
  0xd1   : > { %v576_v44 = vadd.f32 %v2166_v10, %v575_v43  ;;  %v775_v50 = vmax.f32 %v694_v46, 0.0 }
  0xd3   : > { %v728_v47 = vmax.f32 %v576_v44, 0.0 }
  0xd5   : > { %v789_v48 = vpack.c.bf16 %v728_v47, %v727_v45 }
  0xd6   : > { %v695_v49 = vpop.f32.mrf.mxu3 }
  0xd7   : > { %v696_v51 = vadd.f32 %v2166_v10, %v695_v49  ;;  %939 = vmatmul.bf16.gmra.mxu1 %v789_v48  ;;  %1108 = vmatmul.bf16.gmra.mxu2 %v789_v48 }
  0xd8   : > { %v578_v53 = vpop.f32.mrf.mxu0 }
  0xd9   : > { %v776_v54 = vmax.f32 %v696_v51, 0.0  ;;  %v579_v57 = vadd.f32 %v2166_v10, %v578_v53  ;;  %v1889_v51 = vld [vmem:[%s2040_s15 + $0x78] sm:$0xff] }
  0xdb   : > { %617 = vmatmul.bf16.gmra.mxu0 %v1885_v52  ;;  %v2189_v55 = vpack.c.bf16 %v776_v54, %v775_v50  ;;  %v729_v60 = vmax.f32 %v579_v57, 0.0 }
  0xdd   : > { %1059 = vmatmul.bf16.gmra.mxu3 %v2189_v55 }
  0xde   : > { %v698_v56 = vpop.f32.mrf.mxu3 }
  0xdf   : > { %v699_v61 = vadd.f32 %v2166_v10, %v698_v56 }
  0xe0   : > { %v580_v58 = vpop.f32.mrf.mxu0 }
  0xe1   : > { %v581_v59 = vadd.f32 %v2166_v10, %v580_v58  ;;  %v777_v1 = vmax.f32 %v699_v61, 0.0 }
  0xe3   : > { %v730_v62 = vmax.f32 %v581_v59, 0.0 }
  0xe5   : > { %v790_v63 = vpack.c.bf16 %v730_v62, %v729_v60 }
  0xe6   : > { %v700_v0 = vpop.f32.mrf.mxu3 }
  0xe7   : > { %v701_v2 = vadd.f32 %v2166_v10, %v700_v0  ;;  %944 = vmatmul.bf16.gmra.mxu1 %v790_v63  ;;  %1113 = vmatmul.bf16.gmra.mxu2 %v790_v63 }
  0xe8   : > { %v583_v4 = vpop.f32.mrf.mxu0 }
  0xe9   : > { %v778_v5 = vmax.f32 %v701_v2, 0.0  ;;  %v584_v8 = vadd.f32 %v2166_v10, %v583_v4 }
  0xeb   : > { %622 = vmatmul.bf16.gmra.mxu0 %v1886_v3  ;;  %v2197_v6 = vpack.c.bf16 %v778_v5, %v777_v1  ;;  %v731_v12 = vmax.f32 %v584_v8, 0.0  ;;  %v1890_v3 = vld [vmem:[%s2040_s15 + $0x80] sm:$0xff] }
  0xec   : > { %v835_v8 = vld [vmem:[%s2560_s4] sm:$0x3] }
  0xed   : > { %1064 = vmatmul.bf16.gmra.mxu3 %v2197_v6 }
  0xee   : > { %v703_v7 = vpop.f32.mrf.mxu3 }
  0xef   : > { %v704_v13 = vadd.f32 %v2166_v10, %v703_v7 }
  0xf0   : > { %v585_v9 = vpop.f32.mrf.mxu0 }
  0xf1   : > { %v586_v11 = vadd.f32 %v2166_v10, %v585_v9  ;;  %v779_v17 = vmax.f32 %v704_v13, 0.0  ;;  %v2237_v13 = vperm.slane %v835_v8, 0 }
  0xf3   : > { %v732_v14 = vmax.f32 %v586_v11, 0.0 }
  0xf5   : > { %v791_v15 = vpack.c.bf16 %v732_v14, %v731_v12 }
  0xf6   : > { %v705_v16 = vpop.f32.mrf.mxu3 }
  0xf7   : > { %v706_v18 = vadd.f32 %v2166_v10, %v705_v16  ;;  %949 = vmatmul.bf16.gmra.mxu1 %v791_v15  ;;  %1118 = vmatmul.bf16.gmra.mxu2 %v791_v15 }
  0xf8   : > { %v588_v20 = vpop.f32.mrf.mxu0 }
  0xf9   : > { %v780_v21 = vmax.f32 %v706_v18, 0.0  ;;  %v589_v24 = vadd.f32 %v2166_v10, %v588_v20  ;;  %v2241_v20 = vperm.slane %v835_v8, 1 }
  0xfb   : > { %627 = vmatmul.bf16.gmra.mxu0 %v1887_v19  ;;  %v2205_v22 = vpack.c.bf16 %v780_v21, %v779_v17  ;;  %v733_v28 = vmax.f32 %v589_v24, 0.0  ;;  %v1891_v21 = vld [vmem:[%s2040_s15 + $0x88] sm:$0xff] }
  0xfd   : > { %1069 = vmatmul.bf16.gmra.mxu3 %v2205_v22 }
  0xfe   : > { %v708_v23 = vpop.f32.mrf.mxu3 }
  0xff   : > { %v709_v29 = vadd.f32 %v2166_v10, %v708_v23 }
 0x100   : > { %v590_v26 = vpop.f32.mrf.mxu0 }
 0x101   : > { %v591_v27 = vadd.f32 %v2166_v10, %v590_v26  ;;  %v781_v33 = vmax.f32 %v709_v29, 0.0 }
 0x103   : > { %v734_v30 = vmax.f32 %v591_v27, 0.0 }
 0x105   : > { %v792_v31 = vpack.c.bf16 %v734_v30, %v733_v28 }
 0x106   : > { %v710_v32 = vpop.f32.mrf.mxu3 }
 0x107   : > { %v711_v34 = vadd.f32 %v2166_v10, %v710_v32  ;;  %954 = vmatmul.bf16.gmra.mxu1 %v792_v31  ;;  %1123 = vmatmul.bf16.gmra.mxu2 %v792_v31 }
 0x108   : > { %v593_v36 = vpop.f32.mrf.mxu0 }
 0x109   : > { %v782_v37 = vmax.f32 %v711_v34, 0.0  ;;  %v594_v41 = vadd.f32 %v2166_v10, %v593_v36 }
 0x10b   : > { %632 = vmatmul.bf16.gmra.mxu0 %v1888_v35  ;;  %v2213_v38 = vpack.c.bf16 %v782_v37, %v781_v33  ;;  %v735_v44 = vmax.f32 %v594_v41, 0.0 }
 0x10d   : > { %1074 = vmatmul.bf16.gmra.mxu3 %v2213_v38 }
 0x10e   : > { %v713_v39 = vpop.f32.mrf.mxu3 }
 0x10f   : > { %v714_v45 = vadd.f32 %v2166_v10, %v713_v39 }
 0x110   : > { %v595_v42 = vpop.f32.mrf.mxu0 }
 0x111   : > { %v596_v43 = vadd.f32 %v2166_v10, %v595_v42  ;;  %v783_v49 = vmax.f32 %v714_v45, 0.0 }
 0x113   : > { %v736_v46 = vmax.f32 %v596_v43, 0.0 }
 0x115   : > { %v793_v47 = vpack.c.bf16 %v736_v46, %v735_v44 }
 0x116   : > { %v715_v48 = vpop.f32.mrf.mxu3 }
 0x117   : > { %v716_v50 = vadd.f32 %v2166_v10, %v715_v48  ;;  %959 = vmatmul.bf16.gmra.mxu1 %v793_v47  ;;  %1128 = vmatmul.bf16.gmra.mxu2 %v793_v47 }
 0x118   : > { %v598_v52 = vpop.f32.mrf.mxu0 }
 0x119   : > { %v784_v53 = vmax.f32 %v716_v50, 0.0  ;;  %v599_v57 = vadd.f32 %v2166_v10, %v598_v52  ;;  %v1892_v50 = vld [vmem:[%s2040_s15 + $0x90] sm:$0xff] }
 0x11b   : > { %637 = vmatmul.bf16.gmra.mxu0 %v1889_v51  ;;  %v2221_v54 = vpack.c.bf16 %v784_v53, %v783_v49  ;;  %v737_v60 = vmax.f32 %v599_v57, 0.0 }
 0x11d   : > { %1079 = vmatmul.bf16.gmra.mxu3 %v2221_v54 }
 0x11e   : > { %v718_v56 = vpop.f32.mrf.mxu3 }
 0x11f   : > { %v719_v61 = vadd.f32 %v2166_v10, %v718_v56 }
 0x120   : > { %v600_v58 = vpop.f32.mrf.mxu0 }
 0x121   : > { %v601_v59 = vadd.f32 %v2166_v10, %v600_v58  ;;  %v785_v1 = vmax.f32 %v719_v61, 0.0 }
 0x123   : > { %v738_v62 = vmax.f32 %v601_v59, 0.0 }
 0x125   : > { %v794_v63 = vpack.c.bf16 %v738_v62, %v737_v60 }
 0x126   : > { %v720_v0 = vpop.f32.mrf.mxu3 }
 0x127   : > { %v721_v2 = vadd.f32 %v2166_v10, %v720_v0  ;;  %964 = vmatmul.bf16.gmra.mxu1 %v794_v63  ;;  %1133 = vmatmul.bf16.gmra.mxu2 %v794_v63 }
 0x128   : > { %v603_v4 = vpop.f32.mrf.mxu0 }
 0x129   : > { %v786_v5 = vmax.f32 %v721_v2, 0.0  ;;  %v604_v9 = vadd.f32 %v2166_v10, %v603_v4 }
 0x12b   : > { %642 = vmatmul.bf16.gmra.mxu0 %v1890_v3  ;;  %v2229_v7 = vpack.c.bf16 %v786_v5, %v785_v1  ;;  %v739_v14 = vmax.f32 %v604_v9, 0.0 }
 0x12d   : > { %1084 = vmatmul.bf16.gmra.mxu3 %v2229_v7 }
 0x130   : > { %v605_v11 = vpop.f32.mrf.mxu0 }
 0x131   : > { %v606_v12 = vadd.f32 %v2166_v10, %v605_v11 }
 0x133   : > { %v740_v15 = vmax.f32 %v606_v12, 0.0 }
 0x134   : > { %v930_v16 = vpop.f32.mrf.mxu1 }
 0x135   : > { %v931_v17 = vadd.f32 %v930_v16, %v2237_v13  ;;  %v795_v18 = vpack.c.bf16 %v740_v15, %v739_v14 }
 0x137   : > { %v1259_v19 = vmax.f32 %v931_v17, 0.0  ;;  %969 = vmatmul.bf16.gmra.mxu1 %v795_v18  ;;  %1138 = vmatmul.bf16.gmra.mxu2 %v795_v18 }
 0x138   : > { %v608_v23 = vpop.f32.mrf.mxu0 }
 0x139   : > { %v1323_v24 = vpack.c.bf16 %v1259_v19, %v1259_v19  ;;  %v609_v31 = vadd.f32 %v2166_v10, %v608_v23  ;;  %v1893_v23 = vld [vmem:[%s2040_s15 + $0x98] sm:$0xff] }
 0x13a   : > { %v1099_v26 = vpop.f32.mrf.mxu2 }
 0x13b   : > { %1387 = vst [vmem:[%s2247_s22] sm:$0xf] %v1323_v24  ;;  %v1100_v27 = vadd.f32 %v1099_v26, %v2241_v20  ;;  %647 = vmatmul.bf16.gmra.mxu0 %v1891_v21  ;;  %v741_v41 = vmax.f32 %v609_v31, 0.0 }
 0x13c   : > { %v932_v28 = vpop.f32.mrf.mxu1 }
 0x13d   : > { %v1451_v29 = vpack.c.bf16 %v1100_v27, %v1100_v27  ;;  %v933_v30 = vadd.f32 %v932_v28, %v2237_v13  ;;  %1218 = vmatmul.bf16.vlgmr.msra.gmra.mxu3 %v2173_v25 }
 0x13f   : > { %1515 = vst [vmem:[%s2247_s22 + $0x4] sm:$0xf] %v1451_v29  ;;  %v1260_v32 = vmax.f32 %v933_v30, 0.0 }
 0x140   : > { %v610_v33 = vpop.f32.mrf.mxu0  ;;  %v1050_v34 = vpop.f32.mrf.mxu3 }
 0x141   : > { %v1324_v35 = vpack.c.bf16 %v1260_v32, %v1260_v32  ;;  %v611_v36 = vadd.f32 %v2166_v10, %v610_v33  ;;  %v1051_v37 = vadd.f32 %v1050_v34, %v2237_v13 }
 0x142   : > { %v1101_v39 = vpop.f32.mrf.mxu2 }
 0x143   : > { %1388 = vst [vmem:[%s2247_s22 + $0x8] sm:$0xf] %v1324_v35  ;;  %v742_v42 = vmax.f32 %v611_v36, 0.0  ;;  %v1307_v43 = vmax.f32 %v1051_v37, 0.0  ;;  %v1102_v25 = vadd.f32 %v1101_v39, %v2241_v20 }
 0x144   : > { %v935_v44 = vpop.f32.mrf.mxu1 }
 0x145   : > { %v1371_v45 = vpack.c.bf16 %v1307_v43, %v1307_v43  ;;  %v1452_v46 = vpack.c.bf16 %v1102_v25, %v1102_v25  ;;  %v936_v47 = vadd.f32 %v935_v44, %v2237_v13  ;;  %v796_v48 = vpack.c.bf16 %v742_v42, %v741_v41 }
 0x147   : > { %1435 = vst [vmem:[%s2247_s22 + $0x180] sm:$0xf] %v1371_v45  ;;  %v1261_v49 = vmax.f32 %v936_v47, 0.0  ;;  %974 = vmatmul.bf16.gmra.mxu1 %v796_v48  ;;  %1143 = vmatmul.bf16.gmra.mxu2 %v796_v48 }
 0x148   : > { %1516 = vst [vmem:[%s2247_s22 + $0xc] sm:$0xf] %v1452_v46  ;;  %v613_v51 = vpop.f32.mrf.mxu0  ;;  %v1052_v52 = vpop.f32.mrf.mxu3 }
 0x149   : > { %v1325_v53 = vpack.c.bf16 %v1261_v49, %v1261_v49  ;;  %v1053_v56 = vadd.f32 %v1052_v52, %v2237_v13  ;;  %v614_v0 = vadd.f32 %v2166_v10, %v613_v51 }
 0x14a   : > { %v1104_v57 = vpop.f32.mrf.mxu2 }
 0x14b   : > { %1389 = vst [vmem:[%s2247_s22 + $0x10] sm:$0xf] %v1325_v53  ;;  %v1308_v58 = vmax.f32 %v1053_v56, 0.0  ;;  %v1105_v59 = vadd.f32 %v1104_v57, %v2241_v20  ;;  %652 = vmatmul.bf16.gmra.mxu0 %v1892_v50  ;;  %v743_v11 = vmax.f32 %v614_v0, 0.0  ;;  %v1894_v56 = vld [vmem:[%s2040_s15 + $0xa0] sm:$0xff] }
 0x14c   : > { %v937_v60 = vpop.f32.mrf.mxu1 }
 0x14d   : > { %v1372_v61 = vpack.c.bf16 %v1308_v58, %v1308_v58  ;;  %v1453_v62 = vpack.c.bf16 %v1105_v59, %v1105_v59  ;;  %v938_v63 = vadd.f32 %v937_v60, %v2237_v13  ;;  %1223 = vmatmul.bf16.gmra.mxu3 %v2181_v40 }
 0x14f   : > { %1436 = vst [vmem:[%s2247_s22 + $0x188] sm:$0xf] %v1372_v61  ;;  %v1262_v1 = vmax.f32 %v938_v63, 0.0 }
 0x150   : > { %1517 = vst [vmem:[%s2247_s22 + $0x14] sm:$0xf] %v1453_v62  ;;  %v615_v2 = vpop.f32.mrf.mxu0  ;;  %v1055_v3 = vpop.f32.mrf.mxu3 }
 0x151   : > { %v1326_v4 = vpack.c.bf16 %v1262_v1, %v1262_v1  ;;  %v616_v5 = vadd.f32 %v2166_v10, %v615_v2  ;;  %v1056_v8 = vadd.f32 %v1055_v3, %v2237_v13 }
 0x152   : > { %v1106_v9 = vpop.f32.mrf.mxu2 }
 0x153   : > { %1390 = vst [vmem:[%s2247_s22 + $0x18] sm:$0xf] %v1326_v4  ;;  %v744_v12 = vmax.f32 %v616_v5, 0.0  ;;  %v1309_v40 = vmax.f32 %v1056_v8, 0.0  ;;  %v1107_v14 = vadd.f32 %v1106_v9, %v2241_v20 }
 0x154   : > { %v940_v15 = vpop.f32.mrf.mxu1 }
 0x155   : > { %v1373_v16 = vpack.c.bf16 %v1309_v40, %v1309_v40  ;;  %v1454_v17 = vpack.c.bf16 %v1107_v14, %v1107_v14  ;;  %v941_v18 = vadd.f32 %v940_v15, %v2237_v13  ;;  %v797_v19 = vpack.c.bf16 %v744_v12, %v743_v11 }
 0x157   : > { %1437 = vst [vmem:[%s2247_s22 + $0x190] sm:$0xf] %v1373_v16  ;;  %v1263_v21 = vmax.f32 %v941_v18, 0.0  ;;  %979 = vmatmul.bf16.gmra.mxu1 %v797_v19  ;;  %1148 = vmatmul.bf16.gmra.mxu2 %v797_v19 }
 0x158   : > { %1518 = vst [vmem:[%s2247_s22 + $0x1c] sm:$0xf] %v1454_v17  ;;  %v618_v24 = vpop.f32.mrf.mxu0  ;;  %v1057_v26 = vpop.f32.mrf.mxu3 }
 0x159   : > { %v1327_v27 = vpack.c.bf16 %v1263_v21, %v1263_v21  ;;  %v1058_v28 = vadd.f32 %v1057_v26, %v2237_v13  ;;  %v619_v36 = vadd.f32 %v2166_v10, %v618_v24 }
 0x15a   : > { %v1109_v29 = vpop.f32.mrf.mxu2 }
 0x15b   : > { %1391 = vst [vmem:[%s2247_s22 + $0x20] sm:$0xf] %v1327_v27  ;;  %v1310_v30 = vmax.f32 %v1058_v28, 0.0  ;;  %v1110_v31 = vadd.f32 %v1109_v29, %v2241_v20  ;;  %657 = vmatmul.bf16.gmra.mxu0 %v1893_v23  ;;  %v745_v45 = vmax.f32 %v619_v36, 0.0  ;;  %v1895_v27 = vld [vmem:[%s2040_s15 + $0xa8] sm:$0xff] }
 0x15c   : > { %v942_v32 = vpop.f32.mrf.mxu1 }
 0x15d   : > { %v1374_v33 = vpack.c.bf16 %v1310_v30, %v1310_v30  ;;  %v1455_v34 = vpack.c.bf16 %v1110_v31, %v1110_v31  ;;  %v943_v35 = vadd.f32 %v942_v32, %v2237_v13  ;;  %1228 = vmatmul.bf16.gmra.mxu3 %v2189_v55 }
 0x15f   : > { %1438 = vst [vmem:[%s2247_s22 + $0x198] sm:$0xf] %v1374_v33  ;;  %v1264_v37 = vmax.f32 %v943_v35, 0.0 }
 0x160   : > { %1519 = vst [vmem:[%s2247_s22 + $0x24] sm:$0xf] %v1455_v34  ;;  %v620_v39 = vpop.f32.mrf.mxu0  ;;  %v1060_v41 = vpop.f32.mrf.mxu3 }
 0x161   : > { %v1328_v42 = vpack.c.bf16 %v1264_v37, %v1264_v37  ;;  %v621_v43 = vadd.f32 %v2166_v10, %v620_v39  ;;  %v1061_v25 = vadd.f32 %v1060_v41, %v2237_v13 }
 0x162   : > { %v1111_v44 = vpop.f32.mrf.mxu2 }
 0x163   : > { %1392 = vst [vmem:[%s2247_s22 + $0x28] sm:$0xf] %v1328_v42  ;;  %v746_v46 = vmax.f32 %v621_v43, 0.0  ;;  %v1311_v55 = vmax.f32 %v1061_v25, 0.0  ;;  %v1112_v47 = vadd.f32 %v1111_v44, %v2241_v20 }
 0x164   : > { %v945_v48 = vpop.f32.mrf.mxu1 }
 0x165   : > { %v1375_v49 = vpack.c.bf16 %v1311_v55, %v1311_v55  ;;  %v1456_v50 = vpack.c.bf16 %v1112_v47, %v1112_v47  ;;  %v946_v51 = vadd.f32 %v945_v48, %v2237_v13  ;;  %v798_v52 = vpack.c.bf16 %v746_v46, %v745_v45 }
 0x167   : > { %1439 = vst [vmem:[%s2247_s22 + $0x1a0] sm:$0xf] %v1375_v49  ;;  %v1265_v53 = vmax.f32 %v946_v51, 0.0  ;;  %984 = vmatmul.bf16.gmra.mxu1 %v798_v52  ;;  %1153 = vmatmul.bf16.gmra.mxu2 %v798_v52 }
 0x168   : > { %1520 = vst [vmem:[%s2247_s22 + $0x2c] sm:$0xf] %v1456_v50  ;;  %v623_v57 = vpop.f32.mrf.mxu0  ;;  %v1062_v58 = vpop.f32.mrf.mxu3 }
 0x169   : > { %v1329_v59 = vpack.c.bf16 %v1265_v53, %v1265_v53  ;;  %v1063_v60 = vadd.f32 %v1062_v58, %v2237_v13  ;;  %v624_v4 = vadd.f32 %v2166_v10, %v623_v57  ;;  %v1896_v58 = vld [vmem:[%s2040_s15 + $0xb0] sm:$0xff] }
 0x16a   : > { %v1114_v61 = vpop.f32.mrf.mxu2 }
 0x16b   : > { %1393 = vst [vmem:[%s2247_s22 + $0x30] sm:$0xf] %v1329_v59  ;;  %v1312_v62 = vmax.f32 %v1063_v60, 0.0  ;;  %v1115_v63 = vadd.f32 %v1114_v61, %v2241_v20  ;;  %662 = vmatmul.bf16.gmra.mxu0 %v1894_v56  ;;  %v747_v15 = vmax.f32 %v624_v4, 0.0 }
 0x16c   : > { %v947_v0 = vpop.f32.mrf.mxu1 }
 0x16d   : > { %v1376_v1 = vpack.c.bf16 %v1312_v62, %v1312_v62  ;;  %v1457_v2 = vpack.c.bf16 %v1115_v63, %v1115_v63  ;;  %v948_v3 = vadd.f32 %v947_v0, %v2237_v13  ;;  %1233 = vmatmul.bf16.gmra.mxu3 %v2197_v6 }
 0x16f   : > { %1440 = vst [vmem:[%s2247_s22 + $0x1a8] sm:$0xf] %v1376_v1  ;;  %v1266_v5 = vmax.f32 %v948_v3, 0.0 }
 0x170   : > { %1521 = vst [vmem:[%s2247_s22 + $0x34] sm:$0xf] %v1457_v2  ;;  %v625_v8 = vpop.f32.mrf.mxu0  ;;  %v1065_v9 = vpop.f32.mrf.mxu3 }
 0x171   : > { %v1330_v11 = vpack.c.bf16 %v1266_v5, %v1266_v5  ;;  %v626_v12 = vadd.f32 %v2166_v10, %v625_v8  ;;  %v1066_v40 = vadd.f32 %v1065_v9, %v2237_v13 }
 0x172   : > { %v1116_v14 = vpop.f32.mrf.mxu2 }
 0x173   : > { %1394 = vst [vmem:[%s2247_s22 + $0x38] sm:$0xf] %v1330_v11  ;;  %v748_v16 = vmax.f32 %v626_v12, 0.0  ;;  %v1313_v6 = vmax.f32 %v1066_v40, 0.0  ;;  %v1117_v17 = vadd.f32 %v1116_v14, %v2241_v20 }
 0x174   : > { %v950_v18 = vpop.f32.mrf.mxu1 }
 0x175   : > { %v799_v19 = vpack.c.bf16 %v748_v16, %v747_v15  ;;  %v1377_v21 = vpack.c.bf16 %v1313_v6, %v1313_v6  ;;  %v1458_v23 = vpack.c.bf16 %v1117_v17, %v1117_v17  ;;  %v951_v24 = vadd.f32 %v950_v18, %v2237_v13 }
 0x177   : > { %1441 = vst [vmem:[%s2247_s22 + $0x1b0] sm:$0xf] %v1377_v21  ;;  %v1267_v26 = vmax.f32 %v951_v24, 0.0  ;;  %989 = vmatmul.bf16.gmra.mxu1 %v799_v19  ;;  %1158 = vmatmul.bf16.gmra.mxu2 %v799_v19 }
 0x178   : > { %1522 = vst [vmem:[%s2247_s22 + $0x3c] sm:$0xf] %v1458_v23  ;;  %v628_v28 = vpop.f32.mrf.mxu0  ;;  %v1067_v29 = vpop.f32.mrf.mxu3 }
 0x179   : > { %v1331_v30 = vpack.c.bf16 %v1267_v26, %v1267_v26  ;;  %v1068_v31 = vadd.f32 %v1067_v29, %v2237_v13  ;;  %v629_v41 = vadd.f32 %v2166_v10, %v628_v28  ;;  %v1897_v28 = vld [vmem:[%s2040_s15 + $0xb8] sm:$0xff] }
 0x17a   : > { %v1119_v32 = vpop.f32.mrf.mxu2 }
 0x17b   : > { %1395 = vst [vmem:[%s2247_s22 + $0x40] sm:$0xf] %v1331_v30  ;;  %v1314_v33 = vmax.f32 %v1068_v31, 0.0  ;;  %v1120_v34 = vadd.f32 %v1119_v32, %v2241_v20  ;;  %667 = vmatmul.bf16.gmra.mxu0 %v1895_v27  ;;  %v749_v47 = vmax.f32 %v629_v41, 0.0 }
 0x17c   : > { %v952_v35 = vpop.f32.mrf.mxu1 }
 0x17d   : > { %v1378_v36 = vpack.c.bf16 %v1314_v33, %v1314_v33  ;;  %v1459_v37 = vpack.c.bf16 %v1120_v34, %v1120_v34  ;;  %v953_v39 = vadd.f32 %v952_v35, %v2237_v13  ;;  %1238 = vmatmul.bf16.gmra.mxu3 %v2205_v22 }
 0x17f   : > { %1442 = vst [vmem:[%s2247_s22 + $0x1b8] sm:$0xf] %v1378_v36  ;;  %v1268_v42 = vmax.f32 %v953_v39, 0.0 }
 0x180   : > { %1523 = vst [vmem:[%s2247_s22 + $0x44] sm:$0xf] %v1459_v37  ;;  %v630_v43 = vpop.f32.mrf.mxu0  ;;  %v1070_v25 = vpop.f32.mrf.mxu3 }
 0x181   : > { %v1332_v44 = vpack.c.bf16 %v1268_v42, %v1268_v42  ;;  %v631_v45 = vadd.f32 %v2166_v10, %v630_v43  ;;  %v1071_v46 = vadd.f32 %v1070_v25, %v2237_v13 }
 0x182   : > { %v1121_v55 = vpop.f32.mrf.mxu2 }
 0x183   : > { %1396 = vst [vmem:[%s2247_s22 + $0x48] sm:$0xf] %v1332_v44  ;;  %v750_v48 = vmax.f32 %v631_v45, 0.0  ;;  %v1315_v22 = vmax.f32 %v1071_v46, 0.0  ;;  %v1122_v49 = vadd.f32 %v1121_v55, %v2241_v20 }
 0x184   : > { %v955_v50 = vpop.f32.mrf.mxu1 }
 0x185   : > { %v800_v51 = vpack.c.bf16 %v750_v48, %v749_v47  ;;  %v1379_v52 = vpack.c.bf16 %v1315_v22, %v1315_v22  ;;  %v1460_v53 = vpack.c.bf16 %v1122_v49, %v1122_v49  ;;  %v956_v56 = vadd.f32 %v955_v50, %v2237_v13 }
 0x187   : > { %1443 = vst [vmem:[%s2247_s22 + $0x1c0] sm:$0xf] %v1379_v52  ;;  %v1269_v57 = vmax.f32 %v956_v56, 0.0  ;;  %994 = vmatmul.bf16.gmra.mxu1 %v800_v51  ;;  %1163 = vmatmul.bf16.gmra.mxu2 %v800_v51 }
 0x188   : > { %1524 = vst [vmem:[%s2247_s22 + $0x4c] sm:$0xf] %v1460_v53  ;;  %v633_v59 = vpop.f32.mrf.mxu0  ;;  %v1072_v60 = vpop.f32.mrf.mxu3 }
 0x189   : > { %v1333_v61 = vpack.c.bf16 %v1269_v57, %v1269_v57  ;;  %v1073_v62 = vadd.f32 %v1072_v60, %v2237_v13  ;;  %v634_v8 = vadd.f32 %v2166_v10, %v633_v59 }
 0x18a   : > { %v1124_v63 = vpop.f32.mrf.mxu2 }
 0x18b   : > { %1397 = vst [vmem:[%s2247_s22 + $0x50] sm:$0xf] %v1333_v61  ;;  %v1316_v0 = vmax.f32 %v1073_v62, 0.0  ;;  %v1125_v1 = vadd.f32 %v1124_v63, %v2241_v20  ;;  %672 = vmatmul.bf16.gmra.mxu0 %v1896_v58  ;;  %v751_v6 = vmax.f32 %v634_v8, 0.0 }
 0x18c   : > { %v957_v2 = vpop.f32.mrf.mxu1 }
 0x18d   : > { %v1380_v3 = vpack.c.bf16 %v1316_v0, %v1316_v0  ;;  %v1461_v4 = vpack.c.bf16 %v1125_v1, %v1125_v1  ;;  %v958_v5 = vadd.f32 %v957_v2, %v2237_v13  ;;  %1243 = vmatmul.bf16.gmra.mxu3 %v2213_v38 }
 0x18f   : > { %1444 = vst [vmem:[%s2247_s22 + $0x1c8] sm:$0xf] %v1380_v3  ;;  %v1270_v9 = vmax.f32 %v958_v5, 0.0 }
 0x190   : > { %1525 = vst [vmem:[%s2247_s22 + $0x54] sm:$0xf] %v1461_v4  ;;  %v635_v11 = vpop.f32.mrf.mxu0  ;;  %v1075_v12 = vpop.f32.mrf.mxu3 }
 0x191   : > { %v1334_v40 = vpack.c.bf16 %v1270_v9, %v1270_v9  ;;  %v636_v14 = vadd.f32 %v2166_v10, %v635_v11  ;;  %v1076_v15 = vadd.f32 %v1075_v12, %v2237_v13 }
 0x192   : > { %v1126_v16 = vpop.f32.mrf.mxu2 }
 0x193   : > { %1398 = vst [vmem:[%s2247_s22 + $0x58] sm:$0xf] %v1334_v40  ;;  %v752_v17 = vmax.f32 %v636_v14, 0.0  ;;  %v1317_v38 = vmax.f32 %v1076_v15, 0.0  ;;  %v1127_v18 = vadd.f32 %v1126_v16, %v2241_v20 }
 0x194   : > { %v960_v19 = vpop.f32.mrf.mxu1 }
 0x195   : > { %v801_v21 = vpack.c.bf16 %v752_v17, %v751_v6  ;;  %v1381_v23 = vpack.c.bf16 %v1317_v38, %v1317_v38  ;;  %v1462_v24 = vpack.c.bf16 %v1127_v18, %v1127_v18  ;;  %v961_v26 = vadd.f32 %v960_v19, %v2237_v13 }
 0x197   : > { %1445 = vst [vmem:[%s2247_s22 + $0x1d0] sm:$0xf] %v1381_v23  ;;  %v1271_v27 = vmax.f32 %v961_v26, 0.0  ;;  %999 = vmatmul.bf16.gmra.mxu1 %v801_v21  ;;  %1168 = vmatmul.bf16.gmra.mxu2 %v801_v21 }
 0x198   : > { %1526 = vst [vmem:[%s2247_s22 + $0x5c] sm:$0xf] %v1462_v24  ;;  %v638_v29 = vpop.f32.mrf.mxu0  ;;  %v1077_v30 = vpop.f32.mrf.mxu3 }
 0x199   : > { %v1335_v31 = vpack.c.bf16 %v1271_v27, %v1271_v27  ;;  %v1078_v32 = vadd.f32 %v1077_v30, %v2237_v13  ;;  %v639_v42 = vadd.f32 %v2166_v10, %v638_v29 }
 0x19a   : > { %v1129_v33 = vpop.f32.mrf.mxu2 }
 0x19b   : > { %1399 = vst [vmem:[%s2247_s22 + $0x60] sm:$0xf] %v1335_v31  ;;  %v1318_v34 = vmax.f32 %v1078_v32, 0.0  ;;  %v1130_v35 = vadd.f32 %v1129_v33, %v2241_v20  ;;  %677 = vmatmul.bf16.gmra.mxu0 %v1897_v28  ;;  %v753_v48 = vmax.f32 %v639_v42, 0.0 }
 0x19c   : > { %v962_v36 = vpop.f32.mrf.mxu1 }
 0x19d   : > { %v1382_v37 = vpack.c.bf16 %v1318_v34, %v1318_v34  ;;  %v1463_v39 = vpack.c.bf16 %v1130_v35, %v1130_v35  ;;  %v963_v41 = vadd.f32 %v962_v36, %v2237_v13  ;;  %1248 = vmatmul.bf16.gmra.mxu3 %v2221_v54 }
 0x19f   : > { %1446 = vst [vmem:[%s2247_s22 + $0x1d8] sm:$0xf] %v1382_v37  ;;  %v1272_v43 = vmax.f32 %v963_v41, 0.0 }
 0x1a0   : > { %1527 = vst [vmem:[%s2247_s22 + $0x64] sm:$0xf] %v1463_v39  ;;  %v640_v25 = vpop.f32.mrf.mxu0  ;;  %v1080_v44 = vpop.f32.mrf.mxu3 }
 0x1a1   : > { %v1336_v45 = vpack.c.bf16 %v1272_v43, %v1272_v43  ;;  %v641_v46 = vadd.f32 %v2166_v10, %v640_v25  ;;  %v1081_v55 = vadd.f32 %v1080_v44, %v2237_v13 }
 0x1a2   : > { %v1131_v47 = vpop.f32.mrf.mxu2 }
 0x1a3   : > { %1400 = vst [vmem:[%s2247_s22 + $0x68] sm:$0xf] %v1336_v45  ;;  %v754_v22 = vmax.f32 %v641_v46, 0.0  ;;  %v1319_v49 = vmax.f32 %v1081_v55, 0.0  ;;  %v1132_v54 = vadd.f32 %v1131_v47, %v2241_v20 }
 0x1a4   : > { %v965_v50 = vpop.f32.mrf.mxu1 }
 0x1a5   : > { %v802_v51 = vpack.c.bf16 %v754_v22, %v753_v48  ;;  %v1383_v52 = vpack.c.bf16 %v1319_v49, %v1319_v49  ;;  %v1464_v53 = vpack.c.bf16 %v1132_v54, %v1132_v54  ;;  %v966_v56 = vadd.f32 %v965_v50, %v2237_v13 }
 0x1a7   : > { %1447 = vst [vmem:[%s2247_s22 + $0x1e0] sm:$0xf] %v1383_v52  ;;  %v1273_v57 = vmax.f32 %v966_v56, 0.0  ;;  %1004 = vmatmul.bf16.gmra.mxu1 %v802_v51  ;;  %1173 = vmatmul.bf16.gmra.mxu2 %v802_v51 }
 0x1a8   : > { %1528 = vst [vmem:[%s2247_s22 + $0x6c] sm:$0xf] %v1464_v53  ;;  %v643_v58 = vpop.f32.mrf.mxu0  ;;  %v1082_v59 = vpop.f32.mrf.mxu3 }
 0x1a9   : > { %v1337_v60 = vpack.c.bf16 %v1273_v57, %v1273_v57  ;;  %v1083_v61 = vadd.f32 %v1082_v59, %v2237_v13  ;;  %v644_v5 = vadd.f32 %v2166_v10, %v643_v58 }
 0x1aa   : > { %v1134_v62 = vpop.f32.mrf.mxu2 }
 0x1ab   : > { %1401 = vst [vmem:[%s2247_s22 + $0x70] sm:$0xf] %v1337_v60  ;;  %v1320_v63 = vmax.f32 %v1083_v61, 0.0  ;;  %v1135_v0 = vadd.f32 %v1134_v62, %v2241_v20  ;;  %v755_v16 = vmax.f32 %v644_v5, 0.0 }
 0x1ac   : > { %v967_v1 = vpop.f32.mrf.mxu1 }
 0x1ad   : > { %v1384_v2 = vpack.c.bf16 %v1320_v63, %v1320_v63  ;;  %v1465_v3 = vpack.c.bf16 %v1135_v0, %v1135_v0  ;;  %v968_v4 = vadd.f32 %v967_v1, %v2237_v13  ;;  %1253 = vmatmul.bf16.gmra.mxu3 %v2229_v7  ;;  %v2395_v63 = vld [vmem:[%s2558_s2] ss:$0 sm:$0xff] }
 0x1af   : > { %1448 = vst [vmem:[%s2247_s22 + $0x1e8] sm:$0xf] %v1384_v2  ;;  %v1274_v8 = vmax.f32 %v968_v4, 0.0 }
 0x1b0   : > { %1529 = vst [vmem:[%s2247_s22 + $0x74] sm:$0xf] %v1465_v3  ;;  %v645_v9 = vpop.f32.mrf.mxu0  ;;  %v1085_v11 = vpop.f32.mrf.mxu3 }
 0x1b1   : > { %v1338_v12 = vpack.c.bf16 %v1274_v8, %v1274_v8  ;;  %v646_v40 = vadd.f32 %v2166_v10, %v645_v9  ;;  %v1086_v14 = vadd.f32 %v1085_v11, %v2237_v13 }
 0x1b2   : > { %v1136_v15 = vpop.f32.mrf.mxu2 }
 0x1b3   : > { %1402 = vst [vmem:[%s2247_s22 + $0x78] sm:$0xf] %v1338_v12  ;;  %v756_v6 = vmax.f32 %v646_v40, 0.0  ;;  %v1321_v17 = vmax.f32 %v1086_v14, 0.0  ;;  %v1137_v7 = vadd.f32 %v1136_v15, %v2241_v20 }
 0x1b4   : > { %v970_v38 = vpop.f32.mrf.mxu1 }
 0x1b5   : > { %v803_v18 = vpack.c.bf16 %v756_v6, %v755_v16  ;;  %v1385_v19 = vpack.c.bf16 %v1321_v17, %v1321_v17  ;;  %v1466_v21 = vpack.c.bf16 %v1137_v7, %v1137_v7  ;;  %v971_v23 = vadd.f32 %v970_v38, %v2237_v13 }
 0x1b7   : > { %1449 = vst [vmem:[%s2247_s22 + $0x1f0] sm:$0xf] %v1385_v19  ;;  %v1275_v24 = vmax.f32 %v971_v23, 0.0  ;;  %1009 = vmatmul.bf16.gmra.mxu1 %v803_v18  ;;  %1178 = vmatmul.bf16.gmra.mxu2 %v803_v18 }
 0x1b8   : > { %1530 = vst [vmem:[%s2247_s22 + $0x7c] sm:$0xf] %v1466_v21  ;;  %v648_v26 = vpop.f32.mrf.mxu0  ;;  %v1087_v27 = vpop.f32.mrf.mxu3 }
 0x1b9   : > { %v1339_v28 = vpack.c.bf16 %v1275_v24, %v1275_v24  ;;  %v1088_v29 = vadd.f32 %v1087_v27, %v2237_v13  ;;  %v649_v37 = vadd.f32 %v2166_v10, %v648_v26 }
 0x1ba   : > { %v1139_v30 = vpop.f32.mrf.mxu2 }
 0x1bb   : > { %1403 = vst [vmem:[%s2247_s22 + $0x80] sm:$0xf] %v1339_v28  ;;  %v1322_v31 = vmax.f32 %v1088_v29, 0.0  ;;  %v1140_v32 = vadd.f32 %v1139_v30, %v2241_v20  ;;  %v757_v46 = vmax.f32 %v649_v37, 0.0 }
 0x1bc   : > { %v972_v33 = vpop.f32.mrf.mxu1 }
 0x1bd   : > { %v1386_v34 = vpack.c.bf16 %v1322_v31, %v1322_v31  ;;  %v1467_v35 = vpack.c.bf16 %v1140_v32, %v1140_v32  ;;  %v973_v36 = vadd.f32 %v972_v33, %v2237_v13 }
 0x1bf   : > { %1450 = vst [vmem:[%s2247_s22 + $0x1f8] sm:$0xf] %v1386_v34  ;;  %v1276_v39 = vmax.f32 %v973_v36, 0.0 }
 0x1c0   : > { %1531 = vst [vmem:[%s2247_s22 + $0x84] sm:$0xf] %v1467_v35  ;;  %v650_v41 = vpop.f32.mrf.mxu0  ;;  %v1219_v42 = vpop.f32.mrf.mxu3 }
 0x1c1   : > { %v1340_v43 = vpack.c.bf16 %v1276_v39, %v1276_v39  ;;  %v651_v25 = vadd.f32 %v2166_v10, %v650_v41  ;;  %v1220_v44 = vadd.f32 %v1219_v42, %v2241_v20 }
 0x1c2   : > { %v1141_v45 = vpop.f32.mrf.mxu2 }
 0x1c3   : > { %1404 = vst [vmem:[%s2247_s22 + $0x88] sm:$0xf] %v1340_v43  ;;  %v758_v55 = vmax.f32 %v651_v25, 0.0  ;;  %v1499_v47 = vpack.c.bf16 %v1220_v44, %v1220_v44  ;;  %v1142_v48 = vadd.f32 %v1141_v45, %v2241_v20 }
 0x1c4   : > { %v975_v22 = vpop.f32.mrf.mxu1 }
 0x1c5   : > { %v804_v49 = vpack.c.bf16 %v758_v55, %v757_v46  ;;  %1563 = vst [vmem:[%s2247_s22 + $0x184] sm:$0xf] %v1499_v47  ;;  %v1468_v54 = vpack.c.bf16 %v1142_v48, %v1142_v48  ;;  %v976_v50 = vadd.f32 %v975_v22, %v2237_v13 }
 0x1c7   : > { %1532 = vst [vmem:[%s2247_s22 + $0x8c] sm:$0xf] %v1468_v54  ;;  %v1277_v51 = vmax.f32 %v976_v50, 0.0  ;;  %1014 = vmatmul.bf16.gmra.mxu1 %v804_v49  ;;  %1183 = vmatmul.bf16.gmra.mxu2 %v804_v49 }
 0x1c8   : > { %v653_v10 = vpop.f32.mrf.mxu0  ;;  %v1221_v52 = vpop.f32.mrf.mxu3 }
 0x1c9   : > { %v1341_v53 = vpack.c.bf16 %v1277_v51, %v1277_v51  ;;  %v1222_v56 = vadd.f32 %v1221_v52, %v2241_v20  ;;  %v654_v0 = vadd.f32 %v2395_v63, %v653_v10 }
 0x1ca   : > { %v1144_v57 = vpop.f32.mrf.mxu2 }
 0x1cb   : > { %1405 = vst [vmem:[%s2247_s22 + $0x90] sm:$0xf] %v1341_v53  ;;  %v1500_v58 = vpack.c.bf16 %v1222_v56, %v1222_v56  ;;  %v1145_v59 = vadd.f32 %v1144_v57, %v2241_v20  ;;  %v759_v11 = vmax.f32 %v654_v0, 0.0 }
 0x1cc   : > { %v977_v60 = vpop.f32.mrf.mxu1 }
 0x1cd   : > { %1564 = vst [vmem:[%s2247_s22 + $0x18c] sm:$0xf] %v1500_v58  ;;  %v1469_v61 = vpack.c.bf16 %v1145_v59, %v1145_v59  ;;  %v978_v62 = vadd.f32 %v977_v60, %v2237_v13 }
 0x1cf   : > { %1533 = vst [vmem:[%s2247_s22 + $0x94] sm:$0xf] %v1469_v61  ;;  %v1278_v1 = vmax.f32 %v978_v62, 0.0 }
 0x1d0   : > { %v655_v2 = vpop.f32.mrf.mxu0  ;;  %v1224_v3 = vpop.f32.mrf.mxu3 }
 0x1d1   : > { %v1342_v4 = vpack.c.bf16 %v1278_v1, %v1278_v1  ;;  %v656_v5 = vadd.f32 %v2395_v63, %v655_v2  ;;  %v1225_v8 = vadd.f32 %v1224_v3, %v2241_v20 }
 0x1d2   : > { %v1146_v9 = vpop.f32.mrf.mxu2 }
 0x1d3   : > { %1406 = vst [vmem:[%s2247_s22 + $0x98] sm:$0xf] %v1342_v4  ;;  %v760_v12 = vmax.f32 %v656_v5, 0.0  ;;  %v1501_v40 = vpack.c.bf16 %v1225_v8, %v1225_v8  ;;  %v1147_v14 = vadd.f32 %v1146_v9, %v2241_v20 }
 0x1d4   : > { %v980_v15 = vpop.f32.mrf.mxu1 }
 0x1d5   : > { %v805_v16 = vpack.c.bf16 %v760_v12, %v759_v11  ;;  %1565 = vst [vmem:[%s2247_s22 + $0x194] sm:$0xf] %v1501_v40  ;;  %v1470_v6 = vpack.c.bf16 %v1147_v14, %v1147_v14  ;;  %v981_v17 = vadd.f32 %v980_v15, %v2237_v13 }
 0x1d7   : > { %1534 = vst [vmem:[%s2247_s22 + $0x9c] sm:$0xf] %v1470_v6  ;;  %v1279_v7 = vmax.f32 %v981_v17, 0.0  ;;  %1019 = vmatmul.bf16.gmra.mxu1 %v805_v16  ;;  %1188 = vmatmul.bf16.gmra.mxu2 %v805_v16 }
 0x1d8   : > { %v658_v38 = vpop.f32.mrf.mxu0  ;;  %v1226_v18 = vpop.f32.mrf.mxu3 }
 0x1d9   : > { %v1343_v19 = vpack.c.bf16 %v1279_v7, %v1279_v7  ;;  %v1227_v21 = vadd.f32 %v1226_v18, %v2241_v20  ;;  %v659_v30 = vadd.f32 %v2395_v63, %v658_v38 }
 0x1da   : > { %v1149_v23 = vpop.f32.mrf.mxu2 }
 0x1db   : > { %1407 = vst [vmem:[%s2247_s22 + $0xa0] sm:$0xf] %v1343_v19  ;;  %v1502_v24 = vpack.c.bf16 %v1227_v21, %v1227_v21  ;;  %v1150_v26 = vadd.f32 %v1149_v23, %v2241_v20  ;;  %v761_v39 = vmax.f32 %v659_v30, 0.0 }
 0x1dc   : > { %v982_v27 = vpop.f32.mrf.mxu1 }
 0x1dd   : > { %1566 = vst [vmem:[%s2247_s22 + $0x19c] sm:$0xf] %v1502_v24  ;;  %v1471_v28 = vpack.c.bf16 %v1150_v26, %v1150_v26  ;;  %v983_v29 = vadd.f32 %v982_v27, %v2237_v13 }
 0x1df   : > { %1535 = vst [vmem:[%s2247_s22 + $0xa4] sm:$0xf] %v1471_v28  ;;  %v1280_v31 = vmax.f32 %v983_v29, 0.0 }
 0x1e0   : > { %v660_v32 = vpop.f32.mrf.mxu0  ;;  %v1229_v33 = vpop.f32.mrf.mxu3 }
 0x1e1   : > { %v1344_v34 = vpack.c.bf16 %v1280_v31, %v1280_v31  ;;  %v661_v35 = vadd.f32 %v2395_v63, %v660_v32  ;;  %v1230_v36 = vadd.f32 %v1229_v33, %v2241_v20 }
 0x1e2   : > { %v1151_v37 = vpop.f32.mrf.mxu2 }
 0x1e3   : > { %1408 = vst [vmem:[%s2247_s22 + $0xa8] sm:$0xf] %v1344_v34  ;;  %v762_v41 = vmax.f32 %v661_v35, 0.0  ;;  %v1503_v42 = vpack.c.bf16 %v1230_v36, %v1230_v36  ;;  %v1152_v43 = vadd.f32 %v1151_v37, %v2241_v20 }
 0x1e4   : > { %v985_v25 = vpop.f32.mrf.mxu1 }
 0x1e5   : > { %v806_v44 = vpack.c.bf16 %v762_v41, %v761_v39  ;;  %1567 = vst [vmem:[%s2247_s22 + $0x1a4] sm:$0xf] %v1503_v42  ;;  %v1472_v45 = vpack.c.bf16 %v1152_v43, %v1152_v43  ;;  %v986_v46 = vadd.f32 %v985_v25, %v2237_v13 }
 0x1e7   : > { %1536 = vst [vmem:[%s2247_s22 + $0xac] sm:$0xf] %v1472_v45  ;;  %v1281_v55 = vmax.f32 %v986_v46, 0.0  ;;  %1024 = vmatmul.bf16.gmra.mxu1 %v806_v44  ;;  %1193 = vmatmul.bf16.gmra.mxu2 %v806_v44 }
 0x1e8   : > { %v663_v47 = vpop.f32.mrf.mxu0  ;;  %v1231_v48 = vpop.f32.mrf.mxu3 }
 0x1e9   : > { %v1345_v22 = vpack.c.bf16 %v1281_v55, %v1281_v55  ;;  %v1232_v49 = vadd.f32 %v1231_v48, %v2241_v20  ;;  %v664_v56 = vadd.f32 %v2395_v63, %v663_v47 }
 0x1ea   : > { %v1154_v54 = vpop.f32.mrf.mxu2 }
 0x1eb   : > { %1409 = vst [vmem:[%s2247_s22 + $0xb0] sm:$0xf] %v1345_v22  ;;  %v1504_v50 = vpack.c.bf16 %v1232_v49, %v1232_v49  ;;  %v1155_v51 = vadd.f32 %v1154_v54, %v2241_v20  ;;  %v763_v1 = vmax.f32 %v664_v56, 0.0 }
 0x1ec   : > { %v987_v10 = vpop.f32.mrf.mxu1 }
 0x1ed   : > { %1568 = vst [vmem:[%s2247_s22 + $0x1ac] sm:$0xf] %v1504_v50  ;;  %v1473_v52 = vpack.c.bf16 %v1155_v51, %v1155_v51  ;;  %v988_v53 = vadd.f32 %v987_v10, %v2237_v13 }
 0x1ef   : > { %1537 = vst [vmem:[%s2247_s22 + $0xb4] sm:$0xf] %v1473_v52  ;;  %v1282_v57 = vmax.f32 %v988_v53, 0.0 }
 0x1f0   : > { %v665_v58 = vpop.f32.mrf.mxu0  ;;  %v1234_v59 = vpop.f32.mrf.mxu3 }
 0x1f1   : > { %v1346_v60 = vpack.c.bf16 %v1282_v57, %v1282_v57  ;;  %v666_v61 = vadd.f32 %v2395_v63, %v665_v58  ;;  %v1235_v62 = vadd.f32 %v1234_v59, %v2241_v20 }
 0x1f2   : > { %v1156_v0 = vpop.f32.mrf.mxu2 }
 0x1f3   : > { %1410 = vst [vmem:[%s2247_s22 + $0xb8] sm:$0xf] %v1346_v60  ;;  %v764_v2 = vmax.f32 %v666_v61, 0.0  ;;  %v1505_v3 = vpack.c.bf16 %v1235_v62, %v1235_v62  ;;  %v1157_v4 = vadd.f32 %v1156_v0, %v2241_v20 }
 0x1f4   : > { %v990_v5 = vpop.f32.mrf.mxu1 }
 0x1f5   : > { %v807_v8 = vpack.c.bf16 %v764_v2, %v763_v1  ;;  %1569 = vst [vmem:[%s2247_s22 + $0x1b4] sm:$0xf] %v1505_v3  ;;  %v1474_v9 = vpack.c.bf16 %v1157_v4, %v1157_v4  ;;  %v991_v11 = vadd.f32 %v990_v5, %v2237_v13 }
 0x1f7   : > { %1538 = vst [vmem:[%s2247_s22 + $0xbc] sm:$0xf] %v1474_v9  ;;  %v1283_v12 = vmax.f32 %v991_v11, 0.0  ;;  %1029 = vmatmul.bf16.gmra.mxu1 %v807_v8  ;;  %1198 = vmatmul.bf16.gmra.mxu2 %v807_v8 }
 0x1f8   : > { %v668_v40 = vpop.f32.mrf.mxu0  ;;  %v1236_v14 = vpop.f32.mrf.mxu3 }
 0x1f9   : > { %v1347_v15 = vpack.c.bf16 %v1283_v12, %v1283_v12  ;;  %v1237_v16 = vadd.f32 %v1236_v14, %v2241_v20  ;;  %v669_v21 = vadd.f32 %v2395_v63, %v668_v40 }
 0x1fa   : > { %v1159_v6 = vpop.f32.mrf.mxu2 }
 0x1fb   : > { %1411 = vst [vmem:[%s2247_s22 + $0xc0] sm:$0xf] %v1347_v15  ;;  %v1506_v17 = vpack.c.bf16 %v1237_v16, %v1237_v16  ;;  %v1160_v7 = vadd.f32 %v1159_v6, %v2241_v20  ;;  %v765_v31 = vmax.f32 %v669_v21, 0.0 }
 0x1fc   : > { %v992_v38 = vpop.f32.mrf.mxu1 }
 0x1fd   : > { %1570 = vst [vmem:[%s2247_s22 + $0x1bc] sm:$0xf] %v1506_v17  ;;  %v1475_v18 = vpack.c.bf16 %v1160_v7, %v1160_v7  ;;  %v993_v19 = vadd.f32 %v992_v38, %v2237_v13 }
 0x1ff   : > { %1539 = vst [vmem:[%s2247_s22 + $0xc4] sm:$0xf] %v1475_v18  ;;  %v1284_v23 = vmax.f32 %v993_v19, 0.0 }
 0x200   : > { %v670_v24 = vpop.f32.mrf.mxu0  ;;  %v1239_v26 = vpop.f32.mrf.mxu3 }
 0x201   : > { %v1348_v27 = vpack.c.bf16 %v1284_v23, %v1284_v23  ;;  %v671_v28 = vadd.f32 %v2395_v63, %v670_v24  ;;  %v1240_v29 = vadd.f32 %v1239_v26, %v2241_v20 }
 0x202   : > { %v1161_v30 = vpop.f32.mrf.mxu2 }
 0x203   : > { %1412 = vst [vmem:[%s2247_s22 + $0xc8] sm:$0xf] %v1348_v27  ;;  %v766_v32 = vmax.f32 %v671_v28, 0.0  ;;  %v1507_v33 = vpack.c.bf16 %v1240_v29, %v1240_v29  ;;  %v1162_v34 = vadd.f32 %v1161_v30, %v2241_v20 }
 0x204   : > { %v995_v35 = vpop.f32.mrf.mxu1 }
 0x205   : > { %v808_v36 = vpack.c.bf16 %v766_v32, %v765_v31  ;;  %1571 = vst [vmem:[%s2247_s22 + $0x1c4] sm:$0xf] %v1507_v33  ;;  %v1476_v37 = vpack.c.bf16 %v1162_v34, %v1162_v34  ;;  %v996_v39 = vadd.f32 %v995_v35, %v2237_v13 }
 0x207   : > { %1540 = vst [vmem:[%s2247_s22 + $0xcc] sm:$0xf] %v1476_v37  ;;  %v1285_v41 = vmax.f32 %v996_v39, 0.0  ;;  %1034 = vmatmul.bf16.gmra.mxu1 %v808_v36  ;;  %1203 = vmatmul.bf16.gmra.mxu2 %v808_v36 }
 0x208   : > { %v673_v42 = vpop.f32.mrf.mxu0  ;;  %v1241_v43 = vpop.f32.mrf.mxu3 }
 0x209   : > { %v1349_v25 = vpack.c.bf16 %v1285_v41, %v1285_v41  ;;  %v1242_v44 = vadd.f32 %v1241_v43, %v2241_v20  ;;  %v674_v49 = vadd.f32 %v2395_v63, %v673_v42 }
 0x20a   : > { %v1164_v45 = vpop.f32.mrf.mxu2 }
 0x20b   : > { %1413 = vst [vmem:[%s2247_s22 + $0xd0] sm:$0xf] %v1349_v25  ;;  %v1508_v46 = vpack.c.bf16 %v1242_v44, %v1242_v44  ;;  %v1165_v55 = vadd.f32 %v1164_v45, %v2241_v20  ;;  %v767_v57 = vmax.f32 %v674_v49, 0.0 }
 0x20c   : > { %v997_v47 = vpop.f32.mrf.mxu1 }
 0x20d   : > { %1572 = vst [vmem:[%s2247_s22 + $0x1cc] sm:$0xf] %v1508_v46  ;;  %v1477_v48 = vpack.c.bf16 %v1165_v55, %v1165_v55  ;;  %v998_v22 = vadd.f32 %v997_v47, %v2237_v13 }
 0x20f   : > { %1541 = vst [vmem:[%s2247_s22 + $0xd4] sm:$0xf] %v1477_v48  ;;  %v1286_v54 = vmax.f32 %v998_v22, 0.0 }
 0x210   : > { %v675_v50 = vpop.f32.mrf.mxu0  ;;  %v1244_v51 = vpop.f32.mrf.mxu3 }
 0x211   : > { %v1350_v10 = vpack.c.bf16 %v1286_v54, %v1286_v54  ;;  %v676_v52 = vadd.f32 %v2395_v63, %v675_v50  ;;  %v1245_v53 = vadd.f32 %v1244_v51, %v2241_v20 }
 0x212   : > { %v1166_v56 = vpop.f32.mrf.mxu2 }
 0x213   : > { %1414 = vst [vmem:[%s2247_s22 + $0xd8] sm:$0xf] %v1350_v10  ;;  %v768_v58 = vmax.f32 %v676_v52, 0.0  ;;  %v1509_v59 = vpack.c.bf16 %v1245_v53, %v1245_v53  ;;  %v1167_v60 = vadd.f32 %v1166_v56, %v2241_v20 }
 0x214   : > { %v1000_v61 = vpop.f32.mrf.mxu1 }
 0x215   : > { %v809_v62 = vpack.c.bf16 %v768_v58, %v767_v57  ;;  %1573 = vst [vmem:[%s2247_s22 + $0x1d4] sm:$0xf] %v1509_v59  ;;  %v1478_v0 = vpack.c.bf16 %v1167_v60, %v1167_v60  ;;  %v1001_v1 = vadd.f32 %v1000_v61, %v2237_v13 }
 0x217   : > { %1542 = vst [vmem:[%s2247_s22 + $0xdc] sm:$0xf] %v1478_v0  ;;  %v1287_v2 = vmax.f32 %v1001_v1, 0.0  ;;  %1039 = vmatmul.bf16.gmra.mxu1 %v809_v62  ;;  %1208 = vmatmul.bf16.gmra.mxu2 %v809_v62 }
 0x218   : > { %v678_v3 = vpop.f32.mrf.mxu0  ;;  %v1246_v4 = vpop.f32.mrf.mxu3 }
 0x219   : > { %v1351_v5 = vpack.c.bf16 %v1287_v2, %v1287_v2  ;;  %v1247_v8 = vadd.f32 %v1246_v4, %v2241_v20  ;;  %v679_v16 = vadd.f32 %v2395_v63, %v678_v3 }
 0x21a   : > { %v1169_v9 = vpop.f32.mrf.mxu2 }
 0x21b   : > { %1415 = vst [vmem:[%s2247_s22 + $0xe0] sm:$0xf] %v1351_v5  ;;  %v1510_v11 = vpack.c.bf16 %v1247_v8, %v1247_v8  ;;  %v1170_v12 = vadd.f32 %v1169_v9, %v2241_v20  ;;  %v769_v23 = vmax.f32 %v679_v16, 0.0 }
 0x21c   : > { %v1002_v40 = vpop.f32.mrf.mxu1 }
 0x21d   : > { %1574 = vst [vmem:[%s2247_s22 + $0x1dc] sm:$0xf] %v1510_v11  ;;  %v1479_v14 = vpack.c.bf16 %v1170_v12, %v1170_v12  ;;  %v1003_v15 = vadd.f32 %v1002_v40, %v2237_v13 }
 0x21f   : > { %1543 = vst [vmem:[%s2247_s22 + $0xe4] sm:$0xf] %v1479_v14  ;;  %v1288_v6 = vmax.f32 %v1003_v15, 0.0 }
 0x220   : > { %v680_v17 = vpop.f32.mrf.mxu0  ;;  %v1249_v7 = vpop.f32.mrf.mxu3 }
 0x221   : > { %v1352_v38 = vpack.c.bf16 %v1288_v6, %v1288_v6  ;;  %v681_v18 = vadd.f32 %v2395_v63, %v680_v17  ;;  %v1250_v19 = vadd.f32 %v1249_v7, %v2241_v20 }
 0x222   : > { %v1171_v21 = vpop.f32.mrf.mxu2 }
 0x223   : > { %1416 = vst [vmem:[%s2247_s22 + $0xe8] sm:$0xf] %v1352_v38  ;;  %v770_v24 = vmax.f32 %v681_v18, 0.0  ;;  %v1511_v26 = vpack.c.bf16 %v1250_v19, %v1250_v19  ;;  %v1172_v27 = vadd.f32 %v1171_v21, %v2241_v20 }
 0x224   : > { %v1005_v28 = vpop.f32.mrf.mxu1 }
 0x225   : > { %v810_v29 = vpack.c.bf16 %v770_v24, %v769_v23  ;;  %1575 = vst [vmem:[%s2247_s22 + $0x1e4] sm:$0xf] %v1511_v26  ;;  %v1480_v30 = vpack.c.bf16 %v1172_v27, %v1172_v27  ;;  %v1006_v31 = vadd.f32 %v1005_v28, %v2237_v13 }
 0x227   : > { %1544 = vst [vmem:[%s2247_s22 + $0xec] sm:$0xf] %v1480_v30  ;;  %v1289_v63 = vmax.f32 %v1006_v31, 0.0  ;;  %1044 = vmatmul.bf16.gmra.mxu1 %v810_v29  ;;  %1213 = vmatmul.bf16.gmra.mxu2 %v810_v29 }
 0x228   : > { %v1251_v32 = vpop.f32.mrf.mxu3 }
 0x229   : > { %v1353_v33 = vpack.c.bf16 %v1289_v63, %v1289_v63  ;;  %v1252_v34 = vadd.f32 %v1251_v32, %v2241_v20 }
 0x22a   : > { %v1174_v35 = vpop.f32.mrf.mxu2 }
 0x22b   : > { %1417 = vst [vmem:[%s2247_s22 + $0xf0] sm:$0xf] %v1353_v33  ;;  %v1512_v36 = vpack.c.bf16 %v1252_v34, %v1252_v34  ;;  %v1175_v37 = vadd.f32 %v1174_v35, %v2241_v20 }
 0x22c   : > { %v1007_v39 = vpop.f32.mrf.mxu1 }
 0x22d   : > { %1576 = vst [vmem:[%s2247_s22 + $0x1ec] sm:$0xf] %v1512_v36  ;;  %v1481_v41 = vpack.c.bf16 %v1175_v37, %v1175_v37  ;;  %v1008_v42 = vadd.f32 %v1007_v39, %v2237_v13 }
 0x22f   : > { %1545 = vst [vmem:[%s2247_s22 + $0xf4] sm:$0xf] %v1481_v41  ;;  %v1290_v43 = vmax.f32 %v1008_v42, 0.0 }
 0x230   : > { %v1254_v25 = vpop.f32.mrf.mxu3 }
 0x231   : > { %v1354_v44 = vpack.c.bf16 %v1290_v43, %v1290_v43  ;;  %v1255_v45 = vadd.f32 %v1254_v25, %v2241_v20 }
 0x232   : > { %v1176_v46 = vpop.f32.mrf.mxu2 }
 0x233   : > { %1418 = vst [vmem:[%s2247_s22 + $0xf8] sm:$0xf] %v1354_v44  ;;  %v1513_v55 = vpack.c.bf16 %v1255_v45, %v1255_v45  ;;  %v1177_v47 = vadd.f32 %v1176_v46, %v2241_v20 }
 0x234   : > { %v1010_v48 = vpop.f32.mrf.mxu1 }
 0x235   : > { %1577 = vst [vmem:[%s2247_s22 + $0x1f4] sm:$0xf] %v1513_v55  ;;  %v1482_v22 = vpack.c.bf16 %v1177_v47, %v1177_v47  ;;  %v1011_v49 = vadd.f32 %v1010_v48, %v2237_v13 }
 0x237   : > { %1546 = vst [vmem:[%s2247_s22 + $0xfc] sm:$0xf] %v1482_v22  ;;  %v1291_v54 = vmax.f32 %v1011_v49, 0.0 }
 0x238   : > { %v1256_v50 = vpop.f32.mrf.mxu3 }
 0x239   : > { %v1355_v51 = vpack.c.bf16 %v1291_v54, %v1291_v54  ;;  %v1257_v10 = vadd.f32 %v1256_v50, %v2241_v20 }
 0x23a   : > { %v1179_v52 = vpop.f32.mrf.mxu2 }
 0x23b   : > { %1419 = vst [vmem:[%s2247_s22 + $0x100] sm:$0xf] %v1355_v51  ;;  %v1514_v53 = vpack.c.bf16 %v1257_v10, %v1257_v10  ;;  %v1180_v56 = vadd.f32 %v1179_v52, %v2241_v20 }
 0x23c   : > { %v1012_v57 = vpop.f32.mrf.mxu1 }
 0x23d   : > { %1578 = vst [vmem:[%s2247_s22 + $0x1fc] sm:$0xf] %v1514_v53  ;;  %v1483_v58 = vpack.c.bf16 %v1180_v56, %v1180_v56  ;;  %v1013_v59 = vadd.f32 %v1012_v57, %v2237_v13 }
 0x23f   : > { %1547 = vst [vmem:[%s2247_s22 + $0x104] sm:$0xf] %v1483_v58  ;;  %v1292_v60 = vmax.f32 %v1013_v59, 0.0 }
 0x241   : > { %v1356_v61 = vpack.c.bf16 %v1292_v60, %v1292_v60 }
 0x242   : > { %v1181_v62 = vpop.f32.mrf.mxu2 }
 0x243   : > { %1420 = vst [vmem:[%s2247_s22 + $0x108] sm:$0xf] %v1356_v61  ;;  %v1182_v0 = vadd.f32 %v1181_v62, %v2241_v20 }
 0x244   : > { %v1015_v1 = vpop.f32.mrf.mxu1 }
 0x245   : > { %v1484_v2 = vpack.c.bf16 %v1182_v0, %v1182_v0  ;;  %v1016_v3 = vadd.f32 %v1015_v1, %v2237_v13 }
 0x247   : > { %1548 = vst [vmem:[%s2247_s22 + $0x10c] sm:$0xf] %v1484_v2  ;;  %v1293_v4 = vmax.f32 %v1016_v3, 0.0 }
 0x249   : > { %v1357_v5 = vpack.c.bf16 %v1293_v4, %v1293_v4 }
 0x24a   : > { %v1184_v8 = vpop.f32.mrf.mxu2 }
 0x24b   : > { %1421 = vst [vmem:[%s2247_s22 + $0x110] sm:$0xf] %v1357_v5  ;;  %v1185_v9 = vadd.f32 %v1184_v8, %v2241_v20 }
 0x24c   : > { %v1017_v11 = vpop.f32.mrf.mxu1 }
 0x24d   : > { %v1485_v12 = vpack.c.bf16 %v1185_v9, %v1185_v9  ;;  %v1018_v40 = vadd.f32 %v1017_v11, %v2237_v13 }
 0x24f   : > { %1549 = vst [vmem:[%s2247_s22 + $0x114] sm:$0xf] %v1485_v12  ;;  %v1294_v14 = vmax.f32 %v1018_v40, 0.0 }
 0x251   : > { %v1358_v15 = vpack.c.bf16 %v1294_v14, %v1294_v14 }
 0x252   : > { %v1186_v16 = vpop.f32.mrf.mxu2 }
 0x253   : > { %1422 = vst [vmem:[%s2247_s22 + $0x118] sm:$0xf] %v1358_v15  ;;  %v1187_v6 = vadd.f32 %v1186_v16, %v2241_v20 }
 0x254   : > { %v1020_v17 = vpop.f32.mrf.mxu1 }
 0x255   : > { %v1486_v7 = vpack.c.bf16 %v1187_v6, %v1187_v6  ;;  %v1021_v38 = vadd.f32 %v1020_v17, %v2237_v13 }
 0x257   : > { %1550 = vst [vmem:[%s2247_s22 + $0x11c] sm:$0xf] %v1486_v7  ;;  %v1295_v18 = vmax.f32 %v1021_v38, 0.0 }
 0x259   : > { %v1359_v19 = vpack.c.bf16 %v1295_v18, %v1295_v18 }
 0x25a   : > { %v1189_v21 = vpop.f32.mrf.mxu2 }
 0x25b   : > { %1423 = vst [vmem:[%s2247_s22 + $0x120] sm:$0xf] %v1359_v19  ;;  %v1190_v23 = vadd.f32 %v1189_v21, %v2241_v20 }
 0x25c   : > { %v1022_v24 = vpop.f32.mrf.mxu1 }
 0x25d   : > { %v1487_v26 = vpack.c.bf16 %v1190_v23, %v1190_v23  ;;  %v1023_v27 = vadd.f32 %v1022_v24, %v2237_v13 }
 0x25f   : > { %1551 = vst [vmem:[%s2247_s22 + $0x124] sm:$0xf] %v1487_v26  ;;  %v1296_v28 = vmax.f32 %v1023_v27, 0.0 }
 0x261   : > { %v1360_v29 = vpack.c.bf16 %v1296_v28, %v1296_v28 }
 0x262   : > { %v1191_v30 = vpop.f32.mrf.mxu2 }
 0x263   : > { %1424 = vst [vmem:[%s2247_s22 + $0x128] sm:$0xf] %v1360_v29  ;;  %v1192_v31 = vadd.f32 %v1191_v30, %v2241_v20 }
 0x264   : > { %v1025_v63 = vpop.f32.mrf.mxu1 }
 0x265   : > { %v1488_v32 = vpack.c.bf16 %v1192_v31, %v1192_v31  ;;  %v1026_v33 = vadd.f32 %v1025_v63, %v2237_v13 }
 0x267   : > { %1552 = vst [vmem:[%s2247_s22 + $0x12c] sm:$0xf] %v1488_v32  ;;  %v1297_v34 = vmax.f32 %v1026_v33, 0.0 }
 0x269   : > { %v1361_v35 = vpack.c.bf16 %v1297_v34, %v1297_v34 }
 0x26a   : > { %v1194_v36 = vpop.f32.mrf.mxu2 }
 0x26b   : > { %1425 = vst [vmem:[%s2247_s22 + $0x130] sm:$0xf] %v1361_v35  ;;  %v1195_v37 = vadd.f32 %v1194_v36, %v2241_v20 }
 0x26c   : > { %v1027_v39 = vpop.f32.mrf.mxu1 }
 0x26d   : > { %v1489_v41 = vpack.c.bf16 %v1195_v37, %v1195_v37  ;;  %v1028_v42 = vadd.f32 %v1027_v39, %v2237_v13 }
 0x26f   : > { %1553 = vst [vmem:[%s2247_s22 + $0x134] sm:$0xf] %v1489_v41  ;;  %v1298_v43 = vmax.f32 %v1028_v42, 0.0 }
 0x271   : > { %v1362_v25 = vpack.c.bf16 %v1298_v43, %v1298_v43 }
 0x272   : > { %v1196_v44 = vpop.f32.mrf.mxu2 }
 0x273   : > { %1426 = vst [vmem:[%s2247_s22 + $0x138] sm:$0xf] %v1362_v25  ;;  %v1197_v45 = vadd.f32 %v1196_v44, %v2241_v20 }
 0x274   : > { %v1030_v46 = vpop.f32.mrf.mxu1 }
 0x275   : > { %v1490_v55 = vpack.c.bf16 %v1197_v45, %v1197_v45  ;;  %v1031_v47 = vadd.f32 %v1030_v46, %v2237_v13 }
 0x277   : > { %1554 = vst [vmem:[%s2247_s22 + $0x13c] sm:$0xf] %v1490_v55  ;;  %v1299_v48 = vmax.f32 %v1031_v47, 0.0 }
 0x279   : > { %v1363_v22 = vpack.c.bf16 %v1299_v48, %v1299_v48 }
 0x27a   : > { %v1199_v49 = vpop.f32.mrf.mxu2 }
 0x27b   : > { %1427 = vst [vmem:[%s2247_s22 + $0x140] sm:$0xf] %v1363_v22  ;;  %v1200_v54 = vadd.f32 %v1199_v49, %v2241_v20 }
 0x27c   : > { %v1032_v50 = vpop.f32.mrf.mxu1 }
 0x27d   : > { %v1491_v51 = vpack.c.bf16 %v1200_v54, %v1200_v54  ;;  %v1033_v10 = vadd.f32 %v1032_v50, %v2237_v13 }
 0x27f   : > { %1555 = vst [vmem:[%s2247_s22 + $0x144] sm:$0xf] %v1491_v51  ;;  %v1300_v52 = vmax.f32 %v1033_v10, 0.0 }
 0x281   : > { %v1364_v53 = vpack.c.bf16 %v1300_v52, %v1300_v52 }
 0x282   : > { %v1201_v56 = vpop.f32.mrf.mxu2 }
 0x283   : > { %1428 = vst [vmem:[%s2247_s22 + $0x148] sm:$0xf] %v1364_v53  ;;  %v1202_v57 = vadd.f32 %v1201_v56, %v2241_v20 }
 0x284   : > { %v1035_v58 = vpop.f32.mrf.mxu1 }
 0x285   : > { %v1492_v59 = vpack.c.bf16 %v1202_v57, %v1202_v57  ;;  %v1036_v60 = vadd.f32 %v1035_v58, %v2237_v13 }
 0x287   : > { %1556 = vst [vmem:[%s2247_s22 + $0x14c] sm:$0xf] %v1492_v59  ;;  %v1301_v61 = vmax.f32 %v1036_v60, 0.0 }
 0x289   : > { %v1365_v62 = vpack.c.bf16 %v1301_v61, %v1301_v61 }
 0x28a   : > { %v1204_v0 = vpop.f32.mrf.mxu2 }
 0x28b   : > { %1429 = vst [vmem:[%s2247_s22 + $0x150] sm:$0xf] %v1365_v62  ;;  %v1205_v1 = vadd.f32 %v1204_v0, %v2241_v20 }
 0x28c   : > { %v1037_v2 = vpop.f32.mrf.mxu1 }
 0x28d   : > { %v1493_v3 = vpack.c.bf16 %v1205_v1, %v1205_v1  ;;  %v1038_v4 = vadd.f32 %v1037_v2, %v2237_v13 }
 0x28f   : > { %1557 = vst [vmem:[%s2247_s22 + $0x154] sm:$0xf] %v1493_v3  ;;  %v1302_v5 = vmax.f32 %v1038_v4, 0.0 }
 0x291   : > { %v1366_v8 = vpack.c.bf16 %v1302_v5, %v1302_v5 }
 0x292   : > { %v1206_v9 = vpop.f32.mrf.mxu2 }
 0x293   : > { %1430 = vst [vmem:[%s2247_s22 + $0x158] sm:$0xf] %v1366_v8  ;;  %v1207_v11 = vadd.f32 %v1206_v9, %v2241_v20 }
 0x294   : > { %v1040_v12 = vpop.f32.mrf.mxu1 }
 0x295   : > { %v1494_v40 = vpack.c.bf16 %v1207_v11, %v1207_v11  ;;  %v1041_v14 = vadd.f32 %v1040_v12, %v2237_v13 }
 0x297   : > { %1558 = vst [vmem:[%s2247_s22 + $0x15c] sm:$0xf] %v1494_v40  ;;  %v1303_v15 = vmax.f32 %v1041_v14, 0.0 }
 0x299   : > { %v1367_v16 = vpack.c.bf16 %v1303_v15, %v1303_v15 }
 0x29a   : > { %v1209_v6 = vpop.f32.mrf.mxu2 }
 0x29b   : > { %1431 = vst [vmem:[%s2247_s22 + $0x160] sm:$0xf] %v1367_v16  ;;  %v1210_v17 = vadd.f32 %v1209_v6, %v2241_v20 }
 0x29c   : > { %v1042_v7 = vpop.f32.mrf.mxu1 }
 0x29d   : > { %v1495_v38 = vpack.c.bf16 %v1210_v17, %v1210_v17  ;;  %v1043_v18 = vadd.f32 %v1042_v7, %v2237_v13 }
 0x29f   : > { %1559 = vst [vmem:[%s2247_s22 + $0x164] sm:$0xf] %v1495_v38  ;;  %v1304_v19 = vmax.f32 %v1043_v18, 0.0 }
 0x2a1   : > { %v1368_v21 = vpack.c.bf16 %v1304_v19, %v1304_v19 }
 0x2a2   : > { %v1211_v23 = vpop.f32.mrf.mxu2 }
 0x2a3   : > { %1432 = vst [vmem:[%s2247_s22 + $0x168] sm:$0xf] %v1368_v21  ;;  %v1212_v24 = vadd.f32 %v1211_v23, %v2241_v20 }
 0x2a4   : > { %v1045_v26 = vpop.f32.mrf.mxu1 }
 0x2a5   : > { %v1496_v27 = vpack.c.bf16 %v1212_v24, %v1212_v24  ;;  %v1046_v28 = vadd.f32 %v1045_v26, %v2237_v13 }
 0x2a7   : > { %1560 = vst [vmem:[%s2247_s22 + $0x16c] sm:$0xf] %v1496_v27  ;;  %v1305_v29 = vmax.f32 %v1046_v28, 0.0 }
 0x2a9   : > { %v1369_v30 = vpack.c.bf16 %v1305_v29, %v1305_v29 }
 0x2aa   : > { %v1214_v31 = vpop.f32.mrf.mxu2 }
 0x2ab   : > { %1433 = vst [vmem:[%s2247_s22 + $0x170] sm:$0xf] %v1369_v30  ;;  %v1215_v63 = vadd.f32 %v1214_v31, %v2241_v20 }
 0x2ac   : > { %v1047_v32 = vpop.f32.mrf.mxu1 }
 0x2ad   : > { %v1497_v33 = vpack.c.bf16 %v1215_v63, %v1215_v63  ;;  %v1048_v34 = vadd.f32 %v1047_v32, %v2237_v13 }
 0x2af   : > { %1561 = vst [vmem:[%s2247_s22 + $0x174] sm:$0xf] %v1497_v33  ;;  %v1306_v35 = vmax.f32 %v1048_v34, 0.0 }
 0x2b1   : > { %v1370_v36 = vpack.c.bf16 %v1306_v35, %v1306_v35 }
 0x2b2   : > { %v1216_v37 = vpop.f32.mrf.mxu2 }
 0x2b3   : > { %1434 = vst [vmem:[%s2247_s22 + $0x178] sm:$0xf] %v1370_v36  ;;  %v1217_v39 = vadd.f32 %v1216_v37, %v2241_v20 }
 0x2b5   : > { %v1498_v41 = vpack.c.bf16 %v1217_v39, %v1217_v39 }
 0x2b7   : > { %1562 = vst [vmem:[%s2247_s22 + $0x17c] sm:$0xf] %v1498_v41 }
 0x2b8 PF: > { %s15_s18 = sadd.s32 1, %s1970_s18  }
 0x2b9   : > { %p12_p4 = scmp.ge.s32.totalorder %s15_s18, 6  }
 0x2bb   :  { %14 = sbr.rel (!%p12_p4) target bundleno = 1 (0x1), region = 70 }

// kernel: _lambda_.6
= control target key start
LH: loop header
LB: loop body
LE: loop exit
PB: predicated region body
PF: predicated region fallthrough
CT: control target
= control target key end

     0   :  { %s4831_s27 = smov 0   ;;  %s5971_s0 = inlined_call_operand.vmem [shape: bf16[512,1152], index: 0, kind: input, shape index: {}]   ;;  %s5972_s1 = inlined_call_operand.vmem [shape: bf16[512,128], index: 1, kind: input, shape index: {}]   ;;  %s5973_s2 = inlined_call_operand.vmem [shape: bf16[1152,128], index: 2, kind: input, shape index: {}]   ;;  %s5974_s3 = inlined_call_operand.vmem [shape: f32[1,128], index: 3, kind: input, shape index: {}]   ;;  %s5975_s4 = inlined_call_operand.vmem [shape: bf16[128,128], index: 4, kind: input, shape index: {}]   ;;  %s5976_s5 = inlined_call_operand.vmem [shape: f32[1,128], index: 5, kind: input, shape index: {}]   ;;  %s5977_s6 = inlined_call_operand.vmem [shape: bf16[128,256], index: 6, kind: input, shape index: {}]   ;;  %s5978_s7 = inlined_call_operand.vmem [shape: f32[1,256], index: 7, kind: input, shape index: {}]   ;;  %s5979_s8 = inlined_call_operand.vmem [shape: bf16[512,256], index: 8, kind: output, shape index: {}]  }
   0x1 LB: > { %s3472_s28 = sadd.s32 4294967295, %s4784_s27   ;;  %p3476_p0 = scmp.ge.s32.totalorder %s4784_s27, 1  ;;  %s4784_s27 = sphi %s4831_s27, %s18_s27  }
   0x2   : > { %p275_p1 = scmp.lt.s32.totalorder %s4784_s27, 3 }
   0x4   : > { %p276_p2 = pnand %p3476_p0, %p275_p1 }
   0x5   : > { %s3477_s11 = sshll.u32 (!%p276_p2), %s3472_s28, 5 }
   0x6   : > { %279 = sbr.rel (%p276_p2) target bundleno = 1224 (0x4c8), region = 52  ;;  %p317_p3 = scmp.lt.s32.totalorder (!%p276_p2), %s3477_s11, 63 }
   0xb   : > { %v4598_v0 = vld [vmem:[%s5973_s2 + $0x38] sm:$0xff]  ;;  %v4597_v4 = vld [vmem:[%s5973_s2 + $0x30] sm:$0xff]  ;;  %v4596_v8 = vld [vmem:[%s5973_s2 + $0x28] sm:$0xff]  ;;  %s5981_s11 = smov (!%p317_p3, %s3477_s11), 63 }
   0xc   : > { %v4614_v1 = vld [vmem:[%s5973_s2 + $0xb8] sm:$0xff]  ;;  %1812 = vmatpush.bf16.msra.mxu0 %v4598_v0  ;;  %v4613_v5 = vld [vmem:[%s5973_s2 + $0xb0] sm:$0xff]  ;;  %v4612_v9 = vld [vmem:[%s5973_s2 + $0xa8] sm:$0xff]  ;;  %s4766_s12 = smul.u32 36, %s5981_s11  ;;  %s4446_s16 = sshll.u32 %s5981_s11, 3 }
   0xd   : > { %v4606_v2 = vld [vmem:[%s5973_s2 + $0x78] sm:$0xff]  ;;  %1990 = vmatpush.bf16.msra.mxu2 %v4614_v1  ;;  %v4605_v6 = vld [vmem:[%s5973_s2 + $0x70] sm:$0xff]  ;;  %v4604_v10 = vld [vmem:[%s5973_s2 + $0x68] sm:$0xff]  ;;  %s5821_s19 = scalar_lea.vmem %s5979_s8, %s4446_s16 }
   0xe   : > { %v4622_v3 = vld [vmem:[%s5973_s2 + $0xf8] sm:$0xff]  ;;  %1901 = vmatpush.bf16.msra.mxu1 %v4606_v2  ;;  %v4621_v7 = vld [vmem:[%s5973_s2 + $0xf0] sm:$0xff]  ;;  %v4620_v11 = vld [vmem:[%s5973_s2 + $0xe8] sm:$0xff]  ;;  %s4923_s22 = scalar_lea.vmem %s5971_s0, %s4766_s12 }
   0xf   : > { %2079 = vmatpush.bf16.msra.mxu3 %v4622_v3  ;;  %v4595_v12 = vld [vmem:[%s5973_s2 + $0x20] sm:$0xff]  ;;  %v4594_v16 = vld [vmem:[%s5973_s2 + $0x18] sm:$0xff]  ;;  %v4593_v20 = vld [vmem:[%s5973_s2 + $0x10] sm:$0xff] }
  0x10   : > { %1813 = vmatpush.bf16.msra.mxu0 %v4597_v4  ;;  %v4611_v13 = vld [vmem:[%s5973_s2 + $0xa0] sm:$0xff]  ;;  %v4610_v17 = vld [vmem:[%s5973_s2 + $0x98] sm:$0xff]  ;;  %v4609_v21 = vld [vmem:[%s5973_s2 + $0x90] sm:$0xff] }
  0x11   : > { %1991 = vmatpush.bf16.msra.mxu2 %v4613_v5  ;;  %v4603_v14 = vld [vmem:[%s5973_s2 + $0x60] sm:$0xff]  ;;  %v4602_v18 = vld [vmem:[%s5973_s2 + $0x58] sm:$0xff]  ;;  %v4601_v22 = vld [vmem:[%s5973_s2 + $0x50] sm:$0xff] }
  0x12   : > { %1902 = vmatpush.bf16.msra.mxu1 %v4605_v6  ;;  %v4619_v15 = vld [vmem:[%s5973_s2 + $0xe0] sm:$0xff]  ;;  %v4618_v19 = vld [vmem:[%s5973_s2 + $0xd8] sm:$0xff]  ;;  %v4617_v23 = vld [vmem:[%s5973_s2 + $0xd0] sm:$0xff] }
  0x13   : > { %2080 = vmatpush.bf16.msra.mxu3 %v4621_v7  ;;  %v4592_v24 = vld [vmem:[%s5973_s2 + $0x8] sm:$0xff]  ;;  %v4591_v28 = vld [vmem:[%s5973_s2] sm:$0xff]  ;;  %v3496_v39 = vld [vmem:[%s4923_s22 + $0x2c] sm:$0xf0] }
  0x14   : > { %1814 = vmatpush.bf16.msra.mxu0 %v4596_v8  ;;  %v4608_v25 = vld [vmem:[%s5973_s2 + $0x88] sm:$0xff]  ;;  %v4607_v29 = vld [vmem:[%s5973_s2 + $0x80] sm:$0xff]  ;;  %v4630_v40 = vld [vmem:[%s5973_s2 + $0x138] sm:$0xff] }
  0x15   : > { %1992 = vmatpush.bf16.msra.mxu2 %v4612_v9  ;;  %v4600_v26 = vld [vmem:[%s5973_s2 + $0x48] sm:$0xff]  ;;  %v4599_v30 = vld [vmem:[%s5973_s2 + $0x40] sm:$0xff]  ;;  %v4629_v45 = vld [vmem:[%s5973_s2 + $0x130] sm:$0xff] }
  0x16   : > { %1903 = vmatpush.bf16.msra.mxu1 %v4604_v10  ;;  %v4616_v27 = vld [vmem:[%s5973_s2 + $0xc8] sm:$0xff]  ;;  %v4615_v31 = vld [vmem:[%s5973_s2 + $0xc0] sm:$0xff]  ;;  %v3530_v48 = vld [vmem:[%s4923_s22 + $0x50] sm:$0xf] }
  0x17   : > { %2081 = vmatpush.bf16.msra.mxu3 %v4620_v11  ;;  %v3486_v32 = vld [vmem:[%s4923_s22] sm:$0xf]  ;;  %v4451_v33 = vld [vmem:[%s4923_s22 + $0x20] sm:$0xf0]  ;;  %v3494_v34 = vld [vmem:[%s4923_s22 + $0x8] sm:$0xf] }
  0x18   : > { %1815 = vmatpush.bf16.msra.mxu0 %v4595_v12  ;;  %v4452_v35 = vld [vmem:[%s4923_s22 + $0x28] sm:$0xf0]  ;;  %v4447_v36 = vld [vmem:[%s4923_s22 + $0x4] sm:$0xf]  ;;  %v3488_v37 = vld [vmem:[%s4923_s22 + $0x24] sm:$0xf0]  ;;  %v3487_v41 = vor.u32 %v4451_v33, %v3486_v32 }
  0x19   : > { %1993 = vmatpush.bf16.msra.mxu2 %v4611_v13  ;;  %v4448_v38 = vld [vmem:[%s4923_s22 + $0xc] sm:$0xf]  ;;  %v3495_v42 = vor.u32 %v4452_v35, %v3494_v34  ;;  %v3491_v43 = vor.u32 %v4447_v36, %v3488_v37  ;;  %v3522_v46 = vld [vmem:[%s4923_s22 + $0x48] sm:$0xf]  ;;  %v4461_v49 = vld [vmem:[%s4923_s22 + $0x70] sm:$0xf0] }
  0x1a   : > { %1904 = vmatpush.bf16.msra.mxu1 %v4603_v14  ;;  %v3499_v44 = vor.u32 %v4448_v38, %v3496_v39  ;;  %v4460_v47 = vld [vmem:[%s4923_s22 + $0x68] sm:$0xf0]  ;;  %v3524_v51 = vld [vmem:[%s4923_s22 + $0x6c] sm:$0xf0]  ;;  %v4457_v52 = vld [vmem:[%s4923_s22 + $0x54] sm:$0xf]  ;;  %v3531_v55 = vor.u32 %v4461_v49, %v3530_v48 }
  0x1b   : > { %2082 = vmatpush.bf16.msra.mxu3 %v4619_v15  ;;  %v4456_v50 = vld [vmem:[%s4923_s22 + $0x4c] sm:$0xf]  ;;  %v3532_v53 = vld [vmem:[%s4923_s22 + $0x74] sm:$0xf0]  ;;  %v3523_v54 = vor.u32 %v4460_v47, %v3522_v46  ;;  %v3558_v58 = vld [vmem:[%s4923_s22 + $0x90] sm:$0xf] }
  0x1c   : > { %1816 = vmatpush.bf16.msra.mxu0 %v4594_v16  ;;  %v3527_v56 = vor.u32 %v4456_v50, %v3524_v51  ;;  %v3535_v57 = vor.u32 %v4457_v52, %v3532_v53  ;;  %v4469_v59 = vld [vmem:[%s4923_s22 + $0xb0] sm:$0xf0]  ;;  %v3566_v60 = vld [vmem:[%s4923_s22 + $0x98] sm:$0xf]  ;;  %v4470_v61 = vld [vmem:[%s4923_s22 + $0xb8] sm:$0xf0] }
  0x1d   : > { %1994 = vmatpush.bf16.msra.mxu2 %v4610_v17  ;;  %v4465_v62 = vld [vmem:[%s4923_s22 + $0x94] sm:$0xf]  ;;  %v3560_v63 = vld [vmem:[%s4923_s22 + $0xb4] sm:$0xf0]  ;;  %v4466_v0 = vld [vmem:[%s4923_s22 + $0x9c] sm:$0xf]  ;;  %v3559_v2 = vor.u32 %v4469_v59, %v3558_v58  ;;  %v3567_v3 = vor.u32 %v4470_v61, %v3566_v60 }
  0x1e   : > { %1905 = vmatpush.bf16.msra.mxu1 %v4602_v18  ;;  %v3568_v1 = vld [vmem:[%s4923_s22 + $0xbc] sm:$0xf0]  ;;  %v3563_v4 = vor.u32 %v4465_v62, %v3560_v63  ;;  %v4628_v6 = vld [vmem:[%s5973_s2 + $0x128] sm:$0xff]  ;;  %v3594_v7 = vld [vmem:[%s4923_s22 + $0xd8] sm:$0xf] }
  0x1f   : > { %2083 = vmatpush.bf16.msra.mxu3 %v4618_v19  ;;  %v3571_v5 = vor.u32 %v4466_v0, %v3568_v1  ;;  %v4478_v8 = vld [vmem:[%s4923_s22 + $0xf8] sm:$0xf0]  ;;  %v3602_v9 = vld [vmem:[%s4923_s22 + $0xe0] sm:$0xf]  ;;  %v4479_v10 = vld [vmem:[%s4923_s22 + $0x100] sm:$0xf0] }
  0x20   : > { %1817 = vmatpush.bf16.msra.mxu0 %v4593_v20  ;;  %v4474_v11 = vld [vmem:[%s4923_s22 + $0xdc] sm:$0xf]  ;;  %v3596_v12 = vld [vmem:[%s4923_s22 + $0xfc] sm:$0xf0]  ;;  %v4475_v13 = vld [vmem:[%s4923_s22 + $0xe4] sm:$0xf]  ;;  %v3595_v15 = vor.u32 %v4478_v8, %v3594_v7  ;;  %v3603_v16 = vor.u32 %v4479_v10, %v3602_v9 }
  0x21   : > { %1995 = vmatpush.bf16.msra.mxu2 %v4609_v21  ;;  %v3604_v14 = vld [vmem:[%s4923_s22 + $0x104] sm:$0xf0]  ;;  %v3599_v17 = vor.u32 %v4474_v11, %v3596_v12  ;;  %v3630_v19 = vld [vmem:[%s4923_s22 + $0x120] sm:$0xf]  ;;  %v4487_v20 = vld [vmem:[%s4923_s22 + $0x140] sm:$0xf0] }
  0x22   : > { %1906 = vmatpush.bf16.msra.mxu1 %v4601_v22  ;;  %v3607_v18 = vor.u32 %v4475_v13, %v3604_v14  ;;  %v3638_v21 = vld [vmem:[%s4923_s22 + $0x128] sm:$0xf]  ;;  %v4488_v22 = vld [vmem:[%s4923_s22 + $0x148] sm:$0xf0]  ;;  %v3674_v34 = vld [vmem:[%s4923_s22 + $0x170] sm:$0xf] }
  0x23   : > { %2084 = vmatpush.bf16.msra.mxu3 %v4617_v23  ;;  %v4483_v23 = vld [vmem:[%s4923_s22 + $0x124] sm:$0xf]  ;;  %v3666_v32 = vld [vmem:[%s4923_s22 + $0x168] sm:$0xf]  ;;  %v4496_v33 = vld [vmem:[%s4923_s22 + $0x188] sm:$0xf0] }
  0x24   : > { %1818 = vmatpush.bf16.msra.mxu0 %v4592_v24  ;;  %v3632_v24 = vld [vmem:[%s4923_s22 + $0x144] sm:$0xf0]  ;;  %v4497_v35 = vld [vmem:[%s4923_s22 + $0x190] sm:$0xf0]  ;;  %v4492_v36 = vld [vmem:[%s4923_s22 + $0x16c] sm:$0xf] }
  0x25   : > { %1996 = vmatpush.bf16.msra.mxu2 %v4608_v25  ;;  %v4484_v25 = vld [vmem:[%s4923_s22 + $0x12c] sm:$0xf]  ;;  %v3668_v37 = vld [vmem:[%s4923_s22 + $0x18c] sm:$0xf0]  ;;  %v4493_v38 = vld [vmem:[%s4923_s22 + $0x174] sm:$0xf] }
  0x26   : > { %1907 = vmatpush.bf16.msra.mxu1 %v4600_v26  ;;  %v3640_v26 = vld [vmem:[%s4923_s22 + $0x14c] sm:$0xf0]  ;;  %v3676_v39 = vld [vmem:[%s4923_s22 + $0x194] sm:$0xf0]  ;;  %v4506_v47 = vld [vmem:[%s4923_s22 + $0x1d8] sm:$0xf0] }
  0x27   : > { %2085 = vmatpush.bf16.msra.mxu3 %v4616_v27  ;;  %v3631_v27 = vor.u32 %v4487_v20, %v3630_v19  ;;  %v3710_v46 = vld [vmem:[%s4923_s22 + $0x1b8] sm:$0xf]  ;;  %v4501_v48 = vld [vmem:[%s4923_s22 + $0x1b4] sm:$0xf]  ;;  %v4502_v50 = vld [vmem:[%s4923_s22 + $0x1bc] sm:$0xf] }
  0x28   : > { %1819 = vmatpush.bf16.msra.mxu0 %v4591_v28  ;;  %v3639_v28 = vor.u32 %v4488_v22, %v3638_v21  ;;  %v3704_v49 = vld [vmem:[%s4923_s22 + $0x1d4] sm:$0xf0]  ;;  %v3712_v51 = vld [vmem:[%s4923_s22 + $0x1dc] sm:$0xf0]  ;;  %v3711_v53 = vor.u32 %v4506_v47, %v3710_v46  ;;  %v4514_v58 = vld [vmem:[%s4923_s22 + $0x218] sm:$0xf0] }
  0x29   : > { %1997 = vmatpush.bf16.msra.mxu2 %v4607_v29  ;;  %v3635_v29 = vor.u32 %v4483_v23, %v3632_v24  ;;  %v3746_v59 = vld [vmem:[%s4923_s22 + $0x200] sm:$0xf]  ;;  %v4515_v60 = vld [vmem:[%s4923_s22 + $0x220] sm:$0xf0]  ;;  %v4510_v61 = vld [vmem:[%s4923_s22 + $0x1fc] sm:$0xf] }
  0x2a   : > { %1908 = vmatpush.bf16.msra.mxu1 %v4599_v30  ;;  %v3643_v30 = vor.u32 %v4484_v25, %v3640_v26  ;;  %v3740_v62 = vld [vmem:[%s4923_s22 + $0x21c] sm:$0xf0]  ;;  %v4511_v63 = vld [vmem:[%s4923_s22 + $0x204] sm:$0xf]  ;;  %v3748_v0 = vld [vmem:[%s4923_s22 + $0x224] sm:$0xf0] }
  0x2b   : > { %2086 = vmatpush.bf16.msra.mxu3 %v4615_v31  ;;  %1820 = vmatmul.bf16.vlgmr.msra.gmra.mxu0 %v3487_v41  ;;  %v4627_v31 = vld [vmem:[%s5973_s2 + $0x120] sm:$0xff]  ;;  %v3675_v41 = vor.u32 %v4497_v35, %v3674_v34  ;;  %v3782_v9 = vld [vmem:[%s4923_s22 + $0x248] sm:$0xf]  ;;  %v4524_v10 = vld [vmem:[%s4923_s22 + $0x268] sm:$0xf0] }
  0x2c   : > { %2168 = vmatpush.bf16.msrb.mxu0 %v4630_v40  ;;  %1998 = vmatmul.bf16.vlgmr.msra.gmra.mxu2 %v3495_v42  ;;  %v3667_v40 = vor.u32 %v4496_v33, %v3666_v32  ;;  %v3671_v42 = vor.u32 %v4492_v36, %v3668_v37  ;;  %v3774_v7 = vld [vmem:[%s4923_s22 + $0x240] sm:$0xf]  ;;  %v4523_v8 = vld [vmem:[%s4923_s22 + $0x260] sm:$0xf0]  ;;  %v3776_v12 = vld [vmem:[%s4923_s22 + $0x264] sm:$0xf0] }
  0x2d   : > { %1909 = vmatmul.bf16.vlgmr.msra.gmra.mxu1 %v3491_v43  ;;  %v3679_v43 = vor.u32 %v4493_v38, %v3676_v39  ;;  %v4519_v11 = vld [vmem:[%s4923_s22 + $0x244] sm:$0xf]  ;;  %v4520_v13 = vld [vmem:[%s4923_s22 + $0x24c] sm:$0xf]  ;;  %v3784_v14 = vld [vmem:[%s4923_s22 + $0x26c] sm:$0xf0] }
  0x2e   : > { %2087 = vmatmul.bf16.vlgmr.msra.gmra.mxu3 %v3499_v44  ;;  %v3702_v44 = vld [vmem:[%s4923_s22 + $0x1b0] sm:$0xf]  ;;  %v3787_v19 = vor.u32 %v4520_v13, %v3784_v14  ;;  %v3810_v32 = vld [vmem:[%s4923_s22 + $0x288] sm:$0xf]  ;;  %v4532_v33 = vld [vmem:[%s4923_s22 + $0x2a8] sm:$0xf0] }
  0x2f   : > { %v4625_v23 = vld [vmem:[%s5973_s2 + $0x110] sm:$0xff]  ;;  %v4528_v36 = vld [vmem:[%s4923_s22 + $0x28c] sm:$0xf]  ;;  %v3820_v39 = vld [vmem:[%s4923_s22 + $0x2b4] sm:$0xf0] }
  0x30   : > { %2169 = vmatpush.bf16.msrb.mxu0 %v4629_v45  ;;  %v4505_v45 = vld [vmem:[%s4923_s22 + $0x1d0] sm:$0xf0]  ;;  %v3818_v34 = vld [vmem:[%s4923_s22 + $0x290] sm:$0xf] }
  0x31   : > { %v3703_v52 = vor.u32 %v4505_v45, %v3702_v44  ;;  %v4533_v35 = vld [vmem:[%s4923_s22 + $0x2b0] sm:$0xf0]  ;;  %v3812_v37 = vld [vmem:[%s4923_s22 + $0x2ac] sm:$0xf0] }
  0x32   : > { %v4529_v38 = vld [vmem:[%s4923_s22 + $0x294] sm:$0xf]  ;;  %v3819_v44 = vor.u32 %v4533_v35, %v3818_v34  ;;  %v3815_v47 = vor.u32 %v4528_v36, %v3812_v37  ;;  %v4547_v34 = vld [vmem:[%s4923_s22 + $0x324] sm:$0xf]  ;;  %v3892_v35 = vld [vmem:[%s4923_s22 + $0x344] sm:$0xf0] }
  0x33   : > { %v4637_v45 = vld [vmem:[%s5973_s2 + $0x170] sm:$0xff] }
  0x34   : > { %2170 = vmatpush.bf16.msrb.mxu0 %v4628_v6  ;;  %v5028_v6 = vld [vmem:[%s5974_s3] ss:$0 sm:$0xff] }
  0x38   : > { %2171 = vmatpush.bf16.msrb.mxu0 %v4627_v31 }
  0x3b   : > { %1825 = vmatmul.bf16.gmra.mxu0 %v3523_v54  ;;  %v3707_v54 = vor.u32 %v4501_v48, %v3704_v49  ;;  %v3823_v48 = vor.u32 %v4529_v38, %v3820_v39 }
  0x3c   : > { %2003 = vmatmul.bf16.gmra.mxu2 %v3531_v55  ;;  %v3715_v55 = vor.u32 %v4502_v50, %v3712_v51 }
  0x3d   : > { %1914 = vmatmul.bf16.gmra.mxu1 %v3527_v56  ;;  %v4626_v56 = vld [vmem:[%s5973_s2 + $0x118] sm:$0xff] }
  0x3e   : > { %2092 = vmatmul.bf16.gmra.mxu3 %v3535_v57  ;;  %2172 = vmatpush.bf16.msrb.mxu0 %v4626_v56  ;;  %v3738_v57 = vld [vmem:[%s4923_s22 + $0x1f8] sm:$0xf] }
  0x3f   : > { %v3739_v1 = vor.u32 %v4514_v58, %v3738_v57 }
  0x42   : > { %2173 = vmatpush.bf16.msrb.mxu0 %v4625_v23 }
  0x4b   : > { %1830 = vmatmul.bf16.gmra.mxu0 %v3559_v2  ;;  %v3747_v2 = vor.u32 %v4515_v60, %v3746_v59 }
  0x4c   : > { %2008 = vmatmul.bf16.gmra.mxu2 %v3567_v3  ;;  %v4638_v3 = vld [vmem:[%s5973_s2 + $0x178] sm:$0xff] }
  0x4d   : > { %1919 = vmatmul.bf16.gmra.mxu1 %v3563_v4  ;;  %v3743_v4 = vor.u32 %v4510_v61, %v3740_v62  ;;  %v3846_v61 = vld [vmem:[%s4923_s22 + $0x2d0] sm:$0xf]  ;;  %v4541_v62 = vld [vmem:[%s4923_s22 + $0x2f0] sm:$0xf0] }
  0x4e   : > { %2097 = vmatmul.bf16.gmra.mxu3 %v3571_v5  ;;  %v3751_v5 = vor.u32 %v4511_v63, %v3748_v0  ;;  %2257 = vmatpush.bf16.msrb.mxu1 %v4638_v3  ;;  %v3854_v63 = vld [vmem:[%s4923_s22 + $0x2d8] sm:$0xf]  ;;  %v4542_v0 = vld [vmem:[%s4923_s22 + $0x2f8] sm:$0xf0] }
  0x4f   : > { %v4538_v3 = vld [vmem:[%s4923_s22 + $0x2dc] sm:$0xf] }
  0x52   : > { %2258 = vmatpush.bf16.msrb.mxu1 %v4637_v45 }
  0x5b   : > { %1835 = vmatmul.bf16.gmra.mxu0 %v3595_v15  ;;  %v3775_v15 = vor.u32 %v4523_v8, %v3774_v7 }
  0x5c   : > { %2013 = vmatmul.bf16.gmra.mxu2 %v3603_v16  ;;  %v3783_v16 = vor.u32 %v4524_v10, %v3782_v9  ;;  %v3847_v9 = vor.u32 %v4541_v62, %v3846_v61  ;;  %v3855_v10 = vor.u32 %v4542_v0, %v3854_v63  ;;  %v3926_v61 = vld [vmem:[%s4923_s22 + $0x368] sm:$0xf]  ;;  %v4560_v62 = vld [vmem:[%s4923_s22 + $0x388] sm:$0xf0]  ;;  %v4555_v63 = vld [vmem:[%s4923_s22 + $0x364] sm:$0xf] }
  0x5d   : > { %1924 = vmatmul.bf16.gmra.mxu1 %v3599_v17  ;;  %v3920_v0 = vld [vmem:[%s4923_s22 + $0x384] sm:$0xf0] }
  0x5e   : > { %2102 = vmatmul.bf16.gmra.mxu3 %v3607_v18  ;;  %v3779_v18 = vor.u32 %v4519_v11, %v3776_v12 }
  0x6b   : > { %1840 = vmatmul.bf16.gmra.mxu0 %v3631_v27 }
  0x6c   : > { %2018 = vmatmul.bf16.gmra.mxu2 %v3639_v28 }
  0x6d   : > { %1929 = vmatmul.bf16.gmra.mxu1 %v3635_v29 }
  0x6e   : > { %2107 = vmatmul.bf16.gmra.mxu3 %v3643_v30 }
  0x7b   : > { %1845 = vmatmul.bf16.gmra.mxu0 %v3667_v40 }
  0x7c   : > { %2023 = vmatmul.bf16.gmra.mxu2 %v3675_v41 }
  0x7d   : > { %1934 = vmatmul.bf16.gmra.mxu1 %v3671_v42 }
  0x7e   : > { %2112 = vmatmul.bf16.gmra.mxu3 %v3679_v43  ;;  %v3811_v43 = vor.u32 %v4532_v33, %v3810_v32  ;;  %v4546_v32 = vld [vmem:[%s4923_s22 + $0x31c] sm:$0xf]  ;;  %v3884_v33 = vld [vmem:[%s4923_s22 + $0x33c] sm:$0xf0] }
  0x8b   : > { %1850 = vmatmul.bf16.gmra.mxu0 %v3703_v52 }
  0x8c   : > { %2028 = vmatmul.bf16.gmra.mxu2 %v3711_v53 }
  0x8d   : > { %1939 = vmatmul.bf16.gmra.mxu1 %v3707_v54 }
  0x8e   : > { %2117 = vmatmul.bf16.gmra.mxu3 %v3715_v55 }
  0x9b   : > { %1855 = vmatmul.bf16.gmra.mxu0 %v3739_v1  ;;  %v4537_v1 = vld [vmem:[%s4923_s22 + $0x2d4] sm:$0xf] }
  0x9c   : > { %2033 = vmatmul.bf16.gmra.mxu2 %v3747_v2  ;;  %v3848_v2 = vld [vmem:[%s4923_s22 + $0x2f4] sm:$0xf0] }
  0x9d   : > { %1944 = vmatmul.bf16.gmra.mxu1 %v3743_v4  ;;  %v3856_v4 = vld [vmem:[%s4923_s22 + $0x2fc] sm:$0xf0]  ;;  %v3851_v12 = vor.u32 %v4537_v1, %v3848_v2  ;;  %v4556_v1 = vld [vmem:[%s4923_s22 + $0x36c] sm:$0xf]  ;;  %v3928_v2 = vld [vmem:[%s4923_s22 + $0x38c] sm:$0xf0] }
  0x9e   : > { %2122 = vmatmul.bf16.gmra.mxu3 %v3751_v5  ;;  %v3859_v13 = vor.u32 %v4538_v3, %v3856_v4 }
  0xa8   : > { %v1821_v17 = vpop.f32.mrf.mxu0 }
  0xa9   : > { %v1822_v20 = vadd.f32 %v5028_v6, %v1821_v17 }
  0xaa   : > { %v1910_v21 = vpop.f32.mrf.mxu1 }
  0xab   : > { %v1911_v22 = vadd.f32 %v1910_v21, %v1822_v20  ;;  %1860 = vmatmul.bf16.gmra.mxu0 %v3775_v15 }
  0xac   : > { %2038 = vmatmul.bf16.gmra.mxu2 %v3783_v16 }
  0xad   : > { %1949 = vmatmul.bf16.gmra.mxu1 %v3779_v18  ;;  %v4624_v18 = vld [vmem:[%s5973_s2 + $0x108] sm:$0xff] }
  0xae   : > { %2127 = vmatmul.bf16.gmra.mxu3 %v3787_v19  ;;  %2174 = vmatpush.bf16.msrb.mxu0 %v4624_v18  ;;  %v4623_v18 = vld [vmem:[%s5973_s2 + $0x100] sm:$0xff] }
  0xaf   : > { %v1999_v24 = vpop.f32.mrf.mxu2 }
  0xb0   : > { %v2000_v25 = vadd.f32 %v1999_v24, %v1911_v22  ;;  %v1823_v27 = vpop.f32.mrf.mxu0 }
  0xb1   : > { %v2088_v26 = vpop.f32.mrf.mxu3  ;;  %v1824_v28 = vadd.f32 %v5028_v6, %v1823_v27  ;;  %v3882_v27 = vld [vmem:[%s4923_s22 + $0x318] sm:$0xf] }
  0xb2   : > { %v5043_v29 = vadd.f32 %v2088_v26, %v2000_v25  ;;  %v1912_v30 = vpop.f32.mrf.mxu1  ;;  %2175 = vmatpush.bf16.msrb.mxu0 %v4623_v18  ;;  %v4578_v18 = vld [vmem:[%s4923_s22 + $0x418] sm:$0xf0] }
  0xb3   : > { %v1913_v31 = vadd.f32 %v1912_v30, %v1824_v28  ;;  %v4550_v28 = vld [vmem:[%s4923_s22 + $0x338] sm:$0xf0]  ;;  %v3890_v30 = vld [vmem:[%s4923_s22 + $0x320] sm:$0xf] }
  0xb4   : > { %v3883_v39 = vor.u32 %v4550_v28, %v3882_v27 }
  0xb7   : > { %v2001_v40 = vpop.f32.mrf.mxu2 }
  0xb8   : > { %v2002_v41 = vadd.f32 %v2001_v40, %v1913_v31  ;;  %v1826_v46 = vpop.f32.mrf.mxu0  ;;  %v4551_v31 = vld [vmem:[%s4923_s22 + $0x340] sm:$0xf0] }
  0xb9   : > { %v2090_v42 = vpop.f32.mrf.mxu3  ;;  %v1827_v49 = vadd.f32 %v5028_v6, %v1826_v46  ;;  %v3891_v40 = vor.u32 %v4551_v31, %v3890_v30  ;;  %v4644_v31 = vld [vmem:[%s5973_s2 + $0x1a8] sm:$0xff] }
  0xba   : > { %v5057_v50 = vadd.f32 %v2090_v42, %v2002_v41  ;;  %v1915_v51 = vpop.f32.mrf.mxu1  ;;  %v4636_v41 = vld [vmem:[%s5973_s2 + $0x168] sm:$0xff] }
  0xbb   : > { %v1916_v52 = vadd.f32 %v1915_v51, %v1827_v49  ;;  %1865 = vmatmul.bf16.gmra.mxu0 %v3811_v43  ;;  %v3887_v43 = vor.u32 %v4546_v32, %v3884_v33  ;;  %2259 = vmatpush.bf16.msrb.mxu1 %v4636_v41  ;;  %v3954_v33 = vld [vmem:[%s4923_s22 + $0x3a8] sm:$0xf]  ;;  %v3964_v41 = vld [vmem:[%s4923_s22 + $0x3d4] sm:$0xf0] }
  0xbc   : > { %2043 = vmatmul.bf16.gmra.mxu2 %v3819_v44  ;;  %v3895_v44 = vor.u32 %v4547_v34, %v3892_v35  ;;  %v4568_v34 = vld [vmem:[%s4923_s22 + $0x3c8] sm:$0xf0]  ;;  %v3962_v35 = vld [vmem:[%s4923_s22 + $0x3b0] sm:$0xf] }
  0xbd   : > { %1954 = vmatmul.bf16.gmra.mxu1 %v3815_v47 }
  0xbe   : > { %2132 = vmatmul.bf16.gmra.mxu3 %v3823_v48 }
  0xbf   : > { %v2004_v53 = vpop.f32.mrf.mxu2 }
  0xc0   : > { %v2005_v54 = vadd.f32 %v2004_v53, %v1916_v52  ;;  %v1828_v56 = vpop.f32.mrf.mxu0 }
  0xc1   : > { %v2093_v55 = vpop.f32.mrf.mxu3  ;;  %v1829_v57 = vadd.f32 %v5028_v6, %v1828_v56 }
  0xc2   : > { %v5060_v58 = vadd.f32 %v2093_v55, %v2005_v54  ;;  %v1917_v59 = vpop.f32.mrf.mxu1 }
  0xc3   : > { %v1918_v60 = vadd.f32 %v1917_v59, %v1829_v57  ;;  %v3918_v59 = vld [vmem:[%s4923_s22 + $0x360] sm:$0xf] }
  0xc7   : > { %v2006_v5 = vpop.f32.mrf.mxu2 }
  0xc8   : > { %v2007_v7 = vadd.f32 %v2006_v5, %v1918_v60  ;;  %v1831_v11 = vpop.f32.mrf.mxu0  ;;  %v4559_v60 = vld [vmem:[%s4923_s22 + $0x380] sm:$0xf0] }
  0xc9   : > { %v2095_v8 = vpop.f32.mrf.mxu3  ;;  %v1832_v14 = vadd.f32 %v5028_v6, %v1831_v11  ;;  %v3931_v11 = vor.u32 %v4556_v1, %v3928_v2  ;;  %v4641_v1 = vld [vmem:[%s5973_s2 + $0x190] sm:$0xff] }
  0xca   : > { %v5071_v15 = vadd.f32 %v2095_v8, %v2007_v7  ;;  %v1920_v16 = vpop.f32.mrf.mxu1  ;;  %v3919_v7 = vor.u32 %v4559_v60, %v3918_v59  ;;  %v3927_v8 = vor.u32 %v4560_v62, %v3926_v61  ;;  %v4642_v60 = vld [vmem:[%s5973_s2 + $0x198] sm:$0xff] }
  0xcb   : > { %v1921_v17 = vadd.f32 %v1920_v16, %v1832_v14  ;;  %1870 = vmatmul.bf16.gmra.mxu0 %v3847_v9  ;;  %v4646_v16 = vld [vmem:[%s5973_s2 + $0x1b8] sm:$0xff] }
  0xcc   : > { %2048 = vmatmul.bf16.gmra.mxu2 %v3855_v10  ;;  %v3923_v10 = vor.u32 %v4555_v63, %v3920_v0  ;;  %v4634_v62 = vld [vmem:[%s5973_s2 + $0x158] sm:$0xff] }
  0xcd   : > { %1959 = vmatmul.bf16.gmra.mxu1 %v3851_v12  ;;  %2346 = vmatpush.bf16.msrb.mxu2 %v4646_v16  ;;  %v4650_v63 = vld [vmem:[%s5973_s2 + $0x1d8] sm:$0xff]  ;;  %v4577_v16 = vld [vmem:[%s4923_s22 + $0x410] sm:$0xf0] }
  0xce   : > { %2137 = vmatmul.bf16.gmra.mxu3 %v3859_v13 }
  0xcf   : > { %v2009_v19 = vpop.f32.mrf.mxu2 }
  0xd0   : > { %v2010_v20 = vadd.f32 %v2009_v19, %v1921_v17  ;;  %v1833_v22 = vpop.f32.mrf.mxu0  ;;  %v4654_v19 = vld [vmem:[%s5973_s2 + $0x1f8] sm:$0xff] }
  0xd1   : > { %v2098_v21 = vpop.f32.mrf.mxu3  ;;  %v1834_v23 = vadd.f32 %v5028_v6, %v1833_v22  ;;  %2435 = vmatpush.bf16.msrb.mxu3 %v4654_v19  ;;  %v4573_v19 = vld [vmem:[%s4923_s22 + $0x3f4] sm:$0xf] }
  0xd2   : > { %v5077_v24 = vadd.f32 %v2098_v21, %v2010_v20  ;;  %v1922_v25 = vpop.f32.mrf.mxu1  ;;  %v4645_v21 = vld [vmem:[%s5973_s2 + $0x1b0] sm:$0xff] }
  0xd3   : > { %v1923_v26 = vadd.f32 %v1922_v25, %v1834_v23  ;;  %2347 = vmatpush.bf16.msrb.mxu2 %v4645_v21  ;;  %v4648_v21 = vld [vmem:[%s5973_s2 + $0x1c8] sm:$0xff] }
  0xd7   : > { %v2011_v36 = vpop.f32.mrf.mxu2  ;;  %2348 = vmatpush.bf16.msrb.mxu2 %v4644_v31 }
  0xd8   : > { %v2012_v37 = vadd.f32 %v2011_v36, %v1923_v26  ;;  %v1836_v42 = vpop.f32.mrf.mxu0  ;;  %v4653_v26 = vld [vmem:[%s5973_s2 + $0x1f0] sm:$0xff] }
  0xd9   : > { %v2100_v38 = vpop.f32.mrf.mxu3  ;;  %v1837_v45 = vadd.f32 %v5028_v6, %v1836_v42  ;;  %2436 = vmatpush.bf16.msrb.mxu3 %v4653_v26  ;;  %v4569_v36 = vld [vmem:[%s4923_s22 + $0x3d0] sm:$0xf0] }
  0xda   : > { %v5091_v46 = vadd.f32 %v2100_v38, %v2012_v37  ;;  %v1925_v47 = vpop.f32.mrf.mxu1  ;;  %v4564_v37 = vld [vmem:[%s4923_s22 + $0x3ac] sm:$0xf] }
  0xdb   : > { %v1926_v48 = vadd.f32 %v1925_v47, %v1837_v45  ;;  %1875 = vmatmul.bf16.gmra.mxu0 %v3883_v39  ;;  %v4652_v38 = vld [vmem:[%s5973_s2 + $0x1e8] sm:$0xff]  ;;  %v3956_v39 = vld [vmem:[%s4923_s22 + $0x3cc] sm:$0xf0]  ;;  %v3955_v47 = vor.u32 %v4568_v34, %v3954_v33 }
  0xdc   : > { %2053 = vmatmul.bf16.gmra.mxu2 %v3891_v40  ;;  %v4565_v40 = vld [vmem:[%s4923_s22 + $0x3b4] sm:$0xf] }
  0xdd   : > { %1964 = vmatmul.bf16.gmra.mxu1 %v3887_v43  ;;  %2437 = vmatpush.bf16.msrb.mxu3 %v4652_v38  ;;  %v4643_v43 = vld [vmem:[%s5973_s2 + $0x1a0] sm:$0xff] }
  0xde   : > { %2142 = vmatmul.bf16.gmra.mxu3 %v3895_v44  ;;  %2349 = vmatpush.bf16.msrb.mxu2 %v4643_v43  ;;  %v4647_v38 = vld [vmem:[%s5973_s2 + $0x1c0] sm:$0xff]  ;;  %v4662_v43 = vld [vmem:[%s5973_s2 + $0x238] sm:$0xff] }
  0xdf   : > { %v2014_v49 = vpop.f32.mrf.mxu2  ;;  %2524 = vmatpush.bf16.msra.mxu0 %v4662_v43 }
  0xe0   : > { %v2015_v51 = vadd.f32 %v2014_v49, %v1926_v48  ;;  %v1838_v53 = vpop.f32.mrf.mxu0  ;;  %v3963_v48 = vor.u32 %v4569_v36, %v3962_v35  ;;  %v4635_v49 = vld [vmem:[%s5973_s2 + $0x160] sm:$0xff] }
  0xe1   : > { %v2103_v52 = vpop.f32.mrf.mxu3  ;;  %v1839_v54 = vadd.f32 %v5028_v6, %v1838_v53  ;;  %v3967_v53 = vor.u32 %v4565_v40, %v3964_v41  ;;  %2260 = vmatpush.bf16.msrb.mxu1 %v4635_v49 }
  0xe2   : > { %v5094_v55 = vadd.f32 %v2103_v52, %v2015_v51  ;;  %v1927_v56 = vpop.f32.mrf.mxu1  ;;  %v3959_v52 = vor.u32 %v4564_v37, %v3956_v39  ;;  %2350 = vmatpush.bf16.msrb.mxu2 %v4642_v60  ;;  %v4631_v37 = vld [vmem:[%s5973_s2 + $0x140] sm:$0xff] }
  0xe3   : > { %v1928_v57 = vadd.f32 %v1927_v56, %v1839_v54  ;;  %v4651_v54 = vld [vmem:[%s5973_s2 + $0x1e0] sm:$0xff] }
  0xe4   : > { %2438 = vmatpush.bf16.msrb.mxu3 %v4651_v54  ;;  %v4026_v54 = vld [vmem:[%s4923_s22 + $0x438] sm:$0xf]  ;;  %v4587_v60 = vld [vmem:[%s4923_s22 + $0x460] sm:$0xf0] }
  0xe5   : > { %2261 = vmatpush.bf16.msrb.mxu1 %v4634_v62  ;;  %v4028_v62 = vld [vmem:[%s4923_s22 + $0x45c] sm:$0xf0] }
  0xe6   : > { %2351 = vmatpush.bf16.msrb.mxu2 %v4641_v1 }
  0xe7   : > { %v2016_v3 = vpop.f32.mrf.mxu2 }
  0xe8   : > { %v2017_v4 = vadd.f32 %v2016_v3, %v1928_v57  ;;  %v1841_v9 = vpop.f32.mrf.mxu0  ;;  %2439 = vmatpush.bf16.msrb.mxu3 %v4650_v63  ;;  %v4583_v63 = vld [vmem:[%s4923_s22 + $0x444] sm:$0xf] }
  0xe9   : > { %v2105_v5 = vpop.f32.mrf.mxu3  ;;  %v1842_v12 = vadd.f32 %v5028_v6, %v1841_v9 }
  0xea   : > { %v5105_v13 = vadd.f32 %v2105_v5, %v2017_v4  ;;  %v1930_v14 = vpop.f32.mrf.mxu1  ;;  %v4633_v5 = vld [vmem:[%s5973_s2 + $0x150] sm:$0xff] }
  0xeb   : > { %v1931_v17 = vadd.f32 %v1930_v14, %v1842_v12  ;;  %1880 = vmatmul.bf16.gmra.mxu0 %v3919_v7  ;;  %v4649_v7 = vld [vmem:[%s5973_s2 + $0x1d0] sm:$0xff]  ;;  %2262 = vmatpush.bf16.msrb.mxu1 %v4633_v5  ;;  %v4640_v12 = vld [vmem:[%s5973_s2 + $0x188] sm:$0xff] }
  0xec   : > { %2058 = vmatmul.bf16.gmra.mxu2 %v3927_v8  ;;  %2440 = vmatpush.bf16.msrb.mxu3 %v4649_v7 }
  0xed   : > { %1969 = vmatmul.bf16.gmra.mxu1 %v3923_v10  ;;  %2352 = vmatpush.bf16.msrb.mxu2 %v4640_v12 }
  0xee   : > { %2147 = vmatmul.bf16.gmra.mxu3 %v3931_v11  ;;  %v3990_v11 = vld [vmem:[%s4923_s22 + $0x3f0] sm:$0xf] }
  0xef   : > { %v2019_v20 = vpop.f32.mrf.mxu2 }
  0xf0   : > { %v2020_v22 = vadd.f32 %v2019_v20, %v1931_v17  ;;  %v1843_v25 = vpop.f32.mrf.mxu0  ;;  %v3998_v17 = vld [vmem:[%s4923_s22 + $0x3f8] sm:$0xf]  ;;  %v4632_v20 = vld [vmem:[%s5973_s2 + $0x148] sm:$0xff]  ;;  %2441 = vmatpush.bf16.msrb.mxu3 %v4648_v21 }
  0xf1   : > { %v2108_v23 = vpop.f32.mrf.mxu3  ;;  %v1844_v27 = vadd.f32 %v5028_v6, %v1843_v25  ;;  %v4000_v25 = vld [vmem:[%s4923_s22 + $0x41c] sm:$0xf0]  ;;  %2263 = vmatpush.bf16.msrb.mxu1 %v4632_v20  ;;  %v3999_v33 = vor.u32 %v4578_v18, %v3998_v17 }
  0xf2   : > { %v5123_v28 = vadd.f32 %v2108_v23, %v2020_v22  ;;  %v1932_v30 = vpop.f32.mrf.mxu1  ;;  %v3992_v22 = vld [vmem:[%s4923_s22 + $0x414] sm:$0xf0]  ;;  %v4574_v23 = vld [vmem:[%s4923_s22 + $0x3fc] sm:$0xf] }
  0xf3   : > { %v1933_v32 = vadd.f32 %v1932_v30, %v1844_v27  ;;  %v4639_v27 = vld [vmem:[%s5973_s2 + $0x180] sm:$0xff]  ;;  %v3995_v35 = vor.u32 %v4573_v19, %v3992_v22  ;;  %v4003_v36 = vor.u32 %v4574_v23, %v4000_v25 }
  0xf4   : > { %2353 = vmatpush.bf16.msrb.mxu2 %v4639_v27  ;;  %2442 = vmatpush.bf16.msrb.mxu3 %v4647_v38  ;;  %v4453_v27 = vld [vmem:[%s4923_s22 + $0x30] sm:$0xf0] }
  0xf5   : > { %2264 = vmatpush.bf16.msrb.mxu1 %v4631_v37 }
  0xf7   : > { %v2021_v42 = vpop.f32.mrf.mxu2 }
  0xf8   : > { %v2022_v44 = vadd.f32 %v2021_v42, %v1933_v32  ;;  %v1846_v51 = vpop.f32.mrf.mxu0  ;;  %v3991_v32 = vor.u32 %v4577_v16, %v3990_v11 }
  0xf9   : > { %v2110_v45 = vpop.f32.mrf.mxu3  ;;  %v1847_v56 = vadd.f32 %v5028_v6, %v1846_v51 }
  0xfa   : > { %v5149_v57 = vadd.f32 %v2110_v45, %v2022_v44  ;;  %v1935_v59 = vpop.f32.mrf.mxu1 }
  0xfb   : > { %v1936_v61 = vadd.f32 %v1935_v59, %v1847_v56  ;;  %1885 = vmatmul.bf16.gmra.mxu0 %v3955_v47  ;;  %v4586_v56 = vld [vmem:[%s4923_s22 + $0x458] sm:$0xf0]  ;;  %v4034_v59 = vld [vmem:[%s4923_s22 + $0x440] sm:$0xf] }
  0xfc   : > { %2063 = vmatmul.bf16.gmra.mxu2 %v3963_v48  ;;  %v4035_v5 = vor.u32 %v4587_v60, %v4034_v59 }
  0xfd   : > { %1974 = vmatmul.bf16.gmra.mxu1 %v3959_v52 }
  0xfe   : > { %2152 = vmatmul.bf16.gmra.mxu3 %v3967_v53 }
  0xff   : > { %v2024_v0 = vpop.f32.mrf.mxu2 }
 0x100   : > { %v2025_v2 = vadd.f32 %v2024_v0, %v1936_v61  ;;  %v1848_v4 = vpop.f32.mrf.mxu0  ;;  %v4582_v61 = vld [vmem:[%s4923_s22 + $0x43c] sm:$0xf]  ;;  %v4036_v0 = vld [vmem:[%s4923_s22 + $0x464] sm:$0xf0] }
 0x101   : > { %v2113_v3 = vpop.f32.mrf.mxu3  ;;  %v1849_v8 = vadd.f32 %v5028_v6, %v1848_v4  ;;  %v4027_v4 = vor.u32 %v4586_v56, %v4026_v54 }
 0x102   : > { %v5170_v9 = vadd.f32 %v2113_v3, %v2025_v2  ;;  %v1937_v10 = vpop.f32.mrf.mxu1 }
 0x103   : > { %v1938_v14 = vadd.f32 %v1937_v10, %v1849_v8  ;;  %v4031_v8 = vor.u32 %v4582_v61, %v4028_v62  ;;  %v4039_v10 = vor.u32 %v4583_v63, %v4036_v0  ;;  %v3538_v0 = vld [vmem:[%s4923_s22 + $0x58] sm:$0xf] }
 0x107   : > { %v2026_v26 = vpop.f32.mrf.mxu2 }
 0x108   : > { %v2027_v30 = vadd.f32 %v2026_v26, %v1938_v14  ;;  %v1851_v34 = vpop.f32.mrf.mxu0  ;;  %v3502_v26 = vld [vmem:[%s4923_s22 + $0x10] sm:$0xf] }
 0x109   : > { %v2115_v31 = vpop.f32.mrf.mxu3  ;;  %v1852_v39 = vadd.f32 %v5028_v6, %v1851_v34  ;;  %v4450_v34 = vld [vmem:[%s4923_s22 + $0x1c] sm:$0xf] }
 0x10a   : > { %v5199_v40 = vadd.f32 %v2115_v31, %v2027_v30  ;;  %v1940_v41 = vpop.f32.mrf.mxu1  ;;  %v3510_v30 = vld [vmem:[%s4923_s22 + $0x18] sm:$0xf]  ;;  %v4454_v31 = vld [vmem:[%s4923_s22 + $0x38] sm:$0xf0] }
 0x10b   : > { %v1941_v42 = vadd.f32 %v1940_v41, %v1852_v39  ;;  %1890 = vmatmul.bf16.gmra.mxu0 %v3991_v32  ;;  %v4449_v32 = vld [vmem:[%s4923_s22 + $0x14] sm:$0xf]  ;;  %v3503_v39 = vor.u32 %v4453_v27, %v3502_v26  ;;  %v3511_v41 = vor.u32 %v4454_v31, %v3510_v30 }
 0x10c   : > { %2068 = vmatmul.bf16.gmra.mxu2 %v3999_v33  ;;  %v3504_v33 = vld [vmem:[%s4923_s22 + $0x34] sm:$0xf0] }
 0x10d   : > { %1979 = vmatmul.bf16.gmra.mxu1 %v3995_v35  ;;  %v3512_v35 = vld [vmem:[%s4923_s22 + $0x3c] sm:$0xf0]  ;;  %v3507_v43 = vor.u32 %v4449_v32, %v3504_v33 }
 0x10e   : > { %2157 = vmatmul.bf16.gmra.mxu3 %v4003_v36 }
 0x10f   : > { %v2029_v44 = vpop.f32.mrf.mxu2 }
 0x110   : > { %v2030_v45 = vadd.f32 %v2029_v44, %v1941_v42  ;;  %v1853_v48 = vpop.f32.mrf.mxu0  ;;  %v3515_v44 = vor.u32 %v4450_v34, %v3512_v35 }
 0x111   : > { %v2118_v47 = vpop.f32.mrf.mxu3  ;;  %v1854_v49 = vadd.f32 %v5028_v6, %v1853_v48 }
 0x112   : > { %v5205_v51 = vadd.f32 %v2118_v47, %v2030_v45  ;;  %v1942_v52 = vpop.f32.mrf.mxu1 }
 0x113   : > { %v1943_v53 = vadd.f32 %v1942_v52, %v1854_v49  ;;  %v4661_v52 = vld [vmem:[%s5973_s2 + $0x230] sm:$0xff] }
 0x114   : > { %2525 = vmatpush.bf16.msra.mxu0 %v4661_v52 }
 0x117   : > { %v2031_v1 = vpop.f32.mrf.mxu2 }
 0x118   : > { %v2032_v2 = vadd.f32 %v2031_v1, %v1943_v53  ;;  %v1856_v7 = vpop.f32.mrf.mxu0  ;;  %v4462_v1 = vld [vmem:[%s4923_s22 + $0x78] sm:$0xf0] }
 0x119   : > { %v2120_v3 = vpop.f32.mrf.mxu3  ;;  %v1857_v11 = vadd.f32 %v5028_v6, %v1856_v7  ;;  %v4459_v7 = vld [vmem:[%s4923_s22 + $0x64] sm:$0xf] }
 0x11a   : > { %v5216_v12 = vadd.f32 %v2120_v3, %v2032_v2  ;;  %v1945_v14 = vpop.f32.mrf.mxu1  ;;  %v3546_v2 = vld [vmem:[%s4923_s22 + $0x60] sm:$0xf]  ;;  %v4463_v3 = vld [vmem:[%s4923_s22 + $0x80] sm:$0xf0] }
 0x11b   : > { %v1946_v16 = vadd.f32 %v1945_v14, %v1857_v11  ;;  %1895 = vmatmul.bf16.gmra.mxu0 %v4027_v4  ;;  %v4458_v4 = vld [vmem:[%s4923_s22 + $0x5c] sm:$0xf] }
 0x11c   : > { %2073 = vmatmul.bf16.gmra.mxu2 %v4035_v5  ;;  %v3540_v5 = vld [vmem:[%s4923_s22 + $0x7c] sm:$0xf0] }
 0x11d   : > { %1984 = vmatmul.bf16.gmra.mxu1 %v4031_v8  ;;  %v3548_v8 = vld [vmem:[%s4923_s22 + $0x84] sm:$0xf0] }
 0x11e   : > { %2162 = vmatmul.bf16.gmra.mxu3 %v4039_v10 }
 0x11f   : > { %v2034_v17 = vpop.f32.mrf.mxu2 }
 0x120   : > { %v2035_v18 = vadd.f32 %v2034_v17, %v1946_v16  ;;  %v1858_v20 = vpop.f32.mrf.mxu0  ;;  %v3539_v16 = vor.u32 %v4462_v1, %v3538_v0  ;;  %v3547_v17 = vor.u32 %v4463_v3, %v3546_v2  ;;  %v4660_v2 = vld [vmem:[%s5973_s2 + $0x228] sm:$0xff] }
 0x121   : > { %v2123_v19 = vpop.f32.mrf.mxu3  ;;  %v1859_v21 = vadd.f32 %v5028_v6, %v1858_v20  ;;  %v3551_v20 = vor.u32 %v4459_v7, %v3548_v8  ;;  %2526 = vmatpush.bf16.msra.mxu0 %v4660_v2  ;;  %v4486_v2 = vld [vmem:[%s4923_s22 + $0x13c] sm:$0xf] }
 0x122   : > { %v5219_v22 = vadd.f32 %v2123_v19, %v2035_v18  ;;  %v1947_v23 = vpop.f32.mrf.mxu1  ;;  %v3543_v19 = vor.u32 %v4458_v4, %v3540_v5 }
 0x123   : > { %v1948_v25 = vadd.f32 %v1947_v23, %v1859_v21 }
 0x127   : > { %v2036_v36 = vpop.f32.mrf.mxu2 }
 0x128   : > { %v2037_v37 = vadd.f32 %v2036_v36, %v1948_v25  ;;  %v1861_v42 = vpop.f32.mrf.mxu0 }
 0x129   : > { %v2125_v38 = vpop.f32.mrf.mxu3  ;;  %v1862_v45 = vadd.f32 %v5028_v6, %v1861_v42  ;;  %v4467_v42 = vld [vmem:[%s4923_s22 + $0xa4] sm:$0xf] }
 0x12a   : > { %v5230_v47 = vadd.f32 %v2125_v38, %v2037_v37  ;;  %v1950_v48 = vpop.f32.mrf.mxu1  ;;  %v3574_v37 = vld [vmem:[%s4923_s22 + $0xa0] sm:$0xf]  ;;  %v4471_v38 = vld [vmem:[%s4923_s22 + $0xc0] sm:$0xf0] }
 0x12b   : > { %v1951_v49 = vadd.f32 %v1950_v48, %v1862_v45  ;;  %2176 = vmatmul.bf16.vlgmr.msrb.gmra.mxu0 %v3503_v39  ;;  %v3582_v39 = vld [vmem:[%s4923_s22 + $0xa8] sm:$0xf]  ;;  %v3584_v45 = vld [vmem:[%s4923_s22 + $0xcc] sm:$0xf0] }
 0x12c   : > { %2354 = vmatmul.bf16.vlgmr.msrb.gmra.mxu2 %v3511_v41  ;;  %v4472_v41 = vld [vmem:[%s4923_s22 + $0xc8] sm:$0xf0] }
 0x12d   : > { %2265 = vmatmul.bf16.vlgmr.msrb.gmra.mxu1 %v3507_v43  ;;  %v3576_v43 = vld [vmem:[%s4923_s22 + $0xc4] sm:$0xf0] }
 0x12e   : > { %2443 = vmatmul.bf16.vlgmr.msrb.gmra.mxu3 %v3515_v44  ;;  %v4468_v44 = vld [vmem:[%s4923_s22 + $0xac] sm:$0xf] }
 0x12f   : > { %v2039_v53 = vpop.f32.mrf.mxu2 }
 0x130   : > { %v2040_v54 = vadd.f32 %v2039_v53, %v1951_v49  ;;  %v1863_v59 = vpop.f32.mrf.mxu0  ;;  %v3575_v53 = vor.u32 %v4471_v38, %v3574_v37 }
 0x131   : > { %v2128_v56 = vpop.f32.mrf.mxu3  ;;  %v1864_v60 = vadd.f32 %v5028_v6, %v1863_v59  ;;  %v3579_v59 = vor.u32 %v4467_v42, %v3576_v43 }
 0x132   : > { %v5236_v61 = vadd.f32 %v2128_v56, %v2040_v54  ;;  %v1952_v62 = vpop.f32.mrf.mxu1  ;;  %v3583_v54 = vor.u32 %v4472_v41, %v3582_v39 }
 0x133   : > { %v1953_v63 = vadd.f32 %v1952_v62, %v1864_v60  ;;  %v3587_v60 = vor.u32 %v4468_v44, %v3584_v45 }
 0x137   : > { %v2041_v10 = vpop.f32.mrf.mxu2 }
 0x138   : > { %v2042_v11 = vadd.f32 %v2041_v10, %v1953_v63  ;;  %v1866_v18 = vpop.f32.mrf.mxu0 }
 0x139   : > { %v2130_v14 = vpop.f32.mrf.mxu3  ;;  %v1867_v21 = vadd.f32 %v5028_v6, %v1866_v18  ;;  %v3618_v18 = vld [vmem:[%s4923_s22 + $0xf0] sm:$0xf] }
 0x13a   : > { %v5247_v23 = vadd.f32 %v2130_v14, %v2042_v11  ;;  %v1955_v25 = vpop.f32.mrf.mxu1 }
 0x13b   : > { %v1956_v26 = vadd.f32 %v1955_v25, %v1867_v21  ;;  %2181 = vmatmul.bf16.gmra.mxu0 %v3539_v16  ;;  %v3610_v16 = vld [vmem:[%s4923_s22 + $0xe8] sm:$0xf]  ;;  %v3612_v21 = vld [vmem:[%s4923_s22 + $0x10c] sm:$0xf0]  ;;  %v4477_v25 = vld [vmem:[%s4923_s22 + $0xf4] sm:$0xf] }
 0x13c   : > { %2359 = vmatmul.bf16.gmra.mxu2 %v3547_v17  ;;  %v4480_v17 = vld [vmem:[%s4923_s22 + $0x108] sm:$0xf0] }
 0x13d   : > { %2270 = vmatmul.bf16.gmra.mxu1 %v3543_v19  ;;  %v4481_v19 = vld [vmem:[%s4923_s22 + $0x110] sm:$0xf0] }
 0x13e   : > { %2448 = vmatmul.bf16.gmra.mxu3 %v3551_v20  ;;  %v4476_v20 = vld [vmem:[%s4923_s22 + $0xec] sm:$0xf] }
 0x13f   : > { %v2044_v27 = vpop.f32.mrf.mxu2 }
 0x140   : > { %v2045_v30 = vadd.f32 %v2044_v27, %v1956_v26  ;;  %v1868_v32 = vpop.f32.mrf.mxu0  ;;  %v3620_v26 = vld [vmem:[%s4923_s22 + $0x114] sm:$0xf0] }
 0x141   : > { %v2133_v31 = vpop.f32.mrf.mxu3  ;;  %v1869_v33 = vadd.f32 %v5028_v6, %v1868_v32  ;;  %v3611_v32 = vor.u32 %v4480_v17, %v3610_v16  ;;  %v3623_v37 = vor.u32 %v4477_v25, %v3620_v26  ;;  %v4659_v25 = vld [vmem:[%s5973_s2 + $0x220] sm:$0xff] }
 0x142   : > { %v5250_v34 = vadd.f32 %v2133_v31, %v2045_v30  ;;  %v1957_v35 = vpop.f32.mrf.mxu1  ;;  %2527 = vmatpush.bf16.msra.mxu0 %v4659_v25  ;;  %v3726_v25 = vld [vmem:[%s4923_s22 + $0x1c8] sm:$0xf] }
 0x143   : > { %v1958_v36 = vadd.f32 %v1957_v35, %v1869_v33  ;;  %v3619_v33 = vor.u32 %v4481_v19, %v3618_v18 }
 0x147   : > { %v2046_v48 = vpop.f32.mrf.mxu2 }
 0x148   : > { %v2047_v49 = vadd.f32 %v2046_v48, %v1958_v36  ;;  %v1871_v56 = vpop.f32.mrf.mxu0  ;;  %v3615_v36 = vor.u32 %v4476_v20, %v3612_v21 }
 0x149   : > { %v2135_v52 = vpop.f32.mrf.mxu3  ;;  %v1872_v62 = vadd.f32 %v5028_v6, %v1871_v56  ;;  %v3646_v56 = vld [vmem:[%s4923_s22 + $0x130] sm:$0xf] }
 0x14a   : > { %v5261_v63 = vadd.f32 %v2135_v52, %v2047_v49  ;;  %v1960_v0 = vpop.f32.mrf.mxu1 }
 0x14b   : > { %v1961_v1 = vadd.f32 %v1960_v0, %v1872_v62  ;;  %2186 = vmatmul.bf16.gmra.mxu0 %v3575_v53  ;;  %v4490_v62 = vld [vmem:[%s4923_s22 + $0x158] sm:$0xf0]  ;;  %v4485_v0 = vld [vmem:[%s4923_s22 + $0x134] sm:$0xf] }
 0x14c   : > { %2364 = vmatmul.bf16.gmra.mxu2 %v3583_v54 }
 0x14d   : > { %2275 = vmatmul.bf16.gmra.mxu1 %v3579_v59  ;;  %v4489_v59 = vld [vmem:[%s4923_s22 + $0x150] sm:$0xf0] }
 0x14e   : > { %2453 = vmatmul.bf16.gmra.mxu3 %v3587_v60  ;;  %v3654_v60 = vld [vmem:[%s4923_s22 + $0x138] sm:$0xf] }
 0x14f   : > { %v2049_v3 = vpop.f32.mrf.mxu2 }
 0x150   : > { %v2050_v4 = vadd.f32 %v2049_v3, %v1961_v1  ;;  %v1873_v7 = vpop.f32.mrf.mxu0  ;;  %v3648_v1 = vld [vmem:[%s4923_s22 + $0x154] sm:$0xf0]  ;;  %v3656_v3 = vld [vmem:[%s4923_s22 + $0x15c] sm:$0xf0] }
 0x151   : > { %v2138_v5 = vpop.f32.mrf.mxu3  ;;  %v1874_v8 = vadd.f32 %v5028_v6, %v1873_v7  ;;  %v3651_v16 = vor.u32 %v4485_v0, %v3648_v1  ;;  %v3659_v17 = vor.u32 %v4486_v2, %v3656_v3 }
 0x152   : > { %v5267_v10 = vadd.f32 %v2138_v5, %v2050_v4  ;;  %v1962_v11 = vpop.f32.mrf.mxu1 }
 0x153   : > { %v1963_v14 = vadd.f32 %v1962_v11, %v1874_v8  ;;  %v3647_v8 = vor.u32 %v4489_v59, %v3646_v56  ;;  %v3655_v11 = vor.u32 %v4490_v62, %v3654_v60 }
 0x157   : > { %v2051_v27 = vpop.f32.mrf.mxu2 }
 0x158   : > { %v2052_v30 = vadd.f32 %v2051_v27, %v1963_v14  ;;  %v1876_v35 = vpop.f32.mrf.mxu0 }
 0x159   : > { %v2140_v31 = vpop.f32.mrf.mxu3  ;;  %v1877_v38 = vadd.f32 %v5028_v6, %v1876_v35 }
 0x15a   : > { %v5278_v39 = vadd.f32 %v2140_v31, %v2052_v30  ;;  %v1965_v41 = vpop.f32.mrf.mxu1 }
 0x15b   : > { %v1966_v42 = vadd.f32 %v1965_v41, %v1877_v38  ;;  %2191 = vmatmul.bf16.gmra.mxu0 %v3611_v32  ;;  %v4498_v38 = vld [vmem:[%s4923_s22 + $0x198] sm:$0xf0]  ;;  %v3690_v41 = vld [vmem:[%s4923_s22 + $0x180] sm:$0xf] }
 0x15c   : > { %2369 = vmatmul.bf16.gmra.mxu2 %v3619_v33 }
 0x15d   : > { %2280 = vmatmul.bf16.gmra.mxu1 %v3615_v36 }
 0x15e   : > { %2458 = vmatmul.bf16.gmra.mxu3 %v3623_v37  ;;  %v3682_v37 = vld [vmem:[%s4923_s22 + $0x178] sm:$0xf] }
 0x15f   : > { %v2054_v43 = vpop.f32.mrf.mxu2  ;;  %v3683_v56 = vor.u32 %v4498_v38, %v3682_v37 }
 0x160   : > { %v2055_v44 = vadd.f32 %v2054_v43, %v1966_v42  ;;  %v1878_v48 = vpop.f32.mrf.mxu0  ;;  %v4499_v42 = vld [vmem:[%s4923_s22 + $0x1a0] sm:$0xf0]  ;;  %v4494_v43 = vld [vmem:[%s4923_s22 + $0x17c] sm:$0xf] }
 0x161   : > { %v2143_v45 = vpop.f32.mrf.mxu3  ;;  %v1879_v49 = vadd.f32 %v5028_v6, %v1878_v48  ;;  %v3692_v48 = vld [vmem:[%s4923_s22 + $0x1a4] sm:$0xf0]  ;;  %v3691_v59 = vor.u32 %v4499_v42, %v3690_v41 }
 0x162   : > { %v5281_v52 = vadd.f32 %v2143_v45, %v2055_v44  ;;  %v1967_v53 = vpop.f32.mrf.mxu1  ;;  %v3684_v44 = vld [vmem:[%s4923_s22 + $0x19c] sm:$0xf0]  ;;  %v4495_v45 = vld [vmem:[%s4923_s22 + $0x184] sm:$0xf] }
 0x163   : > { %v1968_v54 = vadd.f32 %v1967_v53, %v1879_v49  ;;  %v3687_v62 = vor.u32 %v4494_v43, %v3684_v44  ;;  %v3695_v0 = vor.u32 %v4495_v45, %v3692_v48  ;;  %v4777_v44 = vld [vmem:[%s5974_s3] ss:$0 sm:$0xff] }
 0x167   : > { %v2056_v4 = vpop.f32.mrf.mxu2 }
 0x168   : > { %v2057_v5 = vadd.f32 %v2056_v4, %v1968_v54  ;;  %v1881_v14 = vpop.f32.mrf.mxu0 }
 0x169   : > { %v2145_v7 = vpop.f32.mrf.mxu3  ;;  %v1882_v18 = vadd.f32 %v5028_v6, %v1881_v14 }
 0x16a   : > { %v5292_v19 = vadd.f32 %v2145_v7, %v2057_v5  ;;  %v1970_v20 = vpop.f32.mrf.mxu1 }
 0x16b   : > { %v1971_v21 = vadd.f32 %v1970_v20, %v1882_v18  ;;  %2196 = vmatmul.bf16.gmra.mxu0 %v3647_v8  ;;  %v3718_v20 = vld [vmem:[%s4923_s22 + $0x1c0] sm:$0xf] }
 0x16c   : > { %2374 = vmatmul.bf16.gmra.mxu2 %v3655_v11 }
 0x16d   : > { %2285 = vmatmul.bf16.gmra.mxu1 %v3651_v16 }
 0x16e   : > { %2463 = vmatmul.bf16.gmra.mxu3 %v3659_v17 }
 0x16f   : > { %v2059_v26 = vpop.f32.mrf.mxu2 }
 0x170   : > { %v2060_v27 = vadd.f32 %v2059_v26, %v1971_v21  ;;  %v1883_v31 = vpop.f32.mrf.mxu0  ;;  %v4507_v21 = vld [vmem:[%s4923_s22 + $0x1e0] sm:$0xf0]  ;;  %v4508_v26 = vld [vmem:[%s4923_s22 + $0x1e8] sm:$0xf0] }
 0x171   : > { %v2148_v30 = vpop.f32.mrf.mxu3  ;;  %v1884_v32 = vadd.f32 %v5028_v6, %v1883_v31  ;;  %v4504_v31 = vld [vmem:[%s4923_s22 + $0x1cc] sm:$0xf]  ;;  %v3719_v38 = vor.u32 %v4507_v21, %v3718_v20  ;;  %v3727_v41 = vor.u32 %v4508_v26, %v3726_v25  ;;  %v3764_v20 = vld [vmem:[%s4923_s22 + $0x234] sm:$0xf0] }
 0x172   : > { %v5298_v33 = vadd.f32 %v2148_v30, %v2060_v27  ;;  %v1972_v35 = vpop.f32.mrf.mxu1  ;;  %v4503_v27 = vld [vmem:[%s4923_s22 + $0x1c4] sm:$0xf]  ;;  %v3720_v30 = vld [vmem:[%s4923_s22 + $0x1e4] sm:$0xf0] }
 0x173   : > { %v1973_v36 = vadd.f32 %v1972_v35, %v1884_v32  ;;  %v3728_v32 = vld [vmem:[%s4923_s22 + $0x1ec] sm:$0xf0]  ;;  %v3723_v43 = vor.u32 %v4503_v27, %v3720_v30 }
 0x177   : > { %v2061_v49 = vpop.f32.mrf.mxu2 }
 0x178   : > { %v2062_v53 = vadd.f32 %v2061_v49, %v1973_v36  ;;  %v1886_v60 = vpop.f32.mrf.mxu0 }
 0x179   : > { %v2150_v54 = vpop.f32.mrf.mxu3  ;;  %v1887_v1 = vadd.f32 %v5028_v6, %v1886_v60 }
 0x17a   : > { %v5309_v2 = vadd.f32 %v2150_v54, %v2062_v53  ;;  %v1975_v3 = vpop.f32.mrf.mxu1  ;;  %v4658_v54 = vld [vmem:[%s5973_s2 + $0x218] sm:$0xff] }
 0x17b   : > { %v1976_v4 = vadd.f32 %v1975_v3, %v1887_v1  ;;  %2201 = vmatmul.bf16.gmra.mxu0 %v3683_v56 }
 0x17c   : > { %2379 = vmatmul.bf16.gmra.mxu2 %v3691_v59  ;;  %2528 = vmatpush.bf16.msra.mxu0 %v4658_v54 }
 0x17d   : > { %2290 = vmatmul.bf16.gmra.mxu1 %v3687_v62 }
 0x17e   : > { %2468 = vmatmul.bf16.gmra.mxu3 %v3695_v0 }
 0x17f   : > { %v2064_v5 = vpop.f32.mrf.mxu2 }
 0x180   : > { %v2065_v7 = vadd.f32 %v2064_v5, %v1976_v4  ;;  %v1888_v11 = vpop.f32.mrf.mxu0  ;;  %v3754_v5 = vld [vmem:[%s4923_s22 + $0x208] sm:$0xf] }
 0x181   : > { %v2153_v8 = vpop.f32.mrf.mxu3  ;;  %v1889_v14 = vadd.f32 %v5028_v6, %v1888_v11  ;;  %v3731_v6 = vor.u32 %v4504_v31, %v3728_v32  ;;  %v4517_v11 = vld [vmem:[%s4923_s22 + $0x230] sm:$0xf0]  ;;  %v4670_v31 = vld [vmem:[%s5975_s4 + $0x38] sm:$0xff] }
 0x182   : > { %v5312_v16 = vadd.f32 %v2153_v8, %v2065_v7  ;;  %v1977_v17 = vpop.f32.mrf.mxu1  ;;  %v4516_v7 = vld [vmem:[%s4923_s22 + $0x228] sm:$0xf0]  ;;  %v3762_v8 = vld [vmem:[%s4923_s22 + $0x210] sm:$0xf]  ;;  %2729 = vmatpush.bf16.msra.mxu1 %v4670_v31 }
 0x183   : > { %v1978_v18 = vadd.f32 %v1977_v17, %v1889_v14  ;;  %v4512_v14 = vld [vmem:[%s4923_s22 + $0x20c] sm:$0xf]  ;;  %v3756_v17 = vld [vmem:[%s4923_s22 + $0x22c] sm:$0xf0]  ;;  %v3755_v27 = vor.u32 %v4516_v7, %v3754_v5  ;;  %v3763_v30 = vor.u32 %v4517_v11, %v3762_v8  ;;  %v3792_v5 = vld [vmem:[%s4923_s22 + $0x274] sm:$0xf0] }
 0x184   : > { %v4522_v7 = vld [vmem:[%s4923_s22 + $0x25c] sm:$0xf]  ;;  %v3800_v8 = vld [vmem:[%s4923_s22 + $0x27c] sm:$0xf0] }
 0x187   : > { %v2066_v35 = vpop.f32.mrf.mxu2 }
 0x188   : > { %v2067_v36 = vadd.f32 %v2066_v35, %v1978_v18  ;;  %v1891_v42 = vpop.f32.mrf.mxu0  ;;  %v4513_v18 = vld [vmem:[%s4923_s22 + $0x214] sm:$0xf]  ;;  %v3759_v35 = vor.u32 %v4512_v14, %v3756_v17 }
 0x189   : > { %v2155_v37 = vpop.f32.mrf.mxu3  ;;  %v1892_v45 = vadd.f32 %v4777_v44, %v1891_v42 }
 0x18a   : > { %v5325_v48 = vadd.f32 %v2155_v37, %v2067_v36  ;;  %v1980_v49 = vpop.f32.mrf.mxu1  ;;  %v3767_v36 = vor.u32 %v4513_v18, %v3764_v20 }
 0x18b   : > { %v1981_v53 = vadd.f32 %v1980_v49, %v1892_v45  ;;  %2206 = vmatmul.bf16.gmra.mxu0 %v3719_v38 }
 0x18c   : > { %2384 = vmatmul.bf16.gmra.mxu2 %v3727_v41 }
 0x18d   : > { %2295 = vmatmul.bf16.gmra.mxu1 %v3723_v43 }
 0x18e   : > { %2473 = vmatmul.bf16.gmra.mxu3 %v3731_v6 }
 0x18f   : > { %v2069_v56 = vpop.f32.mrf.mxu2 }
 0x190   : > { %v2070_v59 = vadd.f32 %v2069_v56, %v1981_v53  ;;  %v1893_v62 = vpop.f32.mrf.mxu0 }
 0x191   : > { %v2158_v60 = vpop.f32.mrf.mxu3  ;;  %v1894_v0 = vadd.f32 %v4777_v44, %v1893_v62  ;;  %v4525_v62 = vld [vmem:[%s4923_s22 + $0x270] sm:$0xf0] }
 0x192   : > { %v5330_v1 = vadd.f32 %v2158_v60, %v2070_v59  ;;  %v1982_v3 = vpop.f32.mrf.mxu1  ;;  %v3790_v60 = vld [vmem:[%s4923_s22 + $0x250] sm:$0xf] }
 0x193   : > { %v1983_v4 = vadd.f32 %v1982_v3, %v1894_v0  ;;  %v3798_v0 = vld [vmem:[%s4923_s22 + $0x258] sm:$0xf]  ;;  %v4526_v3 = vld [vmem:[%s4923_s22 + $0x278] sm:$0xf0]  ;;  %v3791_v18 = vor.u32 %v4525_v62, %v3790_v60  ;;  %v3828_v60 = vld [vmem:[%s4923_s22 + $0x2bc] sm:$0xf0] }
 0x194   : > { %v3799_v20 = vor.u32 %v4526_v3, %v3798_v0  ;;  %v4531_v62 = vld [vmem:[%s4923_s22 + $0x2a4] sm:$0xf]  ;;  %v3836_v0 = vld [vmem:[%s4923_s22 + $0x2c4] sm:$0xf0] }
 0x197   : > { %v2071_v21 = vpop.f32.mrf.mxu2 }
 0x198   : > { %v2072_v25 = vadd.f32 %v2071_v21, %v1983_v4  ;;  %v1896_v32 = vpop.f32.mrf.mxu0  ;;  %v4521_v4 = vld [vmem:[%s4923_s22 + $0x254] sm:$0xf] }
 0x199   : > { %v2160_v26 = vpop.f32.mrf.mxu3  ;;  %v1897_v37 = vadd.f32 %v4777_v44, %v1896_v32  ;;  %v4657_v32 = vld [vmem:[%s5973_s2 + $0x210] sm:$0xff] }
 0x19a   : > { %v5343_v38 = vadd.f32 %v2160_v26, %v2072_v25  ;;  %v1985_v41 = vpop.f32.mrf.mxu1  ;;  %v3795_v25 = vor.u32 %v4521_v4, %v3792_v5  ;;  %2529 = vmatpush.bf16.msra.mxu0 %v4657_v32 }
 0x19b   : > { %v1986_v42 = vadd.f32 %v1985_v41, %v1897_v37  ;;  %2211 = vmatmul.bf16.gmra.mxu0 %v3755_v27 }
 0x19c   : > { %2389 = vmatmul.bf16.gmra.mxu2 %v3763_v30 }
 0x19d   : > { %2300 = vmatmul.bf16.gmra.mxu1 %v3759_v35 }
 0x19e   : > { %2478 = vmatmul.bf16.gmra.mxu3 %v3767_v36 }
 0x19f   : > { %v2074_v43 = vpop.f32.mrf.mxu2 }
 0x1a0   : > { %v2075_v6 = vadd.f32 %v2074_v43, %v1986_v42  ;;  %v1898_v49 = vpop.f32.mrf.mxu0 }
 0x1a1   : > { %v2163_v45 = vpop.f32.mrf.mxu3  ;;  %v1899_v53 = vadd.f32 %v4777_v44, %v1898_v49  ;;  %v3803_v44 = vor.u32 %v4522_v7, %v3800_v8  ;;  %v4534_v49 = vld [vmem:[%s4923_s22 + $0x2b8] sm:$0xf0] }
 0x1a2   : > { %v5345_v54 = vadd.f32 %v2163_v45, %v2075_v6  ;;  %v1987_v56 = vpop.f32.mrf.mxu1  ;;  %v3826_v45 = vld [vmem:[%s4923_s22 + $0x298] sm:$0xf] }
 0x1a3   : > { %v1988_v59 = vadd.f32 %v1987_v56, %v1899_v53  ;;  %v3834_v53 = vld [vmem:[%s4923_s22 + $0x2a0] sm:$0xf]  ;;  %v4535_v56 = vld [vmem:[%s4923_s22 + $0x2c0] sm:$0xf0]  ;;  %v3827_v7 = vor.u32 %v4534_v49, %v3826_v45  ;;  %v3864_v45 = vld [vmem:[%s4923_s22 + $0x304] sm:$0xf0] }
 0x1a4   : > { %v3835_v8 = vor.u32 %v4535_v56, %v3834_v53  ;;  %v4540_v49 = vld [vmem:[%s4923_s22 + $0x2ec] sm:$0xf]  ;;  %v3872_v53 = vld [vmem:[%s4923_s22 + $0x30c] sm:$0xf0] }
 0x1a7   : > { %v2076_v11 = vpop.f32.mrf.mxu2 }
 0x1a8   : > { %v2077_v14 = vadd.f32 %v2076_v11, %v1988_v59  ;;  %v2177_v21 = vpop.f32.mrf.mxu0  ;;  %v4530_v59 = vld [vmem:[%s4923_s22 + $0x29c] sm:$0xf] }
 0x1a9   : > { %v2165_v17 = vpop.f32.mrf.mxu3  ;;  %v2178_v27 = vadd.f32 %v2177_v21, %v5043_v29 }
 0x1aa   : > { %v5355_v26 = vadd.f32 %v2165_v17, %v2077_v14  ;;  %v2266_v30 = vpop.f32.mrf.mxu1  ;;  %v3831_v14 = vor.u32 %v4530_v59, %v3828_v60  ;;  %v3839_v17 = vor.u32 %v4531_v62, %v3836_v0 }
 0x1ab   : > { %v2267_v31 = vadd.f32 %v2266_v30, %v2178_v27  ;;  %2216 = vmatmul.bf16.gmra.mxu0 %v3791_v18 }
 0x1ac   : > { %2394 = vmatmul.bf16.gmra.mxu2 %v3799_v20 }
 0x1ad   : > { %2305 = vmatmul.bf16.gmra.mxu1 %v3795_v25 }
 0x1ae   : > { %2483 = vmatmul.bf16.gmra.mxu3 %v3803_v44 }
 0x1af   : > { %v2355_v29 = vpop.f32.mrf.mxu2 }
 0x1b0   : > { %v2356_v35 = vadd.f32 %v2355_v29, %v2267_v31  ;;  %v2179_v37 = vpop.f32.mrf.mxu0 }
 0x1b1   : > { %v2444_v36 = vpop.f32.mrf.mxu3  ;;  %v2180_v41 = vadd.f32 %v2179_v37, %v5057_v50  ;;  %v4669_v50 = vld [vmem:[%s5975_s4 + $0x30] sm:$0xff]  ;;  %v4543_v37 = vld [vmem:[%s4923_s22 + $0x300] sm:$0xf0] }
 0x1b2   : > { %v5362_v42 = vadd.f32 %v2444_v36, %v2356_v35  ;;  %v2268_v43 = vpop.f32.mrf.mxu1  ;;  %2730 = vmatpush.bf16.msra.mxu1 %v4669_v50  ;;  %v3862_v36 = vld [vmem:[%s4923_s22 + $0x2e0] sm:$0xf] }
 0x1b3   : > { %v2269_v6 = vadd.f32 %v2268_v43, %v2180_v41  ;;  %v3870_v41 = vld [vmem:[%s4923_s22 + $0x2e8] sm:$0xf]  ;;  %v4544_v43 = vld [vmem:[%s4923_s22 + $0x308] sm:$0xf0]  ;;  %v3863_v62 = vor.u32 %v4543_v37, %v3862_v36  ;;  %v3900_v36 = vld [vmem:[%s4923_s22 + $0x34c] sm:$0xf0] }
 0x1b4   : > { %v3871_v0 = vor.u32 %v4544_v43, %v3870_v41  ;;  %v4549_v37 = vld [vmem:[%s4923_s22 + $0x334] sm:$0xf]  ;;  %v3908_v41 = vld [vmem:[%s4923_s22 + $0x354] sm:$0xf0] }
 0x1b7   : > { %v2357_v3 = vpop.f32.mrf.mxu2 }
 0x1b8   : > { %v2358_v4 = vadd.f32 %v2357_v3, %v2269_v6  ;;  %v2182_v11 = vpop.f32.mrf.mxu0  ;;  %v4539_v6 = vld [vmem:[%s4923_s22 + $0x2e4] sm:$0xf] }
 0x1b9   : > { %v2446_v5 = vpop.f32.mrf.mxu3  ;;  %v2183_v18 = vadd.f32 %v2182_v11, %v5060_v58  ;;  %v4656_v11 = vld [vmem:[%s5973_s2 + $0x208] sm:$0xff] }
 0x1ba   : > { %v5376_v20 = vadd.f32 %v2446_v5, %v2358_v4  ;;  %v2271_v21 = vpop.f32.mrf.mxu1  ;;  %v3867_v4 = vor.u32 %v4539_v6, %v3864_v45  ;;  %2530 = vmatpush.bf16.msra.mxu0 %v4656_v11 }
 0x1bb   : > { %v2272_v25 = vadd.f32 %v2271_v21, %v2183_v18  ;;  %2221 = vmatmul.bf16.gmra.mxu0 %v3827_v7 }
 0x1bc   : > { %2399 = vmatmul.bf16.gmra.mxu2 %v3835_v8 }
 0x1bd   : > { %2310 = vmatmul.bf16.gmra.mxu1 %v3831_v14 }
 0x1be   : > { %2488 = vmatmul.bf16.gmra.mxu3 %v3839_v17 }
 0x1bf   : > { %v2360_v44 = vpop.f32.mrf.mxu2 }
 0x1c0   : > { %v2361_v27 = vadd.f32 %v2360_v44, %v2272_v25  ;;  %v2184_v30 = vpop.f32.mrf.mxu0 }
 0x1c1   : > { %v2449_v58 = vpop.f32.mrf.mxu3  ;;  %v2185_v31 = vadd.f32 %v2184_v30, %v5071_v15  ;;  %v3875_v15 = vor.u32 %v4540_v49, %v3872_v53  ;;  %v4552_v30 = vld [vmem:[%s4923_s22 + $0x348] sm:$0xf0] }
 0x1c2   : > { %v5379_v32 = vadd.f32 %v2449_v58, %v2361_v27  ;;  %v2273_v29 = vpop.f32.mrf.mxu1  ;;  %v3898_v58 = vld [vmem:[%s4923_s22 + $0x328] sm:$0xf] }
 0x1c3   : > { %v2274_v35 = vadd.f32 %v2273_v29, %v2185_v31  ;;  %v3906_v31 = vld [vmem:[%s4923_s22 + $0x330] sm:$0xf]  ;;  %v4553_v29 = vld [vmem:[%s4923_s22 + $0x350] sm:$0xf0]  ;;  %v3899_v49 = vor.u32 %v4552_v30, %v3898_v58  ;;  %v3936_v58 = vld [vmem:[%s4923_s22 + $0x394] sm:$0xf0] }
 0x1c4   : > { %v3907_v53 = vor.u32 %v4553_v29, %v3906_v31  ;;  %v4558_v30 = vld [vmem:[%s4923_s22 + $0x37c] sm:$0xf]  ;;  %v3944_v31 = vld [vmem:[%s4923_s22 + $0x39c] sm:$0xf0] }
 0x1c7   : > { %v2362_v56 = vpop.f32.mrf.mxu2 }
 0x1c8   : > { %v2363_v59 = vadd.f32 %v2362_v56, %v2274_v35  ;;  %v2187_v3 = vpop.f32.mrf.mxu0  ;;  %v4548_v35 = vld [vmem:[%s4923_s22 + $0x32c] sm:$0xf] }
 0x1c9   : > { %v2451_v60 = vpop.f32.mrf.mxu3  ;;  %v2188_v5 = vadd.f32 %v2187_v3, %v5077_v24 }
 0x1ca   : > { %v5390_v7 = vadd.f32 %v2451_v60, %v2363_v59  ;;  %v2276_v8 = vpop.f32.mrf.mxu1  ;;  %v3903_v59 = vor.u32 %v4548_v35, %v3900_v36  ;;  %v3911_v60 = vor.u32 %v4549_v37, %v3908_v41 }
 0x1cb   : > { %v2277_v50 = vadd.f32 %v2276_v8, %v2188_v5  ;;  %2226 = vmatmul.bf16.gmra.mxu0 %v3863_v62 }
 0x1cc   : > { %2404 = vmatmul.bf16.gmra.mxu2 %v3871_v0 }
 0x1cd   : > { %2315 = vmatmul.bf16.gmra.mxu1 %v3867_v4 }
 0x1ce   : > { %2493 = vmatmul.bf16.gmra.mxu3 %v3875_v15 }
 0x1cf   : > { %v2365_v24 = vpop.f32.mrf.mxu2 }
 0x1d0   : > { %v2366_v14 = vadd.f32 %v2365_v24, %v2277_v50  ;;  %v2189_v18 = vpop.f32.mrf.mxu0 }
 0x1d1   : > { %v2454_v17 = vpop.f32.mrf.mxu3  ;;  %v2190_v21 = vadd.f32 %v2189_v18, %v5091_v46  ;;  %v4668_v46 = vld [vmem:[%s5975_s4 + $0x28] sm:$0xff]  ;;  %v4561_v18 = vld [vmem:[%s4923_s22 + $0x390] sm:$0xf0] }
 0x1d2   : > { %v5396_v25 = vadd.f32 %v2454_v17, %v2366_v14  ;;  %v2278_v44 = vpop.f32.mrf.mxu1  ;;  %2731 = vmatpush.bf16.msra.mxu1 %v4668_v46  ;;  %v3934_v17 = vld [vmem:[%s4923_s22 + $0x370] sm:$0xf] }
 0x1d3   : > { %v2279_v27 = vadd.f32 %v2278_v44, %v2190_v21  ;;  %v3942_v21 = vld [vmem:[%s4923_s22 + $0x378] sm:$0xf]  ;;  %v4562_v44 = vld [vmem:[%s4923_s22 + $0x398] sm:$0xf0]  ;;  %v3935_v37 = vor.u32 %v4561_v18, %v3934_v17  ;;  %v4667_v17 = vld [vmem:[%s5975_s4 + $0x20] sm:$0xff] }
 0x1d4   : > { %v3943_v41 = vor.u32 %v4562_v44, %v3942_v21 }
 0x1d6   : > { %2732 = vmatpush.bf16.msra.mxu1 %v4667_v17  ;;  %v4044_v17 = vld [vmem:[%s4923_s22 + $0x46c] sm:$0xf0] }
 0x1d7   : > { %v2367_v43 = vpop.f32.mrf.mxu2 }
 0x1d8   : > { %v2368_v6 = vadd.f32 %v2367_v43, %v2279_v27  ;;  %v2192_v56 = vpop.f32.mrf.mxu0  ;;  %v4557_v27 = vld [vmem:[%s4923_s22 + $0x374] sm:$0xf] }
 0x1d9   : > { %v2456_v45 = vpop.f32.mrf.mxu3  ;;  %v2193_v62 = vadd.f32 %v2192_v56, %v5094_v55  ;;  %v4655_v56 = vld [vmem:[%s5973_s2 + $0x200] sm:$0xff] }
 0x1da   : > { %v5410_v0 = vadd.f32 %v2456_v45, %v2368_v6  ;;  %v2281_v3 = vpop.f32.mrf.mxu1  ;;  %v3947_v6 = vor.u32 %v4558_v30, %v3944_v31  ;;  %2531 = vmatpush.bf16.msra.mxu0 %v4655_v56 }
 0x1db   : > { %v2282_v4 = vadd.f32 %v2281_v3, %v2193_v62  ;;  %2231 = vmatmul.bf16.gmra.mxu0 %v3899_v49  ;;  %v3970_v62 = vld [vmem:[%s4923_s22 + $0x3b8] sm:$0xf]  ;;  %v4570_v3 = vld [vmem:[%s4923_s22 + $0x3d8] sm:$0xf0] }
 0x1dc   : > { %2409 = vmatmul.bf16.gmra.mxu2 %v3907_v53 }
 0x1dd   : > { %2320 = vmatmul.bf16.gmra.mxu1 %v3903_v59 }
 0x1de   : > { %2498 = vmatmul.bf16.gmra.mxu3 %v3911_v60 }
 0x1df   : > { %v2370_v15 = vpop.f32.mrf.mxu2 }
 0x1e0   : > { %v2371_v5 = vadd.f32 %v2370_v15, %v2282_v4  ;;  %v2194_v8 = vpop.f32.mrf.mxu0  ;;  %v3978_v4 = vld [vmem:[%s4923_s22 + $0x3c0] sm:$0xf]  ;;  %v4571_v15 = vld [vmem:[%s4923_s22 + $0x3e0] sm:$0xf0] }
 0x1e1   : > { %v2459_v55 = vpop.f32.mrf.mxu3  ;;  %v2195_v50 = vadd.f32 %v2194_v8, %v5105_v13  ;;  %v3939_v13 = vor.u32 %v4557_v27, %v3936_v58  ;;  %v4567_v8 = vld [vmem:[%s4923_s22 + $0x3c4] sm:$0xf] }
 0x1e2   : > { %v5413_v11 = vadd.f32 %v2459_v55, %v2371_v5  ;;  %v2283_v24 = vpop.f32.mrf.mxu1  ;;  %v4566_v5 = vld [vmem:[%s4923_s22 + $0x3bc] sm:$0xf]  ;;  %v3972_v55 = vld [vmem:[%s4923_s22 + $0x3dc] sm:$0xf0] }
 0x1e3   : > { %v2284_v14 = vadd.f32 %v2283_v24, %v2195_v50  ;;  %v3980_v50 = vld [vmem:[%s4923_s22 + $0x3e4] sm:$0xf0]  ;;  %v3971_v24 = vor.u32 %v4570_v3, %v3970_v62  ;;  %v3975_v18 = vor.u32 %v4566_v5, %v3972_v55 }
 0x1e4   : > { %v3983_v21 = vor.u32 %v4567_v8, %v3980_v50  ;;  %v4042_v8 = vld [vmem:[%s4923_s22 + $0x448] sm:$0xf]  ;;  %v4588_v50 = vld [vmem:[%s4923_s22 + $0x468] sm:$0xf0] }
 0x1e7   : > { %v2372_v29 = vpop.f32.mrf.mxu2 }
 0x1e8   : > { %v2373_v35 = vadd.f32 %v2372_v29, %v2284_v14  ;;  %v2197_v43 = vpop.f32.mrf.mxu0  ;;  %v3979_v14 = vor.u32 %v4571_v15, %v3978_v4 }
 0x1e9   : > { %v2461_v36 = vpop.f32.mrf.mxu3  ;;  %v2198_v45 = vadd.f32 %v2197_v43, %v5123_v28  ;;  %v4008_v43 = vld [vmem:[%s4923_s22 + $0x424] sm:$0xf0] }
 0x1ea   : > { %v5424_v49 = vadd.f32 %v2461_v36, %v2373_v35  ;;  %v2286_v53 = vpop.f32.mrf.mxu1  ;;  %v4006_v35 = vld [vmem:[%s4923_s22 + $0x400] sm:$0xf]  ;;  %v4579_v36 = vld [vmem:[%s4923_s22 + $0x420] sm:$0xf0] }
 0x1eb   : > { %v5426_v46 = vadd.f32 %v2286_v53, %v2198_v45  ;;  %2236 = vmatmul.bf16.gmra.mxu0 %v3935_v37  ;;  %v4580_v37 = vld [vmem:[%s4923_s22 + $0x428] sm:$0xf0]  ;;  %v4007_v45 = vor.u32 %v4579_v36, %v4006_v35 }
 0x1ec   : > { %2414 = vmatmul.bf16.gmra.mxu2 %v3943_v41  ;;  %v4575_v41 = vld [vmem:[%s4923_s22 + $0x404] sm:$0xf] }
 0x1ed   : > { %2325 = vmatmul.bf16.gmra.mxu1 %v3939_v13  ;;  %v4576_v13 = vld [vmem:[%s4923_s22 + $0x40c] sm:$0xf] }
 0x1ee   : > { %2503 = vmatmul.bf16.gmra.mxu3 %v3947_v6  ;;  %v4016_v6 = vld [vmem:[%s4923_s22 + $0x42c] sm:$0xf0] }
 0x1f0   : > { %v2199_v28 = vpop.f32.mrf.mxu0 }
 0x1f1   : > { %v5432_v59 = vadd.f32 %v2199_v28, %v5149_v57  ;;  %v4011_v28 = vor.u32 %v4575_v41, %v4008_v43 }
 0x1f2   : > { %v5434_v60 = vpop.f32.mrf.mxu1 }
 0x1f8   : > { %v2202_v57 = vpop.f32.mrf.mxu0 }
 0x1f9   : > { %v2203_v44 = vadd.f32 %v2202_v57, %v5170_v9  ;;  %v4014_v9 = vld [vmem:[%s4923_s22 + $0x408] sm:$0xf]  ;;  %v4585_v57 = vld [vmem:[%s4923_s22 + $0x454] sm:$0xf] }
 0x1fa   : > { %v2291_v27 = vpop.f32.mrf.mxu1  ;;  %v4015_v53 = vor.u32 %v4580_v37, %v4014_v9 }
 0x1fb   : > { %v5448_v58 = vadd.f32 %v2291_v27, %v2203_v44  ;;  %2241 = vmatmul.bf16.gmra.mxu0 %v3971_v24  ;;  %v4050_v24 = vld [vmem:[%s4923_s22 + $0x450] sm:$0xf]  ;;  %v4666_v27 = vld [vmem:[%s5975_s4 + $0x18] sm:$0xff] }
 0x1fc   : > { %2419 = vmatmul.bf16.gmra.mxu2 %v3979_v14  ;;  %v4589_v14 = vld [vmem:[%s4923_s22 + $0x470] sm:$0xf0]  ;;  %2733 = vmatpush.bf16.msra.mxu1 %v4666_v27 }
 0x1fd   : > { %2330 = vmatmul.bf16.gmra.mxu1 %v3975_v18  ;;  %v4052_v18 = vld [vmem:[%s4923_s22 + $0x474] sm:$0xf0]  ;;  %v4051_v44 = vor.u32 %v4589_v14, %v4050_v24 }
 0x1fe   : > { %2508 = vmatmul.bf16.gmra.mxu3 %v3983_v21  ;;  %v4043_v21 = vor.u32 %v4588_v50, %v4042_v8  ;;  %v4055_v35 = vor.u32 %v4585_v57, %v4052_v18  ;;  %v4464_v57 = vld [vmem:[%s4923_s22 + $0x88] sm:$0xf0] }
 0x200   : > { %v2204_v30 = vpop.f32.mrf.mxu0 }
 0x201   : > { %v5451_v31 = vadd.f32 %v2204_v30, %v5199_v40  ;;  %v4019_v40 = vor.u32 %v4576_v13, %v4016_v6  ;;  %v4438_v6 = vld [vmem:[%s5977_s6 + $0x70] sm:$0xf] }
 0x202   : > { %v5453_v29 = vpop.f32.mrf.mxu1 }
 0x208   : > { %v2207_v56 = vpop.f32.mrf.mxu0 }
 0x209   : > { %v2208_v62 = vadd.f32 %v2207_v56, %v5205_v51  ;;  %v4584_v51 = vld [vmem:[%s4923_s22 + $0x44c] sm:$0xf] }
 0x20a   : > { %v2296_v3 = vpop.f32.mrf.mxu1 }
 0x20b   : > { %v5464_v4 = vadd.f32 %v2296_v3, %v2208_v62  ;;  %2246 = vmatmul.bf16.gmra.mxu0 %v4007_v45  ;;  %v3518_v45 = vld [vmem:[%s4923_s22 + $0x20] sm:$0xf] }
 0x20c   : > { %2424 = vmatmul.bf16.gmra.mxu2 %v4015_v53  ;;  %v4455_v53 = vld [vmem:[%s4923_s22 + $0x40] sm:$0xf0] }
 0x20d   : > { %2335 = vmatmul.bf16.gmra.mxu1 %v4011_v28  ;;  %v3519_v28 = vor.u32 %v4455_v53, %v3518_v45  ;;  %v4432_v45 = vld [vmem:[%s5977_s6 + $0x68] sm:$0xf0] }
 0x20e   : > { %2513 = vmatmul.bf16.gmra.mxu3 %v4019_v40  ;;  %v4440_v40 = vld [vmem:[%s5977_s6 + $0x78] sm:$0xf0] }
 0x210   : > { %v2209_v15 = vpop.f32.mrf.mxu0 }
 0x211   : > { %v5467_v5 = vadd.f32 %v2209_v15, %v5216_v12  ;;  %v4047_v12 = vor.u32 %v4584_v51, %v4044_v17  ;;  %v3554_v17 = vld [vmem:[%s4923_s22 + $0x68] sm:$0xf] }
 0x212   : > { %v5469_v55 = vpop.f32.mrf.mxu1  ;;  %v3555_v18 = vor.u32 %v4464_v57, %v3554_v17 }
 0x218   : > { %v2212_v30 = vpop.f32.mrf.mxu0 }
 0x219   : > { %v2213_v36 = vadd.f32 %v2212_v30, %v5219_v22  ;;  %v4686_v22 = vld [vmem:[%s5977_s6 + $0x74] sm:$0xf0] }
 0x21a   : > { %v2301_v9 = vpop.f32.mrf.mxu1  ;;  %v4439_v56 = vor.u32 %v4686_v22, %v4438_v6 }
 0x21b   : > { %v5483_v37 = vadd.f32 %v2301_v9, %v2213_v36  ;;  %2251 = vmatmul.bf16.gmra.mxu0 %v4043_v21  ;;  %v4430_v36 = vld [vmem:[%s5977_s6 + $0x60] sm:$0xf]  ;;  %v4684_v9 = vld [vmem:[%s5977_s6 + $0x64] sm:$0xf0] }
 0x21c   : > { %2429 = vmatmul.bf16.gmra.mxu2 %v4051_v44  ;;  %v4431_v6 = vor.u32 %v4684_v9, %v4430_v36  ;;  %v4682_v36 = vld [vmem:[%s5977_s6 + $0x54] sm:$0xf0]  ;;  %v4491_v9 = vld [vmem:[%s4923_s22 + $0x160] sm:$0xf0] }
 0x21d   : > { %2340 = vmatmul.bf16.gmra.mxu1 %v4047_v12  ;;  %3064 = vmatpush.bf16.msra.mxu2 %v4439_v56 }
 0x21e   : > { %2518 = vmatmul.bf16.gmra.mxu3 %v4055_v35 }
 0x220   : > { %v2214_v41 = vpop.f32.mrf.mxu0 }
 0x221   : > { %v5486_v43 = vadd.f32 %v2214_v41, %v5230_v47  ;;  %v4685_v47 = vld [vmem:[%s5977_s6 + $0x74] sm:$0xf]  ;;  %3065 = vmatpush.bf16.msra.mxu2 %v4431_v6  ;;  %v4424_v6 = vld [vmem:[%s5977_s6 + $0x58] sm:$0xf0] }
 0x222   : > { %v5488_v13 = vpop.f32.mrf.mxu1  ;;  %v4443_v3 = vor.u32 %v4685_v47, %v4440_v40  ;;  %v4473_v41 = vld [vmem:[%s4923_s22 + $0xd0] sm:$0xf0] }
 0x224   : > { %3153 = vmatpush.bf16.msra.mxu3 %v4443_v3 }
 0x228   : > { %v2217_v62 = vpop.f32.mrf.mxu0 }
 0x229   : > { %v2218_v15 = vadd.f32 %v2217_v62, %v5236_v61  ;;  %v4665_v61 = vld [vmem:[%s5975_s4 + $0x10] sm:$0xff] }
 0x22a   : > { %v2306_v8 = vpop.f32.mrf.mxu1  ;;  %2734 = vmatpush.bf16.msra.mxu1 %v4665_v61 }
 0x22b   : > { %v5505_v50 = vadd.f32 %v2306_v8, %v2218_v15  ;;  %2532 = vmatmul.bf16.vlgmr.msra.gmra.mxu0 %v3519_v28  ;;  %v3626_v8 = vld [vmem:[%s4923_s22 + $0xf8] sm:$0xf] }
 0x230   : > { %v2219_v24 = vpop.f32.mrf.mxu0 }
 0x231   : > { %v5508_v14 = vadd.f32 %v2219_v24, %v5247_v23  ;;  %v4482_v24 = vld [vmem:[%s4923_s22 + $0x118] sm:$0xf0] }
 0x232   : > { %v5510_v51 = vpop.f32.mrf.mxu1  ;;  %v3627_v17 = vor.u32 %v4482_v24, %v3626_v8  ;;  %v3698_v8 = vld [vmem:[%s4923_s22 + $0x188] sm:$0xf]  ;;  %v4500_v24 = vld [vmem:[%s4923_s22 + $0x1a8] sm:$0xf0] }
 0x238   : > { %v2222_v21 = vpop.f32.mrf.mxu0 }
 0x239   : > { %v2223_v44 = vadd.f32 %v2222_v21, %v5250_v34  ;;  %v3590_v34 = vld [vmem:[%s4923_s22 + $0xb0] sm:$0xf] }
 0x23a   : > { %v2311_v27 = vpop.f32.mrf.mxu1  ;;  %v3591_v22 = vor.u32 %v4473_v41, %v3590_v34 }
 0x23b   : > { %v5518_v30 = vadd.f32 %v2311_v27, %v2223_v44  ;;  %2537 = vmatmul.bf16.gmra.mxu0 %v3555_v18 }
 0x240   : > { %v2224_v23 = vpop.f32.mrf.mxu0 }
 0x241   : > { %v5521_v12 = vadd.f32 %v2224_v23, %v5261_v63  ;;  %v4683_v63 = vld [vmem:[%s5977_s6 + $0x64] sm:$0xf]  ;;  %v4422_v23 = vld [vmem:[%s5977_s6 + $0x50] sm:$0xf] }
 0x242   : > { %v5523_v35 = vpop.f32.mrf.mxu1  ;;  %v4435_v56 = vor.u32 %v4683_v63, %v4432_v45  ;;  %v4423_v34 = vor.u32 %v4682_v36, %v4422_v23  ;;  %v4414_v36 = vld [vmem:[%s5977_s6 + $0x40] sm:$0xf] }
 0x244   : > { %3154 = vmatpush.bf16.msra.mxu3 %v4435_v56  ;;  %3066 = vmatpush.bf16.msra.mxu2 %v4423_v34 }
 0x248   : > { %v2227_v53 = vpop.f32.mrf.mxu0 }
 0x249   : > { %v2228_v28 = vadd.f32 %v2227_v53, %v5267_v10  ;;  %v4664_v10 = vld [vmem:[%s5975_s4 + $0x8] sm:$0xff] }
 0x24a   : > { %v2316_v47 = vpop.f32.mrf.mxu1  ;;  %2735 = vmatpush.bf16.msra.mxu1 %v4664_v10 }
 0x24b   : > { %v5540_v40 = vadd.f32 %v2316_v47, %v2228_v28  ;;  %2542 = vmatmul.bf16.gmra.mxu0 %v3591_v22 }
 0x250   : > { %v2229_v62 = vpop.f32.mrf.mxu0 }
 0x251   : > { %v5543_v3 = vadd.f32 %v2229_v62, %v5278_v39 }
 0x252   : > { %v5545_v15 = vpop.f32.mrf.mxu1 }
 0x258   : > { %v2232_v57 = vpop.f32.mrf.mxu0 }
 0x259   : > { %v2233_v18 = vadd.f32 %v2232_v57, %v5281_v52  ;;  %v3662_v52 = vld [vmem:[%s4923_s22 + $0x140] sm:$0xf] }
 0x25a   : > { %v2321_v61 = vpop.f32.mrf.mxu1  ;;  %v3663_v41 = vor.u32 %v4491_v9, %v3662_v52  ;;  %v4680_v52 = vld [vmem:[%s5977_s6 + $0x44] sm:$0xf0]  ;;  %v4509_v9 = vld [vmem:[%s4923_s22 + $0x1f0] sm:$0xf0] }
 0x25b   : > { %v5553_v21 = vadd.f32 %v2321_v61, %v2233_v18  ;;  %2547 = vmatmul.bf16.gmra.mxu0 %v3627_v17  ;;  %v3699_v17 = vor.u32 %v4500_v24, %v3698_v8  ;;  %v4415_v34 = vor.u32 %v4680_v52, %v4414_v36 }
 0x25d   : > { %3067 = vmatpush.bf16.msra.mxu2 %v4415_v34  ;;  %v4527_v34 = vld [vmem:[%s4923_s22 + $0x280] sm:$0xf0] }
 0x260   : > { %v2234_v39 = vpop.f32.mrf.mxu0 }
 0x261   : > { %v5556_v44 = vadd.f32 %v2234_v39, %v5292_v19  ;;  %v4681_v19 = vld [vmem:[%s5977_s6 + $0x54] sm:$0xf] }
 0x262   : > { %v5558_v27 = vpop.f32.mrf.mxu1  ;;  %v4427_v63 = vor.u32 %v4681_v19, %v4424_v6  ;;  %v4416_v19 = vld [vmem:[%s5977_s6 + $0x48] sm:$0xf0] }
 0x264   : > { %3155 = vmatpush.bf16.msra.mxu3 %v4427_v63 }
 0x268   : > { %v2237_v22 = vpop.f32.mrf.mxu0 }
 0x269   : > { %v2238_v45 = vadd.f32 %v2237_v22, %v5298_v33  ;;  %v4663_v33 = vld [vmem:[%s5975_s4] sm:$0xff] }
 0x26a   : > { %v2326_v53 = vpop.f32.mrf.mxu1  ;;  %2736 = vmatpush.bf16.msra.mxu1 %v4663_v33  ;;  %v4518_v33 = vld [vmem:[%s4923_s22 + $0x238] sm:$0xf0] }
 0x26b   : > { %v5575_v56 = vadd.f32 %v2326_v53, %v2238_v45  ;;  %2552 = vmatmul.bf16.gmra.mxu0 %v3663_v41 }
 0x270   : > { %v2239_v28 = vpop.f32.mrf.mxu0 }
 0x271   : > { %v5578_v47 = vadd.f32 %v2239_v28, %v5309_v2 }
 0x272   : > { %v5580_v62 = vpop.f32.mrf.mxu1 }
 0x278   : > { %v2242_v10 = vpop.f32.mrf.mxu0 }
 0x279   : > { %v2243_v57 = vadd.f32 %v2242_v10, %v5312_v16  ;;  %v3734_v16 = vld [vmem:[%s4923_s22 + $0x1d0] sm:$0xf] }
 0x27a   : > { %v2331_v18 = vpop.f32.mrf.mxu1  ;;  %v3735_v41 = vor.u32 %v4509_v9, %v3734_v16  ;;  %v4678_v16 = vld [vmem:[%s5977_s6 + $0x34] sm:$0xf0]  ;;  %v3806_v9 = vld [vmem:[%s4923_s22 + $0x260] sm:$0xf] }
 0x27b   : > { %v5588_v61 = vadd.f32 %v2331_v18, %v2243_v57  ;;  %2557 = vmatmul.bf16.gmra.mxu0 %v3699_v17  ;;  %v3770_v17 = vld [vmem:[%s4923_s22 + $0x218] sm:$0xf] }
 0x27c   : > { %v3771_v10 = vor.u32 %v4518_v33, %v3770_v17 }
 0x280   : > { %v2244_v2 = vpop.f32.mrf.mxu0 }
 0x281   : > { %v5591_v39 = vadd.f32 %v2244_v2, %v5325_v48  ;;  %v4679_v48 = vld [vmem:[%s5977_s6 + $0x44] sm:$0xf] }
 0x282   : > { %v5593_v23 = vpop.f32.mrf.mxu1  ;;  %v4419_v22 = vor.u32 %v4679_v48, %v4416_v19  ;;  %v4408_v48 = vld [vmem:[%s5977_s6 + $0x38] sm:$0xf0] }
 0x284   : > { %3156 = vmatpush.bf16.msra.mxu3 %v4419_v22 }
 0x288   : > { %v2247_v6 = vpop.f32.mrf.mxu0 }
 0x289   : > { %v2248_v63 = vadd.f32 %v2247_v6, %v5330_v1 }
 0x28a   : > { %v2336_v45 = vpop.f32.mrf.mxu1 }
 0x28b   : > { %v5610_v53 = vadd.f32 %v2336_v45, %v2248_v63  ;;  %2562 = vmatmul.bf16.gmra.mxu0 %v3735_v41  ;;  %v3807_v41 = vor.u32 %v4527_v34, %v3806_v9 }
 0x290   : > { %v2249_v28 = vpop.f32.mrf.mxu0 }
 0x291   : > { %v5613_v8 = vadd.f32 %v2249_v28, %v5343_v38  ;;  %v4406_v38 = vld [vmem:[%s5977_s6 + $0x30] sm:$0xf]  ;;  %v5641_v28 = vpop.f32.mrf.mxu2 }
 0x292   : > { %v5615_v24 = vpop.f32.mrf.mxu1 }
 0x298   : > { %v2252_v57 = vpop.f32.mrf.mxu0 }
 0x299   : > { %v2253_v18 = vadd.f32 %v2252_v57, %v5345_v54  ;;  %v4407_v54 = vor.u32 %v4678_v16, %v4406_v38  ;;  %v4536_v57 = vld [vmem:[%s4923_s22 + $0x2c8] sm:$0xf0]  ;;  %v5647_v16 = vpop.f32.mrf.mxu2 }
 0x29a   : > { %v2341_v1 = vpop.f32.mrf.mxu1 }
 0x29b   : > { %v5620_v2 = vadd.f32 %v2341_v1, %v2253_v18  ;;  %2567 = vmatmul.bf16.gmra.mxu0 %v3771_v10  ;;  %3068 = vmatpush.bf16.msra.mxu2 %v4407_v54  ;;  %v3842_v10 = vld [vmem:[%s4923_s22 + $0x2a8] sm:$0xf]  ;;  %v5645_v1 = vpop.f32.mrf.mxu3 }
 0x2a0   : > { %v2254_v36 = vpop.f32.mrf.mxu0 }
 0x2a1   : > { %v5623_v52 = vadd.f32 %v2254_v36, %v5355_v26  ;;  %v4677_v26 = vld [vmem:[%s5977_s6 + $0x34] sm:$0xf]  ;;  %v3843_v36 = vor.u32 %v4536_v57, %v3842_v10 }
 0x2a2   : > { %v4411_v6 = vor.u32 %v4677_v26, %v4408_v48  ;;  %v4398_v26 = vld [vmem:[%s5977_s6 + $0x20] sm:$0xf]  ;;  %v4676_v48 = vld [vmem:[%s5977_s6 + $0x24] sm:$0xf0] }
 0x2a4   : > { %3157 = vmatpush.bf16.msra.mxu3 %v4411_v6  ;;  %v4545_v6 = vld [vmem:[%s4923_s22 + $0x310] sm:$0xf0] }
 0x2a8   : > { %v2533_v19 = vpop.f32.mrf.mxu0 }
 0x2a9   : > { %v2534_v22 = vadd.f32 %v2533_v19, %v5362_v42  ;;  %v3878_v19 = vld [vmem:[%s4923_s22 + $0x2f0] sm:$0xf] }
 0x2ab   : > { %2572 = vmatmul.bf16.gmra.mxu0 %v3807_v41  ;;  %v2613_v17 = vmax.f32 %v2534_v22, 0.0  ;;  %v4399_v22 = vor.u32 %v4676_v48, %v4398_v26  ;;  %v4554_v26 = vld [vmem:[%s4923_s22 + $0x358] sm:$0xf0] }
 0x2ad   : > { %3069 = vmatpush.bf16.msra.mxu2 %v4399_v22 }
 0x2b0   : > { %v2535_v63 = vpop.f32.mrf.mxu0 }
 0x2b1   : > { %v2536_v45 = vadd.f32 %v2535_v63, %v5376_v20  ;;  %v5650_v20 = vpop.f32.mrf.mxu3 }
 0x2b3   : > { %v2614_v33 = vmax.f32 %v2536_v45, 0.0  ;;  %v4675_v45 = vld [vmem:[%s5977_s6 + $0x24] sm:$0xf] }
 0x2b5   : > { %v2645_v18 = vpack.c.bf16 %v2614_v33, %v2613_v17  ;;  %v4400_v17 = vld [vmem:[%s5977_s6 + $0x28] sm:$0xf0] }
 0x2b6   : > { %v4403_v10 = vor.u32 %v4675_v45, %v4400_v17 }
 0x2b7   : > { %2737 = vmatmul.bf16.vlgmr.msra.gmra.mxu1 %v2645_v18 }
 0x2b8   : > { %v2538_v38 = vpop.f32.mrf.mxu0  ;;  %3158 = vmatpush.bf16.msra.mxu3 %v4403_v10  ;;  %v3950_v10 = vld [vmem:[%s4923_s22 + $0x380] sm:$0xf] }
 0x2b9   : > { %v2539_v42 = vadd.f32 %v2538_v38, %v5379_v32  ;;  %v5661_v32 = vpop.f32.mrf.mxu2  ;;  %v5669_v57 = vpop.f32.mrf.mxu3 }
 0x2bb   : > { %2577 = vmatmul.bf16.gmra.mxu0 %v3843_v36  ;;  %v2615_v54 = vmax.f32 %v2539_v42, 0.0 }
 0x2c0   : > { %v2540_v9 = vpop.f32.mrf.mxu0 }
 0x2c1   : > { %v2541_v34 = vadd.f32 %v2540_v9, %v5390_v7  ;;  %v3879_v7 = vor.u32 %v4545_v6, %v3878_v19  ;;  %v2382_v36 = vpop.f32.mrf.mxu2 }
 0x2c3   : > { %v2616_v41 = vmax.f32 %v2541_v34, 0.0 }
 0x2c5   : > { %v2646_v63 = vpack.c.bf16 %v2616_v41, %v2615_v54  ;;  %v2471_v54 = vpop.f32.mrf.mxu3  ;;  %v3914_v41 = vld [vmem:[%s4923_s22 + $0x338] sm:$0xf] }
 0x2c6   : > { %v3915_v19 = vor.u32 %v4554_v26, %v3914_v41  ;;  %v4392_v41 = vld [vmem:[%s5977_s6 + $0x18] sm:$0xf0] }
 0x2c7   : > { %2742 = vmatmul.bf16.gmra.mxu1 %v2646_v63 }
 0x2c8   : > { %v2543_v33 = vpop.f32.mrf.mxu0 }
 0x2c9   : > { %v2544_v18 = vadd.f32 %v2543_v33, %v5396_v25  ;;  %v5675_v22 = vpop.f32.mrf.mxu2 }
 0x2cb   : > { %2582 = vmatmul.bf16.gmra.mxu0 %v3879_v7  ;;  %v2617_v9 = vmax.f32 %v2544_v18, 0.0  ;;  %v4563_v18 = vld [vmem:[%s4923_s22 + $0x3a0] sm:$0xf0] }
 0x2cd   : > { %v5677_v63 = vpop.f32.mrf.mxu3 }
 0x2d0   : > { %v2545_v38 = vpop.f32.mrf.mxu0 }
 0x2d1   : > { %v2546_v42 = vadd.f32 %v2545_v38, %v5410_v0  ;;  %v5681_v33 = vpop.f32.mrf.mxu2 }
 0x2d3   : > { %v2618_v34 = vmax.f32 %v2546_v42, 0.0  ;;  %v4390_v42 = vld [vmem:[%s5977_s6 + $0x10] sm:$0xf] }
 0x2d5   : > { %v2647_v48 = vpack.c.bf16 %v2618_v34, %v2617_v9  ;;  %v4674_v9 = vld [vmem:[%s5977_s6 + $0x14] sm:$0xf0]  ;;  %v2476_v26 = vpop.f32.mrf.mxu3 }
 0x2d6   : > { %v4391_v34 = vor.u32 %v4674_v9, %v4390_v42 }
 0x2d7   : > { %2747 = vmatmul.bf16.gmra.mxu1 %v2647_v48 }
 0x2d8   : > { %v2548_v6 = vpop.f32.mrf.mxu0  ;;  %3070 = vmatpush.bf16.msra.mxu2 %v4391_v34  ;;  %v4572_v34 = vld [vmem:[%s4923_s22 + $0x3e8] sm:$0xf0] }
 0x2d9   : > { %v2549_v25 = vadd.f32 %v2548_v6, %v5413_v11  ;;  %v3951_v11 = vor.u32 %v4563_v18, %v3950_v10  ;;  %v2376_v6 = vadd.f32 %v5641_v28, %v5426_v46  ;;  %v3986_v28 = vld [vmem:[%s4923_s22 + $0x3c8] sm:$0xf] }
 0x2db   : > { %2587 = vmatmul.bf16.gmra.mxu0 %v3915_v19  ;;  %v2619_v45 = vmax.f32 %v2549_v25, 0.0  ;;  %v2289_v25 = vadd.f32 %v5434_v60, %v5432_v59  ;;  %v3987_v60 = vor.u32 %v4572_v34, %v3986_v28  ;;  %v2386_v34 = vadd.f32 %v5675_v22, %v5464_v4 }
 0x2dd   : > { %v5706_v42 = vpop.f32.mrf.mxu3 }
 0x2e0   : > { %v2550_v7 = vpop.f32.mrf.mxu0 }
 0x2e1   : > { %v2551_v0 = vadd.f32 %v2550_v7, %v5424_v49  ;;  %v4673_v49 = vld [vmem:[%s5977_s6 + $0x14] sm:$0xf]  ;;  %v2378_v7 = vadd.f32 %v5647_v16, %v2289_v25 }
 0x2e2   : > { %v4395_v19 = vor.u32 %v4673_v49, %v4392_v41 }
 0x2e3   : > { %v2620_v17 = vmax.f32 %v2551_v0, 0.0  ;;  %v2465_v0 = vadd.f32 %v5645_v1, %v2376_v6 }
 0x2e4   : > { %3159 = vmatpush.bf16.msra.mxu3 %v4395_v19 }
 0x2e5   : > { %v2648_v38 = vpack.c.bf16 %v2620_v17, %v2619_v45  ;;  %v5703_v45 = vpop.f32.mrf.mxu2  ;;  %v2467_v17 = vadd.f32 %v5650_v20, %v2378_v7  ;;  %v2294_v20 = vadd.f32 %v5453_v29, %v5451_v31  ;;  %v2481_v41 = vpop.f32.mrf.mxu3  ;;  %v4672_v31 = vld [vmem:[%s5977_s6 + $0x4] sm:$0xf0] }
 0x2e7   : > { %2752 = vmatmul.bf16.gmra.mxu1 %v2648_v38  ;;  %v2383_v49 = vadd.f32 %v2382_v36, %v2294_v20  ;;  %v4671_v36 = vld [vmem:[%s5977_s6 + $0x4] sm:$0xf] }
 0x2e8   : > { %v2553_v48 = vpop.f32.mrf.mxu0 }
 0x2e9   : > { %v2554_v10 = vadd.f32 %v2553_v48, %v2465_v0  ;;  %v2472_v19 = vadd.f32 %v2471_v54, %v2383_v49  ;;  %v4384_v54 = vld [vmem:[%s5977_s6 + $0x8] sm:$0xf0] }
 0x2ea   : > { %v4387_v28 = vor.u32 %v4671_v36, %v4384_v54 }
 0x2eb   : > { %2592 = vmatmul.bf16.gmra.mxu0 %v3951_v11  ;;  %v2621_v9 = vmax.f32 %v2554_v10, 0.0  ;;  %v2381_v11 = vadd.f32 %v5661_v32, %v5448_v58  ;;  %v4382_v58 = vld [vmem:[%s5977_s6] sm:$0xf] }
 0x2ec   : > { %v4383_v32 = vor.u32 %v4672_v31, %v4382_v58  ;;  %3160 = vmatpush.bf16.msra.mxu3 %v4387_v28 }
 0x2ed   : > { %v2392_v16 = vpop.f32.mrf.mxu2  ;;  %v2470_v48 = vadd.f32 %v5669_v57, %v2381_v11  ;;  %v2484_v29 = vpop.f32.mrf.mxu3  ;;  %v2475_v11 = vadd.f32 %v5677_v63, %v2386_v34  ;;  %v2304_v63 = vadd.f32 %v5488_v13, %v5486_v43  ;;  %v2309_v43 = vadd.f32 %v5510_v51, %v5508_v14 }
 0x2ee   : > { %3071 = vmatpush.bf16.msra.mxu2 %v4383_v32 }
 0x2f0   : > { %v2555_v18 = vpop.f32.mrf.mxu0 }
 0x2f1   : > { %v2556_v38 = vadd.f32 %v2555_v18, %v2467_v17  ;;  %v4022_v18 = vld [vmem:[%s4923_s22 + $0x410] sm:$0xf] }
 0x2f3   : > { %v2622_v46 = vmax.f32 %v2556_v38, 0.0  ;;  %v4581_v38 = vld [vmem:[%s4923_s22 + $0x430] sm:$0xf0] }
 0x2f4   : > { %v4023_v57 = vor.u32 %v4581_v38, %v4022_v18  ;;  %v2393_v18 = vadd.f32 %v2392_v16, %v2304_v63 }
 0x2f5   : > { %v2649_v59 = vpack.c.bf16 %v2622_v46, %v2621_v9  ;;  %v2395_v0 = vpop.f32.mrf.mxu2 }
 0x2f7   : > { %2757 = vmatmul.bf16.gmra.mxu1 %v2649_v59  ;;  %v2299_v59 = vadd.f32 %v5469_v55, %v5467_v5 }
 0x2f8   : > { %v2558_v1 = vpop.f32.mrf.mxu0 }
 0x2f9   : > { %v2559_v6 = vadd.f32 %v2558_v1, %v2470_v48  ;;  %v2486_v48 = vpop.f32.mrf.mxu3 }
 0x2fb   : > { %2597 = vmatmul.bf16.gmra.mxu0 %v3987_v60  ;;  %v2623_v17 = vmax.f32 %v2559_v6, 0.0  ;;  %v2388_v60 = vadd.f32 %v5681_v33, %v2299_v59  ;;  %v2391_v33 = vadd.f32 %v5703_v45, %v5483_v37  ;;  %v2396_v45 = vadd.f32 %v2395_v0, %v5505_v50  ;;  %v5756_v0 = vld [vmem:[%s5976_s5] ss:$0 sm:$0xff] }
 0x2fd   : > { %v2397_v1 = vpop.f32.mrf.mxu2  ;;  %v2477_v20 = vadd.f32 %v2476_v26, %v2388_v60  ;;  %v2480_v38 = vadd.f32 %v5706_v42, %v2391_v33  ;;  %v5745_v42 = vpop.f32.mrf.mxu1 }
 0x2fe   : > { %v2398_v16 = vadd.f32 %v2397_v1, %v2309_v43  ;;  %v2319_v43 = vadd.f32 %v5545_v15, %v5543_v3 }
 0x300   : > { %v2560_v25 = vpop.f32.mrf.mxu0  ;;  %v2487_v59 = vadd.f32 %v2486_v48, %v2398_v16 }
 0x301   : > { %v2561_v7 = vadd.f32 %v2560_v25, %v2472_v19  ;;  %v2489_v26 = vpop.f32.mrf.mxu3 }
 0x303   : > { %v2624_v10 = vmax.f32 %v2561_v7, 0.0 }
 0x305   : > { %v2650_v9 = vpack.c.bf16 %v2624_v10, %v2623_v17  ;;  %v4058_v17 = vld [vmem:[%s4923_s22 + $0x458] sm:$0xf]  ;;  %v4590_v10 = vld [vmem:[%s4923_s22 + $0x478] sm:$0xf0]  ;;  %v2400_v22 = vpop.f32.mrf.mxu2  ;;  %s3480_s22 = sshll.u32 %s5981_s11, 2 }
 0x306   : > { %v4059_v5 = vor.u32 %v4590_v10, %v4058_v17  ;;  %s5751_s10 = scalar_lea.vmem %s5972_s1, %s3480_s22 }
 0x307   : > { %2762 = vmatmul.bf16.gmra.mxu1 %v2650_v9  ;;  %v2482_v9 = vadd.f32 %v2481_v41, %v2393_v18  ;;  %v2485_v41 = vadd.f32 %v2484_v29, %v2396_v45  ;;  %v4688_v29 = vld [vmem:[%s5751_s10] sm:$0xff]  }
 0x308   : > { %v2563_v46 = vpop.f32.mrf.mxu0  ;;  %v4689_v17 = vunpack.c.l.bf16 %v4688_v29 }
 0x309   : > { %v2564_v49 = vadd.f32 %v2563_v46, %v2475_v11  ;;  %v2491_v46 = vpop.f32.mrf.mxu3 }
 0x30b   : > { %2602 = vmatmul.bf16.gmra.mxu0 %v4023_v57  ;;  %v2625_v25 = vmax.f32 %v2564_v49, 0.0 }
 0x30d   : > { %v2402_v31 = vpop.f32.mrf.mxu2 }
 0x310   : > { %v2565_v19 = vpop.f32.mrf.mxu0 }
 0x311   : > { %v2566_v6 = vadd.f32 %v2565_v19, %v2477_v20  ;;  %v2494_v34 = vpop.f32.mrf.mxu3 }
 0x313   : > { %v2626_v7 = vmax.f32 %v2566_v6, 0.0  ;;  %v2401_v6 = vadd.f32 %v2400_v22, %v5518_v30 }
 0x315   : > { %v2651_v4 = vpack.c.bf16 %v2626_v7, %v2625_v25  ;;  %v2405_v13 = vpop.f32.mrf.mxu2  ;;  %v2314_v25 = vadd.f32 %v5523_v35, %v5521_v12 }
 0x317   : > { %2767 = vmatmul.bf16.gmra.mxu1 %v2651_v4  ;;  %v2403_v10 = vadd.f32 %v2402_v31, %v2314_v25  ;;  %v4690_v4 = vunpack.c.h.bf16 %v4688_v29 }
 0x318   : > { %v2568_v55 = vpop.f32.mrf.mxu0 }
 0x319   : > { %v2569_v58 = vadd.f32 %v2568_v55, %v2480_v38  ;;  %v2496_v1 = vpop.f32.mrf.mxu3  ;;  %v2490_v55 = vadd.f32 %v2489_v26, %v2401_v6  ;;  %v2492_v38 = vadd.f32 %v2491_v46, %v2403_v10  ;;  %v4751_v26 = vld [vmem:[%s5751_s10 + $0x8] sm:$0xff]   ;;  %v2406_v46 = vadd.f32 %v2405_v13, %v5540_v40 }
 0x31b   : > { %2607 = vmatmul.bf16.gmra.mxu0 %v4059_v5  ;;  %v2627_v36 = vmax.f32 %v2569_v58, 0.0 }
 0x31d   : > { %v2407_v50 = vpop.f32.mrf.mxu2 }
 0x320   : > { %v2570_v32 = vpop.f32.mrf.mxu0 }
 0x321   : > { %v2571_v57 = vadd.f32 %v2570_v32, %v2482_v9  ;;  %v2499_v12 = vpop.f32.mrf.mxu3 }
 0x323   : > { %v2628_v54 = vmax.f32 %v2571_v57, 0.0 }
 0x325   : > { %v2652_v28 = vpack.c.bf16 %v2628_v54, %v2627_v36  ;;  %v2410_v18 = vpop.f32.mrf.mxu2 }
 0x327   : > { %2772 = vmatmul.bf16.gmra.mxu1 %v2652_v28 }
 0x328   : > { %v2573_v37 = vpop.f32.mrf.mxu0 }
 0x329   : > { %v2574_v60 = vadd.f32 %v2573_v37, %v2485_v41  ;;  %v4693_v41 = vunpack.c.l.bf16 %v4751_v26 }
 0x32b   : > { %v2629_v49 = vmax.f32 %v2574_v60, 0.0  ;;  %v4694_v60 = vunpack.c.h.bf16 %v4751_v26 }
 0x32d   : > { %v2412_v37 = vpop.f32.mrf.mxu2 }
 0x330   : > { %v2575_v11 = vpop.f32.mrf.mxu0 }
 0x331   : > { %v2576_v20 = vadd.f32 %v2575_v11, %v2487_v59  ;;  %v2408_v59 = vadd.f32 %v2407_v50, %v2319_v43  ;;  %v2501_v11 = vpop.f32.mrf.mxu3  ;;  %v4753_v43 = vld [vmem:[%s5751_s10 + $0x18] sm:$0xff]  }
 0x333   : > { %v2630_v19 = vmax.f32 %v2576_v20, 0.0 }
 0x334   : > { %v2738_v14 = vpop.f32.mrf.mxu1 }
 0x335   : > { %v2653_v51 = vpack.c.bf16 %v2630_v19, %v2629_v49  ;;  %v2739_v7 = vadd.f32 %v5756_v0, %v2738_v14  ;;  %v2495_v49 = vadd.f32 %v2494_v34, %v2406_v46  ;;  %v2415_v3 = vpop.f32.mrf.mxu2 }
 0x337   : > { %2777 = vmatmul.bf16.gmra.mxu1 %v2653_v51  ;;  %v2882_v33 = vadd.f32 %v4689_v17, %v2739_v7  ;;  %v2497_v51 = vadd.f32 %v2496_v1, %v2408_v59  ;;  %v2411_v1 = vadd.f32 %v2410_v18, %v5553_v21  ;;  %v2329_v59 = vadd.f32 %v5580_v62, %v5578_v47 }
 0x338   : > { %v2578_v48 = vpop.f32.mrf.mxu0 }
 0x339   : > { %v2579_v9 = vadd.f32 %v2578_v48, %v2490_v55  ;;  %v2914_v30 = vmax.f32 %v2882_v33, 0.0  ;;  %v2504_v34 = vpop.f32.mrf.mxu3  ;;  %v2324_v55 = vadd.f32 %v5558_v27, %v5556_v44 }
 0x33b   : > { %v2631_v35 = vmax.f32 %v2579_v9, 0.0 }
 0x33c   : > { %v2740_v5 = vpop.f32.mrf.mxu1 }
 0x33d   : > { %v2741_v63 = vadd.f32 %v5756_v0, %v2740_v5 }
 0x33f   : > { %v2883_v58 = vadd.f32 %v4690_v4, %v2741_v63  ;;  %v4752_v4 = vld [vmem:[%s5751_s10 + $0x10] sm:$0xff]  }
 0x340   : > { %v2580_v32 = vpop.f32.mrf.mxu0  ;;  %v4697_v63 = vunpack.c.l.bf16 %v4752_v4  ;;  %v4698_v9 = vunpack.c.h.bf16 %v4752_v4 }
 0x341   : > { %v2915_v22 = vmax.f32 %v2883_v58, 0.0  ;;  %v2581_v57 = vadd.f32 %v2580_v32, %v2492_v38  ;;  %v2413_v38 = vadd.f32 %v2412_v37, %v2324_v55  ;;  %v2417_v58 = vpop.f32.mrf.mxu2  ;;  %v2334_v55 = vadd.f32 %v5593_v23, %v5591_v39 }
 0x343   : > { %v2946_v36 = vpack.c.bf16 %v2915_v22, %v2914_v30  ;;  %v2632_v54 = vmax.f32 %v2581_v57, 0.0  ;;  %v2500_v30 = vadd.f32 %v2499_v12, %v2411_v1 }
 0x344   : > { %v2743_v31 = vpop.f32.mrf.mxu1 }
 0x345   : > { %v2654_v28 = vpack.c.bf16 %v2632_v54, %v2631_v35  ;;  %3072 = vmatmul.bf16.vlgmr.msra.gmra.mxu2 %v2946_v36  ;;  %3161 = vmatmul.bf16.vlgmr.msra.gmra.mxu3 %v2946_v36  ;;  %v2744_v16 = vadd.f32 %v5756_v0, %v2743_v31  ;;  %v2502_v35 = vadd.f32 %v2501_v11, %v2413_v38  ;;  %v2506_v31 = vpop.f32.mrf.mxu3  ;;  %v4701_v11 = vunpack.c.l.bf16 %v4753_v43 }
 0x347   : > { %2782 = vmatmul.bf16.gmra.mxu1 %v2654_v28  ;;  %v2884_v19 = vadd.f32 %v4693_v41, %v2744_v16  ;;  %v2416_v41 = vadd.f32 %v2415_v3, %v5575_v56 }
 0x348   : > { %v2583_v45 = vpop.f32.mrf.mxu0 }
 0x349   : > { %v2584_v29 = vadd.f32 %v2583_v45, %v2495_v49  ;;  %v2916_v40 = vmax.f32 %v2884_v19, 0.0  ;;  %v2420_v12 = vpop.f32.mrf.mxu2  ;;  %v2418_v49 = vadd.f32 %v2417_v58, %v2329_v59  ;;  %v4702_v19 = vunpack.c.h.bf16 %v4753_v43 }
 0x34a   : > { %v2421_v1 = vadd.f32 %v2420_v12, %v5588_v61 }
 0x34b   : > { %v2633_v15 = vmax.f32 %v2584_v29, 0.0 }
 0x34c   : > { %v2745_v20 = vpop.f32.mrf.mxu1 }
 0x34d   : > { %v2746_v14 = vadd.f32 %v5756_v0, %v2745_v20  ;;  %v2509_v20 = vpop.f32.mrf.mxu3 }
 0x34f   : > { %v2885_v48 = vadd.f32 %v4694_v60, %v2746_v14 }
 0x350   : > { %v2585_v6 = vpop.f32.mrf.mxu0 }
 0x351   : > { %v2917_v13 = vmax.f32 %v2885_v48, 0.0  ;;  %v2586_v25 = vadd.f32 %v2585_v6, %v2497_v51  ;;  %v2505_v51 = vadd.f32 %v2504_v34, %v2416_v41  ;;  %v2507_v6 = vadd.f32 %v2506_v31, %v2418_v49  ;;  %v4754_v34 = vld [vmem:[%s5751_s10 + $0x20] sm:$0xff]  }
 0x352   : > { %v4706_v58 = vunpack.c.h.bf16 %v4754_v34 }
 0x353   : > { %v2634_v7 = vmax.f32 %v2586_v25, 0.0  ;;  %v2947_v17 = vpack.c.bf16 %v2917_v13, %v2916_v40  ;;  %v2422_v25 = vpop.f32.mrf.mxu2 }
 0x354   : > { %v2748_v50 = vpop.f32.mrf.mxu1 }
 0x355   : > { %v2655_v10 = vpack.c.bf16 %v2634_v7, %v2633_v15  ;;  %3077 = vmatmul.bf16.gmra.mxu2 %v2947_v17  ;;  %3166 = vmatmul.bf16.gmra.mxu3 %v2947_v17  ;;  %v2749_v33 = vadd.f32 %v5756_v0, %v2748_v50  ;;  %v2511_v50 = vpop.f32.mrf.mxu3 }
 0x357   : > { %2787 = vmatmul.bf16.gmra.mxu1 %v2655_v10  ;;  %v2886_v22 = vadd.f32 %v4697_v63, %v2749_v33  ;;  %v4705_v63 = vunpack.c.l.bf16 %v4754_v34 }
 0x358   : > { %v2588_v5 = vpop.f32.mrf.mxu0 }
 0x359   : > { %v2589_v36 = vadd.f32 %v2588_v5, %v2500_v30  ;;  %v2918_v18 = vmax.f32 %v2886_v22, 0.0  ;;  %v2510_v30 = vadd.f32 %v2509_v20, %v2421_v1 }
 0x35b   : > { %v2635_v27 = vmax.f32 %v2589_v36, 0.0  ;;  %v2425_v38 = vpop.f32.mrf.mxu2 }
 0x35c   : > { %v2750_v32 = vpop.f32.mrf.mxu1  ;;  %v2426_v43 = vadd.f32 %v2425_v38, %v5610_v53 }
 0x35d   : > { %v2751_v57 = vadd.f32 %v5756_v0, %v2750_v32 }
 0x35f   : > { %v2887_v54 = vadd.f32 %v4698_v9, %v2751_v57  ;;  %v2423_v9 = vadd.f32 %v2422_v25, %v2334_v55 }
 0x360   : > { %v2590_v21 = vpop.f32.mrf.mxu0 }
 0x361   : > { %v2919_v28 = vmax.f32 %v2887_v54, 0.0  ;;  %v2591_v44 = vadd.f32 %v2590_v21, %v2502_v35  ;;  %v2514_v35 = vpop.f32.mrf.mxu3  ;;  %v2512_v36 = vadd.f32 %v2511_v50, %v2423_v9 }
 0x362   : > { %v2515_v49 = vadd.f32 %v2514_v35, %v2426_v43 }
 0x363   : > { %v2636_v26 = vmax.f32 %v2591_v44, 0.0  ;;  %v2948_v45 = vpack.c.bf16 %v2919_v28, %v2918_v18 }
 0x364   : > { %v2753_v37 = vpop.f32.mrf.mxu1 }
 0x365   : > { %v2656_v46 = vpack.c.bf16 %v2636_v26, %v2635_v27  ;;  %3082 = vmatmul.bf16.gmra.mxu2 %v2948_v45  ;;  %3171 = vmatmul.bf16.gmra.mxu3 %v2948_v45  ;;  %v2754_v60 = vadd.f32 %v5756_v0, %v2753_v37  ;;  %v2427_v27 = vpop.f32.mrf.mxu2  ;;  %v4755_v37 = vld [vmem:[%s5751_s10 + $0x28] sm:$0xff]  }
 0x366   : > { %v4709_v59 = vunpack.c.l.bf16 %v4755_v37 }
 0x367   : > { %2792 = vmatmul.bf16.gmra.mxu1 %v2656_v46  ;;  %v2888_v29 = vadd.f32 %v4701_v11, %v2754_v60  ;;  %v4710_v11 = vunpack.c.h.bf16 %v4755_v37 }
 0x368   : > { %v2593_v16 = vpop.f32.mrf.mxu0 }
 0x369   : > { %v2594_v40 = vadd.f32 %v2593_v16, %v2505_v51  ;;  %v2920_v3 = vmax.f32 %v2888_v29, 0.0  ;;  %v2516_v46 = vpop.f32.mrf.mxu3  ;;  %v2339_v16 = vadd.f32 %v5615_v24, %v5613_v8 }
 0x36b   : > { %v2637_v62 = vmax.f32 %v2594_v40, 0.0  ;;  %v2428_v60 = vadd.f32 %v2427_v27, %v2339_v16 }
 0x36c   : > { %v2755_v14 = vpop.f32.mrf.mxu1 }
 0x36d   : > { %v2756_v48 = vadd.f32 %v5756_v0, %v2755_v14  ;;  %v2430_v51 = vpop.f32.mrf.mxu2  ;;  %v2517_v29 = vadd.f32 %v2516_v46, %v2428_v60 }
 0x36e   : > { %v2431_v50 = vadd.f32 %v2430_v51, %v5620_v2 }
 0x36f   : > { %v2889_v13 = vadd.f32 %v4702_v19, %v2756_v48 }
 0x370   : > { %v2595_v56 = vpop.f32.mrf.mxu0 }
 0x371   : > { %v2921_v15 = vmax.f32 %v2889_v13, 0.0  ;;  %v2596_v47 = vadd.f32 %v2595_v56, %v2507_v6  ;;  %v2519_v8 = vpop.f32.mrf.mxu3 }
 0x373   : > { %v2638_v7 = vmax.f32 %v2596_v47, 0.0  ;;  %v2949_v17 = vpack.c.bf16 %v2921_v15, %v2920_v3 }
 0x374   : > { %v2758_v10 = vpop.f32.mrf.mxu1 }
 0x375   : > { %v2657_v4 = vpack.c.bf16 %v2638_v7, %v2637_v62  ;;  %3087 = vmatmul.bf16.gmra.mxu2 %v2949_v17  ;;  %3176 = vmatmul.bf16.gmra.mxu3 %v2949_v17  ;;  %v2759_v33 = vadd.f32 %v5756_v0, %v2758_v10  ;;  %v4756_v62 = vld [vmem:[%s5751_s10 + $0x30] sm:$0xff]   ;;  %v2432_v7 = vpop.f32.mrf.mxu2  ;;  %v2344_v10 = vadd.f32 %v5745_v42, %v5623_v52 }
 0x376   : > { %v4713_v34 = vunpack.c.l.bf16 %v4756_v62  ;;  %v4714_v1 = vunpack.c.h.bf16 %v4756_v62 }
 0x377   : > { %2797 = vmatmul.bf16.gmra.mxu1 %v2657_v4  ;;  %v2890_v22 = vadd.f32 %v4705_v63, %v2759_v33  ;;  %v2520_v63 = vadd.f32 %v2519_v8, %v2431_v50 }
 0x378   : > { %v2598_v5 = vpop.f32.mrf.mxu0 }
 0x379   : > { %v2599_v54 = vadd.f32 %v2598_v5, %v2510_v30  ;;  %v2922_v21 = vmax.f32 %v2890_v22, 0.0  ;;  %v2433_v5 = vadd.f32 %v2432_v7, %v2344_v10  ;;  %v2521_v55 = vpop.f32.mrf.mxu3 }
 0x37b   : > { %v2639_v23 = vmax.f32 %v2599_v54, 0.0 }
 0x37c   : > { %v2760_v32 = vpop.f32.mrf.mxu1 }
 0x37d   : > { %v2761_v57 = vadd.f32 %v5756_v0, %v2760_v32 }
 0x37f   : > { %v2891_v31 = vadd.f32 %v4706_v58, %v2761_v57  ;;  %v2522_v58 = vadd.f32 %v2521_v55, %v2433_v5 }
 0x380   : > { %v2600_v61 = vpop.f32.mrf.mxu0 }
 0x381   : > { %v2923_v18 = vmax.f32 %v2891_v31, 0.0  ;;  %v2601_v39 = vadd.f32 %v2600_v61, %v2512_v36  ;;  %v4757_v61 = vld [vmem:[%s5751_s10 + $0x38] sm:$0xff]  }
 0x383   : > { %v2640_v28 = vmax.f32 %v2601_v39, 0.0  ;;  %v2950_v44 = vpack.c.bf16 %v2923_v18, %v2922_v21  ;;  %v4717_v18 = vunpack.c.l.bf16 %v4757_v61  ;;  %v4718_v39 = vunpack.c.h.bf16 %v4757_v61 }
 0x384   : > { %v2763_v26 = vpop.f32.mrf.mxu1 }
 0x385   : > { %v2658_v45 = vpack.c.bf16 %v2640_v28, %v2639_v23  ;;  %3092 = vmatmul.bf16.gmra.mxu2 %v2950_v44  ;;  %3181 = vmatmul.bf16.gmra.mxu3 %v2950_v44  ;;  %v2764_v41 = vadd.f32 %v5756_v0, %v2763_v26 }
 0x387   : > { %2802 = vmatmul.bf16.gmra.mxu1 %v2658_v45  ;;  %v2892_v19 = vadd.f32 %v4709_v59, %v2764_v41 }
 0x388   : > { %v2603_v12 = vpop.f32.mrf.mxu0 }
 0x389   : > { %v2604_v48 = vadd.f32 %v2603_v12, %v2515_v49  ;;  %v2924_v53 = vmax.f32 %v2892_v19, 0.0  ;;  %v4758_v12 = vld [vmem:[%s5751_s10 + $0x40] sm:$0xff]  }
 0x38a   : > { %v4721_v16 = vunpack.c.l.bf16 %v4758_v12  ;;  %v4722_v41 = vunpack.c.h.bf16 %v4758_v12 }
 0x38b   : > { %v2641_v24 = vmax.f32 %v2604_v48, 0.0 }
 0x38c   : > { %v2765_v20 = vpop.f32.mrf.mxu1 }
 0x38d   : > { %v2766_v14 = vadd.f32 %v5756_v0, %v2765_v20 }
 0x38f   : > { %v2893_v6 = vadd.f32 %v4710_v11, %v2766_v14  ;;  %v2978_v14 = vld [vmem:[%s5978_s7] sm:$0x3] }
 0x390   : > { %v2605_v40 = vpop.f32.mrf.mxu0  ;;  %v5809_v48 = vperm.slane %v2978_v14, 0 }
 0x391   : > { %v2925_v13 = vmax.f32 %v2893_v6, 0.0  ;;  %v2606_v25 = vadd.f32 %v2605_v40, %v2517_v29  ;;  %v5811_v6 = vperm.slane %v2978_v14, 1  ;;  %v4759_v40 = vld [vmem:[%s5751_s10 + $0x48] sm:$0xff]  }
 0x392   : > { %v4725_v8 = vunpack.c.l.bf16 %v4759_v40 }
 0x393   : > { %v2642_v56 = vmax.f32 %v2606_v25, 0.0  ;;  %v2951_v3 = vpack.c.bf16 %v2925_v13, %v2924_v53 }
 0x394   : > { %v2768_v15 = vpop.f32.mrf.mxu1 }
 0x395   : > { %v2659_v47 = vpack.c.bf16 %v2642_v56, %v2641_v24  ;;  %3097 = vmatmul.bf16.gmra.mxu2 %v2951_v3  ;;  %3186 = vmatmul.bf16.gmra.mxu3 %v2951_v3  ;;  %v2769_v4 = vadd.f32 %v5756_v0, %v2768_v15 }
 0x397   : > { %2807 = vmatmul.bf16.gmra.mxu1 %v2659_v47  ;;  %v2894_v38 = vadd.f32 %v4713_v34, %v2769_v4  ;;  %v4726_v47 = vunpack.c.h.bf16 %v4759_v40 }
 0x398   : > { %v2608_v17 = vpop.f32.mrf.mxu0 }
 0x399   : > { %v2609_v32 = vadd.f32 %v2608_v17, %v2520_v63  ;;  %v2926_v2 = vmax.f32 %v2894_v38, 0.0 }
 0x39b   : > { %v2643_v52 = vmax.f32 %v2609_v32, 0.0 }
 0x39c   : > { %v2770_v33 = vpop.f32.mrf.mxu1 }
 0x39d   : > { %v2771_v9 = vadd.f32 %v5756_v0, %v2770_v33 }
 0x39f   : > { %v2895_v30 = vadd.f32 %v4714_v1, %v2771_v9 }
 0x3a0   : > { %v2610_v22 = vpop.f32.mrf.mxu0 }
 0x3a1   : > { %v2927_v57 = vmax.f32 %v2895_v30, 0.0  ;;  %v2611_v35 = vadd.f32 %v2610_v22, %v2522_v58  ;;  %v4760_v30 = vld [vmem:[%s5751_s10 + $0x50] sm:$0xff]  }
 0x3a3   : > { %v2644_v42 = vmax.f32 %v2611_v35, 0.0  ;;  %v2952_v36 = vpack.c.bf16 %v2927_v57, %v2926_v2  ;;  %v4729_v35 = vunpack.c.l.bf16 %v4760_v30 }
 0x3a4   : > { %v2773_v54 = vpop.f32.mrf.mxu1 }
 0x3a5   : > { %v2660_v31 = vpack.c.bf16 %v2644_v42, %v2643_v52  ;;  %3102 = vmatmul.bf16.gmra.mxu2 %v2952_v36  ;;  %3191 = vmatmul.bf16.gmra.mxu3 %v2952_v36  ;;  %v2774_v21 = vadd.f32 %v5756_v0, %v2773_v54 }
 0x3a7   : > { %2812 = vmatmul.bf16.gmra.mxu1 %v2660_v31  ;;  %v2896_v28 = vadd.f32 %v4717_v18, %v2774_v21  ;;  %v4730_v31 = vunpack.c.h.bf16 %v4760_v30 }
 0x3a9   : > { %v2928_v26 = vmax.f32 %v2896_v28, 0.0 }
 0x3ac   : > { %v2775_v23 = vpop.f32.mrf.mxu1 }
 0x3ad   : > { %v2776_v44 = vadd.f32 %v5756_v0, %v2775_v23 }
 0x3af   : > { %v2897_v27 = vadd.f32 %v4718_v39, %v2776_v44 }
 0x3b1   : > { %v2929_v45 = vmax.f32 %v2897_v27, 0.0 }
 0x3b3   : > { %v2953_v37 = vpack.c.bf16 %v2929_v45, %v2928_v26 }
 0x3b4   : > { %v2778_v46 = vpop.f32.mrf.mxu1 }
 0x3b5   : > { %3107 = vmatmul.bf16.gmra.mxu2 %v2953_v37  ;;  %3196 = vmatmul.bf16.gmra.mxu3 %v2953_v37  ;;  %v2779_v43 = vadd.f32 %v5756_v0, %v2778_v46 }
 0x3b7   : > { %v2898_v60 = vadd.f32 %v4721_v16, %v2779_v43 }
 0x3b9   : > { %v2930_v49 = vmax.f32 %v2898_v60, 0.0 }
 0x3bc   : > { %v2780_v59 = vpop.f32.mrf.mxu1 }
 0x3bd   : > { %v2781_v11 = vadd.f32 %v5756_v0, %v2780_v59  ;;  %v4761_v59 = vld [vmem:[%s5751_s10 + $0x58] sm:$0xff]  }
 0x3be   : > { %v4734_v40 = vunpack.c.h.bf16 %v4761_v59 }
 0x3bf   : > { %v2899_v20 = vadd.f32 %v4722_v41, %v2781_v11 }
 0x3c1   : > { %v2931_v19 = vmax.f32 %v2899_v20, 0.0 }
 0x3c3   : > { %v2954_v51 = vpack.c.bf16 %v2931_v19, %v2930_v49  ;;  %v4733_v49 = vunpack.c.l.bf16 %v4761_v59 }
 0x3c4   : > { %v2783_v29 = vpop.f32.mrf.mxu1 }
 0x3c5   : > { %3112 = vmatmul.bf16.gmra.mxu2 %v2954_v51  ;;  %3201 = vmatmul.bf16.gmra.mxu3 %v2954_v51  ;;  %v2784_v25 = vadd.f32 %v5756_v0, %v2783_v29 }
 0x3c7   : > { %v2900_v7 = vadd.f32 %v4725_v8, %v2784_v25 }
 0x3c8   : > { %v3073_v53 = vpop.f32.mrf.mxu2  ;;  %v3162_v13 = vpop.f32.mrf.mxu3 }
 0x3c9   : > { %v3074_v24 = vadd.f32 %v3073_v53, %v5809_v48  ;;  %v3163_v56 = vadd.f32 %v3162_v13, %v5811_v6  ;;  %v2932_v5 = vmax.f32 %v2900_v7, 0.0 }
 0x3cb   : > { %v3242_v3 = vmax.f32 %v3074_v24, 0.0  ;;  %v3338_v15 = vpack.c.bf16 %v3163_v56, %v3163_v56 }
 0x3cc   : > { %v2785_v62 = vpop.f32.mrf.mxu1 }
 0x3cd   : > { %v3274_v17 = vpack.c.bf16 %v3242_v3, %v3242_v3  ;;  %3370 = vst [vmem:[%s5821_s19 + $0x4] sm:$0xf] %v3338_v15  ;;  %v2786_v50 = vadd.f32 %v5756_v0, %v2785_v62 }
 0x3cf   : > { %3306 = vst [vmem:[%s5821_s19] sm:$0xf] %v3274_v17  ;;  %v2901_v10 = vadd.f32 %v4726_v47, %v2786_v50 }
 0x3d0   : > { %v3075_v4 = vpop.f32.mrf.mxu2  ;;  %v3164_v34 = vpop.f32.mrf.mxu3 }
 0x3d1   : > { %v2933_v1 = vmax.f32 %v2901_v10, 0.0  ;;  %v3076_v55 = vadd.f32 %v3075_v4, %v5809_v48  ;;  %v3165_v33 = vadd.f32 %v3164_v34, %v5811_v6 }
 0x3d3   : > { %v3243_v63 = vmax.f32 %v3076_v55, 0.0  ;;  %v3339_v38 = vpack.c.bf16 %v3165_v33, %v3165_v33  ;;  %v2955_v9 = vpack.c.bf16 %v2933_v1, %v2932_v5  ;;  %v4762_v5 = vld [vmem:[%s5751_s10 + $0x60] sm:$0xff]  }
 0x3d4   : > { %v2788_v58 = vpop.f32.mrf.mxu1  ;;  %v4738_v30 = vunpack.c.h.bf16 %v4762_v5 }
 0x3d5   : > { %v3275_v32 = vpack.c.bf16 %v3243_v63, %v3243_v63  ;;  %3371 = vst [vmem:[%s5821_s19 + $0xc] sm:$0xf] %v3339_v38  ;;  %3117 = vmatmul.bf16.gmra.mxu2 %v2955_v9  ;;  %3206 = vmatmul.bf16.gmra.mxu3 %v2955_v9  ;;  %v2789_v57 = vadd.f32 %v5756_v0, %v2788_v58  ;;  %v4737_v63 = vunpack.c.l.bf16 %v4762_v5 }
 0x3d7   : > { %3307 = vst [vmem:[%s5821_s19 + $0x8] sm:$0xf] %v3275_v32  ;;  %v2902_v21 = vadd.f32 %v4729_v35, %v2789_v57 }
 0x3d8   : > { %v3078_v22 = vpop.f32.mrf.mxu2  ;;  %v3167_v2 = vpop.f32.mrf.mxu3 }
 0x3d9   : > { %v3079_v52 = vadd.f32 %v3078_v22, %v5809_v48  ;;  %v3168_v42 = vadd.f32 %v3167_v2, %v5811_v6  ;;  %v2934_v27 = vmax.f32 %v2902_v21, 0.0 }
 0x3db   : > { %v3244_v36 = vmax.f32 %v3079_v52, 0.0  ;;  %v3340_v54 = vpack.c.bf16 %v3168_v42, %v3168_v42 }
 0x3dc   : > { %v2790_v61 = vpop.f32.mrf.mxu1 }
 0x3dd   : > { %v3276_v18 = vpack.c.bf16 %v3244_v36, %v3244_v36  ;;  %3372 = vst [vmem:[%s5821_s19 + $0x14] sm:$0xf] %v3340_v54  ;;  %v2791_v39 = vadd.f32 %v5756_v0, %v2790_v61 }
 0x3df   : > { %3308 = vst [vmem:[%s5821_s19 + $0x10] sm:$0xf] %v3276_v18  ;;  %v2903_v23 = vadd.f32 %v4730_v31, %v2791_v39 }
 0x3e0   : > { %v3080_v28 = vpop.f32.mrf.mxu2  ;;  %v3169_v44 = vpop.f32.mrf.mxu3 }
 0x3e1   : > { %v2935_v26 = vmax.f32 %v2903_v23, 0.0  ;;  %v3081_v45 = vadd.f32 %v3080_v28, %v5809_v48  ;;  %v3170_v37 = vadd.f32 %v3169_v44, %v5811_v6 }
 0x3e3   : > { %v3245_v46 = vmax.f32 %v3081_v45, 0.0  ;;  %v3341_v12 = vpack.c.bf16 %v3170_v37, %v3170_v37  ;;  %v2956_v43 = vpack.c.bf16 %v2935_v26, %v2934_v27  ;;  %v4763_v27 = vld [vmem:[%s5751_s10 + $0x68] sm:$0xff]  }
 0x3e4   : > { %v2793_v16 = vpop.f32.mrf.mxu1  ;;  %v4742_v59 = vunpack.c.h.bf16 %v4763_v27 }
 0x3e5   : > { %v3277_v41 = vpack.c.bf16 %v3245_v46, %v3245_v46  ;;  %3373 = vst [vmem:[%s5821_s19 + $0x1c] sm:$0xf] %v3341_v12  ;;  %3122 = vmatmul.bf16.gmra.mxu2 %v2956_v43  ;;  %3211 = vmatmul.bf16.gmra.mxu3 %v2956_v43  ;;  %v2794_v20 = vadd.f32 %v5756_v0, %v2793_v16  ;;  %v4741_v46 = vunpack.c.l.bf16 %v4763_v27 }
 0x3e7   : > { %3309 = vst [vmem:[%s5821_s19 + $0x18] sm:$0xf] %v3277_v41  ;;  %v2904_v13 = vadd.f32 %v4733_v49, %v2794_v20 }
 0x3e8   : > { %v3083_v60 = vpop.f32.mrf.mxu2  ;;  %v3172_v11 = vpop.f32.mrf.mxu3 }
 0x3e9   : > { %v3084_v19 = vadd.f32 %v3083_v60, %v5809_v48  ;;  %v3173_v14 = vadd.f32 %v3172_v11, %v5811_v6  ;;  %v2936_v15 = vmax.f32 %v2904_v13, 0.0 }
 0x3eb   : > { %v3246_v51 = vmax.f32 %v3084_v19, 0.0  ;;  %v3342_v29 = vpack.c.bf16 %v3173_v14, %v3173_v14 }
 0x3ec   : > { %v2795_v53 = vpop.f32.mrf.mxu1 }
 0x3ed   : > { %v3278_v25 = vpack.c.bf16 %v3246_v51, %v3246_v51  ;;  %3374 = vst [vmem:[%s5821_s19 + $0x24] sm:$0xf] %v3342_v29  ;;  %v2796_v8 = vadd.f32 %v5756_v0, %v2795_v53 }
 0x3ef   : > { %3310 = vst [vmem:[%s5821_s19 + $0x20] sm:$0xf] %v3278_v25  ;;  %v2905_v24 = vadd.f32 %v4734_v40, %v2796_v8 }
 0x3f0   : > { %v3085_v56 = vpop.f32.mrf.mxu2  ;;  %v3174_v3 = vpop.f32.mrf.mxu3 }
 0x3f1   : > { %v2937_v47 = vmax.f32 %v2905_v24, 0.0  ;;  %v3086_v62 = vadd.f32 %v3085_v56, %v5809_v48  ;;  %v3175_v7 = vadd.f32 %v3174_v3, %v5811_v6 }
 0x3f3   : > { %v3247_v17 = vmax.f32 %v3086_v62, 0.0  ;;  %v3343_v50 = vpack.c.bf16 %v3175_v7, %v3175_v7  ;;  %v2957_v10 = vpack.c.bf16 %v2937_v47, %v2936_v15  ;;  %v4764_v15 = vld [vmem:[%s5751_s10 + $0x70] sm:$0xff]  }
 0x3f4   : > { %v2798_v4 = vpop.f32.mrf.mxu1  ;;  %v4746_v5 = vunpack.c.h.bf16 %v4764_v15 }
 0x3f5   : > { %v3279_v34 = vpack.c.bf16 %v3247_v17, %v3247_v17  ;;  %3375 = vst [vmem:[%s5821_s19 + $0x2c] sm:$0xf] %v3343_v50  ;;  %3127 = vmatmul.bf16.gmra.mxu2 %v2957_v10  ;;  %3216 = vmatmul.bf16.gmra.mxu3 %v2957_v10  ;;  %v2799_v33 = vadd.f32 %v5756_v0, %v2798_v4  ;;  %v4745_v17 = vunpack.c.l.bf16 %v4764_v15 }
 0x3f7   : > { %3311 = vst [vmem:[%s5821_s19 + $0x28] sm:$0xf] %v3279_v34  ;;  %v2906_v2 = vadd.f32 %v4737_v63, %v2799_v33 }
 0x3f8   : > { %v3088_v1 = vpop.f32.mrf.mxu2  ;;  %v3177_v55 = vpop.f32.mrf.mxu3 }
 0x3f9   : > { %v3089_v38 = vadd.f32 %v3088_v1, %v5809_v48  ;;  %v3178_v9 = vadd.f32 %v3177_v55, %v5811_v6  ;;  %v2938_v54 = vmax.f32 %v2906_v2, 0.0 }
 0x3fb   : > { %v3248_v58 = vmax.f32 %v3089_v38, 0.0  ;;  %v3344_v32 = vpack.c.bf16 %v3178_v9, %v3178_v9 }
 0x3fc   : > { %v2800_v22 = vpop.f32.mrf.mxu1 }
 0x3fd   : > { %v3280_v57 = vpack.c.bf16 %v3248_v58, %v3248_v58  ;;  %3376 = vst [vmem:[%s5821_s19 + $0x34] sm:$0xf] %v3344_v32  ;;  %v2801_v35 = vadd.f32 %v5756_v0, %v2800_v22 }
 0x3ff   : > { %3312 = vst [vmem:[%s5821_s19 + $0x30] sm:$0xf] %v3280_v57  ;;  %v2907_v52 = vadd.f32 %v4738_v30, %v2801_v35 }
 0x400   : > { %v3090_v42 = vpop.f32.mrf.mxu2  ;;  %v3179_v36 = vpop.f32.mrf.mxu3 }
 0x401   : > { %v2939_v31 = vmax.f32 %v2907_v52, 0.0  ;;  %v3091_v61 = vadd.f32 %v3090_v42, %v5809_v48  ;;  %v3180_v21 = vadd.f32 %v3179_v36, %v5811_v6 }
 0x403   : > { %v3249_v18 = vmax.f32 %v3091_v61, 0.0  ;;  %v3345_v39 = vpack.c.bf16 %v3180_v21, %v3180_v21  ;;  %v2958_v23 = vpack.c.bf16 %v2939_v31, %v2938_v54  ;;  %v4765_v54 = vld [vmem:[%s5751_s10 + $0x78] sm:$0xff]  }
 0x404   : > { %v2803_v28 = vpop.f32.mrf.mxu1  ;;  %v4750_v27 = vunpack.c.h.bf16 %v4765_v54 }
 0x405   : > { %v3281_v44 = vpack.c.bf16 %v3249_v18, %v3249_v18  ;;  %3377 = vst [vmem:[%s5821_s19 + $0x3c] sm:$0xf] %v3345_v39  ;;  %3132 = vmatmul.bf16.gmra.mxu2 %v2958_v23  ;;  %3221 = vmatmul.bf16.gmra.mxu3 %v2958_v23  ;;  %v2804_v37 = vadd.f32 %v5756_v0, %v2803_v28  ;;  %v4749_v18 = vunpack.c.l.bf16 %v4765_v54 }
 0x407   : > { %3313 = vst [vmem:[%s5821_s19 + $0x38] sm:$0xf] %v3281_v44  ;;  %v2908_v11 = vadd.f32 %v4741_v46, %v2804_v37 }
 0x408   : > { %v3093_v26 = vpop.f32.mrf.mxu2  ;;  %v3182_v45 = vpop.f32.mrf.mxu3 }
 0x409   : > { %v3094_v12 = vadd.f32 %v3093_v26, %v5809_v48  ;;  %v3183_v43 = vadd.f32 %v3182_v45, %v5811_v6  ;;  %v2940_v29 = vmax.f32 %v2908_v11, 0.0 }
 0x40b   : > { %v3250_v16 = vmax.f32 %v3094_v12, 0.0  ;;  %v3346_v41 = vpack.c.bf16 %v3183_v43, %v3183_v43 }
 0x40c   : > { %v2805_v60 = vpop.f32.mrf.mxu1 }
 0x40d   : > { %v3282_v20 = vpack.c.bf16 %v3250_v16, %v3250_v16  ;;  %3378 = vst [vmem:[%s5821_s19 + $0x44] sm:$0xf] %v3346_v41  ;;  %v2806_v49 = vadd.f32 %v5756_v0, %v2805_v60 }
 0x40f   : > { %3314 = vst [vmem:[%s5821_s19 + $0x40] sm:$0xf] %v3282_v20  ;;  %v2909_v19 = vadd.f32 %v4742_v59, %v2806_v49 }
 0x410   : > { %v3095_v14 = vpop.f32.mrf.mxu2  ;;  %v3184_v51 = vpop.f32.mrf.mxu3 }
 0x411   : > { %v2941_v40 = vmax.f32 %v2909_v19, 0.0  ;;  %v3096_v53 = vadd.f32 %v3095_v14, %v5809_v48  ;;  %v3185_v13 = vadd.f32 %v3184_v51, %v5811_v6 }
 0x413   : > { %v3251_v25 = vmax.f32 %v3096_v53, 0.0  ;;  %v3347_v8 = vpack.c.bf16 %v3185_v13, %v3185_v13  ;;  %v2959_v24 = vpack.c.bf16 %v2941_v40, %v2940_v29 }
 0x414   : > { %v2808_v56 = vpop.f32.mrf.mxu1 }
 0x415   : > { %v3283_v3 = vpack.c.bf16 %v3251_v25, %v3251_v25  ;;  %3379 = vst [vmem:[%s5821_s19 + $0x4c] sm:$0xf] %v3347_v8  ;;  %3137 = vmatmul.bf16.gmra.mxu2 %v2959_v24  ;;  %3226 = vmatmul.bf16.gmra.mxu3 %v2959_v24  ;;  %v2809_v7 = vadd.f32 %v5756_v0, %v2808_v56 }
 0x417   : > { %3315 = vst [vmem:[%s5821_s19 + $0x48] sm:$0xf] %v3283_v3  ;;  %v2910_v55 = vadd.f32 %v4745_v17, %v2809_v7 }
 0x418   : > { %v3098_v47 = vpop.f32.mrf.mxu2  ;;  %v3187_v62 = vpop.f32.mrf.mxu3 }
 0x419   : > { %v3099_v50 = vadd.f32 %v3098_v47, %v5809_v48  ;;  %v3188_v10 = vadd.f32 %v3187_v62, %v5811_v6  ;;  %v2942_v32 = vmax.f32 %v2910_v55, 0.0 }
 0x41b   : > { %v3252_v4 = vmax.f32 %v3099_v50, 0.0  ;;  %v3348_v34 = vpack.c.bf16 %v3188_v10, %v3188_v10 }
 0x41c   : > { %v2810_v1 = vpop.f32.mrf.mxu1 }
 0x41d   : > { %v3284_v33 = vpack.c.bf16 %v3252_v4, %v3252_v4  ;;  %3380 = vst [vmem:[%s5821_s19 + $0x54] sm:$0xf] %v3348_v34  ;;  %v2811_v63 = vadd.f32 %v5756_v0, %v2810_v1 }
 0x41f   : > { %3316 = vst [vmem:[%s5821_s19 + $0x50] sm:$0xf] %v3284_v33  ;;  %v2911_v38 = vadd.f32 %v4746_v5, %v2811_v63 }
 0x420   : > { %v3100_v9 = vpop.f32.mrf.mxu2  ;;  %v3189_v58 = vpop.f32.mrf.mxu3 }
 0x421   : > { %v2943_v30 = vmax.f32 %v2911_v38, 0.0  ;;  %v3101_v22 = vadd.f32 %v3100_v9, %v5809_v48  ;;  %v3190_v2 = vadd.f32 %v3189_v58, %v5811_v6 }
 0x423   : > { %v3253_v57 = vmax.f32 %v3101_v22, 0.0  ;;  %v3349_v35 = vpack.c.bf16 %v3190_v2, %v3190_v2  ;;  %v2960_v52 = vpack.c.bf16 %v2943_v30, %v2942_v32 }
 0x424   : > { %v2813_v42 = vpop.f32.mrf.mxu1 }
 0x425   : > { %v3285_v36 = vpack.c.bf16 %v3253_v57, %v3253_v57  ;;  %3381 = vst [vmem:[%s5821_s19 + $0x5c] sm:$0xf] %v3349_v35  ;;  %3142 = vmatmul.bf16.gmra.mxu2 %v2960_v52  ;;  %3231 = vmatmul.bf16.gmra.mxu3 %v2960_v52  ;;  %v2814_v21 = vadd.f32 %v5756_v0, %v2813_v42 }
 0x427   : > { %3317 = vst [vmem:[%s5821_s19 + $0x58] sm:$0xf] %v3285_v36  ;;  %v2912_v45 = vadd.f32 %v4749_v18, %v2814_v21 }
 0x428   : > { %v3103_v31 = vpop.f32.mrf.mxu2  ;;  %v3192_v61 = vpop.f32.mrf.mxu3 }
 0x429   : > { %v3104_v39 = vadd.f32 %v3103_v31, %v5809_v48  ;;  %v3193_v23 = vadd.f32 %v3192_v61, %v5811_v6  ;;  %v2944_v41 = vmax.f32 %v2912_v45, 0.0 }
 0x42b   : > { %v3254_v28 = vmax.f32 %v3104_v39, 0.0  ;;  %v3350_v44 = vpack.c.bf16 %v3193_v23, %v3193_v23 }
 0x42c   : > { %v2815_v26 = vpop.f32.mrf.mxu1 }
 0x42d   : > { %v3286_v37 = vpack.c.bf16 %v3254_v28, %v3254_v28  ;;  %3382 = vst [vmem:[%s5821_s19 + $0x64] sm:$0xf] %v3350_v44  ;;  %v2816_v46 = vadd.f32 %v5756_v0, %v2815_v26 }
 0x42f   : > { %3318 = vst [vmem:[%s5821_s19 + $0x60] sm:$0xf] %v3286_v37  ;;  %v2913_v12 = vadd.f32 %v4750_v27, %v2816_v46 }
 0x430   : > { %v3105_v43 = vpop.f32.mrf.mxu2  ;;  %v3194_v16 = vpop.f32.mrf.mxu3 }
 0x431   : > { %v2945_v59 = vmax.f32 %v2913_v12, 0.0  ;;  %v3106_v60 = vadd.f32 %v3105_v43, %v5809_v48  ;;  %v3195_v11 = vadd.f32 %v3194_v16, %v5811_v6 }
 0x433   : > { %v3255_v20 = vmax.f32 %v3106_v60, 0.0  ;;  %v3351_v49 = vpack.c.bf16 %v3195_v11, %v3195_v11  ;;  %v2961_v19 = vpack.c.bf16 %v2945_v59, %v2944_v41 }
 0x435   : > { %v3287_v14 = vpack.c.bf16 %v3255_v20, %v3255_v20  ;;  %3383 = vst [vmem:[%s5821_s19 + $0x6c] sm:$0xf] %v3351_v49  ;;  %3147 = vmatmul.bf16.gmra.mxu2 %v2961_v19  ;;  %3236 = vmatmul.bf16.gmra.mxu3 %v2961_v19 }
 0x437   : > { %3319 = vst [vmem:[%s5821_s19 + $0x68] sm:$0xf] %v3287_v14 }
 0x438   : > { %v3108_v0 = vpop.f32.mrf.mxu2  ;;  %v3197_v51 = vpop.f32.mrf.mxu3 }
 0x439   : > { %v3109_v29 = vadd.f32 %v3108_v0, %v5809_v48  ;;  %v3198_v40 = vadd.f32 %v3197_v51, %v5811_v6 }
 0x43b   : > { %v3256_v53 = vmax.f32 %v3109_v29, 0.0  ;;  %v3352_v13 = vpack.c.bf16 %v3198_v40, %v3198_v40 }
 0x43d   : > { %v3288_v25 = vpack.c.bf16 %v3256_v53, %v3256_v53  ;;  %3384 = vst [vmem:[%s5821_s19 + $0x74] sm:$0xf] %v3352_v13 }
 0x43f   : > { %3320 = vst [vmem:[%s5821_s19 + $0x70] sm:$0xf] %v3288_v25 }
 0x440   : > { %v3110_v8 = vpop.f32.mrf.mxu2  ;;  %v3199_v24 = vpop.f32.mrf.mxu3 }
 0x441   : > { %v3111_v56 = vadd.f32 %v3110_v8, %v5809_v48  ;;  %v3200_v3 = vadd.f32 %v3199_v24, %v5811_v6 }
 0x443   : > { %v3257_v15 = vmax.f32 %v3111_v56, 0.0  ;;  %v3353_v47 = vpack.c.bf16 %v3200_v3, %v3200_v3 }
 0x445   : > { %v3289_v62 = vpack.c.bf16 %v3257_v15, %v3257_v15  ;;  %3385 = vst [vmem:[%s5821_s19 + $0x7c] sm:$0xf] %v3353_v47 }
 0x447   : > { %3321 = vst [vmem:[%s5821_s19 + $0x78] sm:$0xf] %v3289_v62 }
 0x448   : > { %v3113_v7 = vpop.f32.mrf.mxu2  ;;  %v3202_v17 = vpop.f32.mrf.mxu3 }
 0x449   : > { %v3114_v50 = vadd.f32 %v3113_v7, %v5809_v48  ;;  %v3203_v10 = vadd.f32 %v3202_v17, %v5811_v6 }
 0x44b   : > { %v3258_v4 = vmax.f32 %v3114_v50, 0.0  ;;  %v3354_v34 = vpack.c.bf16 %v3203_v10, %v3203_v10 }
 0x44d   : > { %v3290_v5 = vpack.c.bf16 %v3258_v4, %v3258_v4  ;;  %3386 = vst [vmem:[%s5821_s19 + $0x84] sm:$0xf] %v3354_v34 }
 0x44f   : > { %3322 = vst [vmem:[%s5821_s19 + $0x80] sm:$0xf] %v3290_v5 }
 0x450   : > { %v3115_v1 = vpop.f32.mrf.mxu2  ;;  %v3204_v55 = vpop.f32.mrf.mxu3 }
 0x451   : > { %v3116_v33 = vadd.f32 %v3115_v1, %v5809_v48  ;;  %v3205_v63 = vadd.f32 %v3204_v55, %v5811_v6 }
 0x453   : > { %v3259_v38 = vmax.f32 %v3116_v33, 0.0  ;;  %v3355_v9 = vpack.c.bf16 %v3205_v63, %v3205_v63 }
 0x455   : > { %v3291_v58 = vpack.c.bf16 %v3259_v38, %v3259_v38  ;;  %3387 = vst [vmem:[%s5821_s19 + $0x8c] sm:$0xf] %v3355_v9 }
 0x457   : > { %3323 = vst [vmem:[%s5821_s19 + $0x88] sm:$0xf] %v3291_v58 }
 0x458   : > { %v3118_v32 = vpop.f32.mrf.mxu2  ;;  %v3207_v30 = vpop.f32.mrf.mxu3 }
 0x459   : > { %v3119_v22 = vadd.f32 %v3118_v32, %v5809_v48  ;;  %v3208_v2 = vadd.f32 %v3207_v30, %v5811_v6 }
 0x45b   : > { %v3260_v57 = vmax.f32 %v3119_v22, 0.0  ;;  %v3356_v35 = vpack.c.bf16 %v3208_v2, %v3208_v2 }
 0x45d   : > { %v3292_v52 = vpack.c.bf16 %v3260_v57, %v3260_v57  ;;  %3388 = vst [vmem:[%s5821_s19 + $0x94] sm:$0xf] %v3356_v35 }
 0x45f   : > { %3324 = vst [vmem:[%s5821_s19 + $0x90] sm:$0xf] %v3292_v52 }
 0x460   : > { %v3120_v42 = vpop.f32.mrf.mxu2  ;;  %v3209_v36 = vpop.f32.mrf.mxu3 }
 0x461   : > { %v3121_v54 = vadd.f32 %v3120_v42, %v5809_v48  ;;  %v3210_v31 = vadd.f32 %v3209_v36, %v5811_v6 }
 0x463   : > { %v3261_v61 = vmax.f32 %v3121_v54, 0.0  ;;  %v3357_v21 = vpack.c.bf16 %v3210_v31, %v3210_v31 }
 0x465   : > { %v3293_v18 = vpack.c.bf16 %v3261_v61, %v3261_v61  ;;  %3389 = vst [vmem:[%s5821_s19 + $0x9c] sm:$0xf] %v3357_v21 }
 0x467   : > { %3325 = vst [vmem:[%s5821_s19 + $0x98] sm:$0xf] %v3293_v18 }
 0x468   : > { %v3123_v39 = vpop.f32.mrf.mxu2  ;;  %v3212_v23 = vpop.f32.mrf.mxu3 }
 0x469   : > { %v3124_v28 = vadd.f32 %v3123_v39, %v5809_v48  ;;  %v3213_v44 = vadd.f32 %v3212_v23, %v5811_v6 }
 0x46b   : > { %v3262_v27 = vmax.f32 %v3124_v28, 0.0  ;;  %v3358_v26 = vpack.c.bf16 %v3213_v44, %v3213_v44 }
 0x46d   : > { %v3294_v45 = vpack.c.bf16 %v3262_v27, %v3262_v27  ;;  %3390 = vst [vmem:[%s5821_s19 + $0xa4] sm:$0xf] %v3358_v26 }
 0x46f   : > { %3326 = vst [vmem:[%s5821_s19 + $0xa0] sm:$0xf] %v3294_v45 }
 0x470   : > { %v3125_v37 = vpop.f32.mrf.mxu2  ;;  %v3214_v46 = vpop.f32.mrf.mxu3 }
 0x471   : > { %v3126_v12 = vadd.f32 %v3125_v37, %v5809_v48  ;;  %v3215_v43 = vadd.f32 %v3214_v46, %v5811_v6 }
 0x473   : > { %v3263_v16 = vmax.f32 %v3126_v12, 0.0  ;;  %v3359_v41 = vpack.c.bf16 %v3215_v43, %v3215_v43 }
 0x475   : > { %v3295_v59 = vpack.c.bf16 %v3263_v16, %v3263_v16  ;;  %3391 = vst [vmem:[%s5821_s19 + $0xac] sm:$0xf] %v3359_v41 }
 0x477   : > { %3327 = vst [vmem:[%s5821_s19 + $0xa8] sm:$0xf] %v3295_v59 }
 0x478   : > { %v3128_v60 = vpop.f32.mrf.mxu2  ;;  %v3217_v11 = vpop.f32.mrf.mxu3 }
 0x479   : > { %v3129_v20 = vadd.f32 %v3128_v60, %v5809_v48  ;;  %v3218_v49 = vadd.f32 %v3217_v11, %v5811_v6 }
 0x47b   : > { %v3264_v19 = vmax.f32 %v3129_v20, 0.0  ;;  %v3360_v14 = vpack.c.bf16 %v3218_v49, %v3218_v49 }
 0x47d   : > { %v3296_v0 = vpack.c.bf16 %v3264_v19, %v3264_v19  ;;  %3392 = vst [vmem:[%s5821_s19 + $0xb4] sm:$0xf] %v3360_v14 }
 0x47f   : > { %3328 = vst [vmem:[%s5821_s19 + $0xb0] sm:$0xf] %v3296_v0 }
 0x480   : > { %v3130_v51 = vpop.f32.mrf.mxu2  ;;  %v3219_v29 = vpop.f32.mrf.mxu3 }
 0x481   : > { %v3131_v40 = vadd.f32 %v3130_v51, %v5809_v48  ;;  %v3220_v53 = vadd.f32 %v3219_v29, %v5811_v6 }
 0x483   : > { %v3265_v13 = vmax.f32 %v3131_v40, 0.0  ;;  %v3361_v25 = vpack.c.bf16 %v3220_v53, %v3220_v53 }
 0x485   : > { %v3297_v8 = vpack.c.bf16 %v3265_v13, %v3265_v13  ;;  %3393 = vst [vmem:[%s5821_s19 + $0xbc] sm:$0xf] %v3361_v25 }
 0x487   : > { %3329 = vst [vmem:[%s5821_s19 + $0xb8] sm:$0xf] %v3297_v8 }
 0x488   : > { %v3133_v24 = vpop.f32.mrf.mxu2  ;;  %v3222_v56 = vpop.f32.mrf.mxu3 }
 0x489   : > { %v3134_v3 = vadd.f32 %v3133_v24, %v5809_v48  ;;  %v3223_v15 = vadd.f32 %v3222_v56, %v5811_v6 }
 0x48b   : > { %v3266_v47 = vmax.f32 %v3134_v3, 0.0  ;;  %v3362_v62 = vpack.c.bf16 %v3223_v15, %v3223_v15 }
 0x48d   : > { %v3298_v7 = vpack.c.bf16 %v3266_v47, %v3266_v47  ;;  %3394 = vst [vmem:[%s5821_s19 + $0xc4] sm:$0xf] %v3362_v62 }
 0x48f   : > { %3330 = vst [vmem:[%s5821_s19 + $0xc0] sm:$0xf] %v3298_v7 }
 0x490   : > { %v3135_v17 = vpop.f32.mrf.mxu2  ;;  %v3224_v50 = vpop.f32.mrf.mxu3 }
 0x491   : > { %v3136_v10 = vadd.f32 %v3135_v17, %v5809_v48  ;;  %v3225_v4 = vadd.f32 %v3224_v50, %v5811_v6 }
 0x493   : > { %v3267_v34 = vmax.f32 %v3136_v10, 0.0  ;;  %v3363_v5 = vpack.c.bf16 %v3225_v4, %v3225_v4 }
 0x495   : > { %v3299_v1 = vpack.c.bf16 %v3267_v34, %v3267_v34  ;;  %3395 = vst [vmem:[%s5821_s19 + $0xcc] sm:$0xf] %v3363_v5 }
 0x497   : > { %3331 = vst [vmem:[%s5821_s19 + $0xc8] sm:$0xf] %v3299_v1 }
 0x498   : > { %v3138_v55 = vpop.f32.mrf.mxu2  ;;  %v3227_v33 = vpop.f32.mrf.mxu3 }
 0x499   : > { %v3139_v63 = vadd.f32 %v3138_v55, %v5809_v48  ;;  %v3228_v38 = vadd.f32 %v3227_v33, %v5811_v6 }
 0x49b   : > { %v3268_v9 = vmax.f32 %v3139_v63, 0.0  ;;  %v3364_v58 = vpack.c.bf16 %v3228_v38, %v3228_v38 }
 0x49d   : > { %v3300_v32 = vpack.c.bf16 %v3268_v9, %v3268_v9  ;;  %3396 = vst [vmem:[%s5821_s19 + $0xd4] sm:$0xf] %v3364_v58 }
 0x49f   : > { %3332 = vst [vmem:[%s5821_s19 + $0xd0] sm:$0xf] %v3300_v32 }
 0x4a0   : > { %v3140_v30 = vpop.f32.mrf.mxu2  ;;  %v3229_v22 = vpop.f32.mrf.mxu3 }
 0x4a1   : > { %v3141_v2 = vadd.f32 %v3140_v30, %v5809_v48  ;;  %v3230_v57 = vadd.f32 %v3229_v22, %v5811_v6 }
 0x4a3   : > { %v3269_v35 = vmax.f32 %v3141_v2, 0.0  ;;  %v3365_v52 = vpack.c.bf16 %v3230_v57, %v3230_v57 }
 0x4a5   : > { %v3301_v42 = vpack.c.bf16 %v3269_v35, %v3269_v35  ;;  %3397 = vst [vmem:[%s5821_s19 + $0xdc] sm:$0xf] %v3365_v52 }
 0x4a7   : > { %3333 = vst [vmem:[%s5821_s19 + $0xd8] sm:$0xf] %v3301_v42 }
 0x4a8   : > { %v3143_v36 = vpop.f32.mrf.mxu2  ;;  %v3232_v54 = vpop.f32.mrf.mxu3 }
 0x4a9   : > { %v3144_v31 = vadd.f32 %v3143_v36, %v5809_v48  ;;  %v3233_v61 = vadd.f32 %v3232_v54, %v5811_v6 }
 0x4ab   : > { %v3270_v21 = vmax.f32 %v3144_v31, 0.0  ;;  %v3366_v18 = vpack.c.bf16 %v3233_v61, %v3233_v61 }
 0x4ad   : > { %v3302_v39 = vpack.c.bf16 %v3270_v21, %v3270_v21  ;;  %3398 = vst [vmem:[%s5821_s19 + $0xe4] sm:$0xf] %v3366_v18 }
 0x4af   : > { %3334 = vst [vmem:[%s5821_s19 + $0xe0] sm:$0xf] %v3302_v39 }
 0x4b0   : > { %v3145_v23 = vpop.f32.mrf.mxu2  ;;  %v3234_v28 = vpop.f32.mrf.mxu3 }
 0x4b1   : > { %v3146_v44 = vadd.f32 %v3145_v23, %v5809_v48  ;;  %v3235_v27 = vadd.f32 %v3234_v28, %v5811_v6 }
 0x4b3   : > { %v3271_v26 = vmax.f32 %v3146_v44, 0.0  ;;  %v3367_v45 = vpack.c.bf16 %v3235_v27, %v3235_v27 }
 0x4b5   : > { %v3303_v37 = vpack.c.bf16 %v3271_v26, %v3271_v26  ;;  %3399 = vst [vmem:[%s5821_s19 + $0xec] sm:$0xf] %v3367_v45 }
 0x4b7   : > { %3335 = vst [vmem:[%s5821_s19 + $0xe8] sm:$0xf] %v3303_v37 }
 0x4b8   : > { %v3148_v46 = vpop.f32.mrf.mxu2  ;;  %v3237_v12 = vpop.f32.mrf.mxu3 }
 0x4b9   : > { %v3149_v43 = vadd.f32 %v3148_v46, %v5809_v48  ;;  %v3238_v16 = vadd.f32 %v3237_v12, %v5811_v6 }
 0x4bb   : > { %v3272_v41 = vmax.f32 %v3149_v43, 0.0  ;;  %v3368_v59 = vpack.c.bf16 %v3238_v16, %v3238_v16 }
 0x4bd   : > { %v3304_v60 = vpack.c.bf16 %v3272_v41, %v3272_v41  ;;  %3400 = vst [vmem:[%s5821_s19 + $0xf4] sm:$0xf] %v3368_v59 }
 0x4bf   : > { %3336 = vst [vmem:[%s5821_s19 + $0xf0] sm:$0xf] %v3304_v60 }
 0x4c0   : > { %v3150_v11 = vpop.f32.mrf.mxu2  ;;  %v3239_v20 = vpop.f32.mrf.mxu3 }
 0x4c1   : > { %v3151_v49 = vadd.f32 %v3150_v11, %v5809_v48  ;;  %v3240_v19 = vadd.f32 %v3239_v20, %v5811_v6 }
 0x4c3   : > { %v3273_v14 = vmax.f32 %v3151_v49, 0.0  ;;  %v3369_v0 = vpack.c.bf16 %v3240_v19, %v3240_v19 }
 0x4c5   : > { %v3305_v51 = vpack.c.bf16 %v3273_v14, %v3273_v14  ;;  %3401 = vst [vmem:[%s5821_s19 + $0xfc] sm:$0xf] %v3369_v0 }
 0x4c7   : > { %3337 = vst [vmem:[%s5821_s19 + $0xf8] sm:$0xf] %v3305_v51 }
 0x4c8 PF: > { %s18_s27 = sadd.s32 1, %s4784_s27  }
 0x4c9   : > { %p15_p4 = scmp.ge.s32.totalorder %s18_s27, 4  }
 0x4cb   :  { %17 = sbr.rel (!%p15_p4) target bundleno = 1 (0x1), region = 85 }

// kernel: _lambda_.7
= control target key start
LH: loop header
LB: loop body
LE: loop exit
PB: predicated region body
PF: predicated region fallthrough
CT: control target
= control target key end

     0   :  { %s4013_s2 = inlined_call_operand.vmem [shape: bf16[1152,128], index: 2, kind: input, shape index: {}]   ;;  %s4014_s3 = inlined_call_operand.vmem [shape: f32[1,128], index: 3, kind: input, shape index: {}]   ;;  %s4015_s0 = inlined_call_operand.vmem [shape: bf16[128,1152], index: 0, kind: input, shape index: {}]   ;;  %s4016_s4 = inlined_call_operand.vmem [shape: bf16[128,128], index: 4, kind: input, shape index: {}]   ;;  %s4017_s6 = inlined_call_operand.vmem [shape: bf16[128,256], index: 6, kind: input, shape index: {}]   ;;  %s4018_s5 = inlined_call_operand.vmem [shape: f32[1,128], index: 5, kind: input, shape index: {}]   ;;  %s4019_s1 = inlined_call_operand.vmem [shape: bf16[128,128], index: 1, kind: input, shape index: {}]   ;;  %s4020_s7 = inlined_call_operand.vmem [shape: f32[1,256], index: 7, kind: input, shape index: {}]   ;;  %s4021_s8 = inlined_call_operand.vmem [shape: bf16[128,256], index: 8, kind: output, shape index: {}]  }
   0x1   :  { %v2746_v0 = vld [vmem:[%s4013_s2 + $0x38] sm:$0xff]  ;;  %v2745_v4 = vld [vmem:[%s4013_s2 + $0x30] sm:$0xff]  ;;  %v2744_v8 = vld [vmem:[%s4013_s2 + $0x28] sm:$0xff] }
   0x2   :  { %v2762_v1 = vld [vmem:[%s4013_s2 + $0xb8] sm:$0xff]  ;;  %1057 = vmatpush.bf16.msra.mxu0 %v2746_v0  ;;  %v2761_v5 = vld [vmem:[%s4013_s2 + $0xb0] sm:$0xff]  ;;  %v2760_v9 = vld [vmem:[%s4013_s2 + $0xa8] sm:$0xff] }
   0x3   :  { %v2754_v2 = vld [vmem:[%s4013_s2 + $0x78] sm:$0xff]  ;;  %1155 = vmatpush.bf16.msra.mxu2 %v2762_v1  ;;  %v2753_v6 = vld [vmem:[%s4013_s2 + $0x70] sm:$0xff]  ;;  %v2752_v10 = vld [vmem:[%s4013_s2 + $0x68] sm:$0xff] }
   0x4   :  { %v2770_v3 = vld [vmem:[%s4013_s2 + $0xf8] sm:$0xff]  ;;  %1106 = vmatpush.bf16.msra.mxu1 %v2754_v2  ;;  %v2769_v7 = vld [vmem:[%s4013_s2 + $0xf0] sm:$0xff]  ;;  %v2768_v11 = vld [vmem:[%s4013_s2 + $0xe8] sm:$0xff] }
   0x5   :  { %1204 = vmatpush.bf16.msra.mxu3 %v2770_v3  ;;  %v2743_v12 = vld [vmem:[%s4013_s2 + $0x20] sm:$0xff]  ;;  %v2742_v16 = vld [vmem:[%s4013_s2 + $0x18] sm:$0xff]  ;;  %v2741_v20 = vld [vmem:[%s4013_s2 + $0x10] sm:$0xff] }
   0x6   :  { %1058 = vmatpush.bf16.msra.mxu0 %v2745_v4  ;;  %v2759_v13 = vld [vmem:[%s4013_s2 + $0xa0] sm:$0xff]  ;;  %v2758_v17 = vld [vmem:[%s4013_s2 + $0x98] sm:$0xff]  ;;  %v2757_v21 = vld [vmem:[%s4013_s2 + $0x90] sm:$0xff] }
   0x7   :  { %1156 = vmatpush.bf16.msra.mxu2 %v2761_v5  ;;  %v2751_v14 = vld [vmem:[%s4013_s2 + $0x60] sm:$0xff]  ;;  %v2750_v18 = vld [vmem:[%s4013_s2 + $0x58] sm:$0xff]  ;;  %v2749_v22 = vld [vmem:[%s4013_s2 + $0x50] sm:$0xff] }
   0x8   :  { %1107 = vmatpush.bf16.msra.mxu1 %v2753_v6  ;;  %v2767_v15 = vld [vmem:[%s4013_s2 + $0xe0] sm:$0xff]  ;;  %v2766_v19 = vld [vmem:[%s4013_s2 + $0xd8] sm:$0xff]  ;;  %v2765_v23 = vld [vmem:[%s4013_s2 + $0xd0] sm:$0xff] }
   0x9   :  { %1205 = vmatpush.bf16.msra.mxu3 %v2769_v7  ;;  %v2740_v24 = vld [vmem:[%s4013_s2 + $0x8] sm:$0xff]  ;;  %v2739_v28 = vld [vmem:[%s4013_s2] sm:$0xff]  ;;  %v2007_v39 = vld [vmem:[%s4015_s0 + $0x2c] sm:$0xf0] }
   0xa   :  { %1059 = vmatpush.bf16.msra.mxu0 %v2744_v8  ;;  %v2756_v25 = vld [vmem:[%s4013_s2 + $0x88] sm:$0xff]  ;;  %v2755_v29 = vld [vmem:[%s4013_s2 + $0x80] sm:$0xff]  ;;  %v2778_v40 = vld [vmem:[%s4013_s2 + $0x138] sm:$0xff] }
   0xb   :  { %1157 = vmatpush.bf16.msra.mxu2 %v2760_v9  ;;  %v2748_v26 = vld [vmem:[%s4013_s2 + $0x48] sm:$0xff]  ;;  %v2747_v30 = vld [vmem:[%s4013_s2 + $0x40] sm:$0xff]  ;;  %v2777_v45 = vld [vmem:[%s4013_s2 + $0x130] sm:$0xff] }
   0xc   :  { %1108 = vmatpush.bf16.msra.mxu1 %v2752_v10  ;;  %v2764_v27 = vld [vmem:[%s4013_s2 + $0xc8] sm:$0xff]  ;;  %v2763_v31 = vld [vmem:[%s4013_s2 + $0xc0] sm:$0xff]  ;;  %v2041_v49 = vld [vmem:[%s4015_s0 + $0x50] sm:$0xf] }
   0xd   :  { %1206 = vmatpush.bf16.msra.mxu3 %v2768_v11  ;;  %v1997_v32 = vld [vmem:[%s4015_s0] sm:$0xf]  ;;  %v2671_v33 = vld [vmem:[%s4015_s0 + $0x20] sm:$0xf0]  ;;  %v2005_v34 = vld [vmem:[%s4015_s0 + $0x8] sm:$0xf] }
   0xe   :  { %1060 = vmatpush.bf16.msra.mxu0 %v2743_v12  ;;  %v2672_v35 = vld [vmem:[%s4015_s0 + $0x28] sm:$0xf0]  ;;  %v2667_v36 = vld [vmem:[%s4015_s0 + $0x4] sm:$0xf]  ;;  %v1999_v37 = vld [vmem:[%s4015_s0 + $0x24] sm:$0xf0]  ;;  %v1998_v41 = vor.u32 %v2671_v33, %v1997_v32 }
   0xf   :  { %1158 = vmatpush.bf16.msra.mxu2 %v2759_v13  ;;  %v2668_v38 = vld [vmem:[%s4015_s0 + $0xc] sm:$0xf]  ;;  %v2006_v42 = vor.u32 %v2672_v35, %v2005_v34  ;;  %v2002_v43 = vor.u32 %v2667_v36, %v1999_v37  ;;  %v2033_v47 = vld [vmem:[%s4015_s0 + $0x48] sm:$0xf]  ;;  %v2681_v50 = vld [vmem:[%s4015_s0 + $0x70] sm:$0xf0] }
  0x10   :  { %1109 = vmatpush.bf16.msra.mxu1 %v2751_v14  ;;  %v2010_v44 = vor.u32 %v2668_v38, %v2007_v39  ;;  %v2776_v46 = vld [vmem:[%s4013_s2 + $0x128] sm:$0xff]  ;;  %v2035_v52 = vld [vmem:[%s4015_s0 + $0x6c] sm:$0xf0]  ;;  %v2677_v53 = vld [vmem:[%s4015_s0 + $0x54] sm:$0xf]  ;;  %v2042_v56 = vor.u32 %v2681_v50, %v2041_v49 }
  0x11   :  { %1207 = vmatpush.bf16.msra.mxu3 %v2767_v15  ;;  %v2680_v48 = vld [vmem:[%s4015_s0 + $0x68] sm:$0xf0]  ;;  %v2043_v54 = vld [vmem:[%s4015_s0 + $0x74] sm:$0xf0]  ;;  %v2775_v59 = vld [vmem:[%s4013_s2 + $0x120] sm:$0xff] }
  0x12   :  { %1061 = vmatpush.bf16.msra.mxu0 %v2742_v16  ;;  %v2676_v51 = vld [vmem:[%s4015_s0 + $0x4c] sm:$0xf]  ;;  %v2034_v55 = vor.u32 %v2680_v48, %v2033_v47  ;;  %v2046_v58 = vor.u32 %v2677_v53, %v2043_v54  ;;  %v2069_v60 = vld [vmem:[%s4015_s0 + $0x90] sm:$0xf]  ;;  %v2689_v61 = vld [vmem:[%s4015_s0 + $0xb0] sm:$0xf0] }
  0x13   :  { %1159 = vmatpush.bf16.msra.mxu2 %v2758_v17  ;;  %v2038_v57 = vor.u32 %v2676_v51, %v2035_v52  ;;  %v2077_v62 = vld [vmem:[%s4015_s0 + $0x98] sm:$0xf]  ;;  %v2690_v63 = vld [vmem:[%s4015_s0 + $0xb8] sm:$0xf0]  ;;  %v2685_v0 = vld [vmem:[%s4015_s0 + $0x94] sm:$0xf]  ;;  %v2070_v4 = vor.u32 %v2689_v61, %v2069_v60 }
  0x14   :  { %1110 = vmatpush.bf16.msra.mxu1 %v2750_v18  ;;  %v2071_v1 = vld [vmem:[%s4015_s0 + $0xb4] sm:$0xf0]  ;;  %v2686_v2 = vld [vmem:[%s4015_s0 + $0x9c] sm:$0xf]  ;;  %v2079_v3 = vld [vmem:[%s4015_s0 + $0xbc] sm:$0xf0]  ;;  %v2078_v5 = vor.u32 %v2690_v63, %v2077_v62 }
  0x15   :  { %1208 = vmatpush.bf16.msra.mxu3 %v2766_v19  ;;  %v2074_v6 = vor.u32 %v2685_v0, %v2071_v1  ;;  %v2082_v7 = vor.u32 %v2686_v2, %v2079_v3  ;;  %v2774_v8 = vld [vmem:[%s4013_s2 + $0x118] sm:$0xff]  ;;  %v2113_v11 = vld [vmem:[%s4015_s0 + $0xe0] sm:$0xf]  ;;  %v2699_v12 = vld [vmem:[%s4015_s0 + $0x100] sm:$0xf0] }
  0x16   :  { %1062 = vmatpush.bf16.msra.mxu0 %v2741_v20  ;;  %v2105_v9 = vld [vmem:[%s4015_s0 + $0xd8] sm:$0xf]  ;;  %v2698_v10 = vld [vmem:[%s4015_s0 + $0xf8] sm:$0xf0]  ;;  %v2107_v14 = vld [vmem:[%s4015_s0 + $0xfc] sm:$0xf0]  ;;  %v2114_v18 = vor.u32 %v2699_v12, %v2113_v11 }
  0x17   :  { %1160 = vmatpush.bf16.msra.mxu2 %v2757_v21  ;;  %v2694_v13 = vld [vmem:[%s4015_s0 + $0xdc] sm:$0xf]  ;;  %v2695_v15 = vld [vmem:[%s4015_s0 + $0xe4] sm:$0xf]  ;;  %v2115_v16 = vld [vmem:[%s4015_s0 + $0x104] sm:$0xf0]  ;;  %v2106_v17 = vor.u32 %v2698_v10, %v2105_v9 }
  0x18   :  { %1111 = vmatpush.bf16.msra.mxu1 %v2749_v22  ;;  %v2110_v19 = vor.u32 %v2694_v13, %v2107_v14  ;;  %v2118_v20 = vor.u32 %v2695_v15, %v2115_v16  ;;  %v2773_v21 = vld [vmem:[%s4013_s2 + $0x110] sm:$0xff]  ;;  %v2141_v22 = vld [vmem:[%s4015_s0 + $0x120] sm:$0xf]  ;;  %v2794_v34 = vld [vmem:[%s4013_s2 + $0x1b8] sm:$0xff] }
  0x19   :  { %1209 = vmatpush.bf16.msra.mxu3 %v2765_v23  ;;  %v2707_v23 = vld [vmem:[%s4015_s0 + $0x140] sm:$0xf0]  ;;  %v2772_v35 = vld [vmem:[%s4013_s2 + $0x108] sm:$0xff]  ;;  %v2786_v36 = vld [vmem:[%s4013_s2 + $0x178] sm:$0xff] }
  0x1a   :  { %1063 = vmatpush.bf16.msra.mxu0 %v2740_v24  ;;  %v2149_v24 = vld [vmem:[%s4015_s0 + $0x128] sm:$0xf]  ;;  %v2802_v37 = vld [vmem:[%s4013_s2 + $0x1f8] sm:$0xff]  ;;  %v2793_v38 = vld [vmem:[%s4013_s2 + $0x1b0] sm:$0xff] }
  0x1b   :  { %1161 = vmatpush.bf16.msra.mxu2 %v2756_v25  ;;  %v2708_v25 = vld [vmem:[%s4015_s0 + $0x148] sm:$0xf0]  ;;  %v2785_v39 = vld [vmem:[%s4013_s2 + $0x170] sm:$0xff]  ;;  %v2187_v51 = vld [vmem:[%s4015_s0 + $0x194] sm:$0xf0] }
  0x1c   :  { %1112 = vmatpush.bf16.msra.mxu1 %v2748_v26  ;;  %v2703_v26 = vld [vmem:[%s4015_s0 + $0x124] sm:$0xf]  ;;  %v2717_v47 = vld [vmem:[%s4015_s0 + $0x190] sm:$0xf0]  ;;  %v2712_v48 = vld [vmem:[%s4015_s0 + $0x16c] sm:$0xf] }
  0x1d   :  { %1210 = vmatpush.bf16.msra.mxu3 %v2764_v27  ;;  %v2143_v27 = vld [vmem:[%s4015_s0 + $0x144] sm:$0xf0]  ;;  %v2179_v49 = vld [vmem:[%s4015_s0 + $0x18c] sm:$0xf0]  ;;  %v2713_v50 = vld [vmem:[%s4015_s0 + $0x174] sm:$0xf] }
  0x1e   :  { %1064 = vmatpush.bf16.msra.mxu0 %v2739_v28  ;;  %v2704_v28 = vld [vmem:[%s4015_s0 + $0x12c] sm:$0xf]  ;;  %v2146_v32 = vor.u32 %v2703_v26, %v2143_v27  ;;  %v2791_v52 = vld [vmem:[%s4013_s2 + $0x1a0] sm:$0xff]  ;;  %v2782_v61 = vld [vmem:[%s4013_s2 + $0x158] sm:$0xff] }
  0x1f   :  { %1162 = vmatpush.bf16.msra.mxu2 %v2755_v29  ;;  %v2151_v29 = vld [vmem:[%s4015_s0 + $0x14c] sm:$0xf0]  ;;  %v2783_v53 = vld [vmem:[%s4013_s2 + $0x160] sm:$0xff]  ;;  %v2798_v62 = vld [vmem:[%s4013_s2 + $0x1d8] sm:$0xff] }
  0x20   :  { %1113 = vmatpush.bf16.msra.mxu1 %v2747_v30  ;;  %v2142_v30 = vor.u32 %v2707_v23, %v2141_v22  ;;  %v2154_v33 = vor.u32 %v2704_v28, %v2151_v29  ;;  %v2799_v54 = vld [vmem:[%s4013_s2 + $0x1e0] sm:$0xff]  ;;  %v2789_v63 = vld [vmem:[%s4013_s2 + $0x190] sm:$0xff]  ;;  %v2788_v2 = vld [vmem:[%s4013_s2 + $0x188] sm:$0xff] }
  0x21   :  { %1211 = vmatpush.bf16.msra.mxu3 %v2763_v31  ;;  %1065 = vmatmul.bf16.vlgmr.msra.gmra.mxu0 %v1998_v41  ;;  %v2150_v31 = vor.u32 %v2708_v25, %v2149_v24  ;;  %v2792_v41 = vld [vmem:[%s4013_s2 + $0x1a8] sm:$0xff]  ;;  %v2771_v60 = vld [vmem:[%s4013_s2 + $0x100] sm:$0xff]  ;;  %v2781_v0 = vld [vmem:[%s4013_s2 + $0x150] sm:$0xff] }
  0x22   :  { %1253 = vmatpush.bf16.msrb.mxu0 %v2778_v40  ;;  %1163 = vmatmul.bf16.vlgmr.msra.gmra.mxu2 %v2006_v42  ;;  %v2801_v40 = vld [vmem:[%s4013_s2 + $0x1f0] sm:$0xff]  ;;  %v2784_v42 = vld [vmem:[%s4013_s2 + $0x168] sm:$0xff]  ;;  %v2215_v10 = vld [vmem:[%s4015_s0 + $0x1d4] sm:$0xf0] }
  0x23   :  { %1114 = vmatmul.bf16.vlgmr.msra.gmra.mxu1 %v2002_v43  ;;  %1351 = vmatpush.bf16.msrb.mxu2 %v2794_v34  ;;  %v2800_v43 = vld [vmem:[%s4013_s2 + $0x1e8] sm:$0xff]  ;;  %v2797_v1 = vld [vmem:[%s4013_s2 + $0x1d0] sm:$0xff]  ;;  %v2722_v11 = vld [vmem:[%s4015_s0 + $0x1bc] sm:$0xf] }
  0x24   :  { %1212 = vmatmul.bf16.vlgmr.msra.gmra.mxu3 %v2010_v44  ;;  %1302 = vmatpush.bf16.msrb.mxu1 %v2786_v36  ;;  %v2177_v44 = vld [vmem:[%s4015_s0 + $0x168] sm:$0xf]  ;;  %v2721_v9 = vld [vmem:[%s4015_s0 + $0x1b4] sm:$0xf]  ;;  %v2223_v12 = vld [vmem:[%s4015_s0 + $0x1dc] sm:$0xf0] }
  0x25   :  { %1400 = vmatpush.bf16.msrb.mxu3 %v2802_v37  ;;  %v2780_v3 = vld [vmem:[%s4013_s2 + $0x148] sm:$0xff]  ;;  %v2787_v13 = vld [vmem:[%s4013_s2 + $0x180] sm:$0xff]  ;;  %v2218_v16 = vor.u32 %v2721_v9, %v2215_v10  ;;  %v2734_v22 = vld [vmem:[%s4015_s0 + $0x218] sm:$0xf0] }
  0x26   :  { %1254 = vmatpush.bf16.msrb.mxu0 %v2777_v45  ;;  %v2716_v45 = vld [vmem:[%s4015_s0 + $0x188] sm:$0xf0]  ;;  %v2257_v23 = vld [vmem:[%s4015_s0 + $0x200] sm:$0xf]  ;;  %v2735_v24 = vld [vmem:[%s4015_s0 + $0x220] sm:$0xf0] }
  0x27   :  { %1352 = vmatpush.bf16.msrb.mxu2 %v2793_v38  ;;  %v2730_v25 = vld [vmem:[%s4015_s0 + $0x1fc] sm:$0xf]  ;;  %v2251_v26 = vld [vmem:[%s4015_s0 + $0x21c] sm:$0xf0]  ;;  %v2731_v27 = vld [vmem:[%s4015_s0 + $0x204] sm:$0xf] }
  0x28   :  { %1303 = vmatpush.bf16.msrb.mxu1 %v2785_v39  ;;  %v2259_v28 = vld [vmem:[%s4015_s0 + $0x224] sm:$0xf0]  ;;  %v3314_v34 = vld [vmem:[%s4014_s3] ss:$0 sm:$0xff]  ;;  %v2673_v36 = vld [vmem:[%s4015_s0 + $0x30] sm:$0xf0] }
  0x29   :  { %1401 = vmatpush.bf16.msrb.mxu3 %v2801_v40  ;;  %v2021_v37 = vld [vmem:[%s4015_s0 + $0x18] sm:$0xf]  ;;  %v2674_v38 = vld [vmem:[%s4015_s0 + $0x38] sm:$0xf0]  ;;  %v2669_v39 = vld [vmem:[%s4015_s0 + $0x14] sm:$0xf] }
  0x2a   :  { %1255 = vmatpush.bf16.msrb.mxu0 %v2776_v46  ;;  %v2185_v46 = vld [vmem:[%s4015_s0 + $0x170] sm:$0xf]  ;;  %v2015_v40 = vld [vmem:[%s4015_s0 + $0x34] sm:$0xf0] }
  0x2b   :  { %1353 = vmatpush.bf16.msrb.mxu2 %v2792_v41  ;;  %v2670_v41 = vld [vmem:[%s4015_s0 + $0x1c] sm:$0xf] }
  0x2c   :  { %1304 = vmatpush.bf16.msrb.mxu1 %v2784_v42  ;;  %v2023_v42 = vld [vmem:[%s4015_s0 + $0x3c] sm:$0xf0] }
  0x2d   :  { %1402 = vmatpush.bf16.msrb.mxu3 %v2800_v43 }
  0x2e   :  { %1256 = vmatpush.bf16.msrb.mxu0 %v2775_v59  ;;  %v2790_v59 = vld [vmem:[%s4013_s2 + $0x198] sm:$0xff] }
  0x2f   :  { %1354 = vmatpush.bf16.msrb.mxu2 %v2791_v52 }
  0x30   :  { %1305 = vmatpush.bf16.msrb.mxu1 %v2783_v53 }
  0x31   :  { %1070 = vmatmul.bf16.gmra.mxu0 %v2034_v55  ;;  %v2178_v55 = vor.u32 %v2716_v45, %v2177_v44  ;;  %1403 = vmatpush.bf16.msrb.mxu3 %v2799_v54  ;;  %v2022_v44 = vor.u32 %v2674_v38, %v2021_v37 }
  0x32   :  { %1168 = vmatmul.bf16.gmra.mxu2 %v2042_v56  ;;  %1257 = vmatpush.bf16.msrb.mxu0 %v2774_v8  ;;  %v2186_v56 = vor.u32 %v2717_v47, %v2185_v46  ;;  %v2726_v8 = vld [vmem:[%s4015_s0 + $0x1d8] sm:$0xf0]  ;;  %v2018_v46 = vor.u32 %v2669_v39, %v2015_v40  ;;  %v2026_v47 = vor.u32 %v2670_v41, %v2023_v42 }
  0x33   :  { %1119 = vmatmul.bf16.gmra.mxu1 %v2038_v57  ;;  %v2182_v57 = vor.u32 %v2712_v48, %v2179_v49  ;;  %1355 = vmatpush.bf16.msrb.mxu2 %v2790_v59 }
  0x34   :  { %1217 = vmatmul.bf16.gmra.mxu3 %v2046_v58  ;;  %v2190_v58 = vor.u32 %v2713_v50, %v2187_v51  ;;  %1306 = vmatpush.bf16.msrb.mxu1 %v2782_v61  ;;  %v2808_v51 = vld [vmem:[%s4013_s2 + $0x228] sm:$0xff]  ;;  %v2682_v61 = vld [vmem:[%s4015_s0 + $0x78] sm:$0xf0] }
  0x35   :  { %1404 = vmatpush.bf16.msrb.mxu3 %v2798_v62  ;;  %v2057_v62 = vld [vmem:[%s4015_s0 + $0x60] sm:$0xf] }
  0x36   :  { %1258 = vmatpush.bf16.msrb.mxu0 %v2773_v21  ;;  %v2249_v21 = vld [vmem:[%s4015_s0 + $0x1f8] sm:$0xf] }
  0x37   :  { %1356 = vmatpush.bf16.msrb.mxu2 %v2789_v63  ;;  %v2250_v29 = vor.u32 %v2734_v22, %v2249_v21  ;;  %v2683_v63 = vld [vmem:[%s4015_s0 + $0x80] sm:$0xf0] }
  0x38   :  { %1307 = vmatpush.bf16.msrb.mxu1 %v2781_v0  ;;  %v2678_v0 = vld [vmem:[%s4015_s0 + $0x5c] sm:$0xf] }
  0x39   :  { %1405 = vmatpush.bf16.msrb.mxu3 %v2797_v1  ;;  %v2051_v1 = vld [vmem:[%s4015_s0 + $0x7c] sm:$0xf0] }
  0x3a   :  { %1259 = vmatpush.bf16.msrb.mxu0 %v2772_v35  ;;  %v2013_v35 = vld [vmem:[%s4015_s0 + $0x10] sm:$0xf]  ;;  %v2054_v10 = vor.u32 %v2678_v0, %v2051_v1 }
  0x3b   :  { %1357 = vmatpush.bf16.msrb.mxu2 %v2788_v2  ;;  %v2014_v43 = vor.u32 %v2673_v36, %v2013_v35  ;;  %v2679_v2 = vld [vmem:[%s4015_s0 + $0x64] sm:$0xf] }
  0x3c   :  { %1308 = vmatpush.bf16.msrb.mxu1 %v2780_v3  ;;  %v2059_v3 = vld [vmem:[%s4015_s0 + $0x84] sm:$0xf0] }
  0x3e   :  { %1260 = vmatpush.bf16.msrb.mxu0 %v2771_v60  ;;  %v2049_v60 = vld [vmem:[%s4015_s0 + $0x58] sm:$0xf] }
  0x3f   :  { %1358 = vmatpush.bf16.msrb.mxu2 %v2787_v13 }
  0x41   :  { %1075 = vmatmul.bf16.gmra.mxu0 %v2070_v4  ;;  %v2796_v4 = vld [vmem:[%s4013_s2 + $0x1c8] sm:$0xff] }
  0x42   :  { %1173 = vmatmul.bf16.gmra.mxu2 %v2078_v5  ;;  %v2213_v5 = vld [vmem:[%s4015_s0 + $0x1b0] sm:$0xf]  ;;  %1406 = vmatpush.bf16.msrb.mxu3 %v2796_v4 }
  0x43   :  { %1124 = vmatmul.bf16.gmra.mxu1 %v2074_v6  ;;  %v2725_v6 = vld [vmem:[%s4015_s0 + $0x1d0] sm:$0xf0] }
  0x44   :  { %1222 = vmatmul.bf16.gmra.mxu3 %v2082_v7  ;;  %v2221_v7 = vld [vmem:[%s4015_s0 + $0x1b8] sm:$0xf]  ;;  %v2214_v14 = vor.u32 %v2725_v6, %v2213_v5 }
  0x45   :  { %v2222_v15 = vor.u32 %v2726_v8, %v2221_v7  ;;  %v2050_v7 = vor.u32 %v2682_v61, %v2049_v60  ;;  %v2058_v8 = vor.u32 %v2683_v63, %v2057_v62  ;;  %v2696_v60 = vld [vmem:[%s4015_s0 + $0xec] sm:$0xf]  ;;  %v2123_v61 = vld [vmem:[%s4015_s0 + $0x10c] sm:$0xf0]  ;;  %v2697_v62 = vld [vmem:[%s4015_s0 + $0xf4] sm:$0xf] }
  0x46   :  { %v2131_v63 = vld [vmem:[%s4015_s0 + $0x114] sm:$0xf0] }
  0x51   :  { %1080 = vmatmul.bf16.gmra.mxu0 %v2106_v17  ;;  %v2226_v17 = vor.u32 %v2722_v11, %v2223_v12  ;;  %v2062_v11 = vor.u32 %v2679_v2, %v2059_v3 }
  0x52   :  { %1178 = vmatmul.bf16.gmra.mxu2 %v2114_v18  ;;  %v2779_v18 = vld [vmem:[%s4013_s2 + $0x140] sm:$0xff] }
  0x53   :  { %1129 = vmatmul.bf16.gmra.mxu1 %v2110_v19  ;;  %v2795_v19 = vld [vmem:[%s4013_s2 + $0x1c0] sm:$0xff] }
  0x54   :  { %1227 = vmatmul.bf16.gmra.mxu3 %v2118_v20  ;;  %1309 = vmatpush.bf16.msrb.mxu1 %v2779_v18  ;;  %v2810_v20 = vld [vmem:[%s4013_s2 + $0x238] sm:$0xff] }
  0x55   :  { %1407 = vmatpush.bf16.msrb.mxu3 %v2795_v19  ;;  %1449 = vmatpush.bf16.msra.mxu0 %v2810_v20 }
  0x61   :  { %1085 = vmatmul.bf16.gmra.mxu0 %v2142_v30  ;;  %v2258_v30 = vor.u32 %v2735_v24, %v2257_v23 }
  0x62   :  { %1183 = vmatmul.bf16.gmra.mxu2 %v2150_v31  ;;  %v2254_v31 = vor.u32 %v2730_v25, %v2251_v26  ;;  %v2085_v25 = vld [vmem:[%s4015_s0 + $0xa0] sm:$0xf]  ;;  %v2691_v26 = vld [vmem:[%s4015_s0 + $0xc0] sm:$0xf0] }
  0x63   :  { %1134 = vmatmul.bf16.gmra.mxu1 %v2146_v32  ;;  %v2262_v32 = vor.u32 %v2731_v27, %v2259_v28  ;;  %v2093_v27 = vld [vmem:[%s4015_s0 + $0xa8] sm:$0xf]  ;;  %v2692_v28 = vld [vmem:[%s4015_s0 + $0xc8] sm:$0xf0]  ;;  %v2086_v37 = vor.u32 %v2691_v26, %v2085_v25  ;;  %v2165_v25 = vld [vmem:[%s4015_s0 + $0x138] sm:$0xf] }
  0x64   :  { %1232 = vmatmul.bf16.gmra.mxu3 %v2154_v33  ;;  %v2809_v33 = vld [vmem:[%s4013_s2 + $0x230] sm:$0xff]  ;;  %v2094_v38 = vor.u32 %v2692_v28, %v2093_v27  ;;  %v2710_v26 = vld [vmem:[%s4015_s0 + $0x158] sm:$0xf0]  ;;  %v2159_v28 = vld [vmem:[%s4015_s0 + $0x154] sm:$0xf0] }
  0x65   :  { %1450 = vmatpush.bf16.msra.mxu0 %v2809_v33  ;;  %v2705_v27 = vld [vmem:[%s4015_s0 + $0x134] sm:$0xf] }
  0x69   :  { %1451 = vmatpush.bf16.msra.mxu0 %v2808_v51 }
  0x71   :  { %1090 = vmatmul.bf16.gmra.mxu0 %v2178_v55 }
  0x72   :  { %1188 = vmatmul.bf16.gmra.mxu2 %v2186_v56 }
  0x73   :  { %1139 = vmatmul.bf16.gmra.mxu1 %v2182_v57 }
  0x74   :  { %1237 = vmatmul.bf16.gmra.mxu3 %v2190_v58 }
  0x81   :  { %1095 = vmatmul.bf16.gmra.mxu0 %v2214_v14 }
  0x82   :  { %1193 = vmatmul.bf16.gmra.mxu2 %v2222_v15 }
  0x83   :  { %1144 = vmatmul.bf16.gmra.mxu1 %v2218_v16  ;;  %v2807_v16 = vld [vmem:[%s4013_s2 + $0x220] sm:$0xff] }
  0x84   :  { %1242 = vmatmul.bf16.gmra.mxu3 %v2226_v17  ;;  %1452 = vmatpush.bf16.msra.mxu0 %v2807_v16 }
  0x91   :  { %1100 = vmatmul.bf16.gmra.mxu0 %v2250_v29  ;;  %v2687_v29 = vld [vmem:[%s4015_s0 + $0xa4] sm:$0xf] }
  0x92   :  { %1198 = vmatmul.bf16.gmra.mxu2 %v2258_v30  ;;  %v2087_v30 = vld [vmem:[%s4015_s0 + $0xc4] sm:$0xf0] }
  0x93   :  { %1149 = vmatmul.bf16.gmra.mxu1 %v2254_v31  ;;  %v2688_v31 = vld [vmem:[%s4015_s0 + $0xac] sm:$0xf]  ;;  %v2090_v40 = vor.u32 %v2687_v29, %v2087_v30  ;;  %v2706_v29 = vld [vmem:[%s4015_s0 + $0x13c] sm:$0xf]  ;;  %v2167_v30 = vld [vmem:[%s4015_s0 + $0x15c] sm:$0xf0] }
  0x94   :  { %1247 = vmatmul.bf16.gmra.mxu3 %v2262_v32  ;;  %v2095_v32 = vld [vmem:[%s4015_s0 + $0xcc] sm:$0xf0] }
  0x95   :  { %v2098_v41 = vor.u32 %v2688_v31, %v2095_v32 }
  0x9e   :  { %v1066_v45 = vpop.f32.mrf.mxu0 }
  0x9f   :  { %v1067_v48 = vadd.f32 %v3314_v34, %v1066_v45 }
  0xa0   :  { %v1115_v49 = vpop.f32.mrf.mxu1 }
  0xa1   :  { %v1116_v50 = vadd.f32 %v1115_v49, %v1067_v48  ;;  %1261 = vmatmul.bf16.vlgmr.msrb.gmra.mxu0 %v2014_v43 }
  0xa2   :  { %1359 = vmatmul.bf16.vlgmr.msrb.gmra.mxu2 %v2022_v44 }
  0xa3   :  { %1310 = vmatmul.bf16.vlgmr.msrb.gmra.mxu1 %v2018_v46  ;;  %v2806_v46 = vld [vmem:[%s4013_s2 + $0x218] sm:$0xff] }
  0xa4   :  { %1408 = vmatmul.bf16.vlgmr.msrb.gmra.mxu3 %v2026_v47  ;;  %1453 = vmatpush.bf16.msra.mxu0 %v2806_v46 }
  0xa5   :  { %v1164_v52 = vpop.f32.mrf.mxu2 }
  0xa6   :  { %v1165_v53 = vadd.f32 %v1164_v52, %v1116_v50  ;;  %v1068_v55 = vpop.f32.mrf.mxu0 }
  0xa7   :  { %v1213_v54 = vpop.f32.mrf.mxu3  ;;  %v1069_v56 = vadd.f32 %v3314_v34, %v1068_v55  ;;  %v2121_v55 = vld [vmem:[%s4015_s0 + $0xe8] sm:$0xf] }
  0xa8   :  { %v3345_v57 = vadd.f32 %v1213_v54, %v1165_v53  ;;  %v1117_v58 = vpop.f32.mrf.mxu1 }
  0xa9   :  { %v1118_v59 = vadd.f32 %v1117_v58, %v1069_v56  ;;  %v2700_v56 = vld [vmem:[%s4015_s0 + $0x108] sm:$0xf0]  ;;  %v2129_v58 = vld [vmem:[%s4015_s0 + $0xf0] sm:$0xf] }
  0xaa   :  { %v2122_v3 = vor.u32 %v2700_v56, %v2121_v55  ;;  %v2201_v55 = vld [vmem:[%s4015_s0 + $0x180] sm:$0xf]  ;;  %v2719_v56 = vld [vmem:[%s4015_s0 + $0x1a0] sm:$0xf0] }
  0xad   :  { %v1166_v4 = vpop.f32.mrf.mxu2 }
  0xae   :  { %v1167_v5 = vadd.f32 %v1166_v4, %v1118_v59  ;;  %v1071_v9 = vpop.f32.mrf.mxu0  ;;  %v2701_v59 = vld [vmem:[%s4015_s0 + $0x110] sm:$0xf0] }
  0xaf   :  { %v1215_v6 = vpop.f32.mrf.mxu3  ;;  %v1072_v12 = vadd.f32 %v3314_v34, %v1071_v9  ;;  %v2130_v4 = vor.u32 %v2701_v59, %v2129_v58  ;;  %v2714_v58 = vld [vmem:[%s4015_s0 + $0x17c] sm:$0xf]  ;;  %v2195_v59 = vld [vmem:[%s4015_s0 + $0x19c] sm:$0xf0] }
  0xb0   :  { %v3372_v13 = vadd.f32 %v1215_v6, %v1167_v5  ;;  %v1120_v14 = vpop.f32.mrf.mxu1  ;;  %v2126_v6 = vor.u32 %v2696_v60, %v2123_v61  ;;  %v2715_v60 = vld [vmem:[%s4015_s0 + $0x184] sm:$0xf]  ;;  %v2203_v61 = vld [vmem:[%s4015_s0 + $0x1a4] sm:$0xf0] }
  0xb1   :  { %v1121_v15 = vadd.f32 %v1120_v14, %v1072_v12  ;;  %1266 = vmatmul.bf16.gmra.mxu0 %v2050_v7  ;;  %v2134_v7 = vor.u32 %v2697_v62, %v2131_v63  ;;  %v2805_v12 = vld [vmem:[%s4013_s2 + $0x210] sm:$0xff] }
  0xb2   :  { %1364 = vmatmul.bf16.gmra.mxu2 %v2058_v8  ;;  %1454 = vmatpush.bf16.msra.mxu0 %v2805_v12 }
  0xb3   :  { %1315 = vmatmul.bf16.gmra.mxu1 %v2054_v10 }
  0xb4   :  { %1413 = vmatmul.bf16.gmra.mxu3 %v2062_v11 }
  0xb5   :  { %v1169_v17 = vpop.f32.mrf.mxu2 }
  0xb6   :  { %v1170_v18 = vadd.f32 %v1169_v17, %v1121_v15  ;;  %v1073_v20 = vpop.f32.mrf.mxu0 }
  0xb7   :  { %v1218_v19 = vpop.f32.mrf.mxu3  ;;  %v1074_v21 = vadd.f32 %v3314_v34, %v1073_v20 }
  0xb8   :  { %v3378_v22 = vadd.f32 %v1218_v19, %v1170_v18  ;;  %v1122_v23 = vpop.f32.mrf.mxu1 }
  0xb9   :  { %v1123_v24 = vadd.f32 %v1122_v23, %v1074_v21  ;;  %v2157_v23 = vld [vmem:[%s4015_s0 + $0x130] sm:$0xf] }
  0xbd   :  { %v1171_v33 = vpop.f32.mrf.mxu2 }
  0xbe   :  { %v1172_v35 = vadd.f32 %v1171_v33, %v1123_v24  ;;  %v1076_v39 = vpop.f32.mrf.mxu0  ;;  %v2709_v24 = vld [vmem:[%s4015_s0 + $0x150] sm:$0xf0] }
  0xbf   :  { %v1220_v36 = vpop.f32.mrf.mxu3  ;;  %v1077_v42 = vadd.f32 %v3314_v34, %v1076_v39  ;;  %v2170_v39 = vor.u32 %v2706_v29, %v2167_v30 }
  0xc0   :  { %v3405_v43 = vadd.f32 %v1220_v36, %v1172_v35  ;;  %v1125_v44 = vpop.f32.mrf.mxu1  ;;  %v2158_v35 = vor.u32 %v2709_v24, %v2157_v23  ;;  %v2166_v36 = vor.u32 %v2710_v26, %v2165_v25  ;;  %v2723_v23 = vld [vmem:[%s4015_s0 + $0x1c4] sm:$0xf]  ;;  %v2231_v24 = vld [vmem:[%s4015_s0 + $0x1e4] sm:$0xf0]  ;;  %v2724_v25 = vld [vmem:[%s4015_s0 + $0x1cc] sm:$0xf] }
  0xc1   :  { %v1126_v45 = vadd.f32 %v1125_v44, %v1077_v42  ;;  %1271 = vmatmul.bf16.gmra.mxu0 %v2086_v37  ;;  %v2239_v26 = vld [vmem:[%s4015_s0 + $0x1ec] sm:$0xf0] }
  0xc2   :  { %1369 = vmatmul.bf16.gmra.mxu2 %v2094_v38  ;;  %v2162_v38 = vor.u32 %v2705_v27, %v2159_v28 }
  0xc3   :  { %1320 = vmatmul.bf16.gmra.mxu1 %v2090_v40 }
  0xc4   :  { %1418 = vmatmul.bf16.gmra.mxu3 %v2098_v41 }
  0xc5   :  { %v1174_v47 = vpop.f32.mrf.mxu2 }
  0xc6   :  { %v1175_v48 = vadd.f32 %v1174_v47, %v1126_v45  ;;  %v1078_v50 = vpop.f32.mrf.mxu0  ;;  %v2804_v45 = vld [vmem:[%s4013_s2 + $0x208] sm:$0xff] }
  0xc7   :  { %v1223_v49 = vpop.f32.mrf.mxu3  ;;  %v1079_v51 = vadd.f32 %v3314_v34, %v1078_v50  ;;  %1455 = vmatpush.bf16.msra.mxu0 %v2804_v45 }
  0xc8   :  { %v3411_v52 = vadd.f32 %v1223_v49, %v1175_v48  ;;  %v1127_v53 = vpop.f32.mrf.mxu1 }
  0xc9   :  { %v1128_v54 = vadd.f32 %v1127_v53, %v1079_v51  ;;  %v2193_v53 = vld [vmem:[%s4015_s0 + $0x178] sm:$0xf] }
  0xcd   :  { %v1176_v0 = vpop.f32.mrf.mxu2 }
  0xce   :  { %v1177_v1 = vadd.f32 %v1176_v0, %v1128_v54  ;;  %v1081_v5 = vpop.f32.mrf.mxu0  ;;  %v2718_v54 = vld [vmem:[%s4015_s0 + $0x198] sm:$0xf0] }
  0xcf   :  { %v1225_v2 = vpop.f32.mrf.mxu3  ;;  %v1082_v8 = vadd.f32 %v3314_v34, %v1081_v5  ;;  %v2194_v0 = vor.u32 %v2718_v54, %v2193_v53  ;;  %v2737_v53 = vld [vmem:[%s4015_s0 + $0x230] sm:$0xf0]  ;;  %v2732_v54 = vld [vmem:[%s4015_s0 + $0x20c] sm:$0xf] }
  0xd0   :  { %v3438_v9 = vadd.f32 %v1225_v2, %v1177_v1  ;;  %v1130_v10 = vpop.f32.mrf.mxu1  ;;  %v2202_v1 = vor.u32 %v2719_v56, %v2201_v55  ;;  %v2267_v55 = vld [vmem:[%s4015_s0 + $0x22c] sm:$0xf0]  ;;  %v2733_v56 = vld [vmem:[%s4015_s0 + $0x214] sm:$0xf] }
  0xd1   :  { %v1131_v11 = vadd.f32 %v1130_v10, %v1082_v8  ;;  %1276 = vmatmul.bf16.gmra.mxu0 %v2122_v3  ;;  %v2198_v3 = vor.u32 %v2714_v58, %v2195_v59  ;;  %v2803_v8 = vld [vmem:[%s4013_s2 + $0x200] sm:$0xff]  ;;  %v2275_v58 = vld [vmem:[%s4015_s0 + $0x234] sm:$0xf0] }
  0xd2   :  { %1374 = vmatmul.bf16.gmra.mxu2 %v2130_v4  ;;  %v2206_v4 = vor.u32 %v2715_v60, %v2203_v61  ;;  %1456 = vmatpush.bf16.msra.mxu0 %v2803_v8 }
  0xd3   :  { %1325 = vmatmul.bf16.gmra.mxu1 %v2126_v6 }
  0xd4   :  { %1423 = vmatmul.bf16.gmra.mxu3 %v2134_v7 }
  0xd5   :  { %v1179_v14 = vpop.f32.mrf.mxu2 }
  0xd6   :  { %v1180_v15 = vadd.f32 %v1179_v14, %v1131_v11  ;;  %v1083_v17 = vpop.f32.mrf.mxu0 }
  0xd7   :  { %v1228_v16 = vpop.f32.mrf.mxu3  ;;  %v1084_v18 = vadd.f32 %v3314_v34, %v1083_v17  ;;  %v2229_v17 = vld [vmem:[%s4015_s0 + $0x1c0] sm:$0xf] }
  0xd8   :  { %v3444_v19 = vadd.f32 %v1228_v16, %v1180_v15  ;;  %v1132_v20 = vpop.f32.mrf.mxu1 }
  0xd9   :  { %v1133_v21 = vadd.f32 %v1132_v20, %v1084_v18  ;;  %v2727_v18 = vld [vmem:[%s4015_s0 + $0x1e0] sm:$0xf0]  ;;  %v2237_v20 = vld [vmem:[%s4015_s0 + $0x1c8] sm:$0xf] }
  0xda   :  { %v2230_v29 = vor.u32 %v2727_v18, %v2229_v17  ;;  %v2029_v18 = vld [vmem:[%s4015_s0 + $0x20] sm:$0xf] }
  0xdd   :  { %v1181_v31 = vpop.f32.mrf.mxu2 }
  0xde   :  { %v1182_v32 = vadd.f32 %v1181_v31, %v1133_v21  ;;  %v1086_v37 = vpop.f32.mrf.mxu0  ;;  %v2728_v21 = vld [vmem:[%s4015_s0 + $0x1e8] sm:$0xf0] }
  0xdf   :  { %v1230_v33 = vpop.f32.mrf.mxu3  ;;  %v1087_v40 = vadd.f32 %v3314_v34, %v1086_v37  ;;  %v2238_v30 = vor.u32 %v2728_v21, %v2237_v20  ;;  %v2675_v20 = vld [vmem:[%s4015_s0 + $0x40] sm:$0xf0] }
  0xe0   :  { %v3471_v41 = vadd.f32 %v1230_v33, %v1182_v32  ;;  %v1135_v42 = vpop.f32.mrf.mxu1  ;;  %v2234_v32 = vor.u32 %v2723_v23, %v2231_v24  ;;  %v2242_v33 = vor.u32 %v2724_v25, %v2239_v26  ;;  %v2030_v21 = vor.u32 %v2675_v20, %v2029_v18  ;;  %v2817_v23 = vld [vmem:[%s4016_s4 + $0x30] sm:$0xff] }
  0xe1   :  { %v1136_v44 = vadd.f32 %v1135_v42, %v1087_v40  ;;  %1281 = vmatmul.bf16.gmra.mxu0 %v2158_v35 }
  0xe2   :  { %1379 = vmatmul.bf16.gmra.mxu2 %v2166_v36 }
  0xe3   :  { %1330 = vmatmul.bf16.gmra.mxu1 %v2162_v38 }
  0xe4   :  { %1428 = vmatmul.bf16.gmra.mxu3 %v2170_v39 }
  0xe5   :  { %v1184_v46 = vpop.f32.mrf.mxu2 }
  0xe6   :  { %v1185_v47 = vadd.f32 %v1184_v46, %v1136_v44  ;;  %v3476_v49 = vpop.f32.mrf.mxu0  ;;  %v2265_v46 = vld [vmem:[%s4015_s0 + $0x208] sm:$0xf] }
  0xe7   :  { %v1233_v48 = vpop.f32.mrf.mxu3 }
  0xe8   :  { %v3478_v50 = vadd.f32 %v1233_v48, %v1185_v47  ;;  %v3480_v51 = vpop.f32.mrf.mxu1  ;;  %v2736_v47 = vld [vmem:[%s4015_s0 + $0x228] sm:$0xf0]  ;;  %v2273_v48 = vld [vmem:[%s4015_s0 + $0x210] sm:$0xf] }
  0xe9   :  { %v2266_v61 = vor.u32 %v2736_v47, %v2265_v46 }
  0xed   :  { %v3506_v62 = vpop.f32.mrf.mxu2 }
  0xee   :  { %v1091_v2 = vpop.f32.mrf.mxu0 }
  0xef   :  { %v3508_v63 = vpop.f32.mrf.mxu3  ;;  %v1092_v5 = vadd.f32 %v3314_v34, %v1091_v2 }
  0xf0   :  { %v1140_v6 = vpop.f32.mrf.mxu1 }
  0xf1   :  { %v1141_v7 = vadd.f32 %v1140_v6, %v1092_v5  ;;  %1286 = vmatmul.bf16.gmra.mxu0 %v2194_v0  ;;  %v2274_v0 = vor.u32 %v2737_v53, %v2273_v48  ;;  %v2137_v48 = vld [vmem:[%s4015_s0 + $0xf8] sm:$0xf]  ;;  %v2702_v53 = vld [vmem:[%s4015_s0 + $0x118] sm:$0xf0] }
  0xf2   :  { %1384 = vmatmul.bf16.gmra.mxu2 %v2202_v1  ;;  %v2818_v1 = vld [vmem:[%s4016_s4 + $0x38] sm:$0xff] }
  0xf3   :  { %1335 = vmatmul.bf16.gmra.mxu1 %v2198_v3  ;;  %v2270_v3 = vor.u32 %v2732_v54, %v2267_v55  ;;  %v2138_v54 = vor.u32 %v2702_v53, %v2137_v48 }
  0xf4   :  { %1433 = vmatmul.bf16.gmra.mxu3 %v2206_v4  ;;  %v2278_v4 = vor.u32 %v2733_v56, %v2275_v58  ;;  %1590 = vmatpush.bf16.msra.mxu1 %v2818_v1  ;;  %v1089_v1 = vadd.f32 %v3314_v34, %v3476_v49  ;;  %v2209_v49 = vld [vmem:[%s4015_s0 + $0x188] sm:$0xf] }
  0xf5   :  { %v1189_v10 = vpop.f32.mrf.mxu2 }
  0xf6   :  { %v1190_v11 = vadd.f32 %v1189_v10, %v1141_v7  ;;  %v3514_v14 = vpop.f32.mrf.mxu0 }
  0xf7   :  { %v1238_v12 = vpop.f32.mrf.mxu3 }
  0xf8   :  { %v3516_v15 = vadd.f32 %v1238_v12, %v1190_v11  ;;  %v3518_v16 = vpop.f32.mrf.mxu1  ;;  %1591 = vmatpush.bf16.msra.mxu1 %v2817_v23 }
  0xfd   :  { %v3544_v27 = vpop.f32.mrf.mxu2 }
  0xfe   :  { %v1096_v31 = vpop.f32.mrf.mxu0 }
  0xff   :  { %v3546_v28 = vpop.f32.mrf.mxu3  ;;  %v1097_v35 = vadd.f32 %v3314_v34, %v1096_v31  ;;  %v2684_v31 = vld [vmem:[%s4015_s0 + $0x88] sm:$0xf0] }
 0x100   :  { %v1145_v36 = vpop.f32.mrf.mxu1 }
 0x101   :  { %v1146_v37 = vadd.f32 %v1145_v36, %v1097_v35  ;;  %1291 = vmatmul.bf16.gmra.mxu0 %v2230_v29 }
 0x102   :  { %1389 = vmatmul.bf16.gmra.mxu2 %v2238_v30  ;;  %v2065_v30 = vld [vmem:[%s4015_s0 + $0x68] sm:$0xf] }
 0x103   :  { %1340 = vmatmul.bf16.gmra.mxu1 %v2234_v32  ;;  %v2066_v32 = vor.u32 %v2684_v31, %v2065_v30 }
 0x104   :  { %1438 = vmatmul.bf16.gmra.mxu3 %v2242_v33 }
 0x105   :  { %v1194_v38 = vpop.f32.mrf.mxu2 }
 0x106   :  { %v1195_v39 = vadd.f32 %v1194_v38, %v1146_v37  ;;  %v3549_v42 = vpop.f32.mrf.mxu0  ;;  %v2101_v37 = vld [vmem:[%s4015_s0 + $0xb0] sm:$0xf]  ;;  %v2693_v38 = vld [vmem:[%s4015_s0 + $0xd0] sm:$0xf0] }
 0x107   :  { %v1243_v40 = vpop.f32.mrf.mxu3 }
 0x108   :  { %v3551_v44 = vadd.f32 %v1243_v40, %v1195_v39  ;;  %v3553_v45 = vpop.f32.mrf.mxu1  ;;  %v2102_v39 = vor.u32 %v2693_v38, %v2101_v37 }
 0x10d   :  { %v3579_v59 = vpop.f32.mrf.mxu2 }
 0x10e   :  { %v1101_v2 = vpop.f32.mrf.mxu0 }
 0x10f   :  { %v3581_v60 = vpop.f32.mrf.mxu3  ;;  %v1102_v5 = vadd.f32 %v3314_v34, %v1101_v2 }
 0x110   :  { %v1150_v6 = vpop.f32.mrf.mxu1 }
 0x111   :  { %v1151_v7 = vadd.f32 %v1150_v6, %v1102_v5  ;;  %1296 = vmatmul.bf16.gmra.mxu0 %v2266_v61  ;;  %v2173_v61 = vld [vmem:[%s4015_s0 + $0x140] sm:$0xf] }
 0x112   :  { %1394 = vmatmul.bf16.gmra.mxu2 %v2274_v0  ;;  %v2711_v0 = vld [vmem:[%s4015_s0 + $0x160] sm:$0xf0] }
 0x113   :  { %1345 = vmatmul.bf16.gmra.mxu1 %v2270_v3  ;;  %v2174_v2 = vor.u32 %v2711_v0, %v2173_v61 }
 0x114   :  { %1443 = vmatmul.bf16.gmra.mxu3 %v2278_v4 }
 0x115   :  { %v1199_v8 = vpop.f32.mrf.mxu2 }
 0x116   :  { %v1200_v10 = vadd.f32 %v1199_v8, %v1151_v7  ;;  %v3587_v12 = vpop.f32.mrf.mxu0 }
 0x117   :  { %v1248_v11 = vpop.f32.mrf.mxu3 }
 0x118   :  { %v3589_v17 = vadd.f32 %v1248_v11, %v1200_v10  ;;  %v1152_v10 = vpop.f32.mrf.mxu1 }
 0x11e   :  { %v1262_v24 = vpop.f32.mrf.mxu0 }
 0x11f   :  { %v3601_v25 = vadd.f32 %v1262_v24, %v3345_v57  ;;  %v2816_v57 = vld [vmem:[%s4016_s4 + $0x28] sm:$0xff]  ;;  %v1250_v24 = vpop.f32.mrf.mxu3 }
 0x120   :  { %1592 = vmatpush.bf16.msra.mxu1 %v2816_v57  ;;  %v2245_v57 = vld [vmem:[%s4015_s0 + $0x1d0] sm:$0xf] }
 0x121   :  { %1457 = vmatmul.bf16.vlgmr.msra.gmra.mxu0 %v2030_v21 }
 0x126   :  { %v1264_v26 = vpop.f32.mrf.mxu0 }
 0x127   :  { %v3604_v29 = vadd.f32 %v1264_v26, %v3372_v13  ;;  %v1311_v26 = vpop.f32.mrf.mxu1 }
 0x12e   :  { %v1267_v33 = vpop.f32.mrf.mxu0 }
 0x12f   :  { %v3616_v35 = vadd.f32 %v1267_v33, %v3378_v22  ;;  %v2815_v22 = vld [vmem:[%s4016_s4 + $0x20] sm:$0xff] }
 0x130   :  { %1593 = vmatpush.bf16.msra.mxu1 %v2815_v22 }
 0x131   :  { %1462 = vmatmul.bf16.gmra.mxu0 %v2066_v32 }
 0x136   :  { %v1269_v13 = vpop.f32.mrf.mxu0 }
 0x137   :  { %v3619_v36 = vadd.f32 %v1269_v13, %v3405_v43 }
 0x13e   :  { %v1272_v40 = vpop.f32.mrf.mxu0 }
 0x13f   :  { %v3631_v46 = vadd.f32 %v1272_v40, %v3411_v52  ;;  %v2814_v52 = vld [vmem:[%s4016_s4 + $0x18] sm:$0xff] }
 0x140   :  { %1594 = vmatpush.bf16.msra.mxu1 %v2814_v52 }
 0x141   :  { %1467 = vmatmul.bf16.gmra.mxu0 %v2102_v39  ;;  %v1313_v39 = vpop.f32.mrf.mxu1 }
 0x146   :  { %v1274_v43 = vpop.f32.mrf.mxu0 }
 0x147   :  { %v3634_v47 = vadd.f32 %v1274_v43, %v3438_v9 }
 0x14e   :  { %v1277_v55 = vpop.f32.mrf.mxu0 }
 0x14f   :  { %v3646_v56 = vadd.f32 %v1277_v55, %v3444_v19  ;;  %v2813_v19 = vld [vmem:[%s4016_s4 + $0x10] sm:$0xff] }
 0x150   :  { %1595 = vmatpush.bf16.msra.mxu1 %v2813_v19 }
 0x151   :  { %1472 = vmatmul.bf16.gmra.mxu0 %v2138_v54  ;;  %v1316_v54 = vpop.f32.mrf.mxu1 }
 0x156   :  { %v1279_v9 = vpop.f32.mrf.mxu0 }
 0x157   :  { %v3649_v58 = vadd.f32 %v1279_v9, %v3471_v41  ;;  %v1138_v41 = vadd.f32 %v3480_v51, %v1089_v1  ;;  %v2720_v51 = vld [vmem:[%s4015_s0 + $0x1a8] sm:$0xf0] }
 0x158   :  { %v2210_v11 = vor.u32 %v2720_v51, %v2209_v49  ;;  %v2833_v49 = vld [vmem:[%s4017_s6 + $0x74] sm:$0xf]  ;;  %v2663_v51 = vld [vmem:[%s4017_s6 + $0x78] sm:$0xf0] }
 0x159   :  { %v1187_v5 = vadd.f32 %v3506_v62, %v1138_v41  ;;  %v2812_v62 = vld [vmem:[%s4016_s4 + $0x8] sm:$0xff] }
 0x15a   :  { %1596 = vmatpush.bf16.msra.mxu1 %v2812_v62 }
 0x15b   :  { %v1236_v6 = vadd.f32 %v3508_v63, %v1187_v5  ;;  %v1201_v63 = vpop.f32.mrf.mxu2 }
 0x15e   :  { %v1282_v3 = vpop.f32.mrf.mxu0 }
 0x15f   :  { %v3664_v4 = vadd.f32 %v1282_v3, %v3478_v50  ;;  %v1094_v50 = vadd.f32 %v3314_v34, %v3514_v14 }
 0x161   :  { %1477 = vmatmul.bf16.gmra.mxu0 %v2174_v2  ;;  %v1143_v20 = vadd.f32 %v3518_v16, %v1094_v50  ;;  %v1099_v16 = vadd.f32 %v3314_v34, %v3549_v42  ;;  %v1318_v2 = vpop.f32.mrf.mxu1 }
 0x163   :  { %v1192_v23 = vadd.f32 %v3544_v27, %v1143_v20  ;;  %v1360_v32 = vpop.f32.mrf.mxu2  ;;  %v1409_v27 = vpop.f32.mrf.mxu3  ;;  %v1148_v37 = vadd.f32 %v3553_v45, %v1099_v16  ;;  %v2281_v45 = vld [vmem:[%s4015_s0 + $0x218] sm:$0xf] }
 0x165   :  { %v1241_v14 = vadd.f32 %v3546_v28, %v1192_v23  ;;  %v2811_v28 = vld [vmem:[%s4016_s4] sm:$0xff]  ;;  %v1197_v22 = vadd.f32 %v3579_v59, %v1148_v37  ;;  %v1104_v59 = vadd.f32 %v3314_v34, %v3587_v12  ;;  %v2661_v34 = vld [vmem:[%s4017_s6 + $0x70] sm:$0xf]  ;;  %v2834_v12 = vld [vmem:[%s4017_s6 + $0x74] sm:$0xf0] }
 0x166   :  { %v1284_v7 = vpop.f32.mrf.mxu0  ;;  %1597 = vmatpush.bf16.msra.mxu1 %v2811_v28  ;;  %v2831_v37 = vld [vmem:[%s4017_s6 + $0x64] sm:$0xf] }
 0x167   :  { %v3668_v8 = vadd.f32 %v1284_v7, %v1236_v6  ;;  %v1246_v42 = vadd.f32 %v3581_v60, %v1197_v22  ;;  %v1153_v60 = vadd.f32 %v1152_v10, %v1104_v59  ;;  %v1312_v7 = vadd.f32 %v1311_v26, %v3601_v25 }
 0x169   :  { %v1202_v1 = vadd.f32 %v1201_v63, %v1153_v60  ;;  %v1321_v50 = vpop.f32.mrf.mxu1  ;;  %v1361_v62 = vadd.f32 %v1360_v32, %v1312_v7  ;;  %v1314_v63 = vadd.f32 %v1313_v39, %v3604_v29  ;;  %v2653_v32 = vld [vmem:[%s4017_s6 + $0x60] sm:$0xf]  ;;  %v2832_v29 = vld [vmem:[%s4017_s6 + $0x64] sm:$0xf0]  ;;  %v2655_v39 = vld [vmem:[%s4017_s6 + $0x68] sm:$0xf0] }
 0x16b   :  { %v1362_v40 = vpop.f32.mrf.mxu2  ;;  %v1411_v43 = vpop.f32.mrf.mxu3  ;;  %v1251_v19 = vadd.f32 %v1250_v24, %v1202_v1  ;;  %v1410_v23 = vadd.f32 %v1409_v27, %v1361_v62  ;;  %v1317_v27 = vadd.f32 %v1316_v54, %v3616_v35 }
 0x16c   :  { %v1363_v20 = vadd.f32 %v1362_v40, %v1314_v63 }
 0x16e   :  { %v1287_v18 = vpop.f32.mrf.mxu0  ;;  %v1412_v24 = vadd.f32 %v1411_v43, %v1363_v20 }
 0x16f   :  { %v3683_v21 = vadd.f32 %v1287_v18, %v3516_v15  ;;  %v2729_v15 = vld [vmem:[%s4015_s0 + $0x1f0] sm:$0xf0] }
 0x170   :  { %v2246_v33 = vor.u32 %v2729_v15, %v2245_v57 }
 0x171   :  { %1482 = vmatmul.bf16.gmra.mxu0 %v2210_v11  ;;  %v2666_v11 = vor.u32 %v2833_v49, %v2663_v51  ;;  %v1323_v57 = vpop.f32.mrf.mxu1 }
 0x173   :  { %v1365_v52 = vpop.f32.mrf.mxu2  ;;  %v1414_v0 = vpop.f32.mrf.mxu3  ;;  %1862 = vmatpush.bf16.msra.mxu3 %v2666_v11 }
 0x174   :  { %v1366_v43 = vadd.f32 %v1365_v52, %v1317_v27 }
 0x176   :  { %v1289_v30 = vpop.f32.mrf.mxu0  ;;  %v1415_v35 = vadd.f32 %v1414_v0, %v1366_v43  ;;  %v1322_v0 = vadd.f32 %v1321_v50, %v3631_v46 }
 0x177   :  { %v3687_v31 = vadd.f32 %v1289_v30, %v1241_v14 }
 0x17b   :  { %v1367_v3 = vpop.f32.mrf.mxu2  ;;  %v1416_v6 = vpop.f32.mrf.mxu3 }
 0x17e   :  { %v1292_v13 = vpop.f32.mrf.mxu0 }
 0x17f   :  { %v3702_v38 = vadd.f32 %v1292_v13, %v3551_v44  ;;  %v2738_v44 = vld [vmem:[%s4015_s0 + $0x238] sm:$0xf0]  ;;  %v2654_v13 = vor.u32 %v2832_v29, %v2653_v32 }
 0x180   :  { %v2282_v55 = vor.u32 %v2738_v44, %v2281_v45  ;;  %v1326_v44 = vpop.f32.mrf.mxu1 }
 0x181   :  { %1487 = vmatmul.bf16.gmra.mxu0 %v2246_v33 }
 0x183   :  { %v1370_v18 = vpop.f32.mrf.mxu2  ;;  %v1419_v25 = vpop.f32.mrf.mxu3 }
 0x184   :  { %v1371_v51 = vadd.f32 %v1370_v18, %v1322_v0 }
 0x186   :  { %v1294_v48 = vpop.f32.mrf.mxu0  ;;  %v1420_v46 = vadd.f32 %v1419_v25, %v1371_v51  ;;  %v1327_v25 = vadd.f32 %v1326_v44, %v3646_v56 }
 0x187   :  { %v3706_v53 = vadd.f32 %v1294_v48, %v1246_v42  ;;  %v2658_v42 = vor.u32 %v2831_v37, %v2655_v39  ;;  %v1319_v48 = vadd.f32 %v1318_v2, %v3619_v36  ;;  %v2830_v36 = vld [vmem:[%s4017_s6 + $0x54] sm:$0xf0] }
 0x188   :  { %v1328_v52 = vpop.f32.mrf.mxu1 }
 0x189   :  { %1863 = vmatpush.bf16.msra.mxu3 %v2658_v42  ;;  %v1368_v45 = vadd.f32 %v1367_v3, %v1319_v48  ;;  %v2829_v3 = vld [vmem:[%s4017_s6 + $0x54] sm:$0xf]  ;;  %v1329_v27 = vadd.f32 %v1328_v52, %v3649_v58  ;;  %v2826_v58 = vld [vmem:[%s4017_s6 + $0x34] sm:$0xf0] }
 0x18b   :  { %v1372_v33 = vpop.f32.mrf.mxu2  ;;  %v1421_v22 = vpop.f32.mrf.mxu3  ;;  %v1417_v59 = vadd.f32 %v1416_v6, %v1368_v45  ;;  %v2647_v6 = vld [vmem:[%s4017_s6 + $0x58] sm:$0xf0] }
 0x18c   :  { %v2650_v49 = vor.u32 %v2829_v3, %v2647_v6 }
 0x18e   :  { %v1297_v9 = vpop.f32.mrf.mxu0  ;;  %1864 = vmatpush.bf16.msra.mxu3 %v2650_v49 }
 0x18f   :  { %v3717_v61 = vadd.f32 %v1297_v9, %v3589_v17  ;;  %v2662_v17 = vor.u32 %v2834_v12, %v2661_v34  ;;  %v2645_v12 = vld [vmem:[%s4017_s6 + $0x50] sm:$0xf] }
 0x190   :  { %v2646_v2 = vor.u32 %v2830_v36, %v2645_v12  ;;  %v1331_v20 = vpop.f32.mrf.mxu1 }
 0x191   :  { %1492 = vmatmul.bf16.gmra.mxu0 %v2282_v55  ;;  %1813 = vmatpush.bf16.msra.mxu2 %v2662_v17 }
 0x193   :  { %v1375_v54 = vpop.f32.mrf.mxu2  ;;  %v1424_v1 = vpop.f32.mrf.mxu3 }
 0x195   :  { %1814 = vmatpush.bf16.msra.mxu2 %v2654_v13  ;;  %v1376_v13 = vadd.f32 %v1375_v54, %v1327_v25  ;;  %v2629_v54 = vld [vmem:[%s4017_s6 + $0x30] sm:$0xf] }
 0x196   :  { %v1299_v41 = vpop.f32.mrf.mxu0 }
 0x197   :  { %v3719_v5 = vadd.f32 %v1299_v41, %v1251_v19  ;;  %v1425_v56 = vadd.f32 %v1424_v1, %v1376_v13  ;;  %v1332_v1 = vadd.f32 %v1331_v20, %v3664_v4 }
 0x198   :  { %v1333_v37 = vpop.f32.mrf.mxu1 }
 0x199   :  { %1815 = vmatpush.bf16.msra.mxu2 %v2646_v2  ;;  %v1334_v52 = vadd.f32 %v1333_v37, %v3668_v8  ;;  %v2824_v8 = vld [vmem:[%s4017_s6 + $0x24] sm:$0xf0] }
 0x19b   :  { %v1377_v17 = vpop.f32.mrf.mxu2  ;;  %v1426_v62 = vpop.f32.mrf.mxu3 }
 0x19c   :  { %v1378_v39 = vadd.f32 %v1377_v17, %v1329_v27 }
 0x19e   :  { %v1458_v10 = vpop.f32.mrf.mxu0 }
 0x19f   :  { %v1459_v14 = vadd.f32 %v1458_v10, %v1410_v23  ;;  %v1324_v10 = vadd.f32 %v1323_v57, %v3634_v47  ;;  %v2828_v47 = vld [vmem:[%s4017_s6 + $0x44] sm:$0xf0] }
 0x1a1   :  { %v1498_v15 = vmax.f32 %v1459_v14, 0.0  ;;  %v1373_v11 = vadd.f32 %v1372_v33, %v1324_v10  ;;  %v2827_v33 = vld [vmem:[%s4017_s6 + $0x44] sm:$0xf] }
 0x1a3   :  { %v1422_v50 = vadd.f32 %v1421_v22, %v1373_v11  ;;  %v1380_v14 = vpop.f32.mrf.mxu2  ;;  %v1429_v18 = vpop.f32.mrf.mxu3 }
 0x1a4   :  { %v1381_v36 = vadd.f32 %v1380_v14, %v1332_v1 }
 0x1a6   :  { %v1460_v26 = vpop.f32.mrf.mxu0  ;;  %v1430_v3 = vadd.f32 %v1429_v18, %v1381_v36 }
 0x1a7   :  { %v1461_v30 = vadd.f32 %v1460_v26, %v1412_v24 }
 0x1a9   :  { %v1499_v16 = vmax.f32 %v1461_v30, 0.0 }
 0x1ab   :  { %v1514_v28 = vpack.c.bf16 %v1499_v16, %v1498_v15  ;;  %v2637_v16 = vld [vmem:[%s4017_s6 + $0x40] sm:$0xf]  ;;  %v1382_v22 = vpop.f32.mrf.mxu2  ;;  %v1431_v43 = vpop.f32.mrf.mxu3 }
 0x1ac   :  { %v2638_v57 = vor.u32 %v2828_v47, %v2637_v16  ;;  %v1383_v0 = vadd.f32 %v1382_v22, %v1334_v52  ;;  %v2613_v22 = vld [vmem:[%s4017_s6 + $0x10] sm:$0xf] }
 0x1ad   :  { %1598 = vmatmul.bf16.vlgmr.msra.gmra.mxu1 %v1514_v28  ;;  %v2639_v28 = vld [vmem:[%s4017_s6 + $0x48] sm:$0xf0] }
 0x1ae   :  { %v1463_v40 = vpop.f32.mrf.mxu0  ;;  %1816 = vmatpush.bf16.msra.mxu2 %v2638_v57  ;;  %v2642_v29 = vor.u32 %v2827_v33, %v2639_v28  ;;  %v1432_v6 = vadd.f32 %v1431_v43, %v1383_v0  ;;  %v2615_v43 = vld [vmem:[%s4017_s6 + $0x18] sm:$0xf0] }
 0x1af   :  { %v1464_v55 = vadd.f32 %v1463_v40, %v1415_v35  ;;  %v1427_v40 = vadd.f32 %v1426_v62, %v1378_v39 }
 0x1b0   :  { %1865 = vmatpush.bf16.msra.mxu3 %v2642_v29 }
 0x1b1   :  { %v1500_v19 = vmax.f32 %v1464_v55, 0.0 }
 0x1b3   :  { %v1434_v2 = vpop.f32.mrf.mxu3 }
 0x1b6   :  { %v1465_v9 = vpop.f32.mrf.mxu0 }
 0x1b7   :  { %v1466_v60 = vadd.f32 %v1465_v9, %v1417_v59  ;;  %v1336_v59 = vpop.f32.mrf.mxu1  ;;  %v1385_v9 = vpop.f32.mrf.mxu2 }
 0x1b8   :  { %v1337_v20 = vadd.f32 %v1336_v59, %v3683_v21 }
 0x1b9   :  { %v1501_v41 = vmax.f32 %v1466_v60, 0.0  ;;  %v2630_v60 = vor.u32 %v2826_v58, %v2629_v54 }
 0x1bb   :  { %v1515_v34 = vpack.c.bf16 %v1501_v41, %v1500_v19  ;;  %v2825_v19 = vld [vmem:[%s4017_s6 + $0x34] sm:$0xf]  ;;  %v2631_v41 = vld [vmem:[%s4017_s6 + $0x38] sm:$0xf0]  ;;  %1817 = vmatpush.bf16.msra.mxu2 %v2630_v60  ;;  %v1436_v62 = vpop.f32.mrf.mxu3 }
 0x1bc   :  { %v2634_v12 = vor.u32 %v2825_v19, %v2631_v41 }
 0x1bd   :  { %1603 = vmatmul.bf16.gmra.mxu1 %v1515_v34 }
 0x1be   :  { %v1468_v7 = vpop.f32.mrf.mxu0  ;;  %1866 = vmatpush.bf16.msra.mxu3 %v2634_v12 }
 0x1bf   :  { %v1469_v63 = vadd.f32 %v1468_v7, %v1420_v46  ;;  %v1338_v4 = vpop.f32.mrf.mxu1  ;;  %v1387_v7 = vpop.f32.mrf.mxu2 }
 0x1c0   :  { %v1339_v16 = vadd.f32 %v1338_v4, %v3687_v31  ;;  %v2822_v31 = vld [vmem:[%s4017_s6 + $0x14] sm:$0xf0] }
 0x1c1   :  { %v1502_v26 = vmax.f32 %v1469_v63, 0.0 }
 0x1c2   :  { %v1388_v18 = vadd.f32 %v1387_v7, %v1339_v16  ;;  %v2819_v7 = vld [vmem:[%s4017_s6 + $0x4] sm:$0xf] }
 0x1c3   :  { %v1439_v57 = vpop.f32.mrf.mxu3 }
 0x1c4   :  { %v1437_v25 = vadd.f32 %v1436_v62, %v1388_v18 }
 0x1c6   :  { %v1470_v23 = vpop.f32.mrf.mxu0 }
 0x1c7   :  { %v1471_v24 = vadd.f32 %v1470_v23, %v1422_v50  ;;  %v2621_v50 = vld [vmem:[%s4017_s6 + $0x20] sm:$0xf]  ;;  %v2823_v23 = vld [vmem:[%s4017_s6 + $0x24] sm:$0xf]  ;;  %v1341_v14 = vpop.f32.mrf.mxu1  ;;  %v1390_v47 = vpop.f32.mrf.mxu2 }
 0x1c8   :  { %v2622_v63 = vor.u32 %v2824_v8, %v2621_v50 }
 0x1c9   :  { %v1503_v30 = vmax.f32 %v1471_v24, 0.0  ;;  %v2623_v24 = vld [vmem:[%s4017_s6 + $0x28] sm:$0xf0] }
 0x1ca   :  { %1818 = vmatpush.bf16.msra.mxu2 %v2622_v63 }
 0x1cb   :  { %v1516_v15 = vpack.c.bf16 %v1503_v30, %v1502_v26  ;;  %v2626_v30 = vor.u32 %v2823_v23, %v2623_v24 }
 0x1cd   :  { %1608 = vmatmul.bf16.gmra.mxu1 %v1516_v15  ;;  %v1386_v15 = vadd.f32 %v1385_v9, %v1337_v20  ;;  %1867 = vmatpush.bf16.msra.mxu3 %v2626_v30 }
 0x1ce   :  { %v1473_v32 = vpop.f32.mrf.mxu0 }
 0x1cf   :  { %v1474_v42 = vadd.f32 %v1473_v32, %v1425_v56  ;;  %v1435_v21 = vadd.f32 %v1434_v2, %v1386_v15  ;;  %v1343_v29 = vpop.f32.mrf.mxu1  ;;  %v1392_v37 = vpop.f32.mrf.mxu2  ;;  %v2614_v56 = vor.u32 %v2822_v31, %v2613_v22 }
 0x1d0   :  { %v1344_v59 = vadd.f32 %v1343_v29, %v3706_v53  ;;  %v2867_v29 = vld [vmem:[%s4019_s1 + $0x8] sm:$0xff]  }
 0x1d1   :  { %v1504_v44 = vmax.f32 %v1474_v42, 0.0  ;;  %v2821_v42 = vld [vmem:[%s4017_s6 + $0x14] sm:$0xf]  ;;  %1819 = vmatpush.bf16.msra.mxu2 %v2614_v56 }
 0x1d6   :  { %v1475_v48 = vpop.f32.mrf.mxu0 }
 0x1d7   :  { %v1476_v45 = vadd.f32 %v1475_v48, %v1427_v40  ;;  %v1342_v40 = vadd.f32 %v1341_v14, %v3702_v38  ;;  %v1441_v48 = vpop.f32.mrf.mxu3  ;;  %v1346_v54 = vpop.f32.mrf.mxu1  ;;  %v3836_v14 = vld [vmem:[%s4018_s5] ss:$0 sm:$0xff] }
 0x1d8   :  { %v1395_v58 = vpop.f32.mrf.mxu2  ;;  %v1347_v2 = vadd.f32 %v1346_v54, %v3717_v61  ;;  %v2607_v61 = vld [vmem:[%s4017_s6 + $0x8] sm:$0xf0] }
 0x1d9   :  { %v1505_v35 = vmax.f32 %v1476_v45, 0.0 }
 0x1da   :  { %v1396_v53 = vadd.f32 %v1395_v58, %v1347_v2 }
 0x1db   :  { %v1517_v55 = vpack.c.bf16 %v1505_v35, %v1504_v44  ;;  %v2618_v44 = vor.u32 %v2821_v42, %v2615_v43  ;;  %v1391_v35 = vadd.f32 %v1390_v47, %v1342_v40 }
 0x1dd   :  { %1613 = vmatmul.bf16.gmra.mxu1 %v1517_v55  ;;  %1868 = vmatpush.bf16.msra.mxu3 %v2618_v44  ;;  %v1393_v55 = vadd.f32 %v1392_v37, %v1344_v59  ;;  %v1440_v38 = vadd.f32 %v1439_v57, %v1391_v35  ;;  %v2842_v37 = vunpack.c.h.bf16 %v2867_v29 }
 0x1de   :  { %v1478_v34 = vpop.f32.mrf.mxu0 }
 0x1df   :  { %v1479_v17 = vadd.f32 %v1478_v34, %v1430_v3  ;;  %v1442_v9 = vadd.f32 %v1441_v48, %v1393_v55  ;;  %v1444_v41 = vpop.f32.mrf.mxu3  ;;  %v1348_v52 = vpop.f32.mrf.mxu1 }
 0x1e0   :  { %v1397_v0 = vpop.f32.mrf.mxu2  ;;  %v1349_v4 = vadd.f32 %v1348_v52, %v3719_v5 }
 0x1e1   :  { %v1506_v10 = vmax.f32 %v1479_v17, 0.0  ;;  %v2820_v17 = vld [vmem:[%s4017_s6 + $0x4] sm:$0xf0] }
 0x1e6   :  { %v1480_v49 = vpop.f32.mrf.mxu0 }
 0x1e7   :  { %v1481_v51 = vadd.f32 %v1480_v49, %v1432_v6  ;;  %v2605_v6 = vld [vmem:[%s4017_s6] sm:$0xf]  ;;  %v1446_v5 = vpop.f32.mrf.mxu3 }
 0x1e8   :  { %v2606_v49 = vor.u32 %v2820_v17, %v2605_v6 }
 0x1e9   :  { %v1507_v11 = vmax.f32 %v1481_v51, 0.0  ;;  %v1398_v51 = vadd.f32 %v1397_v0, %v1349_v4 }
 0x1ea   :  { %1820 = vmatpush.bf16.msra.mxu2 %v2606_v49 }
 0x1eb   :  { %v1518_v46 = vpack.c.bf16 %v1507_v11, %v1506_v10  ;;  %v2610_v10 = vor.u32 %v2819_v7, %v2607_v61  ;;  %v1445_v11 = vadd.f32 %v1444_v41, %v1396_v53  ;;  %v1447_v62 = vadd.f32 %v1446_v5, %v1398_v51  ;;  %v2869_v41 = vld [vmem:[%s4019_s1 + $0x18] sm:$0xff]   ;;  %v2870_v7 = vld [vmem:[%s4019_s1 + $0x20] sm:$0xff]  }
 0x1ec   :  { %v2853_v61 = vunpack.c.l.bf16 %v2870_v7  ;;  %v2854_v51 = vunpack.c.h.bf16 %v2870_v7 }
 0x1ed   :  { %1618 = vmatmul.bf16.gmra.mxu1 %v1518_v46  ;;  %1869 = vmatpush.bf16.msra.mxu3 %v2610_v10 }
 0x1ee   :  { %v1483_v26 = vpop.f32.mrf.mxu0 }
 0x1ef   :  { %v1484_v33 = vadd.f32 %v1483_v26, %v1435_v21  ;;  %v2836_v26 = vld [vmem:[%s4019_s1] sm:$0xff]  }
 0x1f0   :  { %v2837_v15 = vunpack.c.l.bf16 %v2836_v26  ;;  %v2838_v16 = vunpack.c.h.bf16 %v2836_v26 }
 0x1f1   :  { %v1508_v13 = vmax.f32 %v1484_v33, 0.0 }
 0x1f6   :  { %v1485_v28 = vpop.f32.mrf.mxu0 }
 0x1f7   :  { %v1486_v32 = vadd.f32 %v1485_v28, %v1437_v25 }
 0x1f9   :  { %v1509_v27 = vmax.f32 %v1486_v32, 0.0 }
 0x1fb   :  { %v1519_v39 = vpack.c.bf16 %v1509_v27, %v1508_v13  ;;  %v2841_v27 = vunpack.c.l.bf16 %v2867_v29 }
 0x1fd   :  { %1623 = vmatmul.bf16.gmra.mxu1 %v1519_v39 }
 0x1fe   :  { %v1488_v45 = vpop.f32.mrf.mxu0 }
 0x1ff   :  { %v1489_v60 = vadd.f32 %v1488_v45, %v1440_v38  ;;  %v2868_v45 = vld [vmem:[%s4019_s1 + $0x10] sm:$0xff]  }
 0x200   :  { %v2845_v35 = vunpack.c.l.bf16 %v2868_v45  ;;  %v2846_v59 = vunpack.c.h.bf16 %v2868_v45 }
 0x201   :  { %v1510_v34 = vmax.f32 %v1489_v60, 0.0 }
 0x206   :  { %v1490_v1 = vpop.f32.mrf.mxu0 }
 0x207   :  { %v1491_v19 = vadd.f32 %v1490_v1, %v1442_v9 }
 0x209   :  { %v1511_v12 = vmax.f32 %v1491_v19, 0.0 }
 0x20b   :  { %v1520_v36 = vpack.c.bf16 %v1511_v12, %v1510_v34  ;;  %v2849_v12 = vunpack.c.l.bf16 %v2869_v41 }
 0x20d   :  { %1628 = vmatmul.bf16.gmra.mxu1 %v1520_v36  ;;  %v2850_v36 = vunpack.c.h.bf16 %v2869_v41 }
 0x20e   :  { %v1493_v3 = vpop.f32.mrf.mxu0 }
 0x20f   :  { %v1494_v46 = vadd.f32 %v1493_v3, %v1445_v11 }
 0x211   :  { %v1512_v63 = vmax.f32 %v1494_v46, 0.0 }
 0x216   :  { %v1495_v50 = vpop.f32.mrf.mxu0 }
 0x217   :  { %v1496_v8 = vadd.f32 %v1495_v50, %v1447_v62 }
 0x219   :  { %v1513_v20 = vmax.f32 %v1496_v8, 0.0 }
 0x21b   :  { %v1521_v23 = vpack.c.bf16 %v1513_v20, %v1512_v63  ;;  %v2871_v20 = vld [vmem:[%s4019_s1 + $0x28] sm:$0xff]  }
 0x21c   :  { %v2858_v26 = vunpack.c.h.bf16 %v2871_v20 }
 0x21d   :  { %1633 = vmatmul.bf16.gmra.mxu1 %v1521_v23 }
 0x22a   :  { %v1599_v24 = vpop.f32.mrf.mxu1 }
 0x22b   :  { %v1600_v30 = vadd.f32 %v3836_v14, %v1599_v24  ;;  %v2857_v24 = vunpack.c.l.bf16 %v2871_v20 }
 0x22d   :  { %v1671_v18 = vadd.f32 %v2837_v15, %v1600_v30 }
 0x22f   :  { %v1687_v25 = vmax.f32 %v1671_v18, 0.0 }
 0x232   :  { %v1601_v47 = vpop.f32.mrf.mxu1 }
 0x233   :  { %v1602_v21 = vadd.f32 %v3836_v14, %v1601_v47 }
 0x235   :  { %v1672_v57 = vadd.f32 %v2838_v16, %v1602_v21 }
 0x237   :  { %v1688_v33 = vmax.f32 %v1672_v57, 0.0 }
 0x239   :  { %v1703_v28 = vpack.c.bf16 %v1688_v33, %v1687_v25  ;;  %v2872_v33 = vld [vmem:[%s4019_s1 + $0x30] sm:$0xff]  }
 0x23a   :  { %v1604_v32 = vpop.f32.mrf.mxu1  ;;  %v2862_v29 = vunpack.c.h.bf16 %v2872_v33 }
 0x23b   :  { %1821 = vmatmul.bf16.vlgmr.msra.gmra.mxu2 %v1703_v28  ;;  %1870 = vmatmul.bf16.vlgmr.msra.gmra.mxu3 %v1703_v28  ;;  %v1605_v13 = vadd.f32 %v3836_v14, %v1604_v32  ;;  %v2861_v32 = vunpack.c.l.bf16 %v2872_v33 }
 0x23d   :  { %v1673_v22 = vadd.f32 %v2841_v27, %v1605_v13 }
 0x23f   :  { %v1689_v40 = vmax.f32 %v1673_v22, 0.0 }
 0x242   :  { %v1606_v39 = vpop.f32.mrf.mxu1 }
 0x243   :  { %v1607_v31 = vadd.f32 %v3836_v14, %v1606_v39 }
 0x245   :  { %v1674_v56 = vadd.f32 %v2842_v37, %v1607_v31 }
 0x247   :  { %v1690_v42 = vmax.f32 %v1674_v56, 0.0 }
 0x249   :  { %v1704_v43 = vpack.c.bf16 %v1690_v42, %v1689_v40  ;;  %v2873_v42 = vld [vmem:[%s4019_s1 + $0x38] sm:$0xff]  }
 0x24a   :  { %v1609_v48 = vpop.f32.mrf.mxu1  ;;  %v2866_v45 = vunpack.c.h.bf16 %v2873_v42 }
 0x24b   :  { %1826 = vmatmul.bf16.gmra.mxu2 %v1704_v43  ;;  %1875 = vmatmul.bf16.gmra.mxu3 %v1704_v43  ;;  %v1610_v44 = vadd.f32 %v3836_v14, %v1609_v48  ;;  %v2865_v48 = vunpack.c.l.bf16 %v2873_v42 }
 0x24d   :  { %v1675_v54 = vadd.f32 %v2845_v35, %v1610_v44 }
 0x24f   :  { %v1691_v9 = vmax.f32 %v1675_v54, 0.0 }
 0x252   :  { %v1611_v55 = vpop.f32.mrf.mxu1 }
 0x253   :  { %v1612_v38 = vadd.f32 %v3836_v14, %v1611_v55 }
 0x255   :  { %v1676_v58 = vadd.f32 %v2846_v59, %v1612_v38 }
 0x257   :  { %v1692_v60 = vmax.f32 %v1676_v58, 0.0 }
 0x259   :  { %v1705_v1 = vpack.c.bf16 %v1692_v60, %v1691_v9  ;;  %v1727_v9 = vld [vmem:[%s4020_s7] sm:$0x3] }
 0x25a   :  { %v1614_v19 = vpop.f32.mrf.mxu1  ;;  %v3881_v60 = vperm.slane %v1727_v9, 0 }
 0x25b   :  { %1831 = vmatmul.bf16.gmra.mxu2 %v1705_v1  ;;  %1880 = vmatmul.bf16.gmra.mxu3 %v1705_v1  ;;  %v1615_v34 = vadd.f32 %v3836_v14, %v1614_v19  ;;  %v3883_v1 = vperm.slane %v1727_v9, 1 }
 0x25d   :  { %v1677_v2 = vadd.f32 %v2849_v12, %v1615_v34 }
 0x25f   :  { %v1693_v53 = vmax.f32 %v1677_v2, 0.0 }
 0x262   :  { %v1616_v52 = vpop.f32.mrf.mxu1 }
 0x263   :  { %v1617_v0 = vadd.f32 %v3836_v14, %v1616_v52 }
 0x265   :  { %v1678_v3 = vadd.f32 %v2850_v36, %v1617_v0 }
 0x267   :  { %v1694_v4 = vmax.f32 %v1678_v3, 0.0 }
 0x269   :  { %v1706_v6 = vpack.c.bf16 %v1694_v4, %v1693_v53 }
 0x26a   :  { %v1619_v17 = vpop.f32.mrf.mxu1 }
 0x26b   :  { %1836 = vmatmul.bf16.gmra.mxu2 %v1706_v6  ;;  %1885 = vmatmul.bf16.gmra.mxu3 %v1706_v6  ;;  %v1620_v49 = vadd.f32 %v3836_v14, %v1619_v17 }
 0x26d   :  { %v1679_v5 = vadd.f32 %v2853_v61, %v1620_v49 }
 0x26f   :  { %v1695_v46 = vmax.f32 %v1679_v5, 0.0 }
 0x272   :  { %v1621_v10 = vpop.f32.mrf.mxu1 }
 0x273   :  { %v1622_v11 = vadd.f32 %v3836_v14, %v1621_v10 }
 0x275   :  { %v1680_v62 = vadd.f32 %v2854_v51, %v1622_v11 }
 0x277   :  { %v1696_v50 = vmax.f32 %v1680_v62, 0.0 }
 0x279   :  { %v1707_v8 = vpack.c.bf16 %v1696_v50, %v1695_v46 }
 0x27a   :  { %v1624_v63 = vpop.f32.mrf.mxu1 }
 0x27b   :  { %1841 = vmatmul.bf16.gmra.mxu2 %v1707_v8  ;;  %1890 = vmatmul.bf16.gmra.mxu3 %v1707_v8  ;;  %v1625_v23 = vadd.f32 %v3836_v14, %v1624_v63 }
 0x27d   :  { %v1681_v15 = vadd.f32 %v2857_v24, %v1625_v23 }
 0x27f   :  { %v1697_v18 = vmax.f32 %v1681_v15, 0.0 }
 0x282   :  { %v1626_v30 = vpop.f32.mrf.mxu1 }
 0x283   :  { %v1627_v16 = vadd.f32 %v3836_v14, %v1626_v30 }
 0x285   :  { %v1682_v47 = vadd.f32 %v2858_v26, %v1627_v16 }
 0x287   :  { %v1698_v21 = vmax.f32 %v1682_v47, 0.0 }
 0x289   :  { %v1708_v57 = vpack.c.bf16 %v1698_v21, %v1697_v18 }
 0x28a   :  { %v1629_v25 = vpop.f32.mrf.mxu1 }
 0x28b   :  { %1846 = vmatmul.bf16.gmra.mxu2 %v1708_v57  ;;  %1895 = vmatmul.bf16.gmra.mxu3 %v1708_v57  ;;  %v1630_v28 = vadd.f32 %v3836_v14, %v1629_v25 }
 0x28d   :  { %v1683_v27 = vadd.f32 %v2861_v32, %v1630_v28 }
 0x28f   :  { %v1699_v22 = vmax.f32 %v1683_v27, 0.0 }
 0x292   :  { %v1631_v13 = vpop.f32.mrf.mxu1 }
 0x293   :  { %v1632_v37 = vadd.f32 %v3836_v14, %v1631_v13 }
 0x295   :  { %v1684_v39 = vadd.f32 %v2862_v29, %v1632_v37 }
 0x297   :  { %v1700_v31 = vmax.f32 %v1684_v39, 0.0 }
 0x299   :  { %v1709_v56 = vpack.c.bf16 %v1700_v31, %v1699_v22 }
 0x29a   :  { %v1634_v40 = vpop.f32.mrf.mxu1 }
 0x29b   :  { %1851 = vmatmul.bf16.gmra.mxu2 %v1709_v56  ;;  %1900 = vmatmul.bf16.gmra.mxu3 %v1709_v56  ;;  %v1635_v43 = vadd.f32 %v3836_v14, %v1634_v40 }
 0x29d   :  { %v1685_v35 = vadd.f32 %v2865_v48, %v1635_v43 }
 0x29f   :  { %v1701_v54 = vmax.f32 %v1685_v35, 0.0 }
 0x2a2   :  { %v1636_v44 = vpop.f32.mrf.mxu1 }
 0x2a3   :  { %v1637_v59 = vadd.f32 %v3836_v14, %v1636_v44 }
 0x2a5   :  { %v1686_v55 = vadd.f32 %v2866_v45, %v1637_v59 }
 0x2a7   :  { %v1702_v38 = vmax.f32 %v1686_v55, 0.0 }
 0x2a9   :  { %v1710_v58 = vpack.c.bf16 %v1702_v38, %v1701_v54 }
 0x2ab   :  { %1856 = vmatmul.bf16.gmra.mxu2 %v1710_v58  ;;  %1905 = vmatmul.bf16.gmra.mxu3 %v1710_v58 }
 0x2be   :  { %v1822_v19 = vpop.f32.mrf.mxu2  ;;  %v1871_v41 = vpop.f32.mrf.mxu3 }
 0x2bf   :  { %v1823_v34 = vadd.f32 %v1822_v19, %v3881_v60  ;;  %v1872_v14 = vadd.f32 %v1871_v41, %v3883_v1 }
 0x2c1   :  { %v1911_v12 = vmax.f32 %v1823_v34, 0.0  ;;  %v1959_v36 = vpack.c.bf16 %v1872_v14, %v1872_v14 }
 0x2c3   :  { %v1927_v52 = vpack.c.bf16 %v1911_v12, %v1911_v12  ;;  %1975 = vst [vmem:[%s4021_s8 + $0x4] sm:$0xf] %v1959_v36 }
 0x2c5   :  { %1943 = vst [vmem:[%s4021_s8] sm:$0xf] %v1927_v52 }
 0x2c6   :  { %v1824_v2 = vpop.f32.mrf.mxu2  ;;  %v1873_v0 = vpop.f32.mrf.mxu3 }
 0x2c7   :  { %v1825_v3 = vadd.f32 %v1824_v2, %v3881_v60  ;;  %v1874_v53 = vadd.f32 %v1873_v0, %v3883_v1 }
 0x2c9   :  { %v1912_v4 = vmax.f32 %v1825_v3, 0.0  ;;  %v1960_v6 = vpack.c.bf16 %v1874_v53, %v1874_v53 }
 0x2cb   :  { %v1928_v17 = vpack.c.bf16 %v1912_v4, %v1912_v4  ;;  %1976 = vst [vmem:[%s4021_s8 + $0xc] sm:$0xf] %v1960_v6 }
 0x2cd   :  { %1944 = vst [vmem:[%s4021_s8 + $0x8] sm:$0xf] %v1928_v17 }
 0x2ce   :  { %v1827_v7 = vpop.f32.mrf.mxu2  ;;  %v1876_v49 = vpop.f32.mrf.mxu3 }
 0x2cf   :  { %v1828_v61 = vadd.f32 %v1827_v7, %v3881_v60  ;;  %v1877_v51 = vadd.f32 %v1876_v49, %v3883_v1 }
 0x2d1   :  { %v1913_v10 = vmax.f32 %v1828_v61, 0.0  ;;  %v1961_v5 = vpack.c.bf16 %v1877_v51, %v1877_v51 }
 0x2d3   :  { %v1929_v11 = vpack.c.bf16 %v1913_v10, %v1913_v10  ;;  %1977 = vst [vmem:[%s4021_s8 + $0x14] sm:$0xf] %v1961_v5 }
 0x2d5   :  { %1945 = vst [vmem:[%s4021_s8 + $0x10] sm:$0xf] %v1929_v11 }
 0x2d6   :  { %v1829_v62 = vpop.f32.mrf.mxu2  ;;  %v1878_v46 = vpop.f32.mrf.mxu3 }
 0x2d7   :  { %v1830_v50 = vadd.f32 %v1829_v62, %v3881_v60  ;;  %v1879_v8 = vadd.f32 %v1878_v46, %v3883_v1 }
 0x2d9   :  { %v1914_v63 = vmax.f32 %v1830_v50, 0.0  ;;  %v1962_v20 = vpack.c.bf16 %v1879_v8, %v1879_v8 }
 0x2db   :  { %v1930_v23 = vpack.c.bf16 %v1914_v63, %v1914_v63  ;;  %1978 = vst [vmem:[%s4021_s8 + $0x1c] sm:$0xf] %v1962_v20 }
 0x2dd   :  { %1946 = vst [vmem:[%s4021_s8 + $0x18] sm:$0xf] %v1930_v23 }
 0x2de   :  { %v1832_v24 = vpop.f32.mrf.mxu2  ;;  %v1881_v26 = vpop.f32.mrf.mxu3 }
 0x2df   :  { %v1833_v30 = vadd.f32 %v1832_v24, %v3881_v60  ;;  %v1882_v15 = vadd.f32 %v1881_v26, %v3883_v1 }
 0x2e1   :  { %v1915_v16 = vmax.f32 %v1833_v30, 0.0  ;;  %v1963_v47 = vpack.c.bf16 %v1882_v15, %v1882_v15 }
 0x2e3   :  { %v1931_v18 = vpack.c.bf16 %v1915_v16, %v1915_v16  ;;  %1979 = vst [vmem:[%s4021_s8 + $0x24] sm:$0xf] %v1963_v47 }
 0x2e5   :  { %1947 = vst [vmem:[%s4021_s8 + $0x20] sm:$0xf] %v1931_v18 }
 0x2e6   :  { %v1834_v21 = vpop.f32.mrf.mxu2  ;;  %v1883_v57 = vpop.f32.mrf.mxu3 }
 0x2e7   :  { %v1835_v25 = vadd.f32 %v1834_v21, %v3881_v60  ;;  %v1884_v33 = vadd.f32 %v1883_v57, %v3883_v1 }
 0x2e9   :  { %v1916_v28 = vmax.f32 %v1835_v25, 0.0  ;;  %v1964_v32 = vpack.c.bf16 %v1884_v33, %v1884_v33 }
 0x2eb   :  { %v1932_v29 = vpack.c.bf16 %v1916_v28, %v1916_v28  ;;  %1980 = vst [vmem:[%s4021_s8 + $0x2c] sm:$0xf] %v1964_v32 }
 0x2ed   :  { %1948 = vst [vmem:[%s4021_s8 + $0x28] sm:$0xf] %v1932_v29 }
 0x2ee   :  { %v1837_v13 = vpop.f32.mrf.mxu2  ;;  %v1886_v27 = vpop.f32.mrf.mxu3 }
 0x2ef   :  { %v1838_v37 = vadd.f32 %v1837_v13, %v3881_v60  ;;  %v1887_v39 = vadd.f32 %v1886_v27, %v3883_v1 }
 0x2f1   :  { %v1917_v22 = vmax.f32 %v1838_v37, 0.0  ;;  %v1965_v31 = vpack.c.bf16 %v1887_v39, %v1887_v39 }
 0x2f3   :  { %v1933_v56 = vpack.c.bf16 %v1917_v22, %v1917_v22  ;;  %1981 = vst [vmem:[%s4021_s8 + $0x34] sm:$0xf] %v1965_v31 }
 0x2f5   :  { %1949 = vst [vmem:[%s4021_s8 + $0x30] sm:$0xf] %v1933_v56 }
 0x2f6   :  { %v1839_v40 = vpop.f32.mrf.mxu2  ;;  %v1888_v42 = vpop.f32.mrf.mxu3 }
 0x2f7   :  { %v1840_v43 = vadd.f32 %v1839_v40, %v3881_v60  ;;  %v1889_v48 = vadd.f32 %v1888_v42, %v3883_v1 }
 0x2f9   :  { %v1918_v45 = vmax.f32 %v1840_v43, 0.0  ;;  %v1966_v44 = vpack.c.bf16 %v1889_v48, %v1889_v48 }
 0x2fb   :  { %v1934_v35 = vpack.c.bf16 %v1918_v45, %v1918_v45  ;;  %1982 = vst [vmem:[%s4021_s8 + $0x3c] sm:$0xf] %v1966_v44 }
 0x2fd   :  { %1950 = vst [vmem:[%s4021_s8 + $0x38] sm:$0xf] %v1934_v35 }
 0x2fe   :  { %v1842_v59 = vpop.f32.mrf.mxu2  ;;  %v1891_v55 = vpop.f32.mrf.mxu3 }
 0x2ff   :  { %v1843_v54 = vadd.f32 %v1842_v59, %v3881_v60  ;;  %v1892_v38 = vadd.f32 %v1891_v55, %v3883_v1 }
 0x301   :  { %v1919_v58 = vmax.f32 %v1843_v54, 0.0  ;;  %v1967_v9 = vpack.c.bf16 %v1892_v38, %v1892_v38 }
 0x303   :  { %v1935_v19 = vpack.c.bf16 %v1919_v58, %v1919_v58  ;;  %1983 = vst [vmem:[%s4021_s8 + $0x44] sm:$0xf] %v1967_v9 }
 0x305   :  { %1951 = vst [vmem:[%s4021_s8 + $0x40] sm:$0xf] %v1935_v19 }
 0x306   :  { %v1844_v41 = vpop.f32.mrf.mxu2  ;;  %v1893_v34 = vpop.f32.mrf.mxu3 }
 0x307   :  { %v1845_v14 = vadd.f32 %v1844_v41, %v3881_v60  ;;  %v1894_v12 = vadd.f32 %v1893_v34, %v3883_v1 }
 0x309   :  { %v1920_v36 = vmax.f32 %v1845_v14, 0.0  ;;  %v1968_v52 = vpack.c.bf16 %v1894_v12, %v1894_v12 }
 0x30b   :  { %v1936_v2 = vpack.c.bf16 %v1920_v36, %v1920_v36  ;;  %1984 = vst [vmem:[%s4021_s8 + $0x4c] sm:$0xf] %v1968_v52 }
 0x30d   :  { %1952 = vst [vmem:[%s4021_s8 + $0x48] sm:$0xf] %v1936_v2 }
 0x30e   :  { %v1847_v0 = vpop.f32.mrf.mxu2  ;;  %v1896_v3 = vpop.f32.mrf.mxu3 }
 0x30f   :  { %v1848_v53 = vadd.f32 %v1847_v0, %v3881_v60  ;;  %v1897_v4 = vadd.f32 %v1896_v3, %v3883_v1 }
 0x311   :  { %v1921_v6 = vmax.f32 %v1848_v53, 0.0  ;;  %v1969_v17 = vpack.c.bf16 %v1897_v4, %v1897_v4 }
 0x313   :  { %v1937_v7 = vpack.c.bf16 %v1921_v6, %v1921_v6  ;;  %1985 = vst [vmem:[%s4021_s8 + $0x54] sm:$0xf] %v1969_v17 }
 0x315   :  { %1953 = vst [vmem:[%s4021_s8 + $0x50] sm:$0xf] %v1937_v7 }
 0x316   :  { %v1849_v49 = vpop.f32.mrf.mxu2  ;;  %v1898_v61 = vpop.f32.mrf.mxu3 }
 0x317   :  { %v1850_v51 = vadd.f32 %v1849_v49, %v3881_v60  ;;  %v1899_v10 = vadd.f32 %v1898_v61, %v3883_v1 }
 0x319   :  { %v1922_v5 = vmax.f32 %v1850_v51, 0.0  ;;  %v1970_v11 = vpack.c.bf16 %v1899_v10, %v1899_v10 }
 0x31b   :  { %v1938_v62 = vpack.c.bf16 %v1922_v5, %v1922_v5  ;;  %1986 = vst [vmem:[%s4021_s8 + $0x5c] sm:$0xf] %v1970_v11 }
 0x31d   :  { %1954 = vst [vmem:[%s4021_s8 + $0x58] sm:$0xf] %v1938_v62 }
 0x31e   :  { %v1852_v46 = vpop.f32.mrf.mxu2  ;;  %v1901_v50 = vpop.f32.mrf.mxu3 }
 0x31f   :  { %v1853_v8 = vadd.f32 %v1852_v46, %v3881_v60  ;;  %v1902_v63 = vadd.f32 %v1901_v50, %v3883_v1 }
 0x321   :  { %v1923_v20 = vmax.f32 %v1853_v8, 0.0  ;;  %v1971_v23 = vpack.c.bf16 %v1902_v63, %v1902_v63 }
 0x323   :  { %v1939_v24 = vpack.c.bf16 %v1923_v20, %v1923_v20  ;;  %1987 = vst [vmem:[%s4021_s8 + $0x64] sm:$0xf] %v1971_v23 }
 0x325   :  { %1955 = vst [vmem:[%s4021_s8 + $0x60] sm:$0xf] %v1939_v24 }
 0x326   :  { %v1854_v26 = vpop.f32.mrf.mxu2  ;;  %v1903_v30 = vpop.f32.mrf.mxu3 }
 0x327   :  { %v1855_v15 = vadd.f32 %v1854_v26, %v3881_v60  ;;  %v1904_v16 = vadd.f32 %v1903_v30, %v3883_v1 }
 0x329   :  { %v1924_v47 = vmax.f32 %v1855_v15, 0.0  ;;  %v1972_v18 = vpack.c.bf16 %v1904_v16, %v1904_v16 }
 0x32b   :  { %v1940_v21 = vpack.c.bf16 %v1924_v47, %v1924_v47  ;;  %1988 = vst [vmem:[%s4021_s8 + $0x6c] sm:$0xf] %v1972_v18 }
 0x32d   :  { %1956 = vst [vmem:[%s4021_s8 + $0x68] sm:$0xf] %v1940_v21 }
 0x32e   :  { %v1857_v57 = vpop.f32.mrf.mxu2  ;;  %v1906_v25 = vpop.f32.mrf.mxu3 }
 0x32f   :  { %v1858_v33 = vadd.f32 %v1857_v57, %v3881_v60  ;;  %v1907_v28 = vadd.f32 %v1906_v25, %v3883_v1 }
 0x331   :  { %v1925_v32 = vmax.f32 %v1858_v33, 0.0  ;;  %v1973_v29 = vpack.c.bf16 %v1907_v28, %v1907_v28 }
 0x333   :  { %v1941_v13 = vpack.c.bf16 %v1925_v32, %v1925_v32  ;;  %1989 = vst [vmem:[%s4021_s8 + $0x74] sm:$0xf] %v1973_v29 }
 0x335   :  { %1957 = vst [vmem:[%s4021_s8 + $0x70] sm:$0xf] %v1941_v13 }
 0x336   :  { %v1859_v27 = vpop.f32.mrf.mxu2  ;;  %v1908_v37 = vpop.f32.mrf.mxu3 }
 0x337   :  { %v1860_v39 = vadd.f32 %v1859_v27, %v3881_v60  ;;  %v1909_v22 = vadd.f32 %v1908_v37, %v3883_v1 }
 0x339   :  { %v1926_v31 = vmax.f32 %v1860_v39, 0.0  ;;  %v1974_v56 = vpack.c.bf16 %v1909_v22, %v1909_v22 }
 0x33b   :  { %v1942_v40 = vpack.c.bf16 %v1926_v31, %v1926_v31  ;;  %1990 = vst [vmem:[%s4021_s8 + $0x7c] sm:$0xf] %v1974_v56 }
 0x33d   :  { %1958 = vst [vmem:[%s4021_s8 + $0x78] sm:$0xf] %v1942_v40 }

// kernel: _lambda_.8
= control target key start
LH: loop header
LB: loop body
LE: loop exit
PB: predicated region body
PF: predicated region fallthrough
CT: control target
= control target key end

     0   :  { %s2291_s2 = inlined_call_operand.vmem [shape: bf16[1152,128], index: 2, kind: input, shape index: {}]   ;;  %s2292_s0 = inlined_call_operand.vmem [shape: bf16[32,1152], index: 0, kind: input, shape index: {}]   ;;  %s2293_s3 = inlined_call_operand.vmem [shape: f32[1,128], index: 3, kind: input, shape index: {}]   ;;  %s2294_s5 = inlined_call_operand.vmem [shape: f32[1,128], index: 5, kind: input, shape index: {}]   ;;  %s2295_s4 = inlined_call_operand.vmem [shape: bf16[128,128], index: 4, kind: input, shape index: {}]   ;;  %s2296_s6 = inlined_call_operand.vmem [shape: bf16[128,256], index: 6, kind: input, shape index: {}]   ;;  %s2297_s1 = inlined_call_operand.vmem [shape: bf16[32,128], index: 1, kind: input, shape index: {}]   ;;  %s2298_s7 = inlined_call_operand.vmem [shape: f32[1,256], index: 7, kind: input, shape index: {}]   ;;  %s2299_s8 = inlined_call_operand.vmem [shape: bf16[32,256], index: 8, kind: output, shape index: {}]  }
   0x1   :  { %v1648_v0 = vld [vmem:[%s2291_s2 + $0x38] sm:$0xff]  ;;  %v1647_v4 = vld [vmem:[%s2291_s2 + $0x30] sm:$0xff]  ;;  %v1646_v8 = vld [vmem:[%s2291_s2 + $0x28] sm:$0xff] }
   0x2   :  { %v1664_v1 = vld [vmem:[%s2291_s2 + $0xb8] sm:$0xff]  ;;  %721 = vmatpush.bf16.msra.mxu0 %v1648_v0  ;;  %v1663_v5 = vld [vmem:[%s2291_s2 + $0xb0] sm:$0xff]  ;;  %v1662_v9 = vld [vmem:[%s2291_s2 + $0xa8] sm:$0xff] }
   0x3   :  { %v1656_v2 = vld [vmem:[%s2291_s2 + $0x78] sm:$0xff]  ;;  %759 = vmatpush.bf16.msra.mxu2 %v1664_v1  ;;  %v1655_v6 = vld [vmem:[%s2291_s2 + $0x70] sm:$0xff]  ;;  %v1654_v10 = vld [vmem:[%s2291_s2 + $0x68] sm:$0xff] }
   0x4   :  { %v1672_v3 = vld [vmem:[%s2291_s2 + $0xf8] sm:$0xff]  ;;  %740 = vmatpush.bf16.msra.mxu1 %v1656_v2  ;;  %v1671_v7 = vld [vmem:[%s2291_s2 + $0xf0] sm:$0xff]  ;;  %v1670_v11 = vld [vmem:[%s2291_s2 + $0xe8] sm:$0xff] }
   0x5   :  { %778 = vmatpush.bf16.msra.mxu3 %v1672_v3  ;;  %v1645_v12 = vld [vmem:[%s2291_s2 + $0x20] sm:$0xff]  ;;  %v1644_v16 = vld [vmem:[%s2291_s2 + $0x18] sm:$0xff]  ;;  %v1643_v20 = vld [vmem:[%s2291_s2 + $0x10] sm:$0xff] }
   0x6   :  { %722 = vmatpush.bf16.msra.mxu0 %v1647_v4  ;;  %v1661_v13 = vld [vmem:[%s2291_s2 + $0xa0] sm:$0xff]  ;;  %v1660_v17 = vld [vmem:[%s2291_s2 + $0x98] sm:$0xff]  ;;  %v1659_v21 = vld [vmem:[%s2291_s2 + $0x90] sm:$0xff] }
   0x7   :  { %760 = vmatpush.bf16.msra.mxu2 %v1663_v5  ;;  %v1653_v14 = vld [vmem:[%s2291_s2 + $0x60] sm:$0xff]  ;;  %v1652_v18 = vld [vmem:[%s2291_s2 + $0x58] sm:$0xff]  ;;  %v1651_v22 = vld [vmem:[%s2291_s2 + $0x50] sm:$0xff] }
   0x8   :  { %741 = vmatpush.bf16.msra.mxu1 %v1655_v6  ;;  %v1669_v15 = vld [vmem:[%s2291_s2 + $0xe0] sm:$0xff]  ;;  %v1668_v19 = vld [vmem:[%s2291_s2 + $0xd8] sm:$0xff]  ;;  %v1667_v23 = vld [vmem:[%s2291_s2 + $0xd0] sm:$0xff] }
   0x9   :  { %779 = vmatpush.bf16.msra.mxu3 %v1671_v7  ;;  %v1642_v24 = vld [vmem:[%s2291_s2 + $0x8] sm:$0xff]  ;;  %v1641_v28 = vld [vmem:[%s2291_s2] sm:$0xff]  ;;  %v1179_v39 = vld [vmem:[%s2292_s0 + $0x2c] sm:$0xf0] }
   0xa   :  { %723 = vmatpush.bf16.msra.mxu0 %v1646_v8  ;;  %v1658_v25 = vld [vmem:[%s2291_s2 + $0x88] sm:$0xff]  ;;  %v1657_v29 = vld [vmem:[%s2291_s2 + $0x80] sm:$0xff]  ;;  %v1680_v40 = vld [vmem:[%s2291_s2 + $0x138] sm:$0xff] }
   0xb   :  { %761 = vmatpush.bf16.msra.mxu2 %v1662_v9  ;;  %v1650_v26 = vld [vmem:[%s2291_s2 + $0x48] sm:$0xff]  ;;  %v1649_v30 = vld [vmem:[%s2291_s2 + $0x40] sm:$0xff]  ;;  %v1696_v41 = vld [vmem:[%s2291_s2 + $0x1b8] sm:$0xff] }
   0xc   :  { %742 = vmatpush.bf16.msra.mxu1 %v1654_v10  ;;  %v1666_v27 = vld [vmem:[%s2291_s2 + $0xc8] sm:$0xff]  ;;  %v1665_v31 = vld [vmem:[%s2291_s2 + $0xc0] sm:$0xff]  ;;  %v1688_v46 = vld [vmem:[%s2291_s2 + $0x178] sm:$0xff] }
   0xd   :  { %780 = vmatpush.bf16.msra.mxu3 %v1670_v11  ;;  %v1169_v32 = vld [vmem:[%s2292_s0] sm:$0xf]  ;;  %v1627_v33 = vld [vmem:[%s2292_s0 + $0x20] sm:$0xf0]  ;;  %v1177_v34 = vld [vmem:[%s2292_s0 + $0x8] sm:$0xf] }
   0xe   :  { %724 = vmatpush.bf16.msra.mxu0 %v1645_v12  ;;  %v1628_v35 = vld [vmem:[%s2292_s0 + $0x28] sm:$0xf0]  ;;  %v1623_v36 = vld [vmem:[%s2292_s0 + $0x4] sm:$0xf]  ;;  %v1171_v37 = vld [vmem:[%s2292_s0 + $0x24] sm:$0xf0]  ;;  %v1170_v42 = vor.u32 %v1627_v33, %v1169_v32 }
   0xf   :  { %762 = vmatpush.bf16.msra.mxu2 %v1661_v13  ;;  %v1624_v38 = vld [vmem:[%s2292_s0 + $0xc] sm:$0xf]  ;;  %v1178_v43 = vor.u32 %v1628_v35, %v1177_v34  ;;  %v1174_v44 = vor.u32 %v1623_v36, %v1171_v37  ;;  %v1704_v47 = vld [vmem:[%s2291_s2 + $0x1f8] sm:$0xff]  ;;  %v1679_v48 = vld [vmem:[%s2291_s2 + $0x130] sm:$0xff] }
  0x10   :  { %743 = vmatpush.bf16.msra.mxu1 %v1653_v14  ;;  %v1182_v45 = vor.u32 %v1624_v38, %v1179_v39  ;;  %v1695_v49 = vld [vmem:[%s2291_s2 + $0x1b0] sm:$0xff]  ;;  %v1678_v52 = vld [vmem:[%s2291_s2 + $0x128] sm:$0xff]  ;;  %v1677_v56 = vld [vmem:[%s2291_s2 + $0x120] sm:$0xff] }
  0x11   :  { %781 = vmatpush.bf16.msra.mxu3 %v1669_v15  ;;  %v1687_v50 = vld [vmem:[%s2291_s2 + $0x170] sm:$0xff]  ;;  %v1694_v53 = vld [vmem:[%s2291_s2 + $0x1a8] sm:$0xff]  ;;  %v1693_v57 = vld [vmem:[%s2291_s2 + $0x1a0] sm:$0xff] }
  0x12   :  { %725 = vmatpush.bf16.msra.mxu0 %v1644_v16  ;;  %v1703_v51 = vld [vmem:[%s2291_s2 + $0x1f0] sm:$0xff]  ;;  %v1686_v54 = vld [vmem:[%s2291_s2 + $0x168] sm:$0xff]  ;;  %v1685_v58 = vld [vmem:[%s2291_s2 + $0x160] sm:$0xff] }
  0x13   :  { %763 = vmatpush.bf16.msra.mxu2 %v1660_v17  ;;  %v1702_v55 = vld [vmem:[%s2291_s2 + $0x1e8] sm:$0xff]  ;;  %v1701_v59 = vld [vmem:[%s2291_s2 + $0x1e0] sm:$0xff]  ;;  %v1213_v62 = vld [vmem:[%s2292_s0 + $0x50] sm:$0xf] }
  0x14   :  { %744 = vmatpush.bf16.msra.mxu1 %v1652_v18  ;;  %v1205_v60 = vld [vmem:[%s2292_s0 + $0x48] sm:$0xf]  ;;  %v1636_v61 = vld [vmem:[%s2292_s0 + $0x68] sm:$0xf0]  ;;  %v1637_v63 = vld [vmem:[%s2292_s0 + $0x70] sm:$0xf0] }
  0x15   :  { %782 = vmatpush.bf16.msra.mxu3 %v1668_v19  ;;  %v1632_v0 = vld [vmem:[%s2292_s0 + $0x4c] sm:$0xf]  ;;  %v1207_v1 = vld [vmem:[%s2292_s0 + $0x6c] sm:$0xf0]  ;;  %v1633_v2 = vld [vmem:[%s2292_s0 + $0x54] sm:$0xf]  ;;  %v1206_v6 = vor.u32 %v1636_v61, %v1205_v60  ;;  %v1214_v7 = vor.u32 %v1637_v63, %v1213_v62 }
  0x16   :  { %726 = vmatpush.bf16.msra.mxu0 %v1643_v20  ;;  %v1215_v3 = vld [vmem:[%s2292_s0 + $0x74] sm:$0xf0]  ;;  %v1210_v8 = vor.u32 %v1632_v0, %v1207_v1  ;;  %v1675_v12 = vld [vmem:[%s2291_s2 + $0x110] sm:$0xff]  ;;  %v1674_v16 = vld [vmem:[%s2291_s2 + $0x108] sm:$0xff] }
  0x17   :  { %764 = vmatpush.bf16.msra.mxu2 %v1659_v21  ;;  %v1676_v4 = vld [vmem:[%s2291_s2 + $0x118] sm:$0xff]  ;;  %v1218_v9 = vor.u32 %v1633_v2, %v1215_v3  ;;  %v1691_v13 = vld [vmem:[%s2291_s2 + $0x190] sm:$0xff]  ;;  %v1690_v17 = vld [vmem:[%s2291_s2 + $0x188] sm:$0xff] }
  0x18   :  { %745 = vmatpush.bf16.msra.mxu1 %v1651_v22  ;;  %v1692_v5 = vld [vmem:[%s2291_s2 + $0x198] sm:$0xff]  ;;  %v1683_v14 = vld [vmem:[%s2291_s2 + $0x150] sm:$0xff]  ;;  %v1682_v18 = vld [vmem:[%s2291_s2 + $0x148] sm:$0xff] }
  0x19   :  { %783 = vmatpush.bf16.msra.mxu3 %v1667_v23  ;;  %v1684_v10 = vld [vmem:[%s2291_s2 + $0x158] sm:$0xff]  ;;  %v1699_v15 = vld [vmem:[%s2291_s2 + $0x1d0] sm:$0xff]  ;;  %v1698_v19 = vld [vmem:[%s2291_s2 + $0x1c8] sm:$0xff] }
  0x1a   :  { %727 = vmatpush.bf16.msra.mxu0 %v1642_v24  ;;  %v1700_v11 = vld [vmem:[%s2291_s2 + $0x1d8] sm:$0xff]  ;;  %v1673_v20 = vld [vmem:[%s2291_s2 + $0x100] sm:$0xff]  ;;  %v1185_v24 = vld [vmem:[%s2292_s0 + $0x10] sm:$0xf] }
  0x1b   :  { %765 = vmatpush.bf16.msra.mxu2 %v1658_v25  ;;  %v1689_v21 = vld [vmem:[%s2291_s2 + $0x180] sm:$0xff]  ;;  %v1629_v25 = vld [vmem:[%s2292_s0 + $0x30] sm:$0xf0]  ;;  %v1710_v38 = vld [vmem:[%s2291_s2 + $0x228] sm:$0xff] }
  0x1c   :  { %746 = vmatpush.bf16.msra.mxu1 %v1650_v26  ;;  %v1681_v22 = vld [vmem:[%s2291_s2 + $0x140] sm:$0xff]  ;;  %v1712_v26 = vld [vmem:[%s2291_s2 + $0x238] sm:$0xff]  ;;  %v1186_v33 = vor.u32 %v1629_v25, %v1185_v24  ;;  %v1711_v37 = vld [vmem:[%s2291_s2 + $0x230] sm:$0xff] }
  0x1d   :  { %784 = vmatpush.bf16.msra.mxu3 %v1666_v27  ;;  %v1697_v23 = vld [vmem:[%s2291_s2 + $0x1c0] sm:$0xff]  ;;  %v1193_v27 = vld [vmem:[%s2292_s0 + $0x18] sm:$0xf]  ;;  %v1640_v60 = vld [vmem:[%s2292_s0 + $0x88] sm:$0xf0] }
  0x1e   :  { %728 = vmatpush.bf16.msra.mxu0 %v1641_v28  ;;  %v1630_v28 = vld [vmem:[%s2292_s0 + $0x38] sm:$0xf0]  ;;  %v1195_v32 = vld [vmem:[%s2292_s0 + $0x3c] sm:$0xf0] }
  0x1f   :  { %766 = vmatpush.bf16.msra.mxu2 %v1657_v29  ;;  %v1625_v29 = vld [vmem:[%s2292_s0 + $0x14] sm:$0xf]  ;;  %v1194_v34 = vor.u32 %v1630_v28, %v1193_v27  ;;  %v1709_v39 = vld [vmem:[%s2291_s2 + $0x220] sm:$0xff]  ;;  %v1720_v3 = vld [vmem:[%s2295_s4 + $0x38] sm:$0xff] }
  0x20   :  { %747 = vmatpush.bf16.msra.mxu1 %v1649_v30  ;;  %v1187_v30 = vld [vmem:[%s2292_s0 + $0x34] sm:$0xf0] }
  0x21   :  { %785 = vmatpush.bf16.msra.mxu3 %v1665_v31  ;;  %729 = vmatmul.bf16.vlgmr.msra.gmra.mxu0 %v1170_v42  ;;  %v1626_v31 = vld [vmem:[%s2292_s0 + $0x1c] sm:$0xf]  ;;  %v1190_v35 = vor.u32 %v1625_v29, %v1187_v30  ;;  %v1229_v42 = vld [vmem:[%s2292_s0 + $0x60] sm:$0xf] }
  0x22   :  { %797 = vmatpush.bf16.msrb.mxu0 %v1680_v40  ;;  %767 = vmatmul.bf16.vlgmr.msra.gmra.mxu2 %v1178_v43  ;;  %v1198_v36 = vor.u32 %v1626_v31, %v1195_v32  ;;  %v1221_v40 = vld [vmem:[%s2292_s0 + $0x58] sm:$0xf]  ;;  %v1639_v43 = vld [vmem:[%s2292_s0 + $0x80] sm:$0xf0] }
  0x23   :  { %835 = vmatpush.bf16.msrb.mxu2 %v1696_v41  ;;  %748 = vmatmul.bf16.vlgmr.msra.gmra.mxu1 %v1174_v44  ;;  %v1638_v41 = vld [vmem:[%s2292_s0 + $0x78] sm:$0xf0] }
  0x24   :  { %786 = vmatmul.bf16.vlgmr.msra.gmra.mxu3 %v1182_v45  ;;  %816 = vmatpush.bf16.msrb.mxu1 %v1688_v46  ;;  %v1708_v44 = vld [vmem:[%s2291_s2 + $0x218] sm:$0xff]  ;;  %v1223_v46 = vld [vmem:[%s2292_s0 + $0x7c] sm:$0xf0] }
  0x25   :  { %854 = vmatpush.bf16.msrb.mxu3 %v1704_v47  ;;  %v1634_v45 = vld [vmem:[%s2292_s0 + $0x5c] sm:$0xf]  ;;  %v1635_v47 = vld [vmem:[%s2292_s0 + $0x64] sm:$0xf] }
  0x26   :  { %798 = vmatpush.bf16.msrb.mxu0 %v1679_v48  ;;  %v1231_v48 = vld [vmem:[%s2292_s0 + $0x84] sm:$0xf0] }
  0x27   :  { %836 = vmatpush.bf16.msrb.mxu2 %v1695_v49  ;;  %v1222_v49 = vor.u32 %v1638_v41, %v1221_v40 }
  0x28   :  { %817 = vmatpush.bf16.msrb.mxu1 %v1687_v50  ;;  %v1230_v50 = vor.u32 %v1639_v43, %v1229_v42 }
  0x29   :  { %855 = vmatpush.bf16.msrb.mxu3 %v1703_v51  ;;  %v1226_v51 = vor.u32 %v1634_v45, %v1223_v46  ;;  %v1736_v45 = vld [vmem:[%s2296_s6 + $0x74] sm:$0xf0]  ;;  %v1735_v46 = vld [vmem:[%s2296_s6 + $0x74] sm:$0xf] }
  0x2a   :  { %799 = vmatpush.bf16.msrb.mxu0 %v1678_v52  ;;  %v1234_v52 = vor.u32 %v1635_v47, %v1231_v48 }
  0x2b   :  { %837 = vmatpush.bf16.msrb.mxu2 %v1694_v53  ;;  %v1707_v53 = vld [vmem:[%s2291_s2 + $0x210] sm:$0xff] }
  0x2c   :  { %818 = vmatpush.bf16.msrb.mxu1 %v1686_v54  ;;  %v1706_v54 = vld [vmem:[%s2291_s2 + $0x208] sm:$0xff] }
  0x2d   :  { %856 = vmatpush.bf16.msrb.mxu3 %v1702_v55  ;;  %v1705_v55 = vld [vmem:[%s2291_s2 + $0x200] sm:$0xff] }
  0x2e   :  { %800 = vmatpush.bf16.msrb.mxu0 %v1677_v56  ;;  %v1201_v56 = vld [vmem:[%s2292_s0 + $0x20] sm:$0xf] }
  0x2f   :  { %838 = vmatpush.bf16.msrb.mxu2 %v1693_v57  ;;  %v1631_v57 = vld [vmem:[%s2292_s0 + $0x40] sm:$0xf0] }
  0x30   :  { %819 = vmatpush.bf16.msrb.mxu1 %v1685_v58  ;;  %v1202_v58 = vor.u32 %v1631_v57, %v1201_v56  ;;  %v1733_v57 = vld [vmem:[%s2296_s6 + $0x64] sm:$0xf] }
  0x31   :  { %857 = vmatpush.bf16.msrb.mxu3 %v1701_v59  ;;  %734 = vmatmul.bf16.gmra.mxu0 %v1206_v6  ;;  %v1237_v59 = vld [vmem:[%s2292_s0 + $0x68] sm:$0xf]  ;;  %v1719_v6 = vld [vmem:[%s2295_s4 + $0x30] sm:$0xff] }
  0x32   :  { %801 = vmatpush.bf16.msrb.mxu0 %v1676_v4  ;;  %772 = vmatmul.bf16.gmra.mxu2 %v1214_v7  ;;  %v1238_v61 = vor.u32 %v1640_v60, %v1237_v59 }
  0x33   :  { %839 = vmatpush.bf16.msrb.mxu2 %v1692_v5  ;;  %753 = vmatmul.bf16.gmra.mxu1 %v1210_v8  ;;  %v1718_v8 = vld [vmem:[%s2295_s4 + $0x28] sm:$0xff] }
  0x34   :  { %791 = vmatmul.bf16.gmra.mxu3 %v1218_v9  ;;  %820 = vmatpush.bf16.msrb.mxu1 %v1684_v10 }
  0x35   :  { %858 = vmatpush.bf16.msrb.mxu3 %v1700_v11  ;;  %v1717_v11 = vld [vmem:[%s2295_s4 + $0x20] sm:$0xff] }
  0x36   :  { %802 = vmatpush.bf16.msrb.mxu0 %v1675_v12 }
  0x37   :  { %840 = vmatpush.bf16.msrb.mxu2 %v1691_v13 }
  0x38   :  { %821 = vmatpush.bf16.msrb.mxu1 %v1683_v14  ;;  %v1716_v14 = vld [vmem:[%s2295_s4 + $0x18] sm:$0xff] }
  0x39   :  { %859 = vmatpush.bf16.msrb.mxu3 %v1699_v15 }
  0x3a   :  { %803 = vmatpush.bf16.msrb.mxu0 %v1674_v16 }
  0x3b   :  { %841 = vmatpush.bf16.msrb.mxu2 %v1690_v17  ;;  %v1715_v17 = vld [vmem:[%s2295_s4 + $0x10] sm:$0xff] }
  0x3c   :  { %822 = vmatpush.bf16.msrb.mxu1 %v1682_v18  ;;  %v1714_v18 = vld [vmem:[%s2295_s4 + $0x8] sm:$0xff] }
  0x3d   :  { %860 = vmatpush.bf16.msrb.mxu3 %v1698_v19 }
  0x3e   :  { %804 = vmatpush.bf16.msrb.mxu0 %v1673_v20 }
  0x3f   :  { %842 = vmatpush.bf16.msrb.mxu2 %v1689_v21 }
  0x40   :  { %823 = vmatpush.bf16.msrb.mxu1 %v1681_v22  ;;  %v1713_v22 = vld [vmem:[%s2295_s4] sm:$0xff] }
  0x41   :  { %861 = vmatpush.bf16.msrb.mxu3 %v1697_v23  ;;  %805 = vmatmul.bf16.vlgmr.msrb.gmra.mxu0 %v1186_v33  ;;  %v1746_v23 = vld [vmem:[%s2293_s3] ss:$0 sm:$0xff] }
  0x42   :  { %873 = vmatpush.bf16.msra.mxu0 %v1712_v26  ;;  %843 = vmatmul.bf16.vlgmr.msrb.gmra.mxu2 %v1194_v34 }
  0x43   :  { %824 = vmatmul.bf16.vlgmr.msrb.gmra.mxu1 %v1190_v35 }
  0x44   :  { %862 = vmatmul.bf16.vlgmr.msrb.gmra.mxu3 %v1198_v36  ;;  %966 = vmatpush.bf16.msra.mxu1 %v1720_v3  ;;  %v1731_v3 = vld [vmem:[%s2296_s6 + $0x54] sm:$0xf] }
  0x46   :  { %874 = vmatpush.bf16.msra.mxu0 %v1711_v37 }
  0x48   :  { %967 = vmatpush.bf16.msra.mxu1 %v1719_v6 }
  0x4a   :  { %875 = vmatpush.bf16.msra.mxu0 %v1710_v38 }
  0x4c   :  { %968 = vmatpush.bf16.msra.mxu1 %v1718_v8 }
  0x4e   :  { %876 = vmatpush.bf16.msra.mxu0 %v1709_v39 }
  0x50   :  { %969 = vmatpush.bf16.msra.mxu1 %v1717_v11 }
  0x51   :  { %810 = vmatmul.bf16.gmra.mxu0 %v1222_v49 }
  0x52   :  { %877 = vmatpush.bf16.msra.mxu0 %v1708_v44  ;;  %848 = vmatmul.bf16.gmra.mxu2 %v1230_v50  ;;  %v1617_v44 = vld [vmem:[%s2296_s6 + $0x70] sm:$0xf] }
  0x53   :  { %829 = vmatmul.bf16.gmra.mxu1 %v1226_v51  ;;  %v1618_v50 = vor.u32 %v1736_v45, %v1617_v44  ;;  %v1619_v51 = vld [vmem:[%s2296_s6 + $0x78] sm:$0xf0]  ;;  %v1585_v45 = vld [vmem:[%s2296_s6 + $0x30] sm:$0xf] }
  0x54   :  { %867 = vmatmul.bf16.gmra.mxu3 %v1234_v52  ;;  %970 = vmatpush.bf16.msra.mxu1 %v1716_v14  ;;  %v1609_v52 = vld [vmem:[%s2296_s6 + $0x60] sm:$0xf]  ;;  %v1622_v56 = vor.u32 %v1735_v46, %v1619_v51  ;;  %v1728_v46 = vld [vmem:[%s2296_s6 + $0x34] sm:$0xf0] }
  0x55   :  { %1105 = vmatpush.bf16.msra.mxu2 %v1618_v50  ;;  %v1593_v14 = vld [vmem:[%s2296_s6 + $0x40] sm:$0xf] }
  0x56   :  { %878 = vmatpush.bf16.msra.mxu0 %v1707_v53  ;;  %v1734_v53 = vld [vmem:[%s2296_s6 + $0x64] sm:$0xf0]  ;;  %1124 = vmatpush.bf16.msra.mxu3 %v1622_v56  ;;  %v1577_v51 = vld [vmem:[%s2296_s6 + $0x20] sm:$0xf] }
  0x57   :  { %v1610_v59 = vor.u32 %v1734_v53, %v1609_v52  ;;  %v1726_v52 = vld [vmem:[%s2296_s6 + $0x24] sm:$0xf0]  ;;  %v1725_v53 = vld [vmem:[%s2296_s6 + $0x24] sm:$0xf] }
  0x58   :  { %971 = vmatpush.bf16.msra.mxu1 %v1715_v17 }
  0x59   :  { %1106 = vmatpush.bf16.msra.mxu2 %v1610_v59  ;;  %v1723_v59 = vld [vmem:[%s2296_s6 + $0x14] sm:$0xf] }
  0x5a   :  { %879 = vmatpush.bf16.msra.mxu0 %v1706_v54 }
  0x5c   :  { %972 = vmatpush.bf16.msra.mxu1 %v1714_v18  ;;  %v1595_v18 = vld [vmem:[%s2296_s6 + $0x48] sm:$0xf0] }
  0x5e   :  { %880 = vmatpush.bf16.msra.mxu0 %v1705_v55 }
  0x60   :  { %973 = vmatpush.bf16.msra.mxu1 %v1713_v22 }
  0x61   :  { %881 = vmatmul.bf16.vlgmr.msra.gmra.mxu0 %v1202_v58  ;;  %v1611_v58 = vld [vmem:[%s2296_s6 + $0x68] sm:$0xf0] }
  0x71   :  { %886 = vmatmul.bf16.gmra.mxu0 %v1238_v61 }
  0x9e   :  { %v730_v62 = vpop.f32.mrf.mxu0 }
  0x9f   :  { %v731_v25 = vadd.f32 %v1746_v23, %v730_v62  ;;  %v1614_v62 = vor.u32 %v1733_v57, %v1611_v58  ;;  %v1569_v57 = vld [vmem:[%s2296_s6 + $0x10] sm:$0xf]  ;;  %v1724_v58 = vld [vmem:[%s2296_s6 + $0x14] sm:$0xf0] }
  0xa0   :  { %v749_v63 = vpop.f32.mrf.mxu1 }
  0xa1   :  { %v750_v30 = vadd.f32 %v749_v63, %v731_v25  ;;  %v1601_v63 = vld [vmem:[%s2296_s6 + $0x50] sm:$0xf]  ;;  %1125 = vmatpush.bf16.msra.mxu3 %v1614_v62 }
  0xa5   :  { %v768_v1 = vpop.f32.mrf.mxu2 }
  0xa6   :  { %v732_v0 = vpop.f32.mrf.mxu0  ;;  %v769_v31 = vadd.f32 %v768_v1, %v750_v30 }
  0xa7   :  { %v787_v2 = vpop.f32.mrf.mxu3  ;;  %v733_v28 = vadd.f32 %v1746_v23, %v732_v0  ;;  %v1732_v0 = vld [vmem:[%s2296_s6 + $0x54] sm:$0xf0] }
  0xa8   :  { %v751_v5 = vpop.f32.mrf.mxu1  ;;  %v788_v36 = vadd.f32 %v787_v2, %v769_v31 }
  0xa9   :  { %v752_v32 = vadd.f32 %v751_v5, %v733_v28 }
  0xad   :  { %v770_v7 = vpop.f32.mrf.mxu2 }
  0xae   :  { %v735_v4 = vpop.f32.mrf.mxu0  ;;  %v771_v34 = vadd.f32 %v770_v7, %v752_v32 }
  0xaf   :  { %v789_v9 = vpop.f32.mrf.mxu3  ;;  %v736_v42 = vadd.f32 %v1746_v23, %v735_v4  ;;  %v1603_v4 = vld [vmem:[%s2296_s6 + $0x58] sm:$0xf0] }
  0xb0   :  { %v754_v12 = vpop.f32.mrf.mxu1  ;;  %v790_v38 = vadd.f32 %v789_v9, %v771_v34  ;;  %v1602_v9 = vor.u32 %v1732_v0, %v1601_v63  ;;  %v1561_v63 = vld [vmem:[%s2296_s6] sm:$0xf]  ;;  %v1722_v0 = vld [vmem:[%s2296_s6 + $0x4] sm:$0xf0] }
  0xb1   :  { %v755_v60 = vadd.f32 %v754_v12, %v736_v42  ;;  %v1606_v12 = vor.u32 %v1731_v3, %v1603_v4  ;;  %v1563_v3 = vld [vmem:[%s2296_s6 + $0x8] sm:$0xf0] }
  0xb2   :  { %1107 = vmatpush.bf16.msra.mxu2 %v1602_v9 }
  0xb3   :  { %1126 = vmatpush.bf16.msra.mxu3 %v1606_v12 }
  0xb5   :  { %v2129_v13 = vpop.f32.mrf.mxu2 }
  0xb6   :  { %v737_v10 = vpop.f32.mrf.mxu0  ;;  %v774_v5 = vadd.f32 %v2129_v13, %v755_v60  ;;  %v1729_v13 = vld [vmem:[%s2296_s6 + $0x44] sm:$0xf]  ;;  %v1570_v60 = vor.u32 %v1724_v58, %v1569_v57 }
  0xb7   :  { %v2134_v16 = vpop.f32.mrf.mxu3  ;;  %v738_v47 = vadd.f32 %v1746_v23, %v737_v10 }
  0xb8   :  { %v756_v19 = vpop.f32.mrf.mxu1 }
  0xb9   :  { %v757_v1 = vadd.f32 %v756_v19, %v738_v47  ;;  %v793_v19 = vadd.f32 %v2134_v16, %v774_v5  ;;  %v1727_v47 = vld [vmem:[%s2296_s6 + $0x34] sm:$0xf] }
  0xbd   :  { %v775_v20 = vpop.f32.mrf.mxu2 }
  0xbe   :  { %v806_v15 = vpop.f32.mrf.mxu0  ;;  %v776_v7 = vadd.f32 %v775_v20, %v757_v1  ;;  %v1721_v1 = vld [vmem:[%s2296_s6 + $0x4] sm:$0xf] }
  0xbf   :  { %v2148_v24 = vpop.f32.mrf.mxu3  ;;  %v807_v39 = vadd.f32 %v806_v15, %v788_v36  ;;  %v1730_v15 = vld [vmem:[%s2296_s6 + $0x44] sm:$0xf0]  ;;  %v1566_v4 = vor.u32 %v1721_v1, %v1563_v3 }
  0xc0   :  { %v825_v26 = vpop.f32.mrf.mxu1  ;;  %v1594_v23 = vor.u32 %v1730_v15, %v1593_v14 }
  0xc1   :  { %v826_v43 = vadd.f32 %v825_v26, %v807_v39 }
  0xc2   :  { %1108 = vmatpush.bf16.msra.mxu2 %v1594_v23 }
  0xc5   :  { %v844_v29 = vpop.f32.mrf.mxu2 }
  0xc6   :  { %v808_v21 = vpop.f32.mrf.mxu0  ;;  %v845_v54 = vadd.f32 %v844_v29, %v826_v43  ;;  %v1598_v29 = vor.u32 %v1729_v13, %v1595_v18 }
  0xc7   :  { %v863_v33 = vpop.f32.mrf.mxu3  ;;  %v809_v41 = vadd.f32 %v808_v21, %v790_v38  ;;  %v795_v21 = vadd.f32 %v2148_v24, %v776_v7  ;;  %v1738_v7 = vld [vmem:[%s2297_s1] sm:$0xff]  }
  0xc8   :  { %v827_v37 = vpop.f32.mrf.mxu1  ;;  %v864_v6 = vadd.f32 %v863_v33, %v845_v54  ;;  %1127 = vmatpush.bf16.msra.mxu3 %v1598_v29  ;;  %v1578_v54 = vor.u32 %v1726_v52, %v1577_v51  ;;  %v1739_v9 = vunpack.c.l.bf16 %v1738_v7 }
  0xc9   :  { %v828_v55 = vadd.f32 %v827_v37, %v809_v41 }
  0xcd   :  { %v846_v40 = vpop.f32.mrf.mxu2 }
  0xce   :  { %v2150_v27 = vpop.f32.mrf.mxu0  ;;  %v847_v61 = vadd.f32 %v846_v40, %v828_v55  ;;  %v1579_v55 = vld [vmem:[%s2296_s6 + $0x28] sm:$0xf0] }
  0xcf   :  { %v865_v48 = vpop.f32.mrf.mxu3  ;;  %v812_v25 = vadd.f32 %v2150_v27, %v793_v19  ;;  %v1582_v56 = vor.u32 %v1725_v53, %v1579_v55 }
  0xd0   :  { %v830_v2 = vpop.f32.mrf.mxu1  ;;  %v866_v10 = vadd.f32 %v865_v48, %v847_v61  ;;  %v1586_v48 = vor.u32 %v1728_v46, %v1585_v45  ;;  %v1571_v61 = vld [vmem:[%s2296_s6 + $0x18] sm:$0xf0] }
  0xd1   :  { %v831_v33 = vadd.f32 %v830_v2, %v812_v25  ;;  %v1574_v62 = vor.u32 %v1723_v59, %v1571_v61  ;;  %v1562_v2 = vor.u32 %v1722_v0, %v1561_v63 }
  0xd2   :  { %1109 = vmatpush.bf16.msra.mxu2 %v1586_v48 }
  0xd5   :  { %v849_v8 = vpop.f32.mrf.mxu2 }
  0xd6   :  { %v2152_v35 = vpop.f32.mrf.mxu0  ;;  %v850_v24 = vadd.f32 %v849_v8, %v831_v33  ;;  %1110 = vmatpush.bf16.msra.mxu2 %v1578_v54  ;;  %v1019_v33 = vld [vmem:[%s2298_s7] sm:$0x3] }
  0xd7   :  { %v868_v22 = vpop.f32.mrf.mxu3  ;;  %v814_v30 = vadd.f32 %v2152_v35, %v795_v21 }
  0xd8   :  { %v832_v32 = vpop.f32.mrf.mxu1  ;;  %v869_v39 = vadd.f32 %v868_v22, %v850_v24 }
  0xd9   :  { %v833_v36 = vadd.f32 %v832_v32, %v814_v30 }
  0xda   :  { %1111 = vmatpush.bf16.msra.mxu2 %v1570_v60 }
  0xdd   :  { %v851_v16 = vpop.f32.mrf.mxu2 }
  0xde   :  { %v882_v49 = vpop.f32.mrf.mxu0  ;;  %v852_v37 = vadd.f32 %v851_v16, %v833_v36  ;;  %1112 = vmatpush.bf16.msra.mxu2 %v1562_v2  ;;  %v1021_v16 = vperm.slane %v1019_v33, 0 }
  0xdf   :  { %v883_v11 = vadd.f32 %v882_v49, %v864_v6  ;;  %v870_v38 = vpop.f32.mrf.mxu3  ;;  %v1587_v49 = vld [vmem:[%s2296_s6 + $0x38] sm:$0xf0]  ;;  %v1747_v6 = vld [vmem:[%s2294_s5] ss:$0 sm:$0xff] }
  0xe0   :  { %v871_v27 = vadd.f32 %v870_v38, %v852_v37  ;;  %v1590_v50 = vor.u32 %v1727_v47, %v1587_v49 }
  0xe1   :  { %v892_v26 = vmax.f32 %v883_v11, 0.0 }
  0xe2   :  { %1128 = vmatpush.bf16.msra.mxu3 %v1590_v50 }
  0xe6   :  { %v884_v17 = vpop.f32.mrf.mxu0  ;;  %1129 = vmatpush.bf16.msra.mxu3 %v1582_v56 }
  0xe7   :  { %v885_v20 = vadd.f32 %v884_v17, %v866_v10  ;;  %v1740_v10 = vunpack.c.h.bf16 %v1738_v7 }
  0xe9   :  { %v893_v28 = vmax.f32 %v885_v20, 0.0  ;;  %v1745_v20 = vld [vmem:[%s2297_s1 + $0x8] sm:$0xff]  }
  0xea   :  { %1130 = vmatpush.bf16.msra.mxu3 %v1574_v62  ;;  %v1743_v22 = vunpack.c.l.bf16 %v1745_v20  ;;  %v1744_v23 = vunpack.c.h.bf16 %v1745_v20 }
  0xeb   :  { %v896_v31 = vpack.c.bf16 %v893_v28, %v892_v26 }
  0xed   :  { %974 = vmatmul.bf16.vlgmr.msra.gmra.mxu1 %v896_v31 }
  0xee   :  { %v887_v34 = vpop.f32.mrf.mxu0  ;;  %1131 = vmatpush.bf16.msra.mxu3 %v1566_v4 }
  0xef   :  { %v888_v40 = vadd.f32 %v887_v34, %v869_v39  ;;  %v1022_v34 = vperm.slane %v1019_v33, 1 }
  0xf1   :  { %v894_v43 = vmax.f32 %v888_v40, 0.0 }
  0xf6   :  { %v889_v41 = vpop.f32.mrf.mxu0 }
  0xf7   :  { %v890_v42 = vadd.f32 %v889_v41, %v871_v27 }
  0xf9   :  { %v895_v44 = vmax.f32 %v890_v42, 0.0 }
  0xfb   :  { %v897_v35 = vpack.c.bf16 %v895_v44, %v894_v43 }
  0xfd   :  { %979 = vmatmul.bf16.gmra.mxu1 %v897_v35 }
 0x16a   :  { %v975_v5 = vpop.f32.mrf.mxu1 }
 0x16b   :  { %v976_v8 = vadd.f32 %v1747_v6, %v975_v5 }
 0x16d   :  { %v993_v12 = vadd.f32 %v1739_v9, %v976_v8 }
 0x16f   :  { %v997_v17 = vmax.f32 %v993_v12, 0.0 }
 0x172   :  { %v977_v11 = vpop.f32.mrf.mxu1 }
 0x173   :  { %v978_v14 = vadd.f32 %v1747_v6, %v977_v11 }
 0x175   :  { %v994_v15 = vadd.f32 %v1740_v10, %v978_v14 }
 0x177   :  { %v998_v13 = vmax.f32 %v994_v15, 0.0 }
 0x179   :  { %v1001_v18 = vpack.c.bf16 %v998_v13, %v997_v17 }
 0x17a   :  { %v980_v19 = vpop.f32.mrf.mxu1 }
 0x17b   :  { %1113 = vmatmul.bf16.vlgmr.msra.gmra.mxu2 %v1001_v18  ;;  %1132 = vmatmul.bf16.vlgmr.msra.gmra.mxu3 %v1001_v18  ;;  %v981_v21 = vadd.f32 %v1747_v6, %v980_v19 }
 0x17d   :  { %v995_v26 = vadd.f32 %v1743_v22, %v981_v21 }
 0x17f   :  { %v999_v30 = vmax.f32 %v995_v26, 0.0 }
 0x182   :  { %v982_v25 = vpop.f32.mrf.mxu1 }
 0x183   :  { %v983_v28 = vadd.f32 %v1747_v6, %v982_v25 }
 0x185   :  { %v996_v29 = vadd.f32 %v1744_v23, %v983_v28 }
 0x187   :  { %v1000_v31 = vmax.f32 %v996_v29, 0.0 }
 0x189   :  { %v1002_v32 = vpack.c.bf16 %v1000_v31, %v999_v30 }
 0x18b   :  { %1118 = vmatmul.bf16.gmra.mxu2 %v1002_v32  ;;  %1137 = vmatmul.bf16.gmra.mxu3 %v1002_v32 }
 0x1fe   :  { %v1114_v24 = vpop.f32.mrf.mxu2  ;;  %v1133_v36 = vpop.f32.mrf.mxu3 }
 0x1ff   :  { %v1115_v37 = vadd.f32 %v1114_v24, %v1021_v16  ;;  %v1134_v38 = vadd.f32 %v1133_v36, %v1022_v34 }
 0x201   :  { %v1143_v39 = vmax.f32 %v1115_v37, 0.0  ;;  %v1155_v27 = vpack.c.bf16 %v1134_v38, %v1134_v38 }
 0x203   :  { %v1147_v40 = vpack.c.bf16 %v1143_v39, %v1143_v39  ;;  %1159 = vst [vmem:[%s2299_s8 + $0x4] sm:$0xf] %v1155_v27 }
 0x205   :  { %1151 = vst [vmem:[%s2299_s8] sm:$0xf] %v1147_v40 }
 0x206   :  { %v1116_v41 = vpop.f32.mrf.mxu2  ;;  %v1135_v42 = vpop.f32.mrf.mxu3 }
 0x207   :  { %v1117_v43 = vadd.f32 %v1116_v41, %v1021_v16  ;;  %v1136_v44 = vadd.f32 %v1135_v42, %v1022_v34 }
 0x209   :  { %v1144_v35 = vmax.f32 %v1117_v43, 0.0  ;;  %v1156_v45 = vpack.c.bf16 %v1136_v44, %v1136_v44 }
 0x20b   :  { %v1148_v46 = vpack.c.bf16 %v1144_v35, %v1144_v35  ;;  %1160 = vst [vmem:[%s2299_s8 + $0xc] sm:$0xf] %v1156_v45 }
 0x20d   :  { %1152 = vst [vmem:[%s2299_s8 + $0x8] sm:$0xf] %v1148_v46 }
 0x20e   :  { %v1119_v47 = vpop.f32.mrf.mxu2  ;;  %v1138_v48 = vpop.f32.mrf.mxu3 }
 0x20f   :  { %v1120_v49 = vadd.f32 %v1119_v47, %v1021_v16  ;;  %v1139_v50 = vadd.f32 %v1138_v48, %v1022_v34 }
 0x211   :  { %v1145_v51 = vmax.f32 %v1120_v49, 0.0  ;;  %v1157_v52 = vpack.c.bf16 %v1139_v50, %v1139_v50 }
 0x213   :  { %v1149_v53 = vpack.c.bf16 %v1145_v51, %v1145_v51  ;;  %1161 = vst [vmem:[%s2299_s8 + $0x14] sm:$0xf] %v1157_v52 }
 0x215   :  { %1153 = vst [vmem:[%s2299_s8 + $0x10] sm:$0xf] %v1149_v53 }
 0x216   :  { %v1121_v54 = vpop.f32.mrf.mxu2  ;;  %v1140_v55 = vpop.f32.mrf.mxu3 }
 0x217   :  { %v1122_v56 = vadd.f32 %v1121_v54, %v1021_v16  ;;  %v1141_v57 = vadd.f32 %v1140_v55, %v1022_v34 }
 0x219   :  { %v1146_v58 = vmax.f32 %v1122_v56, 0.0  ;;  %v1158_v59 = vpack.c.bf16 %v1141_v57, %v1141_v57 }
 0x21b   :  { %v1150_v60 = vpack.c.bf16 %v1146_v58, %v1146_v58  ;;  %1162 = vst [vmem:[%s2299_s8 + $0x1c] sm:$0xf] %v1158_v59 }
 0x21d   :  { %1154 = vst [vmem:[%s2299_s8 + $0x18] sm:$0xf] %v1150_v60 }

// kernel: _lambda_.9
= control target key start
LH: loop header
LB: loop body
LE: loop exit
PB: predicated region body
PF: predicated region fallthrough
CT: control target
= control target key end

     0   :  { %s1740_s0 = inlined_call_operand.vmem [shape: bf16[8,1152], index: 0, kind: input, shape index: {}]   ;;  %s1741_s1 = inlined_call_operand.vmem [shape: bf16[8,128], index: 1, kind: input, shape index: {}]   ;;  %s1742_s2 = inlined_call_operand.vmem [shape: bf16[1152,128], index: 2, kind: input, shape index: {}]   ;;  %s1743_s3 = inlined_call_operand.vmem [shape: f32[1,128], index: 3, kind: input, shape index: {}]   ;;  %s1744_s4 = inlined_call_operand.vmem [shape: bf16[128,128], index: 4, kind: input, shape index: {}]   ;;  %s1745_s5 = inlined_call_operand.vmem [shape: f32[1,128], index: 5, kind: input, shape index: {}]   ;;  %s1746_s6 = inlined_call_operand.vmem [shape: f32[2,8], index: 6, kind: input, shape index: {}]   ;;  %s1747_s7 = inlined_call_operand.vmem [shape: f32[128,10], index: 7, kind: input, shape index: {}]   ;;  %s1748_s8 = inlined_call_operand.vmem [shape: f32[1,10], index: 8, kind: input, shape index: {}]   ;;  %s1749_s9 = inlined_call_operand.hbm [shape: f32[2,10], index: 9, kind: output, shape index: {}]  }
   0x1   :  { %v1265_v0 = vld [vmem:[%s1742_s2 + $0x38] sm:$0xff]  ;;  %v1264_v4 = vld [vmem:[%s1742_s2 + $0x30] sm:$0xff]  ;;  %v1263_v8 = vld [vmem:[%s1742_s2 + $0x28] sm:$0xff] }
   0x2   :  { %v1281_v1 = vld [vmem:[%s1742_s2 + $0xb8] sm:$0xff]  ;;  %650 = vmatpush.bf16.msra.mxu0 %v1265_v0  ;;  %v1280_v5 = vld [vmem:[%s1742_s2 + $0xb0] sm:$0xff]  ;;  %v1279_v9 = vld [vmem:[%s1742_s2 + $0xa8] sm:$0xff] }
   0x3   :  { %v1289_v2 = vld [vmem:[%s1742_s2 + $0xf8] sm:$0xff]  ;;  %676 = vmatpush.bf16.msra.mxu2 %v1281_v1  ;;  %v1288_v6 = vld [vmem:[%s1742_s2 + $0xf0] sm:$0xff]  ;;  %v1287_v10 = vld [vmem:[%s1742_s2 + $0xe8] sm:$0xff] }
   0x4   :  { %v1273_v3 = vld [vmem:[%s1742_s2 + $0x78] sm:$0xff]  ;;  %689 = vmatpush.bf16.msra.mxu3 %v1289_v2  ;;  %v1272_v7 = vld [vmem:[%s1742_s2 + $0x70] sm:$0xff]  ;;  %v1271_v11 = vld [vmem:[%s1742_s2 + $0x68] sm:$0xff] }
   0x5   :  { %663 = vmatpush.bf16.msra.mxu1 %v1273_v3  ;;  %v1262_v12 = vld [vmem:[%s1742_s2 + $0x20] sm:$0xff]  ;;  %v1261_v16 = vld [vmem:[%s1742_s2 + $0x18] sm:$0xff]  ;;  %v1260_v20 = vld [vmem:[%s1742_s2 + $0x10] sm:$0xff] }
   0x6   :  { %651 = vmatpush.bf16.msra.mxu0 %v1264_v4  ;;  %v1278_v13 = vld [vmem:[%s1742_s2 + $0xa0] sm:$0xff]  ;;  %v1277_v17 = vld [vmem:[%s1742_s2 + $0x98] sm:$0xff]  ;;  %v1276_v21 = vld [vmem:[%s1742_s2 + $0x90] sm:$0xff] }
   0x7   :  { %677 = vmatpush.bf16.msra.mxu2 %v1280_v5  ;;  %v1286_v14 = vld [vmem:[%s1742_s2 + $0xe0] sm:$0xff]  ;;  %v1285_v18 = vld [vmem:[%s1742_s2 + $0xd8] sm:$0xff]  ;;  %v1284_v22 = vld [vmem:[%s1742_s2 + $0xd0] sm:$0xff] }
   0x8   :  { %690 = vmatpush.bf16.msra.mxu3 %v1288_v6  ;;  %v1270_v15 = vld [vmem:[%s1742_s2 + $0x60] sm:$0xff]  ;;  %v1269_v19 = vld [vmem:[%s1742_s2 + $0x58] sm:$0xff]  ;;  %v1268_v23 = vld [vmem:[%s1742_s2 + $0x50] sm:$0xff] }
   0x9   :  { %664 = vmatpush.bf16.msra.mxu1 %v1272_v7 }
   0xa   :  { %652 = vmatpush.bf16.msra.mxu0 %v1263_v8 }
   0xb   :  { %678 = vmatpush.bf16.msra.mxu2 %v1279_v9 }
   0xc   :  { %691 = vmatpush.bf16.msra.mxu3 %v1287_v10 }
   0xd   :  { %665 = vmatpush.bf16.msra.mxu1 %v1271_v11 }
   0xe   :  { %653 = vmatpush.bf16.msra.mxu0 %v1262_v12 }
   0xf   :  { %679 = vmatpush.bf16.msra.mxu2 %v1278_v13 }
  0x10   :  { %692 = vmatpush.bf16.msra.mxu3 %v1286_v14 }
  0x11   :  { %666 = vmatpush.bf16.msra.mxu1 %v1270_v15 }
  0x12   :  { %654 = vmatpush.bf16.msra.mxu0 %v1261_v16 }
  0x13   :  { %680 = vmatpush.bf16.msra.mxu2 %v1277_v17 }
  0x14   :  { %693 = vmatpush.bf16.msra.mxu3 %v1285_v18 }
  0x15   :  { %667 = vmatpush.bf16.msra.mxu1 %v1269_v19 }
  0x16   :  { %14 = vsyncpa [#allocation3], 0  ;;  %655 = vmatpush.bf16.msra.mxu0 %v1260_v20  ;;  %v1259_v24 = vld [vmem:[%s1742_s2 + $0x8] sm:$0xff]  ;;  %v33_v29 = vld [vmem:[%s1740_s0] sm:$0xff]  ;;  %vm855_vm0 = vcmask 64512   ;;  %s928_s23 = sshll.u32 %s1749_s9, 4  ;;  %s929_s23 = int_to_ptr.hbm [resolvable:$true] %s928_s23 }
  0x17   :  { %681 = vmatpush.bf16.msra.mxu2 %v1276_v21  ;;  %v1275_v25 = vld [vmem:[%s1742_s2 + $0x88] sm:$0xff]  ;;  %v1258_v30 = vld [vmem:[%s1742_s2] sm:$0xff]  ;;  %v191_v33 = vunpack.c.l.b16 %v33_v29  ;;  %v1297_v34 = vld [vmem:[%s1742_s2 + $0x138] sm:$0xff]  ;;  %v192_v39 = vunpack.c.h.b16 %v33_v29  ;;  %vm919_vm1 = vcmask 74752  }
  0x18   :  { %v1283_v26 = vld [vmem:[%s1742_s2 + $0xc8] sm:$0xff]  ;;  %694 = vmatpush.bf16.msra.mxu3 %v1284_v22  ;;  %v1274_v31 = vld [vmem:[%s1742_s2 + $0x80] sm:$0xff]  ;;  %v1313_v35 = vld [vmem:[%s1742_s2 + $0x1b8] sm:$0xff] }
  0x19   :  { %668 = vmatpush.bf16.msra.mxu1 %v1268_v23  ;;  %v1267_v27 = vld [vmem:[%s1742_s2 + $0x48] sm:$0xff]  ;;  %v1282_v36 = vld [vmem:[%s1742_s2 + $0xc0] sm:$0xff]  ;;  %v1321_v40 = vld [vmem:[%s1742_s2 + $0x1f8] sm:$0xff]  ;;  %v200_v43 = vpack.c.b16 %v191_v33, %v191_v33  ;;  %v201_v47 = vpack.c.b16 %v192_v39, %v192_v39 }
  0x1a   :  { %v34_v28 = vld [vmem:[%s1740_s0 + $0x8] sm:$0xff]  ;;  %656 = vmatpush.bf16.msra.mxu0 %v1259_v24  ;;  %v1266_v37 = vld [vmem:[%s1742_s2 + $0x40] sm:$0xff]  ;;  %v1305_v41 = vld [vmem:[%s1742_s2 + $0x178] sm:$0xff] }
  0x1b   :  { %682 = vmatpush.bf16.msra.mxu2 %v1275_v25  ;;  %v193_v32 = vunpack.c.l.b16 %v34_v28  ;;  %v194_v38 = vunpack.c.h.b16 %v34_v28  ;;  %v1296_v44 = vld [vmem:[%s1742_s2 + $0x130] sm:$0xff]  ;;  %v1295_v50 = vld [vmem:[%s1742_s2 + $0x128] sm:$0xff]  ;;  %v1294_v54 = vld [vmem:[%s1742_s2 + $0x120] sm:$0xff] }
  0x1c   :  { %695 = vmatpush.bf16.msra.mxu3 %v1283_v26  ;;  %v1312_v45 = vld [vmem:[%s1742_s2 + $0x1b0] sm:$0xff]  ;;  %v1311_v51 = vld [vmem:[%s1742_s2 + $0x1a8] sm:$0xff]  ;;  %v1310_v55 = vld [vmem:[%s1742_s2 + $0x1a0] sm:$0xff] }
  0x1d   :  { %669 = vmatpush.bf16.msra.mxu1 %v1267_v27  ;;  %v202_v42 = vpack.c.b16 %v193_v32, %v193_v32  ;;  %v203_v46 = vpack.c.b16 %v194_v38, %v194_v38  ;;  %v1320_v48 = vld [vmem:[%s1742_s2 + $0x1f0] sm:$0xff]  ;;  %v1319_v52 = vld [vmem:[%s1742_s2 + $0x1e8] sm:$0xff]  ;;  %v1318_v56 = vld [vmem:[%s1742_s2 + $0x1e0] sm:$0xff] }
  0x1e   :  { %657 = vmatpush.bf16.msra.mxu0 %v1258_v30  ;;  %v1304_v49 = vld [vmem:[%s1742_s2 + $0x170] sm:$0xff]  ;;  %v1303_v53 = vld [vmem:[%s1742_s2 + $0x168] sm:$0xff]  ;;  %v1302_v57 = vld [vmem:[%s1742_s2 + $0x160] sm:$0xff] }
  0x1f   :  { %683 = vmatpush.bf16.msra.mxu2 %v1274_v31  ;;  %v1293_v58 = vld [vmem:[%s1742_s2 + $0x118] sm:$0xff]  ;;  %v1292_v62 = vld [vmem:[%s1742_s2 + $0x110] sm:$0xff]  ;;  %v1291_v2 = vld [vmem:[%s1742_s2 + $0x108] sm:$0xff] }
  0x20   :  { %696 = vmatpush.bf16.msra.mxu3 %v1282_v36  ;;  %v1309_v59 = vld [vmem:[%s1742_s2 + $0x198] sm:$0xff]  ;;  %v1308_v63 = vld [vmem:[%s1742_s2 + $0x190] sm:$0xff]  ;;  %v1307_v3 = vld [vmem:[%s1742_s2 + $0x188] sm:$0xff] }
  0x21   :  { %670 = vmatpush.bf16.msra.mxu1 %v1266_v37  ;;  %658 = vmatmul.bf16.vlgmr.msra.gmra.mxu0 %v200_v43  ;;  %v1317_v60 = vld [vmem:[%s1742_s2 + $0x1d8] sm:$0xff]  ;;  %v1316_v0 = vld [vmem:[%s1742_s2 + $0x1d0] sm:$0xff]  ;;  %v1315_v6 = vld [vmem:[%s1742_s2 + $0x1c8] sm:$0xff] }
  0x22   :  { %702 = vmatpush.bf16.msrb.mxu0 %v1297_v34  ;;  %684 = vmatmul.bf16.vlgmr.msra.gmra.mxu2 %v202_v42  ;;  %v1301_v61 = vld [vmem:[%s1742_s2 + $0x158] sm:$0xff]  ;;  %v1300_v1 = vld [vmem:[%s1742_s2 + $0x150] sm:$0xff]  ;;  %v1299_v7 = vld [vmem:[%s1742_s2 + $0x148] sm:$0xff] }
  0x23   :  { %728 = vmatpush.bf16.msrb.mxu2 %v1313_v35  ;;  %697 = vmatmul.bf16.vlgmr.msra.gmra.mxu3 %v203_v46  ;;  %v36_v4 = vld [vmem:[%s1740_s0 + $0x18] sm:$0xff]  ;;  %v35_v5 = vld [vmem:[%s1740_s0 + $0x10] sm:$0xff]  ;;  %v1290_v10 = vld [vmem:[%s1742_s2 + $0x100] sm:$0xff] }
  0x24   :  { %741 = vmatpush.bf16.msrb.mxu3 %v1321_v40  ;;  %671 = vmatmul.bf16.vlgmr.msra.gmra.mxu1 %v201_v47  ;;  %v197_v8 = vunpack.c.l.b16 %v36_v4  ;;  %v195_v9 = vunpack.c.l.b16 %v35_v5  ;;  %v1306_v11 = vld [vmem:[%s1742_s2 + $0x180] sm:$0xff]  ;;  %v1329_v12 = vld [vmem:[%s1742_s2 + $0x238] sm:$0xff]  ;;  %v198_v13 = vunpack.c.h.b16 %v36_v4  ;;  %v196_v16 = vunpack.c.h.b16 %v35_v5  ;;  %v1328_v19 = vld [vmem:[%s1742_s2 + $0x230] sm:$0xff] }
  0x25   :  { %715 = vmatpush.bf16.msrb.mxu1 %v1305_v41  ;;  %v1314_v14 = vld [vmem:[%s1742_s2 + $0x1c0] sm:$0xff]  ;;  %v1327_v22 = vld [vmem:[%s1742_s2 + $0x228] sm:$0xff]  ;;  %v1325_v24 = vld [vmem:[%s1742_s2 + $0x218] sm:$0xff] }
  0x26   :  { %703 = vmatpush.bf16.msrb.mxu0 %v1296_v44  ;;  %v1298_v15 = vld [vmem:[%s1742_s2 + $0x140] sm:$0xff]  ;;  %v206_v17 = vpack.c.b16 %v197_v8, %v197_v8  ;;  %v204_v18 = vpack.c.b16 %v195_v9, %v195_v9  ;;  %v207_v20 = vpack.c.b16 %v198_v13, %v198_v13  ;;  %v205_v21 = vpack.c.b16 %v196_v16, %v196_v16  ;;  %v1324_v25 = vld [vmem:[%s1742_s2 + $0x210] sm:$0xff]  ;;  %v1323_v26 = vld [vmem:[%s1742_s2 + $0x208] sm:$0xff] }
  0x27   :  { %729 = vmatpush.bf16.msrb.mxu2 %v1312_v45  ;;  %v1326_v23 = vld [vmem:[%s1742_s2 + $0x220] sm:$0xff]  ;;  %v1337_v31 = vld [vmem:[%s1744_s4 + $0x38] sm:$0xff]  ;;  %v1336_v34 = vld [vmem:[%s1744_s4 + $0x30] sm:$0xff] }
  0x28   :  { %742 = vmatpush.bf16.msrb.mxu3 %v1320_v48  ;;  %v37_v27 = vld [vmem:[%s1740_s0 + $0x20] sm:$0xf]  ;;  %v1335_v35 = vld [vmem:[%s1744_s4 + $0x28] sm:$0xff]  ;;  %v1333_v41 = vld [vmem:[%s1744_s4 + $0x18] sm:$0xff] }
  0x29   :  { %716 = vmatpush.bf16.msrb.mxu1 %v1304_v49  ;;  %v199_v28 = vunpack.c.l.b16 %v37_v27  ;;  %v1322_v29 = vld [vmem:[%s1742_s2 + $0x200] sm:$0xff]  ;;  %v1332_v44 = vld [vmem:[%s1744_s4 + $0x10] sm:$0xff]  ;;  %v1331_v45 = vld [vmem:[%s1744_s4 + $0x8] sm:$0xff]  ;;  %s1368_s2 = smov [#allocation2]  }
  0x2a   :  { %704 = vmatpush.bf16.msrb.mxu0 %v1295_v50  ;;  %v1334_v39 = vld [vmem:[%s1744_s4 + $0x20] sm:$0xff]  ;;  %v894_v5 = vld [vmem:[%s1747_s7 + $0x78] sm:$0xff]  ;;  %s926_s21 = sshll.u32 %s1368_s2, 4  ;;  %s927_s21 = int_to_ptr.vmem [resolvable:$true] %s926_s21 }
  0x2b   :  { %730 = vmatpush.bf16.msrb.mxu2 %v1311_v51  ;;  %v208_v30 = vpack.c.b16 %v199_v28, %v199_v28  ;;  %v1339_v46 = vld [vmem:[%s1743_s3] ss:$0 sm:$0xff]  ;;  %v890_v9 = vld [vmem:[%s1747_s7 + $0x58] sm:$0xff] }
  0x2c   :  { %743 = vmatpush.bf16.msrb.mxu3 %v1319_v52  ;;  %v1330_v47 = vld [vmem:[%s1744_s4] sm:$0xff]  ;;  %v886_v13 = vld [vmem:[%s1747_s7 + $0x38] sm:$0xff] }
  0x2d   :  { %717 = vmatpush.bf16.msrb.mxu1 %v1303_v53  ;;  %v891_v8 = vld [vmem:[%s1747_s7 + $0x60] sm:$0xff] }
  0x2e   :  { %705 = vmatpush.bf16.msrb.mxu0 %v1294_v54  ;;  %v850_v16 = vld [vmem:[%s1741_s1] sm:$0xf] }
  0x2f   :  { %731 = vmatpush.bf16.msrb.mxu2 %v1310_v55  ;;  %v854_v27 = vld [vmem:[%s1746_s6] sm:$0x3] }
  0x30   :  { %744 = vmatpush.bf16.msrb.mxu3 %v1318_v56 }
  0x31   :  { %718 = vmatpush.bf16.msrb.mxu1 %v1302_v57 }
  0x32   :  { %706 = vmatpush.bf16.msrb.mxu0 %v1293_v58 }
  0x33   :  { %732 = vmatpush.bf16.msrb.mxu2 %v1309_v59 }
  0x34   :  { %745 = vmatpush.bf16.msrb.mxu3 %v1317_v60 }
  0x35   :  { %719 = vmatpush.bf16.msrb.mxu1 %v1301_v61 }
  0x36   :  { %707 = vmatpush.bf16.msrb.mxu0 %v1292_v62 }
  0x37   :  { %733 = vmatpush.bf16.msrb.mxu2 %v1308_v63 }
  0x38   :  { %746 = vmatpush.bf16.msrb.mxu3 %v1316_v0 }
  0x39   :  { %720 = vmatpush.bf16.msrb.mxu1 %v1300_v1 }
  0x3a   :  { %708 = vmatpush.bf16.msrb.mxu0 %v1291_v2 }
  0x3b   :  { %734 = vmatpush.bf16.msrb.mxu2 %v1307_v3 }
  0x3c   :  { %747 = vmatpush.bf16.msrb.mxu3 %v1315_v6  ;;  %v893_v6 = vld [vmem:[%s1747_s7 + $0x70] sm:$0xff] }
  0x3d   :  { %721 = vmatpush.bf16.msrb.mxu1 %v1299_v7  ;;  %v892_v7 = vld [vmem:[%s1747_s7 + $0x68] sm:$0xff] }
  0x3e   :  { %709 = vmatpush.bf16.msrb.mxu0 %v1290_v10  ;;  %v889_v10 = vld [vmem:[%s1747_s7 + $0x50] sm:$0xff] }
  0x3f   :  { %735 = vmatpush.bf16.msrb.mxu2 %v1306_v11  ;;  %v888_v11 = vld [vmem:[%s1747_s7 + $0x48] sm:$0xff] }
  0x40   :  { %748 = vmatpush.bf16.msrb.mxu3 %v1314_v14  ;;  %v885_v14 = vld [vmem:[%s1747_s7 + $0x30] sm:$0xff] }
  0x41   :  { %722 = vmatpush.bf16.msrb.mxu1 %v1298_v15  ;;  %710 = vmatmul.bf16.vlgmr.msrb.gmra.mxu0 %v204_v18  ;;  %v884_v15 = vld [vmem:[%s1747_s7 + $0x28] sm:$0xff]  ;;  %v1340_v18 = vld [vmem:[%s1745_s5] ss:$0 sm:$0xff] }
  0x42   :  { %754 = vmatpush.bf16.msra.mxu0 %v1329_v12  ;;  %736 = vmatmul.bf16.vlgmr.msrb.gmra.mxu2 %v206_v17  ;;  %v887_v12 = vld [vmem:[%s1747_s7 + $0x40] sm:$0xff] }
  0x43   :  { %749 = vmatmul.bf16.vlgmr.msrb.gmra.mxu3 %v207_v20  ;;  %v883_v17 = vld [vmem:[%s1747_s7 + $0x20] sm:$0xff]  ;;  %v851_v20 = vunpack.c.l.bf16 %v850_v16 }
  0x44   :  { %723 = vmatmul.bf16.vlgmr.msrb.gmra.mxu1 %v205_v21  ;;  %899 = vmatpush.msra.mxu3 %v894_v5 }
  0x45   :  { %837 = vmatpush.bf16.msra.mxu1 %v1337_v31  ;;  %v1341_v31 = vld [vmem:[%s1748_s8] ss:$0 sm:$0xff] }
  0x46   :  { %755 = vmatpush.bf16.msra.mxu0 %v1328_v19  ;;  %900 = vmatpush.msra.mxu3 %v893_v6  ;;  %v882_v19 = vld [vmem:[%s1747_s7 + $0x18] sm:$0xff] }
  0x48   :  { %901 = vmatpush.msra.mxu3 %v892_v7 }
  0x49   :  { %838 = vmatpush.bf16.msra.mxu1 %v1336_v34 }
  0x4a   :  { %756 = vmatpush.bf16.msra.mxu0 %v1327_v22  ;;  %902 = vmatpush.msra.mxu3 %v891_v8  ;;  %v881_v22 = vld [vmem:[%s1747_s7 + $0x10] sm:$0xff] }
  0x4c   :  { %903 = vmatpush.msra.mxu3 %v890_v9 }
  0x4d   :  { %839 = vmatpush.bf16.msra.mxu1 %v1335_v35 }
  0x4e   :  { %757 = vmatpush.bf16.msra.mxu0 %v1326_v23  ;;  %904 = vmatpush.msra.mxu3 %v889_v10 }
  0x50   :  { %905 = vmatpush.msra.mxu3 %v888_v11 }
  0x51   :  { %840 = vmatpush.bf16.msra.mxu1 %v1334_v39 }
  0x52   :  { %758 = vmatpush.bf16.msra.mxu0 %v1325_v24  ;;  %906 = vmatpush.msra.mxu3 %v887_v12  ;;  %v880_v24 = vld [vmem:[%s1747_s7 + $0x8] sm:$0xff] }
  0x54   :  { %907 = vmatpush.msra.mxu3 %v886_v13 }
  0x55   :  { %841 = vmatpush.bf16.msra.mxu1 %v1333_v41 }
  0x56   :  { %759 = vmatpush.bf16.msra.mxu0 %v1324_v25  ;;  %908 = vmatpush.msra.mxu3 %v885_v14 }
  0x58   :  { %909 = vmatpush.msra.mxu3 %v884_v15 }
  0x59   :  { %842 = vmatpush.bf16.msra.mxu1 %v1332_v44 }
  0x5a   :  { %760 = vmatpush.bf16.msra.mxu0 %v1323_v26  ;;  %910 = vmatpush.msra.mxu3 %v883_v17 }
  0x5c   :  { %911 = vmatpush.msra.mxu3 %v882_v19 }
  0x5d   :  { %843 = vmatpush.bf16.msra.mxu1 %v1331_v45 }
  0x5e   :  { %761 = vmatpush.bf16.msra.mxu0 %v1322_v29  ;;  %912 = vmatpush.msra.mxu3 %v881_v22  ;;  %v879_v29 = vld [vmem:[%s1747_s7] sm:$0xff] }
  0x60   :  { %913 = vmatpush.msra.mxu3 %v880_v24 }
  0x61   :  { %762 = vmatmul.bf16.vlgmr.msra.gmra.mxu0 %v208_v30  ;;  %844 = vmatpush.bf16.msra.mxu1 %v1330_v47 }
  0x62   :  { %914 = vmatpush.msra.mxu3 %v879_v29 }
  0x9e   :  { %v659_v32 = vpop.f32.mrf.mxu0 }
  0x9f   :  { %v660_v48 = vadd.f32 %v1339_v46, %v659_v32 }
  0xa1   :  { %v672_v33 = vpop.f32.mrf.mxu1 }
  0xa2   :  { %v673_v51 = vadd.f32 %v672_v33, %v660_v48 }
  0xa5   :  { %v685_v36 = vpop.f32.mrf.mxu2 }
  0xa6   :  { %v698_v37 = vpop.f32.mrf.mxu3  ;;  %v661_v38 = vpop.f32.mrf.mxu0  ;;  %v686_v53 = vadd.f32 %v685_v36, %v673_v51 }
  0xa8   :  { %v699_v57 = vadd.f32 %v698_v37, %v686_v53 }
  0xa9   :  { %v674_v40 = vpop.f32.mrf.mxu1 }
  0xad   :  { %v687_v42 = vpop.f32.mrf.mxu2 }
  0xae   :  { %v700_v43 = vpop.f32.mrf.mxu3 }
  0xbe   :  { %v711_v49 = vpop.f32.mrf.mxu0 }
  0xbf   :  { %v712_v59 = vadd.f32 %v711_v49, %v699_v57 }
  0xc1   :  { %v724_v50 = vpop.f32.mrf.mxu1 }
  0xc2   :  { %v725_v61 = vadd.f32 %v724_v50, %v712_v59 }
  0xc5   :  { %v737_v52 = vpop.f32.mrf.mxu2 }
  0xc6   :  { %v750_v54 = vpop.f32.mrf.mxu3  ;;  %v713_v55 = vpop.f32.mrf.mxu0  ;;  %v738_v62 = vadd.f32 %v737_v52, %v725_v61 }
  0xc8   :  { %v751_v63 = vadd.f32 %v750_v54, %v738_v62 }
  0xc9   :  { %v726_v56 = vpop.f32.mrf.mxu1 }
  0xcd   :  { %v739_v58 = vpop.f32.mrf.mxu2 }
  0xce   :  { %v752_v60 = vpop.f32.mrf.mxu3 }
  0xde   :  { %v763_v0 = vpop.f32.mrf.mxu0 }
  0xdf   :  { %v764_v1 = vadd.f32 %v763_v0, %v751_v63 }
  0xe1   :  { %v767_v2 = vmax.f32 %v764_v1, 0.0 }
  0xe3   :  { %v768_v3 = vpack.c.bf16 %v767_v2, %v767_v2 }
  0xe5   :  { %845 = vmatmul.bf16.vlgmr.msra.gmra.mxu1 %v768_v3 }
  0xe6   :  { %v765_v4 = vpop.f32.mrf.mxu0 }
 0x162   :  { %v846_v21 = vpop.f32.mrf.mxu1 }
 0x163   :  { %v847_v23 = vadd.f32 %v1340_v18, %v846_v21 }
 0x165   :  { %v852_v25 = vadd.f32 %v851_v20, %v847_v23 }
 0x167   :  { %v853_v26 = vmax.f32 %v852_v25, 0.0 }
 0x169   :  { %874 = vmatpush.msra.mxu2 %v853_v26 }
 0x16a   :  { %v848_v28 = vpop.f32.mrf.mxu1  ;;  %1257 = vmatmul.msk.f32.vlgmr.msra.gmra.mxu2 %vm855_vm0, %v854_v27 }
 0x1ed   :  { %v876_v30 = vpop.f32.mrf.mxu2 }
 0x1ee   :  { %915 = vmatmul.f32.vlgmr.msra.gmra.mxu3 %v876_v30 }
 0x271   :  { %v916_v32 = vpop.f32.mrf.mxu3 }
 0x272   :  { %v917_v33 = vadd.f32 %v1341_v31, %v916_v32 }
 0x274   :  { %920 = vst.msk [vmem:[#allocation2] sm:$0x3] %vm919_vm1, %v917_v33 }
 0x275   :  { %931 = dma.vmem_to_hbm [thread:$0]  %s927_s21, 32, %s929_s23, [#allocation3]  }
 0x276   :  { %1366 = dma.done.wait [#allocation3], 32  }
 0x277   :  { %1367 = vsyncadd [#allocation3], 4294967264 }
 0x278   :  { %936 = vsyncpa [#allocation3], 1 }

</bundles_post_ra>
